<compile_context>
chip_gen: v7x
topology: tpu7x:2x2x1
jax: 0.10.0
libtpu: 0.0.40
codegen_flags: <defaults>
</compile_context>

<pallas_src>
import functools

import jax
import jax.numpy as jnp
from jax.experimental import pallas as pl
from jax.experimental.pallas import tpu as pltpu


_PAD_LEFT = 8  # left halo width in the VMEM scratch -> sublane-aligned interior store


# ----------------------------------------------------------------------------
# Pallas kernel: fused 3x3 conv over the channel-concat of `n_src` sources
# (stride 1, pad 1 handled in-kernel) + folded-BN affine + optional ReLU.
# One batch element per grid step.
# ----------------------------------------------------------------------------
def _conv3x3_kernel(*refs, n_src, relu):
    # refs layout:
    #   refs[0:n_src]                    source blocks, each (H, W, C_i)  bf16
    #   refs[n_src]                      weight (9*sum(C_i), Cout)        bf16
    #   refs[n_src+1], refs[n_src+2]     scale, bias (1, Cout)            f32
    #   refs[n_src+3]                    output (H, W, Cout)
    #   refs[n_src+4:]                   per-source padded VMEM scratch
    #                                    (H+2, W+_PAD_LEFT+1, C_i)        f32
    src_refs = refs[:n_src]
    w_ref = refs[n_src]
    scale_ref = refs[n_src + 1]
    bias_ref = refs[n_src + 2]
    o_ref = refs[n_src + 3]
    pad_refs = refs[n_src + 4:]

    H, W, Cout = o_ref.shape

    # Build zero-halo'd copies of each source in VMEM (no HBM pad round trip).
    # Scratch is kept in f32 so the (unaligned) kw tap slices stay on the
    # well-supported f32 path; taps are cast to bf16 just before the matmul.
    for x_ref, pad_ref in zip(src_refs, pad_refs):
        pad_ref[...] = jnp.zeros(pad_ref.shape, jnp.float32)
        pad_ref[1:1 + H, _PAD_LEFT:_PAD_LEFT + W, :] = (
            x_ref[...].astype(jnp.float32))

    # 9-tap im2col: one fat (H*W, 9*Cin_total) x (9*Cin_total, Cout) MXU matmul
    # instead of 9 skinny ones.  Lane order (kh, kw, [src0 | src1] channels)
    # matches the wrapper-side weight reshape.
    taps = []
    for kh in range(3):
        for kw in range(3):
            for pad_ref in pad_refs:
                col0 = _PAD_LEFT - 1 + kw
                taps.append(
                    pad_ref[kh:kh + H, col0:col0 + W, :].astype(jnp.bfloat16))
    patch = jnp.concatenate(taps, axis=-1).reshape(H * W, -1)

    y = jnp.dot(patch, w_ref[...], preferred_element_type=jnp.float32)
    y = y * scale_ref[...] + bias_ref[...]
    if relu:
        y = jnp.maximum(y, 0.0)
    o_ref[...] = y.reshape(H, W, Cout).astype(o_ref.dtype)


def conv3x3_block(sources, w, scale, bias, *, relu, out_dtype=jnp.bfloat16):
    """Fused 3x3 conv (+BN affine, +ReLU) over channel-concat of `sources`."""
    B, H, W, _ = sources[0].shape
    cins = [s.shape[-1] for s in sources]
    Cout = w.shape[-1]
    assert w.shape[0] == 9 * sum(cins), (w.shape, cins)
    n_src = len(sources)

    kernel = functools.partial(_conv3x3_kernel, n_src=n_src, relu=relu)

    in_specs = [pl.BlockSpec((None, H, W, c), lambda b: (b, 0, 0, 0))
                for c in cins]
    in_specs += [
        pl.BlockSpec((w.shape[0], Cout), lambda b: (0, 0)),
        pl.BlockSpec((1, Cout), lambda b: (0, 0)),
        pl.BlockSpec((1, Cout), lambda b: (0, 0)),
    ]
    scratch_shapes = [pltpu.VMEM((H + 2, W + _PAD_LEFT + 1, c), jnp.float32)
                      for c in cins]

    return pl.pallas_call(
        kernel,
        out_shape=jax.ShapeDtypeStruct((B, H, W, Cout), out_dtype),
        grid=(B,),
        in_specs=in_specs,
        out_specs=pl.BlockSpec((None, H, W, Cout), lambda b: (b, 0, 0, 0)),
        scratch_shapes=scratch_shapes,
        compiler_params=pltpu.CompilerParams(
            dimension_semantics=("parallel",)),
    )(*sources, w, scale, bias)


# ----------------------------------------------------------------------------
# Cheap glue (plain JAX).  TODO(synk): fuse into the conv kernels (needs
# strided sublane access for the 2x2 pool / nearest-upsample interleave).
# ----------------------------------------------------------------------------
def maxpool2x2(x_nhwc):
    B, H, W, C = x_nhwc.shape
    return x_nhwc.reshape(B, H // 2, 2, W // 2, 2, C).max(axis=(2, 4))


def upsample2x(x_nhwc):
    return jnp.repeat(jnp.repeat(x_nhwc, 2, axis=1), 2, axis=2)


# ----------------------------------------------------------------------------
# Deterministic synthetic parameters (no checkpoint).  Weights are stored
# pre-reshaped to (9*Cin_total, Cout) bf16 so the kernel does a single matmul.
# ----------------------------------------------------------------------------
def init_params(key):
    def conv_params(k, cin, cout):
        kw_, kb_ = jax.random.split(k)
        w = jax.random.normal(kw_, (3, 3, cin, cout), jnp.float32)
        w = w * (1.0 / jnp.sqrt(9.0 * cin))
        w = w.reshape(9 * cin, cout).astype(jnp.bfloat16)
        scale = jnp.ones((1, cout), jnp.float32)        # folded-BN gamma/std
        bias = 0.01 * jax.random.normal(kb_, (1, cout), jnp.float32)
        return (w, scale, bias)

    keys = jax.random.split(key, 6)
    return {
        "enc0": conv_params(keys[0], 3, 16),
        "enc1": conv_params(keys[1], 16, 32),
        "enc2": conv_params(keys[2], 32, 64),
        "dec1": conv_params(keys[3], 64 + 32, 32),   # [upsampled | skip] channels
        "dec0": conv_params(keys[4], 32 + 16, 16),
        "head": conv_params(keys[5], 16, 10),        # n_class = 10
    }


# ----------------------------------------------------------------------------
# Forward: U-Net semantics, NCHW in -> NCHW logits out (10 classes).
# ----------------------------------------------------------------------------
def unet_forward(x_nchw, params):
    _, _, H, W = x_nchw.shape
    assert H % 4 == 0 and W % 4 == 0, "spatial dims must be divisible by 4"

    x = jnp.transpose(x_nchw, (0, 2, 3, 1)).astype(jnp.bfloat16)   # NHWC bf16

    # Encoder
    f0 = conv3x3_block([x], *params["enc0"], relu=True)             # (B,H,  W,  16)
    f1 = conv3x3_block([maxpool2x2(f0)], *params["enc1"], relu=True)  # (B,H/2,W/2,32)
    f2 = conv3x3_block([maxpool2x2(f1)], *params["enc2"], relu=True)  # (B,H/4,W/4,64)

    # Decoder: skip-concat fused into the conv kernel (never hits HBM).
    d1 = conv3x3_block([upsample2x(f2), f1], *params["dec1"], relu=True)  # (B,H/2,W/2,32)
    d0 = conv3x3_block([upsample2x(d1), f0], *params["dec0"], relu=True)  # (B,H,  W,  16)

    # Segmentation head -> f32 logits, no activation.
    logits = conv3x3_block([d0], *params["head"], relu=False,
                           out_dtype=jnp.float32)                   # (B,H,W,10)
    return jnp.transpose(logits, (0, 3, 1, 2))                      # NCHW


if __name__ == "__main__":
    B, C, H, W = 2, 3, 16, 16
    x = jax.random.normal(jax.random.PRNGKey(0), (B, C, H, W), jnp.float32)
    params = init_params(jax.random.PRNGKey(42))

    fwd = jax.jit(lambda inp: unet_forward(inp, params))
    out = jax.block_until_ready(fwd(x))

    assert out.shape == (B, 10, H, W), out.shape
    assert out.dtype == jnp.float32
    assert bool(jnp.all(jnp.isfinite(out)))
    print("KERNEL_OK")
</pallas_src>

<mosaic_0001>
module attributes {stable_mosaic.version = 11 : i64} {
  func.func @_conv3x3_kernel(%arg0: i32, %arg1: memref<1x16x16x3xbf16, #tpu.memory_space<vmem>>, %arg2: memref<27x16xbf16, #tpu.memory_space<vmem>>, %arg3: memref<1x16xf32, #tpu.memory_space<vmem>>, %arg4: memref<1x16xf32, #tpu.memory_space<vmem>>, %arg5: memref<1x16x16x16xbf16, #tpu.memory_space<vmem>>, %arg6: memref<18x25x3xf32, #tpu.memory_space<vmem>>) attributes {dimension_semantics = [#tpu.dimension_semantics<parallel>], iteration_bounds = array<i64: 2>, scalar_prefetch = 0 : i64, scratch_operands = 1 : i64, tpu.core_type = #tpu.core_type<tc>, window_params = [{transform_indices = @transform_0, window_bounds = array<i64: 1, 16, 16, 3>}, {pipeline_mode = #tpu.pipeline_mode<synchronous>, transform_indices = @transform_1, window_bounds = array<i64: 27, 16>}, {pipeline_mode = #tpu.pipeline_mode<synchronous>, transform_indices = @transform_2, window_bounds = array<i64: 1, 16>}, {pipeline_mode = #tpu.pipeline_mode<synchronous>, transform_indices = @transform_3, window_bounds = array<i64: 1, 16>}, {transform_indices = @transform_4, window_bounds = array<i64: 1, 16, 16, 16>}]} {
    %cst = arith.constant 0.000000e+00 : f32
    %0 = vector.broadcast %cst : f32 to vector<18x25x3xf32>
    %c0 = arith.constant 0 : index
    %c0_0 = arith.constant 0 : index
    %c0_1 = arith.constant 0 : index
    %1 = vector.load %arg6[%c0, %c0_0, %c0_1] : memref<18x25x3xf32, #tpu.memory_space<vmem>>, vector<18x25x3xf32>
    tpu.vector_store %arg6[%c0, %c0_0, %c0_1], %0 {strides = array<i32>} : memref<18x25x3xf32, #tpu.memory_space<vmem>>, vector<18x25x3xf32>,
    %c0_2 = arith.constant 0 : index
    %c0_3 = arith.constant 0 : index
    %c0_4 = arith.constant 0 : index
    %c0_5 = arith.constant 0 : index
    %2 = vector.load %arg1[%c0_2, %c0_3, %c0_4, %c0_5] : memref<1x16x16x3xbf16, #tpu.memory_space<vmem>>, vector<1x16x16x3xbf16>
    %3 = vector.shape_cast %2 : vector<1x16x16x3xbf16> to vector<16x16x3xbf16>
    %4 = arith.extf %3 : vector<16x16x3xbf16> to vector<16x16x3xf32>
    %c1 = arith.constant 1 : index
    %c8 = arith.constant 8 : index
    %c0_6 = arith.constant 0 : index
    %5 = vector.load %arg6[%c1, %c8, %c0_6] : memref<18x25x3xf32, #tpu.memory_space<vmem>>, vector<16x16x3xf32>
    tpu.vector_store %arg6[%c1, %c8, %c0_6], %4 {strides = array<i32>} : memref<18x25x3xf32, #tpu.memory_space<vmem>>, vector<16x16x3xf32>,
    %c0_7 = arith.constant 0 : index
    %c7 = arith.constant 7 : index
    %c0_8 = arith.constant 0 : index
    %6 = vector.load %arg6[%c0_7, %c7, %c0_8] : memref<18x25x3xf32, #tpu.memory_space<vmem>>, vector<16x16x3xf32>
    %7 = arith.truncf %6 : vector<16x16x3xf32> to vector<16x16x3xbf16>
    %c0_9 = arith.constant 0 : index
    %c8_10 = arith.constant 8 : index
    %c0_11 = arith.constant 0 : index
    %8 = vector.load %arg6[%c0_9, %c8_10, %c0_11] : memref<18x25x3xf32, #tpu.memory_space<vmem>>, vector<16x16x3xf32>
    %9 = arith.truncf %8 : vector<16x16x3xf32> to vector<16x16x3xbf16>
    %c0_12 = arith.constant 0 : index
    %c9 = arith.constant 9 : index
    %c0_13 = arith.constant 0 : index
    %10 = vector.load %arg6[%c0_12, %c9, %c0_13] : memref<18x25x3xf32, #tpu.memory_space<vmem>>, vector<16x16x3xf32>
    %11 = arith.truncf %10 : vector<16x16x3xf32> to vector<16x16x3xbf16>
    %c1_14 = arith.constant 1 : index
    %c7_15 = arith.constant 7 : index
    %c0_16 = arith.constant 0 : index
    %12 = vector.load %arg6[%c1_14, %c7_15, %c0_16] : memref<18x25x3xf32, #tpu.memory_space<vmem>>, vector<16x16x3xf32>
    %13 = arith.truncf %12 : vector<16x16x3xf32> to vector<16x16x3xbf16>
    %c1_17 = arith.constant 1 : index
    %c8_18 = arith.constant 8 : index
    %c0_19 = arith.constant 0 : index
    %14 = vector.load %arg6[%c1_17, %c8_18, %c0_19] : memref<18x25x3xf32, #tpu.memory_space<vmem>>, vector<16x16x3xf32>
    %15 = arith.truncf %14 : vector<16x16x3xf32> to vector<16x16x3xbf16>
    %c1_20 = arith.constant 1 : index
    %c9_21 = arith.constant 9 : index
    %c0_22 = arith.constant 0 : index
    %16 = vector.load %arg6[%c1_20, %c9_21, %c0_22] : memref<18x25x3xf32, #tpu.memory_space<vmem>>, vector<16x16x3xf32>
    %17 = arith.truncf %16 : vector<16x16x3xf32> to vector<16x16x3xbf16>
    %c2 = arith.constant 2 : index
    %c7_23 = arith.constant 7 : index
    %c0_24 = arith.constant 0 : index
    %18 = vector.load %arg6[%c2, %c7_23, %c0_24] : memref<18x25x3xf32, #tpu.memory_space<vmem>>, vector<16x16x3xf32>
    %19 = arith.truncf %18 : vector<16x16x3xf32> to vector<16x16x3xbf16>
    %c2_25 = arith.constant 2 : index
    %c8_26 = arith.constant 8 : index
    %c0_27 = arith.constant 0 : index
    %20 = vector.load %arg6[%c2_25, %c8_26, %c0_27] : memref<18x25x3xf32, #tpu.memory_space<vmem>>, vector<16x16x3xf32>
    %21 = arith.truncf %20 : vector<16x16x3xf32> to vector<16x16x3xbf16>
    %c2_28 = arith.constant 2 : index
    %c9_29 = arith.constant 9 : index
    %c0_30 = arith.constant 0 : index
    %22 = vector.load %arg6[%c2_28, %c9_29, %c0_30] : memref<18x25x3xf32, #tpu.memory_space<vmem>>, vector<16x16x3xf32>
    %23 = arith.truncf %22 : vector<16x16x3xf32> to vector<16x16x3xbf16>
    %24 = tpu.concatenate %7, %9, %11, %13, %15, %17, %19, %21, %23 in 2 : vector<16x16x3xbf16>, vector<16x16x3xbf16>, vector<16x16x3xbf16>, vector<16x16x3xbf16>, vector<16x16x3xbf16>, vector<16x16x3xbf16>, vector<16x16x3xbf16>, vector<16x16x3xbf16>, vector<16x16x3xbf16> -> vector<16x16x27xbf16>
    %25 = vector.shape_cast %24 : vector<16x16x27xbf16> to vector<256x27xbf16>
    %c0_31 = arith.constant 0 : index
    %c0_32 = arith.constant 0 : index
    %26 = vector.load %arg2[%c0_31, %c0_32] : memref<27x16xbf16, #tpu.memory_space<vmem>>, vector<27x16xbf16>
    %cst_33 = arith.constant dense<0.000000e+00> : vector<256x16xf32>
    %27 = tpu.matmul %25, %26, %cst_33 {dimension_numbers = #tpu.dot_dimension_numbers<[1], [0], [0], [1], [0, 0, 1, 1], [], []>} : vector<256x27xbf16>, vector<27x16xbf16>, vector<256x16xf32> -> vector<256x16xf32>
    %c0_34 = arith.constant 0 : index
    %c0_35 = arith.constant 0 : index
    %28 = vector.load %arg3[%c0_34, %c0_35] : memref<1x16xf32, #tpu.memory_space<vmem>>, vector<1x16xf32>
    %29 = vector.broadcast %28 : vector<1x16xf32> to vector<256x16xf32>
    %30 = arith.mulf %27, %29 : vector<256x16xf32>
    %c0_36 = arith.constant 0 : index
    %c0_37 = arith.constant 0 : index
    %31 = vector.load %arg4[%c0_36, %c0_37] : memref<1x16xf32, #tpu.memory_space<vmem>>, vector<1x16xf32>
    %32 = vector.broadcast %31 : vector<1x16xf32> to vector<256x16xf32>
    %33 = arith.addf %30, %32 : vector<256x16xf32>
    %cst_38 = arith.constant 0.000000e+00 : f32
    %34 = vector.broadcast %cst_38 : f32 to vector<256x16xf32>
    %35 = arith.maximumf %33, %34 : vector<256x16xf32>
    %36 = vector.shape_cast %35 : vector<256x16xf32> to vector<16x16x16xf32>
    %37 = arith.truncf %36 : vector<16x16x16xf32> to vector<16x16x16xbf16>
    %c0_39 = arith.constant 0 : index
    %c0_40 = arith.constant 0 : index
    %c0_41 = arith.constant 0 : index
    %c0_42 = arith.constant 0 : index
    %38 = vector.load %arg5[%c0_39, %c0_40, %c0_41, %c0_42] : memref<1x16x16x16xbf16, #tpu.memory_space<vmem>>, vector<1x16x16x16xbf16>
    %39 = vector.shape_cast %38 : vector<1x16x16x16xbf16> to vector<16x16x16xbf16>
    %40 = vector.shape_cast %37 : vector<16x16x16xbf16> to vector<1x16x16x16xbf16>
    tpu.vector_store %arg5[%c0_39, %c0_40, %c0_41, %c0_42], %40 {strides = array<i32>} : memref<1x16x16x16xbf16, #tpu.memory_space<vmem>>, vector<1x16x16x16xbf16>,
    return
  }
  func.func @transform_0(%arg0: i32) -> (i32, i32, i32, i32) {
    %c0_i32 = arith.constant 0 : i32
    %c0_i32_0 = arith.constant 0 : i32
    %c0_i32_1 = arith.constant 0 : i32
    %c0_i32_2 = arith.constant 0 : i32
    return %arg0, %c0_i32, %c0_i32_0, %c0_i32_1 : i32, i32, i32, i32
  }
  func.func @transform_1(%arg0: i32) -> (i32, i32) {
    %c0_i32 = arith.constant 0 : i32
    %c0_i32_0 = arith.constant 0 : i32
    %c0_i32_1 = arith.constant 0 : i32
    return %c0_i32, %c0_i32_0 : i32, i32
  }
  func.func @transform_2(%arg0: i32) -> (i32, i32) {
    %c0_i32 = arith.constant 0 : i32
    %c0_i32_0 = arith.constant 0 : i32
    %c0_i32_1 = arith.constant 0 : i32
    return %c0_i32, %c0_i32_0 : i32, i32
  }
  func.func @transform_3(%arg0: i32) -> (i32, i32) {
    %c0_i32 = arith.constant 0 : i32
    %c0_i32_0 = arith.constant 0 : i32
    %c0_i32_1 = arith.constant 0 : i32
    return %c0_i32, %c0_i32_0 : i32, i32
  }
  func.func @transform_4(%arg0: i32) -> (i32, i32, i32, i32) {
    %c0_i32 = arith.constant 0 : i32
    %c0_i32_0 = arith.constant 0 : i32
    %c0_i32_1 = arith.constant 0 : i32
    %c0_i32_2 = arith.constant 0 : i32
    return %arg0, %c0_i32, %c0_i32_0, %c0_i32_1 : i32, i32, i32, i32
  }
}

module attributes {stable_mosaic.version = 11 : i64} {
  func.func @_conv3x3_kernel(%arg0: i32, %arg1: memref<1x8x8x16xbf16, #tpu.memory_space<vmem>>, %arg2: memref<144x32xbf16, #tpu.memory_space<vmem>>, %arg3: memref<1x32xf32, #tpu.memory_space<vmem>>, %arg4: memref<1x32xf32, #tpu.memory_space<vmem>>, %arg5: memref<1x8x8x32xbf16, #tpu.memory_space<vmem>>, %arg6: memref<10x17x16xf32, #tpu.memory_space<vmem>>) attributes {dimension_semantics = [#tpu.dimension_semantics<parallel>], iteration_bounds = array<i64: 2>, scalar_prefetch = 0 : i64, scratch_operands = 1 : i64, tpu.core_type = #tpu.core_type<tc>, window_params = [{transform_indices = @transform_0, window_bounds = array<i64: 1, 8, 8, 16>}, {pipeline_mode = #tpu.pipeline_mode<synchronous>, transform_indices = @transform_1, window_bounds = array<i64: 144, 32>}, {pipeline_mode = #tpu.pipeline_mode<synchronous>, transform_indices = @transform_2, window_bounds = array<i64: 1, 32>}, {pipeline_mode = #tpu.pipeline_mode<synchronous>, transform_indices = @transform_3, window_bounds = array<i64: 1, 32>}, {transform_indices = @transform_4, window_bounds = array<i64: 1, 8, 8, 32>}]} {
    %cst = arith.constant 0.000000e+00 : f32
    %0 = vector.broadcast %cst : f32 to vector<10x17x16xf32>
    %c0 = arith.constant 0 : index
    %c0_0 = arith.constant 0 : index
    %c0_1 = arith.constant 0 : index
    %1 = vector.load %arg6[%c0, %c0_0, %c0_1] : memref<10x17x16xf32, #tpu.memory_space<vmem>>, vector<10x17x16xf32>
    tpu.vector_store %arg6[%c0, %c0_0, %c0_1], %0 {strides = array<i32>} : memref<10x17x16xf32, #tpu.memory_space<vmem>>, vector<10x17x16xf32>,
    %c0_2 = arith.constant 0 : index
    %c0_3 = arith.constant 0 : index
    %c0_4 = arith.constant 0 : index
    %c0_5 = arith.constant 0 : index
    %2 = vector.load %arg1[%c0_2, %c0_3, %c0_4, %c0_5] : memref<1x8x8x16xbf16, #tpu.memory_space<vmem>>, vector<1x8x8x16xbf16>
    %3 = vector.shape_cast %2 : vector<1x8x8x16xbf16> to vector<8x8x16xbf16>
    %4 = arith.extf %3 : vector<8x8x16xbf16> to vector<8x8x16xf32>
    %c1 = arith.constant 1 : index
    %c8 = arith.constant 8 : index
    %c0_6 = arith.constant 0 : index
    %5 = vector.load %arg6[%c1, %c8, %c0_6] : memref<10x17x16xf32, #tpu.memory_space<vmem>>, vector<8x8x16xf32>
    tpu.vector_store %arg6[%c1, %c8, %c0_6], %4 {strides = array<i32>} : memref<10x17x16xf32, #tpu.memory_space<vmem>>, vector<8x8x16xf32>,
    %c0_7 = arith.constant 0 : index
    %c7 = arith.constant 7 : index
    %c0_8 = arith.constant 0 : index
    %6 = vector.load %arg6[%c0_7, %c7, %c0_8] : memref<10x17x16xf32, #tpu.memory_space<vmem>>, vector<8x8x16xf32>
    %7 = arith.truncf %6 : vector<8x8x16xf32> to vector<8x8x16xbf16>
    %c0_9 = arith.constant 0 : index
    %c8_10 = arith.constant 8 : index
    %c0_11 = arith.constant 0 : index
    %8 = vector.load %arg6[%c0_9, %c8_10, %c0_11] : memref<10x17x16xf32, #tpu.memory_space<vmem>>, vector<8x8x16xf32>
    %9 = arith.truncf %8 : vector<8x8x16xf32> to vector<8x8x16xbf16>
    %c0_12 = arith.constant 0 : index
    %c9 = arith.constant 9 : index
    %c0_13 = arith.constant 0 : index
    %10 = vector.load %arg6[%c0_12, %c9, %c0_13] : memref<10x17x16xf32, #tpu.memory_space<vmem>>, vector<8x8x16xf32>
    %11 = arith.truncf %10 : vector<8x8x16xf32> to vector<8x8x16xbf16>
    %c1_14 = arith.constant 1 : index
    %c7_15 = arith.constant 7 : index
    %c0_16 = arith.constant 0 : index
    %12 = vector.load %arg6[%c1_14, %c7_15, %c0_16] : memref<10x17x16xf32, #tpu.memory_space<vmem>>, vector<8x8x16xf32>
    %13 = arith.truncf %12 : vector<8x8x16xf32> to vector<8x8x16xbf16>
    %c1_17 = arith.constant 1 : index
    %c8_18 = arith.constant 8 : index
    %c0_19 = arith.constant 0 : index
    %14 = vector.load %arg6[%c1_17, %c8_18, %c0_19] : memref<10x17x16xf32, #tpu.memory_space<vmem>>, vector<8x8x16xf32>
    %15 = arith.truncf %14 : vector<8x8x16xf32> to vector<8x8x16xbf16>
    %c1_20 = arith.constant 1 : index
    %c9_21 = arith.constant 9 : index
    %c0_22 = arith.constant 0 : index
    %16 = vector.load %arg6[%c1_20, %c9_21, %c0_22] : memref<10x17x16xf32, #tpu.memory_space<vmem>>, vector<8x8x16xf32>
    %17 = arith.truncf %16 : vector<8x8x16xf32> to vector<8x8x16xbf16>
    %c2 = arith.constant 2 : index
    %c7_23 = arith.constant 7 : index
    %c0_24 = arith.constant 0 : index
    %18 = vector.load %arg6[%c2, %c7_23, %c0_24] : memref<10x17x16xf32, #tpu.memory_space<vmem>>, vector<8x8x16xf32>
    %19 = arith.truncf %18 : vector<8x8x16xf32> to vector<8x8x16xbf16>
    %c2_25 = arith.constant 2 : index
    %c8_26 = arith.constant 8 : index
    %c0_27 = arith.constant 0 : index
    %20 = vector.load %arg6[%c2_25, %c8_26, %c0_27] : memref<10x17x16xf32, #tpu.memory_space<vmem>>, vector<8x8x16xf32>
    %21 = arith.truncf %20 : vector<8x8x16xf32> to vector<8x8x16xbf16>
    %c2_28 = arith.constant 2 : index
    %c9_29 = arith.constant 9 : index
    %c0_30 = arith.constant 0 : index
    %22 = vector.load %arg6[%c2_28, %c9_29, %c0_30] : memref<10x17x16xf32, #tpu.memory_space<vmem>>, vector<8x8x16xf32>
    %23 = arith.truncf %22 : vector<8x8x16xf32> to vector<8x8x16xbf16>
    %24 = tpu.concatenate %7, %9, %11, %13, %15, %17, %19, %21, %23 in 2 : vector<8x8x16xbf16>, vector<8x8x16xbf16>, vector<8x8x16xbf16>, vector<8x8x16xbf16>, vector<8x8x16xbf16>, vector<8x8x16xbf16>, vector<8x8x16xbf16>, vector<8x8x16xbf16>, vector<8x8x16xbf16> -> vector<8x8x144xbf16>
    %25 = vector.shape_cast %24 : vector<8x8x144xbf16> to vector<64x144xbf16>
    %c0_31 = arith.constant 0 : index
    %c0_32 = arith.constant 0 : index
    %26 = vector.load %arg2[%c0_31, %c0_32] : memref<144x32xbf16, #tpu.memory_space<vmem>>, vector<144x32xbf16>
    %cst_33 = arith.constant dense<0.000000e+00> : vector<64x32xf32>
    %27 = tpu.matmul %25, %26, %cst_33 {dimension_numbers = #tpu.dot_dimension_numbers<[1], [0], [0], [1], [0, 0, 1, 1], [], []>} : vector<64x144xbf16>, vector<144x32xbf16>, vector<64x32xf32> -> vector<64x32xf32>
    %c0_34 = arith.constant 0 : index
    %c0_35 = arith.constant 0 : index
    %28 = vector.load %arg3[%c0_34, %c0_35] : memref<1x32xf32, #tpu.memory_space<vmem>>, vector<1x32xf32>
    %29 = vector.broadcast %28 : vector<1x32xf32> to vector<64x32xf32>
    %30 = arith.mulf %27, %29 : vector<64x32xf32>
    %c0_36 = arith.constant 0 : index
    %c0_37 = arith.constant 0 : index
    %31 = vector.load %arg4[%c0_36, %c0_37] : memref<1x32xf32, #tpu.memory_space<vmem>>, vector<1x32xf32>
    %32 = vector.broadcast %31 : vector<1x32xf32> to vector<64x32xf32>
    %33 = arith.addf %30, %32 : vector<64x32xf32>
    %cst_38 = arith.constant 0.000000e+00 : f32
    %34 = vector.broadcast %cst_38 : f32 to vector<64x32xf32>
    %35 = arith.maximumf %33, %34 : vector<64x32xf32>
    %36 = vector.shape_cast %35 : vector<64x32xf32> to vector<8x8x32xf32>
    %37 = arith.truncf %36 : vector<8x8x32xf32> to vector<8x8x32xbf16>
    %c0_39 = arith.constant 0 : index
    %c0_40 = arith.constant 0 : index
    %c0_41 = arith.constant 0 : index
    %c0_42 = arith.constant 0 : index
    %38 = vector.load %arg5[%c0_39, %c0_40, %c0_41, %c0_42] : memref<1x8x8x32xbf16, #tpu.memory_space<vmem>>, vector<1x8x8x32xbf16>
    %39 = vector.shape_cast %38 : vector<1x8x8x32xbf16> to vector<8x8x32xbf16>
    %40 = vector.shape_cast %37 : vector<8x8x32xbf16> to vector<1x8x8x32xbf16>
    tpu.vector_store %arg5[%c0_39, %c0_40, %c0_41, %c0_42], %40 {strides = array<i32>} : memref<1x8x8x32xbf16, #tpu.memory_space<vmem>>, vector<1x8x8x32xbf16>,
    return
  }
  func.func @transform_0(%arg0: i32) -> (i32, i32, i32, i32) {
    %c0_i32 = arith.constant 0 : i32
    %c0_i32_0 = arith.constant 0 : i32
    %c0_i32_1 = arith.constant 0 : i32
    %c0_i32_2 = arith.constant 0 : i32
    return %arg0, %c0_i32, %c0_i32_0, %c0_i32_1 : i32, i32, i32, i32
  }
  func.func @transform_1(%arg0: i32) -> (i32, i32) {
    %c0_i32 = arith.constant 0 : i32
    %c0_i32_0 = arith.constant 0 : i32
    %c0_i32_1 = arith.constant 0 : i32
    return %c0_i32, %c0_i32_0 : i32, i32
  }
  func.func @transform_2(%arg0: i32) -> (i32, i32) {
    %c0_i32 = arith.constant 0 : i32
    %c0_i32_0 = arith.constant 0 : i32
    %c0_i32_1 = arith.constant 0 : i32
    return %c0_i32, %c0_i32_0 : i32, i32
  }
  func.func @transform_3(%arg0: i32) -> (i32, i32) {
    %c0_i32 = arith.constant 0 : i32
    %c0_i32_0 = arith.constant 0 : i32
    %c0_i32_1 = arith.constant 0 : i32
    return %c0_i32, %c0_i32_0 : i32, i32
  }
  func.func @transform_4(%arg0: i32) -> (i32, i32, i32, i32) {
    %c0_i32 = arith.constant 0 : i32
    %c0_i32_0 = arith.constant 0 : i32
    %c0_i32_1 = arith.constant 0 : i32
    %c0_i32_2 = arith.constant 0 : i32
    return %arg0, %c0_i32, %c0_i32_0, %c0_i32_1 : i32, i32, i32, i32
  }
}

module attributes {stable_mosaic.version = 11 : i64} {
  func.func @_conv3x3_kernel(%arg0: i32, %arg1: memref<1x4x4x32xbf16, #tpu.memory_space<vmem>>, %arg2: memref<288x64xbf16, #tpu.memory_space<vmem>>, %arg3: memref<1x64xf32, #tpu.memory_space<vmem>>, %arg4: memref<1x64xf32, #tpu.memory_space<vmem>>, %arg5: memref<1x4x4x64xbf16, #tpu.memory_space<vmem>>, %arg6: memref<6x13x32xf32, #tpu.memory_space<vmem>>) attributes {dimension_semantics = [#tpu.dimension_semantics<parallel>], iteration_bounds = array<i64: 2>, scalar_prefetch = 0 : i64, scratch_operands = 1 : i64, tpu.core_type = #tpu.core_type<tc>, window_params = [{transform_indices = @transform_0, window_bounds = array<i64: 1, 4, 4, 32>}, {pipeline_mode = #tpu.pipeline_mode<synchronous>, transform_indices = @transform_1, window_bounds = array<i64: 288, 64>}, {pipeline_mode = #tpu.pipeline_mode<synchronous>, transform_indices = @transform_2, window_bounds = array<i64: 1, 64>}, {pipeline_mode = #tpu.pipeline_mode<synchronous>, transform_indices = @transform_3, window_bounds = array<i64: 1, 64>}, {transform_indices = @transform_4, window_bounds = array<i64: 1, 4, 4, 64>}]} {
    %cst = arith.constant 0.000000e+00 : f32
    %0 = vector.broadcast %cst : f32 to vector<6x13x32xf32>
    %c0 = arith.constant 0 : index
    %c0_0 = arith.constant 0 : index
    %c0_1 = arith.constant 0 : index
    %1 = vector.load %arg6[%c0, %c0_0, %c0_1] : memref<6x13x32xf32, #tpu.memory_space<vmem>>, vector<6x13x32xf32>
    tpu.vector_store %arg6[%c0, %c0_0, %c0_1], %0 {strides = array<i32>} : memref<6x13x32xf32, #tpu.memory_space<vmem>>, vector<6x13x32xf32>,
    %c0_2 = arith.constant 0 : index
    %c0_3 = arith.constant 0 : index
    %c0_4 = arith.constant 0 : index
    %c0_5 = arith.constant 0 : index
    %2 = vector.load %arg1[%c0_2, %c0_3, %c0_4, %c0_5] : memref<1x4x4x32xbf16, #tpu.memory_space<vmem>>, vector<1x4x4x32xbf16>
    %3 = vector.shape_cast %2 : vector<1x4x4x32xbf16> to vector<4x4x32xbf16>
    %4 = arith.extf %3 : vector<4x4x32xbf16> to vector<4x4x32xf32>
    %c1 = arith.constant 1 : index
    %c8 = arith.constant 8 : index
    %c0_6 = arith.constant 0 : index
    %5 = vector.load %arg6[%c1, %c8, %c0_6] : memref<6x13x32xf32, #tpu.memory_space<vmem>>, vector<4x4x32xf32>
    tpu.vector_store %arg6[%c1, %c8, %c0_6], %4 {strides = array<i32>} : memref<6x13x32xf32, #tpu.memory_space<vmem>>, vector<4x4x32xf32>,
    %c0_7 = arith.constant 0 : index
    %c7 = arith.constant 7 : index
    %c0_8 = arith.constant 0 : index
    %6 = vector.load %arg6[%c0_7, %c7, %c0_8] : memref<6x13x32xf32, #tpu.memory_space<vmem>>, vector<4x4x32xf32>
    %7 = arith.truncf %6 : vector<4x4x32xf32> to vector<4x4x32xbf16>
    %c0_9 = arith.constant 0 : index
    %c8_10 = arith.constant 8 : index
    %c0_11 = arith.constant 0 : index
    %8 = vector.load %arg6[%c0_9, %c8_10, %c0_11] : memref<6x13x32xf32, #tpu.memory_space<vmem>>, vector<4x4x32xf32>
    %9 = arith.truncf %8 : vector<4x4x32xf32> to vector<4x4x32xbf16>
    %c0_12 = arith.constant 0 : index
    %c9 = arith.constant 9 : index
    %c0_13 = arith.constant 0 : index
    %10 = vector.load %arg6[%c0_12, %c9, %c0_13] : memref<6x13x32xf32, #tpu.memory_space<vmem>>, vector<4x4x32xf32>
    %11 = arith.truncf %10 : vector<4x4x32xf32> to vector<4x4x32xbf16>
    %c1_14 = arith.constant 1 : index
    %c7_15 = arith.constant 7 : index
    %c0_16 = arith.constant 0 : index
    %12 = vector.load %arg6[%c1_14, %c7_15, %c0_16] : memref<6x13x32xf32, #tpu.memory_space<vmem>>, vector<4x4x32xf32>
    %13 = arith.truncf %12 : vector<4x4x32xf32> to vector<4x4x32xbf16>
    %c1_17 = arith.constant 1 : index
    %c8_18 = arith.constant 8 : index
    %c0_19 = arith.constant 0 : index
    %14 = vector.load %arg6[%c1_17, %c8_18, %c0_19] : memref<6x13x32xf32, #tpu.memory_space<vmem>>, vector<4x4x32xf32>
    %15 = arith.truncf %14 : vector<4x4x32xf32> to vector<4x4x32xbf16>
    %c1_20 = arith.constant 1 : index
    %c9_21 = arith.constant 9 : index
    %c0_22 = arith.constant 0 : index
    %16 = vector.load %arg6[%c1_20, %c9_21, %c0_22] : memref<6x13x32xf32, #tpu.memory_space<vmem>>, vector<4x4x32xf32>
    %17 = arith.truncf %16 : vector<4x4x32xf32> to vector<4x4x32xbf16>
    %c2 = arith.constant 2 : index
    %c7_23 = arith.constant 7 : index
    %c0_24 = arith.constant 0 : index
    %18 = vector.load %arg6[%c2, %c7_23, %c0_24] : memref<6x13x32xf32, #tpu.memory_space<vmem>>, vector<4x4x32xf32>
    %19 = arith.truncf %18 : vector<4x4x32xf32> to vector<4x4x32xbf16>
    %c2_25 = arith.constant 2 : index
    %c8_26 = arith.constant 8 : index
    %c0_27 = arith.constant 0 : index
    %20 = vector.load %arg6[%c2_25, %c8_26, %c0_27] : memref<6x13x32xf32, #tpu.memory_space<vmem>>, vector<4x4x32xf32>
    %21 = arith.truncf %20 : vector<4x4x32xf32> to vector<4x4x32xbf16>
    %c2_28 = arith.constant 2 : index
    %c9_29 = arith.constant 9 : index
    %c0_30 = arith.constant 0 : index
    %22 = vector.load %arg6[%c2_28, %c9_29, %c0_30] : memref<6x13x32xf32, #tpu.memory_space<vmem>>, vector<4x4x32xf32>
    %23 = arith.truncf %22 : vector<4x4x32xf32> to vector<4x4x32xbf16>
    %24 = tpu.concatenate %7, %9, %11, %13, %15, %17, %19, %21, %23 in 2 : vector<4x4x32xbf16>, vector<4x4x32xbf16>, vector<4x4x32xbf16>, vector<4x4x32xbf16>, vector<4x4x32xbf16>, vector<4x4x32xbf16>, vector<4x4x32xbf16>, vector<4x4x32xbf16>, vector<4x4x32xbf16> -> vector<4x4x288xbf16>
    %25 = vector.shape_cast %24 : vector<4x4x288xbf16> to vector<16x288xbf16>
    %c0_31 = arith.constant 0 : index
    %c0_32 = arith.constant 0 : index
    %26 = vector.load %arg2[%c0_31, %c0_32] : memref<288x64xbf16, #tpu.memory_space<vmem>>, vector<288x64xbf16>
    %cst_33 = arith.constant dense<0.000000e+00> : vector<16x64xf32>
    %27 = tpu.matmul %25, %26, %cst_33 {dimension_numbers = #tpu.dot_dimension_numbers<[1], [0], [0], [1], [0, 0, 1, 1], [], []>} : vector<16x288xbf16>, vector<288x64xbf16>, vector<16x64xf32> -> vector<16x64xf32>
    %c0_34 = arith.constant 0 : index
    %c0_35 = arith.constant 0 : index
    %28 = vector.load %arg3[%c0_34, %c0_35] : memref<1x64xf32, #tpu.memory_space<vmem>>, vector<1x64xf32>
    %29 = vector.broadcast %28 : vector<1x64xf32> to vector<16x64xf32>
    %30 = arith.mulf %27, %29 : vector<16x64xf32>
    %c0_36 = arith.constant 0 : index
    %c0_37 = arith.constant 0 : index
    %31 = vector.load %arg4[%c0_36, %c0_37] : memref<1x64xf32, #tpu.memory_space<vmem>>, vector<1x64xf32>
    %32 = vector.broadcast %31 : vector<1x64xf32> to vector<16x64xf32>
    %33 = arith.addf %30, %32 : vector<16x64xf32>
    %cst_38 = arith.constant 0.000000e+00 : f32
    %34 = vector.broadcast %cst_38 : f32 to vector<16x64xf32>
    %35 = arith.maximumf %33, %34 : vector<16x64xf32>
    %36 = vector.shape_cast %35 : vector<16x64xf32> to vector<4x4x64xf32>
    %37 = arith.truncf %36 : vector<4x4x64xf32> to vector<4x4x64xbf16>
    %c0_39 = arith.constant 0 : index
    %c0_40 = arith.constant 0 : index
    %c0_41 = arith.constant 0 : index
    %c0_42 = arith.constant 0 : index
    %38 = vector.load %arg5[%c0_39, %c0_40, %c0_41, %c0_42] : memref<1x4x4x64xbf16, #tpu.memory_space<vmem>>, vector<1x4x4x64xbf16>
    %39 = vector.shape_cast %38 : vector<1x4x4x64xbf16> to vector<4x4x64xbf16>
    %40 = vector.shape_cast %37 : vector<4x4x64xbf16> to vector<1x4x4x64xbf16>
    tpu.vector_store %arg5[%c0_39, %c0_40, %c0_41, %c0_42], %40 {strides = array<i32>} : memref<1x4x4x64xbf16, #tpu.memory_space<vmem>>, vector<1x4x4x64xbf16>,
    return
  }
  func.func @transform_0(%arg0: i32) -> (i32, i32, i32, i32) {
    %c0_i32 = arith.constant 0 : i32
    %c0_i32_0 = arith.constant 0 : i32
    %c0_i32_1 = arith.constant 0 : i32
    %c0_i32_2 = arith.constant 0 : i32
    return %arg0, %c0_i32, %c0_i32_0, %c0_i32_1 : i32, i32, i32, i32
  }
  func.func @transform_1(%arg0: i32) -> (i32, i32) {
    %c0_i32 = arith.constant 0 : i32
    %c0_i32_0 = arith.constant 0 : i32
    %c0_i32_1 = arith.constant 0 : i32
    return %c0_i32, %c0_i32_0 : i32, i32
  }
  func.func @transform_2(%arg0: i32) -> (i32, i32) {
    %c0_i32 = arith.constant 0 : i32
    %c0_i32_0 = arith.constant 0 : i32
    %c0_i32_1 = arith.constant 0 : i32
    return %c0_i32, %c0_i32_0 : i32, i32
  }
  func.func @transform_3(%arg0: i32) -> (i32, i32) {
    %c0_i32 = arith.constant 0 : i32
    %c0_i32_0 = arith.constant 0 : i32
    %c0_i32_1 = arith.constant 0 : i32
    return %c0_i32, %c0_i32_0 : i32, i32
  }
  func.func @transform_4(%arg0: i32) -> (i32, i32, i32, i32) {
    %c0_i32 = arith.constant 0 : i32
    %c0_i32_0 = arith.constant 0 : i32
    %c0_i32_1 = arith.constant 0 : i32
    %c0_i32_2 = arith.constant 0 : i32
    return %arg0, %c0_i32, %c0_i32_0, %c0_i32_1 : i32, i32, i32, i32
  }
}

module attributes {stable_mosaic.version = 11 : i64} {
  func.func @_conv3x3_kernel(%arg0: i32, %arg1: memref<1x8x8x64xbf16, #tpu.memory_space<vmem>>, %arg2: memref<1x8x8x32xbf16, #tpu.memory_space<vmem>>, %arg3: memref<864x32xbf16, #tpu.memory_space<vmem>>, %arg4: memref<1x32xf32, #tpu.memory_space<vmem>>, %arg5: memref<1x32xf32, #tpu.memory_space<vmem>>, %arg6: memref<1x8x8x32xbf16, #tpu.memory_space<vmem>>, %arg7: memref<10x17x64xf32, #tpu.memory_space<vmem>>, %arg8: memref<10x17x32xf32, #tpu.memory_space<vmem>>) attributes {dimension_semantics = [#tpu.dimension_semantics<parallel>], iteration_bounds = array<i64: 2>, scalar_prefetch = 0 : i64, scratch_operands = 2 : i64, tpu.core_type = #tpu.core_type<tc>, window_params = [{transform_indices = @transform_0, window_bounds = array<i64: 1, 8, 8, 64>}, {transform_indices = @transform_1, window_bounds = array<i64: 1, 8, 8, 32>}, {pipeline_mode = #tpu.pipeline_mode<synchronous>, transform_indices = @transform_2, window_bounds = array<i64: 864, 32>}, {pipeline_mode = #tpu.pipeline_mode<synchronous>, transform_indices = @transform_3, window_bounds = array<i64: 1, 32>}, {pipeline_mode = #tpu.pipeline_mode<synchronous>, transform_indices = @transform_4, window_bounds = array<i64: 1, 32>}, {transform_indices = @transform_5, window_bounds = array<i64: 1, 8, 8, 32>}]} {
    %cst = arith.constant 0.000000e+00 : f32
    %0 = vector.broadcast %cst : f32 to vector<10x17x64xf32>
    %c0 = arith.constant 0 : index
    %c0_0 = arith.constant 0 : index
    %c0_1 = arith.constant 0 : index
    %1 = vector.load %arg7[%c0, %c0_0, %c0_1] : memref<10x17x64xf32, #tpu.memory_space<vmem>>, vector<10x17x64xf32>
    tpu.vector_store %arg7[%c0, %c0_0, %c0_1], %0 {strides = array<i32>} : memref<10x17x64xf32, #tpu.memory_space<vmem>>, vector<10x17x64xf32>,
    %c0_2 = arith.constant 0 : index
    %c0_3 = arith.constant 0 : index
    %c0_4 = arith.constant 0 : index
    %c0_5 = arith.constant 0 : index
    %2 = vector.load %arg1[%c0_2, %c0_3, %c0_4, %c0_5] : memref<1x8x8x64xbf16, #tpu.memory_space<vmem>>, vector<1x8x8x64xbf16>
    %3 = vector.shape_cast %2 : vector<1x8x8x64xbf16> to vector<8x8x64xbf16>
    %4 = arith.extf %3 : vector<8x8x64xbf16> to vector<8x8x64xf32>
    %c1 = arith.constant 1 : index
    %c8 = arith.constant 8 : index
    %c0_6 = arith.constant 0 : index
    %5 = vector.load %arg7[%c1, %c8, %c0_6] : memref<10x17x64xf32, #tpu.memory_space<vmem>>, vector<8x8x64xf32>
    tpu.vector_store %arg7[%c1, %c8, %c0_6], %4 {strides = array<i32>} : memref<10x17x64xf32, #tpu.memory_space<vmem>>, vector<8x8x64xf32>,
    %cst_7 = arith.constant 0.000000e+00 : f32
    %6 = vector.broadcast %cst_7 : f32 to vector<10x17x32xf32>
    %c0_8 = arith.constant 0 : index
    %c0_9 = arith.constant 0 : index
    %c0_10 = arith.constant 0 : index
    %7 = vector.load %arg8[%c0_8, %c0_9, %c0_10] : memref<10x17x32xf32, #tpu.memory_space<vmem>>, vector<10x17x32xf32>
    tpu.vector_store %arg8[%c0_8, %c0_9, %c0_10], %6 {strides = array<i32>} : memref<10x17x32xf32, #tpu.memory_space<vmem>>, vector<10x17x32xf32>,
    %c0_11 = arith.constant 0 : index
    %c0_12 = arith.constant 0 : index
    %c0_13 = arith.constant 0 : index
    %c0_14 = arith.constant 0 : index
    %8 = vector.load %arg2[%c0_11, %c0_12, %c0_13, %c0_14] : memref<1x8x8x32xbf16, #tpu.memory_space<vmem>>, vector<1x8x8x32xbf16>
    %9 = vector.shape_cast %8 : vector<1x8x8x32xbf16> to vector<8x8x32xbf16>
    %10 = arith.extf %9 : vector<8x8x32xbf16> to vector<8x8x32xf32>
    %c1_15 = arith.constant 1 : index
    %c8_16 = arith.constant 8 : index
    %c0_17 = arith.constant 0 : index
    %11 = vector.load %arg8[%c1_15, %c8_16, %c0_17] : memref<10x17x32xf32, #tpu.memory_space<vmem>>, vector<8x8x32xf32>
    tpu.vector_store %arg8[%c1_15, %c8_16, %c0_17], %10 {strides = array<i32>} : memref<10x17x32xf32, #tpu.memory_space<vmem>>, vector<8x8x32xf32>,
    %c0_18 = arith.constant 0 : index
    %c7 = arith.constant 7 : index
    %c0_19 = arith.constant 0 : index
    %12 = vector.load %arg7[%c0_18, %c7, %c0_19] : memref<10x17x64xf32, #tpu.memory_space<vmem>>, vector<8x8x64xf32>
    %13 = arith.truncf %12 : vector<8x8x64xf32> to vector<8x8x64xbf16>
    %c0_20 = arith.constant 0 : index
    %c7_21 = arith.constant 7 : index
    %c0_22 = arith.constant 0 : index
    %14 = vector.load %arg8[%c0_20, %c7_21, %c0_22] : memref<10x17x32xf32, #tpu.memory_space<vmem>>, vector<8x8x32xf32>
    %15 = arith.truncf %14 : vector<8x8x32xf32> to vector<8x8x32xbf16>
    %c0_23 = arith.constant 0 : index
    %c8_24 = arith.constant 8 : index
    %c0_25 = arith.constant 0 : index
    %16 = vector.load %arg7[%c0_23, %c8_24, %c0_25] : memref<10x17x64xf32, #tpu.memory_space<vmem>>, vector<8x8x64xf32>
    %17 = arith.truncf %16 : vector<8x8x64xf32> to vector<8x8x64xbf16>
    %c0_26 = arith.constant 0 : index
    %c8_27 = arith.constant 8 : index
    %c0_28 = arith.constant 0 : index
    %18 = vector.load %arg8[%c0_26, %c8_27, %c0_28] : memref<10x17x32xf32, #tpu.memory_space<vmem>>, vector<8x8x32xf32>
    %19 = arith.truncf %18 : vector<8x8x32xf32> to vector<8x8x32xbf16>
    %c0_29 = arith.constant 0 : index
    %c9 = arith.constant 9 : index
    %c0_30 = arith.constant 0 : index
    %20 = vector.load %arg7[%c0_29, %c9, %c0_30] : memref<10x17x64xf32, #tpu.memory_space<vmem>>, vector<8x8x64xf32>
    %21 = arith.truncf %20 : vector<8x8x64xf32> to vector<8x8x64xbf16>
    %c0_31 = arith.constant 0 : index
    %c9_32 = arith.constant 9 : index
    %c0_33 = arith.constant 0 : index
    %22 = vector.load %arg8[%c0_31, %c9_32, %c0_33] : memref<10x17x32xf32, #tpu.memory_space<vmem>>, vector<8x8x32xf32>
    %23 = arith.truncf %22 : vector<8x8x32xf32> to vector<8x8x32xbf16>
    %c1_34 = arith.constant 1 : index
    %c7_35 = arith.constant 7 : index
    %c0_36 = arith.constant 0 : index
    %24 = vector.load %arg7[%c1_34, %c7_35, %c0_36] : memref<10x17x64xf32, #tpu.memory_space<vmem>>, vector<8x8x64xf32>
    %25 = arith.truncf %24 : vector<8x8x64xf32> to vector<8x8x64xbf16>
    %c1_37 = arith.constant 1 : index
    %c7_38 = arith.constant 7 : index
    %c0_39 = arith.constant 0 : index
    %26 = vector.load %arg8[%c1_37, %c7_38, %c0_39] : memref<10x17x32xf32, #tpu.memory_space<vmem>>, vector<8x8x32xf32>
    %27 = arith.truncf %26 : vector<8x8x32xf32> to vector<8x8x32xbf16>
    %c1_40 = arith.constant 1 : index
    %c8_41 = arith.constant 8 : index
    %c0_42 = arith.constant 0 : index
    %28 = vector.load %arg7[%c1_40, %c8_41, %c0_42] : memref<10x17x64xf32, #tpu.memory_space<vmem>>, vector<8x8x64xf32>
    %29 = arith.truncf %28 : vector<8x8x64xf32> to vector<8x8x64xbf16>
    %c1_43 = arith.constant 1 : index
    %c8_44 = arith.constant 8 : index
    %c0_45 = arith.constant 0 : index
    %30 = vector.load %arg8[%c1_43, %c8_44, %c0_45] : memref<10x17x32xf32, #tpu.memory_space<vmem>>, vector<8x8x32xf32>
    %31 = arith.truncf %30 : vector<8x8x32xf32> to vector<8x8x32xbf16>
    %c1_46 = arith.constant 1 : index
    %c9_47 = arith.constant 9 : index
    %c0_48 = arith.constant 0 : index
    %32 = vector.load %arg7[%c1_46, %c9_47, %c0_48] : memref<10x17x64xf32, #tpu.memory_space<vmem>>, vector<8x8x64xf32>
    %33 = arith.truncf %32 : vector<8x8x64xf32> to vector<8x8x64xbf16>
    %c1_49 = arith.constant 1 : index
    %c9_50 = arith.constant 9 : index
    %c0_51 = arith.constant 0 : index
    %34 = vector.load %arg8[%c1_49, %c9_50, %c0_51] : memref<10x17x32xf32, #tpu.memory_space<vmem>>, vector<8x8x32xf32>
    %35 = arith.truncf %34 : vector<8x8x32xf32> to vector<8x8x32xbf16>
    %c2 = arith.constant 2 : index
    %c7_52 = arith.constant 7 : index
    %c0_53 = arith.constant 0 : index
    %36 = vector.load %arg7[%c2, %c7_52, %c0_53] : memref<10x17x64xf32, #tpu.memory_space<vmem>>, vector<8x8x64xf32>
    %37 = arith.truncf %36 : vector<8x8x64xf32> to vector<8x8x64xbf16>
    %c2_54 = arith.constant 2 : index
    %c7_55 = arith.constant 7 : index
    %c0_56 = arith.constant 0 : index
    %38 = vector.load %arg8[%c2_54, %c7_55, %c0_56] : memref<10x17x32xf32, #tpu.memory_space<vmem>>, vector<8x8x32xf32>
    %39 = arith.truncf %38 : vector<8x8x32xf32> to vector<8x8x32xbf16>
    %c2_57 = arith.constant 2 : index
    %c8_58 = arith.constant 8 : index
    %c0_59 = arith.constant 0 : index
    %40 = vector.load %arg7[%c2_57, %c8_58, %c0_59] : memref<10x17x64xf32, #tpu.memory_space<vmem>>, vector<8x8x64xf32>
    %41 = arith.truncf %40 : vector<8x8x64xf32> to vector<8x8x64xbf16>
    %c2_60 = arith.constant 2 : index
    %c8_61 = arith.constant 8 : index
    %c0_62 = arith.constant 0 : index
    %42 = vector.load %arg8[%c2_60, %c8_61, %c0_62] : memref<10x17x32xf32, #tpu.memory_space<vmem>>, vector<8x8x32xf32>
    %43 = arith.truncf %42 : vector<8x8x32xf32> to vector<8x8x32xbf16>
    %c2_63 = arith.constant 2 : index
    %c9_64 = arith.constant 9 : index
    %c0_65 = arith.constant 0 : index
    %44 = vector.load %arg7[%c2_63, %c9_64, %c0_65] : memref<10x17x64xf32, #tpu.memory_space<vmem>>, vector<8x8x64xf32>
    %45 = arith.truncf %44 : vector<8x8x64xf32> to vector<8x8x64xbf16>
    %c2_66 = arith.constant 2 : index
    %c9_67 = arith.constant 9 : index
    %c0_68 = arith.constant 0 : index
    %46 = vector.load %arg8[%c2_66, %c9_67, %c0_68] : memref<10x17x32xf32, #tpu.memory_space<vmem>>, vector<8x8x32xf32>
    %47 = arith.truncf %46 : vector<8x8x32xf32> to vector<8x8x32xbf16>
    %48 = tpu.concatenate %13, %15, %17, %19, %21, %23, %25, %27, %29, %31, %33, %35, %37, %39, %41, %43 in 2 : vector<8x8x64xbf16>, vector<8x8x32xbf16>, vector<8x8x64xbf16>, vector<8x8x32xbf16>, vector<8x8x64xbf16>, vector<8x8x32xbf16>, vector<8x8x64xbf16>, vector<8x8x32xbf16>, vector<8x8x64xbf16>, vector<8x8x32xbf16>, vector<8x8x64xbf16>, vector<8x8x32xbf16>, vector<8x8x64xbf16>, vector<8x8x32xbf16>, vector<8x8x64xbf16>, vector<8x8x32xbf16> -> vector<8x8x768xbf16>
    %49 = tpu.concatenate %45, %47 in 2 : vector<8x8x64xbf16>, vector<8x8x32xbf16> -> vector<8x8x96xbf16>
    %50 = tpu.concatenate %48, %49 in 2 : vector<8x8x768xbf16>, vector<8x8x96xbf16> -> vector<8x8x864xbf16>
    %51 = vector.shape_cast %50 : vector<8x8x864xbf16> to vector<64x864xbf16>
    %c0_69 = arith.constant 0 : index
    %c0_70 = arith.constant 0 : index
    %52 = vector.load %arg3[%c0_69, %c0_70] : memref<864x32xbf16, #tpu.memory_space<vmem>>, vector<864x32xbf16>
    %cst_71 = arith.constant dense<0.000000e+00> : vector<64x32xf32>
    %53 = tpu.matmul %51, %52, %cst_71 {dimension_numbers = #tpu.dot_dimension_numbers<[1], [0], [0], [1], [0, 0, 1, 1], [], []>} : vector<64x864xbf16>, vector<864x32xbf16>, vector<64x32xf32> -> vector<64x32xf32>
    %c0_72 = arith.constant 0 : index
    %c0_73 = arith.constant 0 : index
    %54 = vector.load %arg4[%c0_72, %c0_73] : memref<1x32xf32, #tpu.memory_space<vmem>>, vector<1x32xf32>
    %55 = vector.broadcast %54 : vector<1x32xf32> to vector<64x32xf32>
    %56 = arith.mulf %53, %55 : vector<64x32xf32>
    %c0_74 = arith.constant 0 : index
    %c0_75 = arith.constant 0 : index
    %57 = vector.load %arg5[%c0_74, %c0_75] : memref<1x32xf32, #tpu.memory_space<vmem>>, vector<1x32xf32>
    %58 = vector.broadcast %57 : vector<1x32xf32> to vector<64x32xf32>
    %59 = arith.addf %56, %58 : vector<64x32xf32>
    %cst_76 = arith.constant 0.000000e+00 : f32
    %60 = vector.broadcast %cst_76 : f32 to vector<64x32xf32>
    %61 = arith.maximumf %59, %60 : vector<64x32xf32>
    %62 = vector.shape_cast %61 : vector<64x32xf32> to vector<8x8x32xf32>
    %63 = arith.truncf %62 : vector<8x8x32xf32> to vector<8x8x32xbf16>
    %c0_77 = arith.constant 0 : index
    %c0_78 = arith.constant 0 : index
    %c0_79 = arith.constant 0 : index
    %c0_80 = arith.constant 0 : index
    %64 = vector.load %arg6[%c0_77, %c0_78, %c0_79, %c0_80] : memref<1x8x8x32xbf16, #tpu.memory_space<vmem>>, vector<1x8x8x32xbf16>
    %65 = vector.shape_cast %64 : vector<1x8x8x32xbf16> to vector<8x8x32xbf16>
    %66 = vector.shape_cast %63 : vector<8x8x32xbf16> to vector<1x8x8x32xbf16>
    tpu.vector_store %arg6[%c0_77, %c0_78, %c0_79, %c0_80], %66 {strides = array<i32>} : memref<1x8x8x32xbf16, #tpu.memory_space<vmem>>, vector<1x8x8x32xbf16>,
    return
  }
  func.func @transform_0(%arg0: i32) -> (i32, i32, i32, i32) {
    %c0_i32 = arith.constant 0 : i32
    %c0_i32_0 = arith.constant 0 : i32
    %c0_i32_1 = arith.constant 0 : i32
    %c0_i32_2 = arith.constant 0 : i32
    return %arg0, %c0_i32, %c0_i32_0, %c0_i32_1 : i32, i32, i32, i32
  }
  func.func @transform_1(%arg0: i32) -> (i32, i32, i32, i32) {
    %c0_i32 = arith.constant 0 : i32
    %c0_i32_0 = arith.constant 0 : i32
    %c0_i32_1 = arith.constant 0 : i32
    %c0_i32_2 = arith.constant 0 : i32
    return %arg0, %c0_i32, %c0_i32_0, %c0_i32_1 : i32, i32, i32, i32
  }
  func.func @transform_2(%arg0: i32) -> (i32, i32) {
    %c0_i32 = arith.constant 0 : i32
    %c0_i32_0 = arith.constant 0 : i32
    %c0_i32_1 = arith.constant 0 : i32
    return %c0_i32, %c0_i32_0 : i32, i32
  }
  func.func @transform_3(%arg0: i32) -> (i32, i32) {
    %c0_i32 = arith.constant 0 : i32
    %c0_i32_0 = arith.constant 0 : i32
    %c0_i32_1 = arith.constant 0 : i32
    return %c0_i32, %c0_i32_0 : i32, i32
  }
  func.func @transform_4(%arg0: i32) -> (i32, i32) {
    %c0_i32 = arith.constant 0 : i32
    %c0_i32_0 = arith.constant 0 : i32
    %c0_i32_1 = arith.constant 0 : i32
    return %c0_i32, %c0_i32_0 : i32, i32
  }
  func.func @transform_5(%arg0: i32) -> (i32, i32, i32, i32) {
    %c0_i32 = arith.constant 0 : i32
    %c0_i32_0 = arith.constant 0 : i32
    %c0_i32_1 = arith.constant 0 : i32
    %c0_i32_2 = arith.constant 0 : i32
    return %arg0, %c0_i32, %c0_i32_0, %c0_i32_1 : i32, i32, i32, i32
  }
}

module attributes {stable_mosaic.version = 11 : i64} {
  func.func @_conv3x3_kernel(%arg0: i32, %arg1: memref<1x16x16x32xbf16, #tpu.memory_space<vmem>>, %arg2: memref<1x16x16x16xbf16, #tpu.memory_space<vmem>>, %arg3: memref<432x16xbf16, #tpu.memory_space<vmem>>, %arg4: memref<1x16xf32, #tpu.memory_space<vmem>>, %arg5: memref<1x16xf32, #tpu.memory_space<vmem>>, %arg6: memref<1x16x16x16xbf16, #tpu.memory_space<vmem>>, %arg7: memref<18x25x32xf32, #tpu.memory_space<vmem>>, %arg8: memref<18x25x16xf32, #tpu.memory_space<vmem>>) attributes {dimension_semantics = [#tpu.dimension_semantics<parallel>], iteration_bounds = array<i64: 2>, scalar_prefetch = 0 : i64, scratch_operands = 2 : i64, tpu.core_type = #tpu.core_type<tc>, window_params = [{transform_indices = @transform_0, window_bounds = array<i64: 1, 16, 16, 32>}, {transform_indices = @transform_1, window_bounds = array<i64: 1, 16, 16, 16>}, {pipeline_mode = #tpu.pipeline_mode<synchronous>, transform_indices = @transform_2, window_bounds = array<i64: 432, 16>}, {pipeline_mode = #tpu.pipeline_mode<synchronous>, transform_indices = @transform_3, window_bounds = array<i64: 1, 16>}, {pipeline_mode = #tpu.pipeline_mode<synchronous>, transform_indices = @transform_4, window_bounds = array<i64: 1, 16>}, {transform_indices = @transform_5, window_bounds = array<i64: 1, 16, 16, 16>}]} {
    %cst = arith.constant 0.000000e+00 : f32
    %0 = vector.broadcast %cst : f32 to vector<18x25x32xf32>
    %c0 = arith.constant 0 : index
    %c0_0 = arith.constant 0 : index
    %c0_1 = arith.constant 0 : index
    %1 = vector.load %arg7[%c0, %c0_0, %c0_1] : memref<18x25x32xf32, #tpu.memory_space<vmem>>, vector<18x25x32xf32>
    tpu.vector_store %arg7[%c0, %c0_0, %c0_1], %0 {strides = array<i32>} : memref<18x25x32xf32, #tpu.memory_space<vmem>>, vector<18x25x32xf32>,
    %c0_2 = arith.constant 0 : index
    %c0_3 = arith.constant 0 : index
    %c0_4 = arith.constant 0 : index
    %c0_5 = arith.constant 0 : index
    %2 = vector.load %arg1[%c0_2, %c0_3, %c0_4, %c0_5] : memref<1x16x16x32xbf16, #tpu.memory_space<vmem>>, vector<1x16x16x32xbf16>
    %3 = vector.shape_cast %2 : vector<1x16x16x32xbf16> to vector<16x16x32xbf16>
    %4 = arith.extf %3 : vector<16x16x32xbf16> to vector<16x16x32xf32>
    %c1 = arith.constant 1 : index
    %c8 = arith.constant 8 : index
    %c0_6 = arith.constant 0 : index
    %5 = vector.load %arg7[%c1, %c8, %c0_6] : memref<18x25x32xf32, #tpu.memory_space<vmem>>, vector<16x16x32xf32>
    tpu.vector_store %arg7[%c1, %c8, %c0_6], %4 {strides = array<i32>} : memref<18x25x32xf32, #tpu.memory_space<vmem>>, vector<16x16x32xf32>,
    %cst_7 = arith.constant 0.000000e+00 : f32
    %6 = vector.broadcast %cst_7 : f32 to vector<18x25x16xf32>
    %c0_8 = arith.constant 0 : index
    %c0_9 = arith.constant 0 : index
    %c0_10 = arith.constant 0 : index
    %7 = vector.load %arg8[%c0_8, %c0_9, %c0_10] : memref<18x25x16xf32, #tpu.memory_space<vmem>>, vector<18x25x16xf32>
    tpu.vector_store %arg8[%c0_8, %c0_9, %c0_10], %6 {strides = array<i32>} : memref<18x25x16xf32, #tpu.memory_space<vmem>>, vector<18x25x16xf32>,
    %c0_11 = arith.constant 0 : index
    %c0_12 = arith.constant 0 : index
    %c0_13 = arith.constant 0 : index
    %c0_14 = arith.constant 0 : index
    %8 = vector.load %arg2[%c0_11, %c0_12, %c0_13, %c0_14] : memref<1x16x16x16xbf16, #tpu.memory_space<vmem>>, vector<1x16x16x16xbf16>
    %9 = vector.shape_cast %8 : vector<1x16x16x16xbf16> to vector<16x16x16xbf16>
    %10 = arith.extf %9 : vector<16x16x16xbf16> to vector<16x16x16xf32>
    %c1_15 = arith.constant 1 : index
    %c8_16 = arith.constant 8 : index
    %c0_17 = arith.constant 0 : index
    %11 = vector.load %arg8[%c1_15, %c8_16, %c0_17] : memref<18x25x16xf32, #tpu.memory_space<vmem>>, vector<16x16x16xf32>
    tpu.vector_store %arg8[%c1_15, %c8_16, %c0_17], %10 {strides = array<i32>} : memref<18x25x16xf32, #tpu.memory_space<vmem>>, vector<16x16x16xf32>,
    %c0_18 = arith.constant 0 : index
    %c7 = arith.constant 7 : index
    %c0_19 = arith.constant 0 : index
    %12 = vector.load %arg7[%c0_18, %c7, %c0_19] : memref<18x25x32xf32, #tpu.memory_space<vmem>>, vector<16x16x32xf32>
    %13 = arith.truncf %12 : vector<16x16x32xf32> to vector<16x16x32xbf16>
    %c0_20 = arith.constant 0 : index
    %c7_21 = arith.constant 7 : index
    %c0_22 = arith.constant 0 : index
    %14 = vector.load %arg8[%c0_20, %c7_21, %c0_22] : memref<18x25x16xf32, #tpu.memory_space<vmem>>, vector<16x16x16xf32>
    %15 = arith.truncf %14 : vector<16x16x16xf32> to vector<16x16x16xbf16>
    %c0_23 = arith.constant 0 : index
    %c8_24 = arith.constant 8 : index
    %c0_25 = arith.constant 0 : index
    %16 = vector.load %arg7[%c0_23, %c8_24, %c0_25] : memref<18x25x32xf32, #tpu.memory_space<vmem>>, vector<16x16x32xf32>
    %17 = arith.truncf %16 : vector<16x16x32xf32> to vector<16x16x32xbf16>
    %c0_26 = arith.constant 0 : index
    %c8_27 = arith.constant 8 : index
    %c0_28 = arith.constant 0 : index
    %18 = vector.load %arg8[%c0_26, %c8_27, %c0_28] : memref<18x25x16xf32, #tpu.memory_space<vmem>>, vector<16x16x16xf32>
    %19 = arith.truncf %18 : vector<16x16x16xf32> to vector<16x16x16xbf16>
    %c0_29 = arith.constant 0 : index
    %c9 = arith.constant 9 : index
    %c0_30 = arith.constant 0 : index
    %20 = vector.load %arg7[%c0_29, %c9, %c0_30] : memref<18x25x32xf32, #tpu.memory_space<vmem>>, vector<16x16x32xf32>
    %21 = arith.truncf %20 : vector<16x16x32xf32> to vector<16x16x32xbf16>
    %c0_31 = arith.constant 0 : index
    %c9_32 = arith.constant 9 : index
    %c0_33 = arith.constant 0 : index
    %22 = vector.load %arg8[%c0_31, %c9_32, %c0_33] : memref<18x25x16xf32, #tpu.memory_space<vmem>>, vector<16x16x16xf32>
    %23 = arith.truncf %22 : vector<16x16x16xf32> to vector<16x16x16xbf16>
    %c1_34 = arith.constant 1 : index
    %c7_35 = arith.constant 7 : index
    %c0_36 = arith.constant 0 : index
    %24 = vector.load %arg7[%c1_34, %c7_35, %c0_36] : memref<18x25x32xf32, #tpu.memory_space<vmem>>, vector<16x16x32xf32>
    %25 = arith.truncf %24 : vector<16x16x32xf32> to vector<16x16x32xbf16>
    %c1_37 = arith.constant 1 : index
    %c7_38 = arith.constant 7 : index
    %c0_39 = arith.constant 0 : index
    %26 = vector.load %arg8[%c1_37, %c7_38, %c0_39] : memref<18x25x16xf32, #tpu.memory_space<vmem>>, vector<16x16x16xf32>
    %27 = arith.truncf %26 : vector<16x16x16xf32> to vector<16x16x16xbf16>
    %c1_40 = arith.constant 1 : index
    %c8_41 = arith.constant 8 : index
    %c0_42 = arith.constant 0 : index
    %28 = vector.load %arg7[%c1_40, %c8_41, %c0_42] : memref<18x25x32xf32, #tpu.memory_space<vmem>>, vector<16x16x32xf32>
    %29 = arith.truncf %28 : vector<16x16x32xf32> to vector<16x16x32xbf16>
    %c1_43 = arith.constant 1 : index
    %c8_44 = arith.constant 8 : index
    %c0_45 = arith.constant 0 : index
    %30 = vector.load %arg8[%c1_43, %c8_44, %c0_45] : memref<18x25x16xf32, #tpu.memory_space<vmem>>, vector<16x16x16xf32>
    %31 = arith.truncf %30 : vector<16x16x16xf32> to vector<16x16x16xbf16>
    %c1_46 = arith.constant 1 : index
    %c9_47 = arith.constant 9 : index
    %c0_48 = arith.constant 0 : index
    %32 = vector.load %arg7[%c1_46, %c9_47, %c0_48] : memref<18x25x32xf32, #tpu.memory_space<vmem>>, vector<16x16x32xf32>
    %33 = arith.truncf %32 : vector<16x16x32xf32> to vector<16x16x32xbf16>
    %c1_49 = arith.constant 1 : index
    %c9_50 = arith.constant 9 : index
    %c0_51 = arith.constant 0 : index
    %34 = vector.load %arg8[%c1_49, %c9_50, %c0_51] : memref<18x25x16xf32, #tpu.memory_space<vmem>>, vector<16x16x16xf32>
    %35 = arith.truncf %34 : vector<16x16x16xf32> to vector<16x16x16xbf16>
    %c2 = arith.constant 2 : index
    %c7_52 = arith.constant 7 : index
    %c0_53 = arith.constant 0 : index
    %36 = vector.load %arg7[%c2, %c7_52, %c0_53] : memref<18x25x32xf32, #tpu.memory_space<vmem>>, vector<16x16x32xf32>
    %37 = arith.truncf %36 : vector<16x16x32xf32> to vector<16x16x32xbf16>
    %c2_54 = arith.constant 2 : index
    %c7_55 = arith.constant 7 : index
    %c0_56 = arith.constant 0 : index
    %38 = vector.load %arg8[%c2_54, %c7_55, %c0_56] : memref<18x25x16xf32, #tpu.memory_space<vmem>>, vector<16x16x16xf32>
    %39 = arith.truncf %38 : vector<16x16x16xf32> to vector<16x16x16xbf16>
    %c2_57 = arith.constant 2 : index
    %c8_58 = arith.constant 8 : index
    %c0_59 = arith.constant 0 : index
    %40 = vector.load %arg7[%c2_57, %c8_58, %c0_59] : memref<18x25x32xf32, #tpu.memory_space<vmem>>, vector<16x16x32xf32>
    %41 = arith.truncf %40 : vector<16x16x32xf32> to vector<16x16x32xbf16>
    %c2_60 = arith.constant 2 : index
    %c8_61 = arith.constant 8 : index
    %c0_62 = arith.constant 0 : index
    %42 = vector.load %arg8[%c2_60, %c8_61, %c0_62] : memref<18x25x16xf32, #tpu.memory_space<vmem>>, vector<16x16x16xf32>
    %43 = arith.truncf %42 : vector<16x16x16xf32> to vector<16x16x16xbf16>
    %c2_63 = arith.constant 2 : index
    %c9_64 = arith.constant 9 : index
    %c0_65 = arith.constant 0 : index
    %44 = vector.load %arg7[%c2_63, %c9_64, %c0_65] : memref<18x25x32xf32, #tpu.memory_space<vmem>>, vector<16x16x32xf32>
    %45 = arith.truncf %44 : vector<16x16x32xf32> to vector<16x16x32xbf16>
    %c2_66 = arith.constant 2 : index
    %c9_67 = arith.constant 9 : index
    %c0_68 = arith.constant 0 : index
    %46 = vector.load %arg8[%c2_66, %c9_67, %c0_68] : memref<18x25x16xf32, #tpu.memory_space<vmem>>, vector<16x16x16xf32>
    %47 = arith.truncf %46 : vector<16x16x16xf32> to vector<16x16x16xbf16>
    %48 = tpu.concatenate %13, %15, %17, %19, %21, %23, %25, %27, %29, %31, %33, %35, %37, %39, %41, %43 in 2 : vector<16x16x32xbf16>, vector<16x16x16xbf16>, vector<16x16x32xbf16>, vector<16x16x16xbf16>, vector<16x16x32xbf16>, vector<16x16x16xbf16>, vector<16x16x32xbf16>, vector<16x16x16xbf16>, vector<16x16x32xbf16>, vector<16x16x16xbf16>, vector<16x16x32xbf16>, vector<16x16x16xbf16>, vector<16x16x32xbf16>, vector<16x16x16xbf16>, vector<16x16x32xbf16>, vector<16x16x16xbf16> -> vector<16x16x384xbf16>
    %49 = tpu.concatenate %45, %47 in 2 : vector<16x16x32xbf16>, vector<16x16x16xbf16> -> vector<16x16x48xbf16>
    %50 = tpu.concatenate %48, %49 in 2 : vector<16x16x384xbf16>, vector<16x16x48xbf16> -> vector<16x16x432xbf16>
    %51 = vector.shape_cast %50 : vector<16x16x432xbf16> to vector<256x432xbf16>
    %c0_69 = arith.constant 0 : index
    %c0_70 = arith.constant 0 : index
    %52 = vector.load %arg3[%c0_69, %c0_70] : memref<432x16xbf16, #tpu.memory_space<vmem>>, vector<432x16xbf16>
    %cst_71 = arith.constant dense<0.000000e+00> : vector<256x16xf32>
    %53 = tpu.matmul %51, %52, %cst_71 {dimension_numbers = #tpu.dot_dimension_numbers<[1], [0], [0], [1], [0, 0, 1, 1], [], []>} : vector<256x432xbf16>, vector<432x16xbf16>, vector<256x16xf32> -> vector<256x16xf32>
    %c0_72 = arith.constant 0 : index
    %c0_73 = arith.constant 0 : index
    %54 = vector.load %arg4[%c0_72, %c0_73] : memref<1x16xf32, #tpu.memory_space<vmem>>, vector<1x16xf32>
    %55 = vector.broadcast %54 : vector<1x16xf32> to vector<256x16xf32>
    %56 = arith.mulf %53, %55 : vector<256x16xf32>
    %c0_74 = arith.constant 0 : index
    %c0_75 = arith.constant 0 : index
    %57 = vector.load %arg5[%c0_74, %c0_75] : memref<1x16xf32, #tpu.memory_space<vmem>>, vector<1x16xf32>
    %58 = vector.broadcast %57 : vector<1x16xf32> to vector<256x16xf32>
    %59 = arith.addf %56, %58 : vector<256x16xf32>
    %cst_76 = arith.constant 0.000000e+00 : f32
    %60 = vector.broadcast %cst_76 : f32 to vector<256x16xf32>
    %61 = arith.maximumf %59, %60 : vector<256x16xf32>
    %62 = vector.shape_cast %61 : vector<256x16xf32> to vector<16x16x16xf32>
    %63 = arith.truncf %62 : vector<16x16x16xf32> to vector<16x16x16xbf16>
    %c0_77 = arith.constant 0 : index
    %c0_78 = arith.constant 0 : index
    %c0_79 = arith.constant 0 : index
    %c0_80 = arith.constant 0 : index
    %64 = vector.load %arg6[%c0_77, %c0_78, %c0_79, %c0_80] : memref<1x16x16x16xbf16, #tpu.memory_space<vmem>>, vector<1x16x16x16xbf16>
    %65 = vector.shape_cast %64 : vector<1x16x16x16xbf16> to vector<16x16x16xbf16>
    %66 = vector.shape_cast %63 : vector<16x16x16xbf16> to vector<1x16x16x16xbf16>
    tpu.vector_store %arg6[%c0_77, %c0_78, %c0_79, %c0_80], %66 {strides = array<i32>} : memref<1x16x16x16xbf16, #tpu.memory_space<vmem>>, vector<1x16x16x16xbf16>,
    return
  }
  func.func @transform_0(%arg0: i32) -> (i32, i32, i32, i32) {
    %c0_i32 = arith.constant 0 : i32
    %c0_i32_0 = arith.constant 0 : i32
    %c0_i32_1 = arith.constant 0 : i32
    %c0_i32_2 = arith.constant 0 : i32
    return %arg0, %c0_i32, %c0_i32_0, %c0_i32_1 : i32, i32, i32, i32
  }
  func.func @transform_1(%arg0: i32) -> (i32, i32, i32, i32) {
    %c0_i32 = arith.constant 0 : i32
    %c0_i32_0 = arith.constant 0 : i32
    %c0_i32_1 = arith.constant 0 : i32
    %c0_i32_2 = arith.constant 0 : i32
    return %arg0, %c0_i32, %c0_i32_0, %c0_i32_1 : i32, i32, i32, i32
  }
  func.func @transform_2(%arg0: i32) -> (i32, i32) {
    %c0_i32 = arith.constant 0 : i32
    %c0_i32_0 = arith.constant 0 : i32
    %c0_i32_1 = arith.constant 0 : i32
    return %c0_i32, %c0_i32_0 : i32, i32
  }
  func.func @transform_3(%arg0: i32) -> (i32, i32) {
    %c0_i32 = arith.constant 0 : i32
    %c0_i32_0 = arith.constant 0 : i32
    %c0_i32_1 = arith.constant 0 : i32
    return %c0_i32, %c0_i32_0 : i32, i32
  }
  func.func @transform_4(%arg0: i32) -> (i32, i32) {
    %c0_i32 = arith.constant 0 : i32
    %c0_i32_0 = arith.constant 0 : i32
    %c0_i32_1 = arith.constant 0 : i32
    return %c0_i32, %c0_i32_0 : i32, i32
  }
  func.func @transform_5(%arg0: i32) -> (i32, i32, i32, i32) {
    %c0_i32 = arith.constant 0 : i32
    %c0_i32_0 = arith.constant 0 : i32
    %c0_i32_1 = arith.constant 0 : i32
    %c0_i32_2 = arith.constant 0 : i32
    return %arg0, %c0_i32, %c0_i32_0, %c0_i32_1 : i32, i32, i32, i32
  }
}

module attributes {stable_mosaic.version = 11 : i64} {
  func.func @_conv3x3_kernel(%arg0: i32, %arg1: memref<1x16x16x16xbf16, #tpu.memory_space<vmem>>, %arg2: memref<144x10xbf16, #tpu.memory_space<vmem>>, %arg3: memref<1x10xf32, #tpu.memory_space<vmem>>, %arg4: memref<1x10xf32, #tpu.memory_space<vmem>>, %arg5: memref<1x16x16x10xf32, #tpu.memory_space<vmem>>, %arg6: memref<18x25x16xf32, #tpu.memory_space<vmem>>) attributes {dimension_semantics = [#tpu.dimension_semantics<parallel>], iteration_bounds = array<i64: 2>, scalar_prefetch = 0 : i64, scratch_operands = 1 : i64, tpu.core_type = #tpu.core_type<tc>, window_params = [{transform_indices = @transform_0, window_bounds = array<i64: 1, 16, 16, 16>}, {pipeline_mode = #tpu.pipeline_mode<synchronous>, transform_indices = @transform_1, window_bounds = array<i64: 144, 10>}, {pipeline_mode = #tpu.pipeline_mode<synchronous>, transform_indices = @transform_2, window_bounds = array<i64: 1, 10>}, {pipeline_mode = #tpu.pipeline_mode<synchronous>, transform_indices = @transform_3, window_bounds = array<i64: 1, 10>}, {transform_indices = @transform_4, window_bounds = array<i64: 1, 16, 16, 10>}]} {
    %cst = arith.constant 0.000000e+00 : f32
    %0 = vector.broadcast %cst : f32 to vector<18x25x16xf32>
    %c0 = arith.constant 0 : index
    %c0_0 = arith.constant 0 : index
    %c0_1 = arith.constant 0 : index
    %1 = vector.load %arg6[%c0, %c0_0, %c0_1] : memref<18x25x16xf32, #tpu.memory_space<vmem>>, vector<18x25x16xf32>
    tpu.vector_store %arg6[%c0, %c0_0, %c0_1], %0 {strides = array<i32>} : memref<18x25x16xf32, #tpu.memory_space<vmem>>, vector<18x25x16xf32>,
    %c0_2 = arith.constant 0 : index
    %c0_3 = arith.constant 0 : index
    %c0_4 = arith.constant 0 : index
    %c0_5 = arith.constant 0 : index
    %2 = vector.load %arg1[%c0_2, %c0_3, %c0_4, %c0_5] : memref<1x16x16x16xbf16, #tpu.memory_space<vmem>>, vector<1x16x16x16xbf16>
    %3 = vector.shape_cast %2 : vector<1x16x16x16xbf16> to vector<16x16x16xbf16>
    %4 = arith.extf %3 : vector<16x16x16xbf16> to vector<16x16x16xf32>
    %c1 = arith.constant 1 : index
    %c8 = arith.constant 8 : index
    %c0_6 = arith.constant 0 : index
    %5 = vector.load %arg6[%c1, %c8, %c0_6] : memref<18x25x16xf32, #tpu.memory_space<vmem>>, vector<16x16x16xf32>
    tpu.vector_store %arg6[%c1, %c8, %c0_6], %4 {strides = array<i32>} : memref<18x25x16xf32, #tpu.memory_space<vmem>>, vector<16x16x16xf32>,
    %c0_7 = arith.constant 0 : index
    %c7 = arith.constant 7 : index
    %c0_8 = arith.constant 0 : index
    %6 = vector.load %arg6[%c0_7, %c7, %c0_8] : memref<18x25x16xf32, #tpu.memory_space<vmem>>, vector<16x16x16xf32>
    %7 = arith.truncf %6 : vector<16x16x16xf32> to vector<16x16x16xbf16>
    %c0_9 = arith.constant 0 : index
    %c8_10 = arith.constant 8 : index
    %c0_11 = arith.constant 0 : index
    %8 = vector.load %arg6[%c0_9, %c8_10, %c0_11] : memref<18x25x16xf32, #tpu.memory_space<vmem>>, vector<16x16x16xf32>
    %9 = arith.truncf %8 : vector<16x16x16xf32> to vector<16x16x16xbf16>
    %c0_12 = arith.constant 0 : index
    %c9 = arith.constant 9 : index
    %c0_13 = arith.constant 0 : index
    %10 = vector.load %arg6[%c0_12, %c9, %c0_13] : memref<18x25x16xf32, #tpu.memory_space<vmem>>, vector<16x16x16xf32>
    %11 = arith.truncf %10 : vector<16x16x16xf32> to vector<16x16x16xbf16>
    %c1_14 = arith.constant 1 : index
    %c7_15 = arith.constant 7 : index
    %c0_16 = arith.constant 0 : index
    %12 = vector.load %arg6[%c1_14, %c7_15, %c0_16] : memref<18x25x16xf32, #tpu.memory_space<vmem>>, vector<16x16x16xf32>
    %13 = arith.truncf %12 : vector<16x16x16xf32> to vector<16x16x16xbf16>
    %c1_17 = arith.constant 1 : index
    %c8_18 = arith.constant 8 : index
    %c0_19 = arith.constant 0 : index
    %14 = vector.load %arg6[%c1_17, %c8_18, %c0_19] : memref<18x25x16xf32, #tpu.memory_space<vmem>>, vector<16x16x16xf32>
    %15 = arith.truncf %14 : vector<16x16x16xf32> to vector<16x16x16xbf16>
    %c1_20 = arith.constant 1 : index
    %c9_21 = arith.constant 9 : index
    %c0_22 = arith.constant 0 : index
    %16 = vector.load %arg6[%c1_20, %c9_21, %c0_22] : memref<18x25x16xf32, #tpu.memory_space<vmem>>, vector<16x16x16xf32>
    %17 = arith.truncf %16 : vector<16x16x16xf32> to vector<16x16x16xbf16>
    %c2 = arith.constant 2 : index
    %c7_23 = arith.constant 7 : index
    %c0_24 = arith.constant 0 : index
    %18 = vector.load %arg6[%c2, %c7_23, %c0_24] : memref<18x25x16xf32, #tpu.memory_space<vmem>>, vector<16x16x16xf32>
    %19 = arith.truncf %18 : vector<16x16x16xf32> to vector<16x16x16xbf16>
    %c2_25 = arith.constant 2 : index
    %c8_26 = arith.constant 8 : index
    %c0_27 = arith.constant 0 : index
    %20 = vector.load %arg6[%c2_25, %c8_26, %c0_27] : memref<18x25x16xf32, #tpu.memory_space<vmem>>, vector<16x16x16xf32>
    %21 = arith.truncf %20 : vector<16x16x16xf32> to vector<16x16x16xbf16>
    %c2_28 = arith.constant 2 : index
    %c9_29 = arith.constant 9 : index
    %c0_30 = arith.constant 0 : index
    %22 = vector.load %arg6[%c2_28, %c9_29, %c0_30] : memref<18x25x16xf32, #tpu.memory_space<vmem>>, vector<16x16x16xf32>
    %23 = arith.truncf %22 : vector<16x16x16xf32> to vector<16x16x16xbf16>
    %24 = tpu.concatenate %7, %9, %11, %13, %15, %17, %19, %21, %23 in 2 : vector<16x16x16xbf16>, vector<16x16x16xbf16>, vector<16x16x16xbf16>, vector<16x16x16xbf16>, vector<16x16x16xbf16>, vector<16x16x16xbf16>, vector<16x16x16xbf16>, vector<16x16x16xbf16>, vector<16x16x16xbf16> -> vector<16x16x144xbf16>
    %25 = vector.shape_cast %24 : vector<16x16x144xbf16> to vector<256x144xbf16>
    %c0_31 = arith.constant 0 : index
    %c0_32 = arith.constant 0 : index
    %26 = vector.load %arg2[%c0_31, %c0_32] : memref<144x10xbf16, #tpu.memory_space<vmem>>, vector<144x10xbf16>
    %cst_33 = arith.constant dense<0.000000e+00> : vector<256x10xf32>
    %27 = tpu.matmul %25, %26, %cst_33 {dimension_numbers = #tpu.dot_dimension_numbers<[1], [0], [0], [1], [0, 0, 1, 1], [], []>} : vector<256x144xbf16>, vector<144x10xbf16>, vector<256x10xf32> -> vector<256x10xf32>
    %c0_34 = arith.constant 0 : index
    %c0_35 = arith.constant 0 : index
    %28 = vector.load %arg3[%c0_34, %c0_35] : memref<1x10xf32, #tpu.memory_space<vmem>>, vector<1x10xf32>
    %29 = vector.broadcast %28 : vector<1x10xf32> to vector<256x10xf32>
    %30 = arith.mulf %27, %29 : vector<256x10xf32>
    %c0_36 = arith.constant 0 : index
    %c0_37 = arith.constant 0 : index
    %31 = vector.load %arg4[%c0_36, %c0_37] : memref<1x10xf32, #tpu.memory_space<vmem>>, vector<1x10xf32>
    %32 = vector.broadcast %31 : vector<1x10xf32> to vector<256x10xf32>
    %33 = arith.addf %30, %32 : vector<256x10xf32>
    %34 = vector.shape_cast %33 : vector<256x10xf32> to vector<16x16x10xf32>
    %c0_38 = arith.constant 0 : index
    %c0_39 = arith.constant 0 : index
    %c0_40 = arith.constant 0 : index
    %c0_41 = arith.constant 0 : index
    %35 = vector.load %arg5[%c0_38, %c0_39, %c0_40, %c0_41] : memref<1x16x16x10xf32, #tpu.memory_space<vmem>>, vector<1x16x16x10xf32>
    %36 = vector.shape_cast %35 : vector<1x16x16x10xf32> to vector<16x16x10xf32>
    %37 = vector.shape_cast %34 : vector<16x16x10xf32> to vector<1x16x16x10xf32>
    tpu.vector_store %arg5[%c0_38, %c0_39, %c0_40, %c0_41], %37 {strides = array<i32>} : memref<1x16x16x10xf32, #tpu.memory_space<vmem>>, vector<1x16x16x10xf32>,
    return
  }
  func.func @transform_0(%arg0: i32) -> (i32, i32, i32, i32) {
    %c0_i32 = arith.constant 0 : i32
    %c0_i32_0 = arith.constant 0 : i32
    %c0_i32_1 = arith.constant 0 : i32
    %c0_i32_2 = arith.constant 0 : i32
    return %arg0, %c0_i32, %c0_i32_0, %c0_i32_1 : i32, i32, i32, i32
  }
  func.func @transform_1(%arg0: i32) -> (i32, i32) {
    %c0_i32 = arith.constant 0 : i32
    %c0_i32_0 = arith.constant 0 : i32
    %c0_i32_1 = arith.constant 0 : i32
    return %c0_i32, %c0_i32_0 : i32, i32
  }
  func.func @transform_2(%arg0: i32) -> (i32, i32) {
    %c0_i32 = arith.constant 0 : i32
    %c0_i32_0 = arith.constant 0 : i32
    %c0_i32_1 = arith.constant 0 : i32
    return %c0_i32, %c0_i32_0 : i32, i32
  }
  func.func @transform_3(%arg0: i32) -> (i32, i32) {
    %c0_i32 = arith.constant 0 : i32
    %c0_i32_0 = arith.constant 0 : i32
    %c0_i32_1 = arith.constant 0 : i32
    return %c0_i32, %c0_i32_0 : i32, i32
  }
  func.func @transform_4(%arg0: i32) -> (i32, i32, i32, i32) {
    %c0_i32 = arith.constant 0 : i32
    %c0_i32_0 = arith.constant 0 : i32
    %c0_i32_1 = arith.constant 0 : i32
    %c0_i32_2 = arith.constant 0 : i32
    return %arg0, %c0_i32, %c0_i32_0, %c0_i32_1 : i32, i32, i32, i32
  }
}

</mosaic_0001>

<bundles_post_ra>
// kernel: _lambda_.7
= control target key start
LH: loop header
LB: loop body
LE: loop exit
PB: predicated region body
PF: predicated region fallthrough
CT: control target
= control target key end

     0   :  { %s1143_s15 = smov 0   ;;  %s1457_s0 = inlined_call_operand.vmem [shape: bf16[2,8,8,16], index: 0, kind: input, shape index: {}]   ;;  %s1458_s1 = inlined_call_operand.vmem [shape: bf16[144,32], index: 1, kind: input, shape index: {}]   ;;  %s1459_s2 = inlined_call_operand.vmem [shape: f32[1,32], index: 2, kind: input, shape index: {}]   ;;  %s1460_s3 = inlined_call_operand.vmem [shape: f32[1,32], index: 3, kind: input, shape index: {}]   ;;  %s1461_s4 = inlined_call_operand.vmem [shape: bf16[2,8,8,32], index: 4, kind: output, shape index: {}]  }
   0x1 LB: > { %s998_s16 = sadd.s32 4294967295, %s1107_s15   ;;  %p1002_p0 = scmp.ge.s32.totalorder %s1107_s15, 1  ;;  %s1107_s15 = sphi %s1143_s15, %s14_s15  }
   0x2   : > { %p162_p1 = scmp.lt.s32.totalorder %s1107_s15, 3 }
   0x4   : > { %p163_p2 = pnand %p1002_p0, %p162_p1 }
   0x5   : > { %vm199_vm0 = vcmask (!%p163_p2), 130048   ;;  %vm202_vm1 = vcmask (!%p163_p2), 122880   ;;  %v1109_v0 = vmov (!%p163_p2), 0.0   ;;  %p188_p3 = scmp.lt.s32.totalorder (!%p163_p2), %s998_s16, 1  ;;  %s1110_s21 = smov (!%p163_p2), 16   ;;  %v1112_v27 = vmov (!%p163_p2), 0  }
   0x6   : > { %166 = sbr.rel (%p163_p2) target bundleno = 480 (0x1e0), region = 36  ;;  %201 = vst.msk [vmem:[#allocation2 + $0x8] sm:$0xff] (!%p163_p2), %vm199_vm0, %v1109_v0  ;;  %200 = vst.msk [vmem:[#allocation2] sm:$0xff] (!%p163_p2), %vm199_vm0, %v1109_v0  ;;  %s1111_s22 = smov (!%p163_p2), 32   ;;  %823 = vmatprep.subr.bf16.mxu0 (!%p163_p2), %v1112_v27  ;;  %1057 = vmatprep.subr.bf16.mxu1 (!%p163_p2), %v1112_v27  ;;  %v1092_v32 = vld [vmem:[%s1458_s1] sm:$0xff] (!%p163_p2)   ;;  %v1093_v33 = vld [vmem:[%s1458_s1 + $0x8] sm:$0xff] (!%p163_p2)  }
   0x7   : > { %204 = vst.msk [vmem:[#allocation2 + $0x18] sm:$0xff] (!%p163_p2), %vm199_vm0, %v1109_v0  ;;  %205 = vst.msk [vmem:[#allocation2 + $0x20] sm:$0xff] (!%p163_p2), %vm199_vm0, %v1109_v0  ;;  %824 = vmatpush1.bf16.msra.mxu0 (!%p163_p2), %v1092_v32  ;;  %1066 = vmatpush1.bf16.msra.mxu1 (!%p163_p2), %v1092_v32  ;;  %s1113_s27 = smov (!%p163_p2), 48   ;;  %v1094_v37 = vld [vmem:[%s1458_s1 + $0x10] sm:$0xff] (!%p163_p2)   ;;  %v1095_v40 = vld [vmem:[%s1458_s1 + $0x18] sm:$0xff] (!%p163_p2)   ;;  %s1114_s6 = smov (!%p163_p2), 64  }
   0x8   : > { %207 = vst.msk [vmem:[#allocation2 + $0x30] sm:$0xff] (!%p163_p2), %vm199_vm0, %v1109_v0  ;;  %208 = vst.msk [vmem:[#allocation2 + $0x38] sm:$0xff] (!%p163_p2), %vm199_vm0, %v1109_v0  ;;  %825 = vmatprep.subr.bf16.mxu0 (!%p163_p2), %v1112_v27  ;;  %1058 = vmatprep.subr.bf16.mxu1 (!%p163_p2), %v1112_v27  ;;  %v1096_v43 = vld [vmem:[%s1458_s1 + $0x20] sm:$0xff] (!%p163_p2)   ;;  %v1097_v46 = vld [vmem:[%s1458_s1 + $0x28] sm:$0xff] (!%p163_p2)   ;;  %s1115_s11 = smov (!%p163_p2), 80   ;;  %s1116_s19 = smov (!%p163_p2), 96  }
   0x9   : > { %210 = vst.msk [vmem:[#allocation2 + $0x48] sm:$0xff] (!%p163_p2), %vm199_vm0, %v1109_v0  ;;  %211 = vst.msk [vmem:[#allocation2 + $0x50] sm:$0xff] (!%p163_p2), %vm199_vm0, %v1109_v0  ;;  %v1098_v49 = vld [vmem:[%s1458_s1 + $0x30] sm:$0xff] (!%p163_p2)   ;;  %v1099_v52 = vld [vmem:[%s1458_s1 + $0x38] sm:$0xff] (!%p163_p2)   ;;  %s1117_s24 = smov (!%p163_p2), 112   ;;  %vm593_vm2 = vcmask (!%p163_p2), 261120  }
   0xa   : > { %213 = vst.msk [vmem:[#allocation2 + $0x60] sm:$0xff] (!%p163_p2), %vm199_vm0, %v1109_v0  ;;  %214 = vst.msk [vmem:[#allocation2 + $0x68] sm:$0xff] (!%p163_p2), %vm199_vm0, %v1109_v0  ;;  %v1100_v56 = vld [vmem:[%s1458_s1 + $0x40] sm:$0xff] (!%p163_p2)   ;;  %vm610_vm3 = vcmask (!%p163_p2), 392192   ;;  %vm627_vm4 = vcmask (!%p163_p2), 523264   ;;  %vm644_vm5 = vcmask (!%p163_p2), 654336  }
   0xb   : > { %216 = vst.msk [vmem:[#allocation2 + $0x78] sm:$0xff] (!%p163_p2), %vm199_vm0, %v1109_v0  ;;  %217 = vst.msk [vmem:[#allocation2 + $0x80] sm:$0xff] (!%p163_p2), %vm199_vm0, %v1109_v0  ;;  %826 = vmatpush1.bf16.msra.mxu0 (!%p163_p2), %v1093_v33  ;;  %1067 = vmatpush1.bf16.msra.mxu1 (!%p163_p2), %v1093_v33  ;;  %vm661_vm6 = vcmask (!%p163_p2), 785408   ;;  %vm678_vm7 = vcmask (!%p163_p2), 916480   ;;  %vm934_vm8 = vcmask (!%p163_p2), 257024  }
   0xc   : > { %219 = vst.msk [vmem:[#allocation2 + $0x90] sm:$0xff] (!%p163_p2), %vm199_vm0, %v1109_v0  ;;  %220 = vst.msk [vmem:[#allocation2 + $0x98] sm:$0xff] (!%p163_p2), %vm199_vm0, %v1109_v0  ;;  %827 = vmatprep.subr.bf16.mxu0 (!%p163_p2), %v1112_v27  ;;  %1059 = vmatprep.subr.bf16.mxu1 (!%p163_p2), %v1112_v27 }
   0xd   : > { %222 = vst.msk [vmem:[#allocation2 + $0xa8] sm:$0xff] %vm199_vm0, %v1109_v0  ;;  %223 = vst.msk [vmem:[#allocation2 + $0xb0] sm:$0xff] %vm199_vm0, %v1109_v0  ;;  %s1463_s16 = smov (!%p188_p3, %s998_s16), 1  ;;  %v272_v4 = vld [vmem:[#allocation2 + $0x8] sm:$0xff] }
   0xe   : > { %225 = vst.msk [vmem:[#allocation2 + $0xc0] sm:$0xff] %vm199_vm0, %v1109_v0  ;;  %226 = vst.msk [vmem:[#allocation2 + $0xc8] sm:$0xff] %vm199_vm0, %v1109_v0  ;;  %s1032_s17 = sshll.u32 %s1463_s16, 5  ;;  %v280_v11 = vpack.c.bf16 %v272_v4, %v272_v4 }
   0xf   : > { %228 = vst.msk [vmem:[#allocation2 + $0xd8] sm:$0xff] %vm199_vm0, %v1109_v0  ;;  %229 = vst.msk [vmem:[#allocation2 + $0xe0] sm:$0xff] %vm199_vm0, %v1109_v0  ;;  %s192_s20 = scalar_lea.vmem %s1457_s0, %s1032_s17  ;;  %828 = vmatpush1.bf16.msra.mxu0 %v1094_v37  ;;  %1068 = vmatpush1.bf16.msra.mxu1 %v1094_v37  ;;  %s1436_s29 = scalar_lea.vmem %s1461_s4, %s1032_s17 }
  0x10   : > { %203 = vst.msk [vmem:[#allocation2 + $0x10] sm:$0x1] %vm202_vm1, %v1109_v0  ;;  %206 = vst.msk [vmem:[#allocation2 + $0x28] sm:$0x1] %vm202_vm1, %v1109_v0  ;;  %v1054_v1 = vld [vmem:[%s192_s20 + $0x8] sm:$0xff]   ;;  %v1039_v2 = vld [vmem:[%s192_s20] sm:$0xff]   ;;  %409 = vrot.lane.b32.xlu0 %v280_v11, %s1110_s21  ;;  %829 = vmatprep.subr.bf16.mxu0 %v1112_v27 }
  0x11   : > { %209 = vst.msk [vmem:[#allocation2 + $0x40] sm:$0x1] %vm202_vm1, %v1109_v0  ;;  %212 = vst.msk [vmem:[#allocation2 + $0x58] sm:$0x1] %vm202_vm1, %v1109_v0  ;;  %v1055_v3 = vld [vmem:[%s192_s20 + $0x10] sm:$0xff]   ;;  %v1045_v6 = vunpack.c.h.bf16 %v1054_v1  ;;  %v1044_v7 = vunpack.c.l.bf16 %v1054_v1  ;;  %v1040_v8 = vunpack.c.l.bf16 %v1039_v2  ;;  %v1056_v10 = vld [vmem:[%s192_s20 + $0x18] sm:$0xff]   ;;  %v1041_v12 = vunpack.c.h.bf16 %v1039_v2  ;;  %1060 = vmatprep.subr.bf16.mxu1 %v1112_v27 }
  0x12   : > { %215 = vst.msk [vmem:[#allocation2 + $0x70] sm:$0x1] %vm202_vm1, %v1109_v0  ;;  %218 = vst.msk [vmem:[#allocation2 + $0x88] sm:$0x1] %vm202_vm1, %v1109_v0  ;;  %v1048_v9 = vunpack.c.l.bf16 %v1055_v3  ;;  %v1049_v13 = vunpack.c.h.bf16 %v1055_v3  ;;  %v1052_v14 = vunpack.c.l.bf16 %v1056_v10  ;;  %v1053_v15 = vunpack.c.h.bf16 %v1056_v10 }
  0x13   : > { %221 = vst.msk [vmem:[#allocation2 + $0xa0] sm:$0x1] %vm202_vm1, %v1109_v0  ;;  %224 = vst.msk [vmem:[#allocation2 + $0xb8] sm:$0x1] %vm202_vm1, %v1109_v0  ;;  %830 = vmatpush1.bf16.msra.mxu0 %v1095_v40  ;;  %1069 = vmatpush1.bf16.msra.mxu1 %v1095_v40 }
  0x14   : > { %227 = vst.msk [vmem:[#allocation2 + $0xd0] sm:$0x1] %vm202_vm1, %v1109_v0  ;;  %230 = vst.msk [vmem:[#allocation2 + $0xe8] sm:$0x1] %vm202_vm1, %v1109_v0  ;;  %831 = vmatprep.subr.bf16.mxu0 %v1112_v27  ;;  %1061 = vmatprep.subr.bf16.mxu1 %v1112_v27 }
  0x15   : > { %251 = vst.msk [vmem:[#allocation2 + $0x68] sm:$0xff] %vm199_vm0, %v1045_v6  ;;  %250 = vst.msk [vmem:[#allocation2 + $0x50] sm:$0xff] %vm199_vm0, %v1044_v7 }
  0x16   : > { %248 = vst.msk [vmem:[#allocation2 + $0x20] sm:$0xff] %vm199_vm0, %v1040_v8  ;;  %252 = vst.msk [vmem:[#allocation2 + $0x80] sm:$0xff] %vm199_vm0, %v1048_v9 }
  0x17   : > { %v288_v5 = vld [vmem:[#allocation2 + $0x9] sm:$0xff]  ;;  %249 = vst.msk [vmem:[#allocation2 + $0x38] sm:$0xff] %vm199_vm0, %v1041_v12  ;;  %253 = vst.msk [vmem:[#allocation2 + $0x98] sm:$0xff] %vm199_vm0, %v1049_v13  ;;  %832 = vmatpush1.bf16.msra.mxu0 %v1096_v43  ;;  %1070 = vmatpush1.bf16.msra.mxu1 %v1096_v43  ;;  %v360_v13 = vld [vmem:[#allocation2 + $0xdf] sm:$0xff] }
  0x18   : > { %v296_v16 = vpack.c.bf16 %v288_v5, %v288_v5  ;;  %254 = vst.msk [vmem:[#allocation2 + $0xb0] sm:$0xff] %vm199_vm0, %v1052_v14  ;;  %255 = vst.msk [vmem:[#allocation2 + $0xc8] sm:$0xff] %vm199_vm0, %v1053_v15  ;;  %833 = vmatprep.subr.bf16.mxu0 %v1112_v27  ;;  %1062 = vmatprep.subr.bf16.mxu1 %v1112_v27  ;;  %v368_v14 = vpack.c.bf16 %v360_v13, %v360_v13  ;;  %v376_v15 = vld [vmem:[#allocation2 + $0xe0] sm:$0xff] }
  0x19   : > { %v256_v43 = vld [vmem:[#allocation2 + $0x7] sm:$0xff] }
  0x1a   : > { %433 = vrot.lane.b32.xlu0 %v296_v16, %s1111_s22  ;;  %v384_v16 = vpack.c.bf16 %v376_v15, %v376_v15 }
  0x1b   : > { %834 = vmatpush1.bf16.msra.mxu0 %v1097_v46  ;;  %1071 = vmatpush1.bf16.msra.mxu1 %v1097_v46  ;;  %v264_v46 = vpack.c.bf16 %v256_v43, %v256_v43 }
  0x1c   : > { %v276_v17 = vld [vmem:[#allocation2 + $0x68] sm:$0xff]  ;;  %835 = vmatprep.subr.bf16.mxu0 %v1112_v27  ;;  %1063 = vmatprep.subr.bf16.mxu1 %v1112_v27  ;;  %v291_v55 = vld [vmem:[#allocation2 + $0x51] sm:$0xff] }
  0x1d   : > { %v273_v18 = vld [vmem:[#allocation2 + $0x20] sm:$0xff]  ;;  %v1203_v20 = vpack.c.bf16 %v276_v17, %v276_v17  ;;  %v1205_v22 = vld [vmem:[#allocation2 + $0x69] sm:$0xff]  ;;  %v299_v3 = vpack.c.bf16 %v291_v55, %v291_v55 }
  0x1e   : > { %v277_v19 = vld [vmem:[#allocation2 + $0x80] sm:$0xff]  ;;  %v281_v21 = vpack.c.bf16 %v273_v18, %v273_v18  ;;  %v1214_v24 = vpack.c.bf16 %v1205_v22, %v1205_v22  ;;  %v305_v36 = vld [vmem:[#allocation2 + $0x37] sm:$0xff]  ;;  %v354_v54 = vld [vmem:[#allocation2 + $0x4f] sm:$0xff] }
  0x1f   : > { %417 = vrot.lane.b32.xlu1 %v1203_v20, %s1110_s21  ;;  %v1210_v23 = vpack.c.bf16 %v277_v19, %v277_v19  ;;  %v289_v25 = vld [vmem:[#allocation2 + $0x21] sm:$0xff]  ;;  %v1247_v38 = vpack.c.bf16 %v305_v36, %v305_v36  ;;  %v309_v39 = vld [vmem:[#allocation2 + $0x97] sm:$0xff]  ;;  %836 = vmatpush1.bf16.msra.mxu0 %v1098_v49  ;;  %v1298_v58 = vpack.c.bf16 %v354_v54, %v354_v54  ;;  %v358_v59 = vld [vmem:[#allocation2 + $0xaf] sm:$0xff] }
  0x20   : > { %411 = vrot.lane.b32.xlu0 %v281_v21, %s1110_s21  ;;  %v304_v26 = vld [vmem:[#allocation2 + $0x1f] sm:$0xff]  ;;  %v297_v28 = vpack.c.bf16 %v289_v25, %v289_v25  ;;  %v1257_v41 = vpack.c.bf16 %v309_v39, %v309_v39  ;;  %1072 = vmatpush1.bf16.msra.mxu1 %v1098_v49  ;;  %v295_v60 = vld [vmem:[#allocation2 + $0xb1] sm:$0xff]  ;;  %v1306_v62 = vpack.c.bf16 %v358_v59, %v358_v59  ;;  %v307_v5 = vld [vmem:[#allocation2 + $0x67] sm:$0xff] }
  0x21   : > { %v1222_v29 = vpack.c.bf16 %v304_v26, %v304_v26  ;;  %v1224_v30 = vld [vmem:[#allocation2 + $0x81] sm:$0xff]  ;;  %v321_v42 = vld [vmem:[#allocation2 + $0x38] sm:$0xff]  ;;  %837 = vmatprep.subr.bf16.mxu0 %v1112_v27  ;;  %1064 = vmatprep.subr.bf16.mxu1 %v1112_v27  ;;  %v370_v63 = vld [vmem:[#allocation2 + $0x50] sm:$0xff]  ;;  %v303_v4 = vpack.c.bf16 %v295_v60, %v295_v60  ;;  %v1326_v6 = vpack.c.bf16 %v307_v5, %v307_v5 }
  0x22   : > { %v308_v31 = vld [vmem:[#allocation2 + $0x7f] sm:$0xff]  ;;  %v301_v34 = vpack.c.bf16 %v1224_v30, %v1224_v30  ;;  %v329_v44 = vpack.c.bf16 %v321_v42, %v321_v42  ;;  %v378_v0 = vpack.c.bf16 %v370_v63, %v370_v63  ;;  %v374_v1 = vld [vmem:[#allocation2 + $0xb0] sm:$0xff]  ;;  %v311_v7 = vld [vmem:[#allocation2 + $0xc7] sm:$0xff] }
  0x23   : > { %419 = vrot.lane.b32.xlu1 %v1210_v23, %s1110_s21  ;;  %v1237_v35 = vpack.c.bf16 %v308_v31, %v308_v31  ;;  %v325_v45 = vld [vmem:[#allocation2 + $0x98] sm:$0xff]  ;;  %838 = vmatpush1.bf16.msra.mxu0 %v1099_v52  ;;  %v382_v2 = vpack.c.bf16 %v374_v1, %v374_v1  ;;  %v319_v8 = vpack.c.bf16 %v311_v7, %v311_v7  ;;  %v327_v9 = vld [vmem:[#allocation2 + $0xc8] sm:$0xff] }
  0x24   : > { %441 = vrot.lane.b32.xlu0 %v1214_v24, %s1111_s22  ;;  %v333_v47 = vpack.c.bf16 %v325_v45, %v325_v45  ;;  %v337_v48 = vld [vmem:[#allocation2 + $0x39] sm:$0xff]  ;;  %1073 = vmatpush1.bf16.msra.mxu1 %v1099_v52  ;;  %v335_v10 = vpack.c.bf16 %v327_v9, %v327_v9  ;;  %v1338_v11 = vld [vmem:[#allocation2 + $0xc9] sm:$0xff] }
  0x25   : > { %v345_v50 = vpack.c.bf16 %v337_v48, %v337_v48  ;;  %v341_v51 = vld [vmem:[#allocation2 + $0x99] sm:$0xff]  ;;  %v1034_v57 = vpack.c.bf16 %v291_v55, %v337_v48  ;;  %839 = vmatprep.subr.bf16.mxu0 %v1112_v27  ;;  %1065 = vmatprep.subr.bf16.mxu1 %v1112_v27  ;;  %v351_v12 = vpack.c.bf16 %v1338_v11, %v1338_v11 }
  0x26   : > { %v349_v53 = vpack.c.bf16 %v341_v51, %v341_v51  ;;  %v1036_v61 = vpack.c.bf16 %v295_v60, %v341_v51 }
  0x27   : > { %435 = vrot.lane.b32.xlu1 %v297_v28, %s1111_s22  ;;  %1024 = vmatprep.mubr.msk.bf16.mxu0 %vm199_vm0, %v1034_v57 }
  0x28   : > { %457 = vrot.lane.b32.xlu0 %v1222_v29, %s1113_s27  ;;  %840 = vmatpush1.bf16.msra.mxu0 %v1100_v56 }
  0x29   : > { %1074 = vmatpush1.bf16.msra.mxu1 %v1100_v56  ;;  %1026 = vmatprep.mubr.msk.bf16.mxu1 %vm199_vm0, %v1036_v61 }
  0x2b   : > { %443 = vrot.lane.b32.xlu1 %v301_v34, %s1111_s22 }
  0x2c   : > { %465 = vrot.lane.b32.xlu0 %v1237_v35, %s1113_s27 }
  0x2f   : > { %459 = vrot.lane.b32.xlu1 %v1247_v38, %s1113_s27 }
  0x30   : > { %481 = vrot.lane.b32.xlu0 %v281_v21, %s1114_s6 }
  0x33   : > { %467 = vrot.lane.b32.xlu1 %v1257_v41, %s1113_s27 }
  0x34   : > { %489 = vrot.lane.b32.xlu0 %v1210_v23, %s1114_s6 }
  0x37   : > { %483 = vrot.lane.b32.xlu1 %v329_v44, %s1114_s6 }
  0x38   : > { %505 = vrot.lane.b32.xlu0 %v297_v28, %s1115_s11 }
  0x3b   : > { %491 = vrot.lane.b32.xlu1 %v333_v47, %s1114_s6 }
  0x3c   : > { %513 = vrot.lane.b32.xlu0 %v301_v34, %s1115_s11 }
  0x3f   : > { %507 = vrot.lane.b32.xlu1 %v345_v50, %s1115_s11 }
  0x40   : > { %529 = vrot.lane.b32.xlu0 %v1247_v38, %s1116_s19 }
  0x43   : > { %515 = vrot.lane.b32.xlu1 %v349_v53, %s1115_s11 }
  0x44   : > { %537 = vrot.lane.b32.xlu0 %v1257_v41, %s1116_s19 }
  0x47   : > { %531 = vrot.lane.b32.xlu1 %v1298_v58, %s1116_s19 }
  0x48   : > { %553 = vrot.lane.b32.xlu0 %v329_v44, %s1117_s24 }
  0x4b   : > { %539 = vrot.lane.b32.xlu1 %v1306_v62, %s1116_s19 }
  0x4c   : > { %561 = vrot.lane.b32.xlu0 %v333_v47, %s1117_s24 }
  0x4f   : > { %555 = vrot.lane.b32.xlu1 %v378_v0, %s1117_s24 }
  0x50   : > { %413 = vrot.lane.b32.xlu0 %v329_v44, %s1110_s21 }
  0x53   : > { %563 = vrot.lane.b32.xlu1 %v382_v2, %s1117_s24 }
  0x54   : > { %421 = vrot.lane.b32.xlu0 %v333_v47, %s1110_s21 }
  0x57   : > { %415 = vrot.lane.b32.xlu1 %v378_v0, %s1110_s21 }
  0x58   : > { %437 = vrot.lane.b32.xlu0 %v345_v50, %s1111_s22 }
  0x5b   : > { %423 = vrot.lane.b32.xlu1 %v382_v2, %s1110_s21 }
  0x5c   : > { %445 = vrot.lane.b32.xlu0 %v349_v53, %s1111_s22 }
  0x5f   : > { %439 = vrot.lane.b32.xlu1 %v299_v3, %s1111_s22 }
  0x60   : > { %461 = vrot.lane.b32.xlu0 %v1298_v58, %s1113_s27 }
  0x63   : > { %447 = vrot.lane.b32.xlu1 %v303_v4, %s1111_s22 }
  0x64   : > { %469 = vrot.lane.b32.xlu0 %v1306_v62, %s1113_s27 }
  0x67   : > { %463 = vrot.lane.b32.xlu1 %v1326_v6, %s1113_s27 }
  0x68   : > { %485 = vrot.lane.b32.xlu0 %v378_v0, %s1114_s6 }
  0x6b   : > { %471 = vrot.lane.b32.xlu1 %v319_v8, %s1113_s27 }
  0x6c   : > { %493 = vrot.lane.b32.xlu0 %v382_v2, %s1114_s6 }
  0x6f   : > { %487 = vrot.lane.b32.xlu1 %v1203_v20, %s1114_s6 }
  0x70   : > { %509 = vrot.lane.b32.xlu0 %v299_v3, %s1115_s11 }
  0x73   : > { %495 = vrot.lane.b32.xlu1 %v335_v10, %s1114_s6 }
  0x74   : > { %517 = vrot.lane.b32.xlu0 %v303_v4, %s1115_s11 }
  0x77   : > { %511 = vrot.lane.b32.xlu1 %v1214_v24, %s1115_s11 }
  0x78   : > { %533 = vrot.lane.b32.xlu0 %v1326_v6, %s1116_s19 }
  0x7b   : > { %519 = vrot.lane.b32.xlu1 %v351_v12, %s1115_s11  ;;  %v392_v12 = vld [vmem:[#allocation2 + $0xe1] sm:$0xff] }
  0x7c   : > { %541 = vrot.lane.b32.xlu0 %v319_v8, %s1116_s19 }
  0x7f   : > { %535 = vrot.lane.b32.xlu1 %v1237_v35, %s1116_s19 }
  0x80   : > { %557 = vrot.lane.b32.xlu0 %v1203_v20, %s1117_s24 }
  0x82   : > { %v410_v17 = vpop.permute.xlu0 %409 }
  0x83   : > { %543 = vrot.lane.b32.xlu1 %v368_v14, %s1116_s19  ;;  %v571_v49 = vsel %vm199_vm0, %v264_v46, %v410_v17 }
  0x84   : > { %565 = vrot.lane.b32.xlu0 %v335_v10, %s1117_s24 }
  0x87   : > { %559 = vrot.lane.b32.xlu1 %v1210_v23, %s1117_s24 }
  0x8b   : > { %567 = vrot.lane.b32.xlu1 %v384_v16, %s1117_s24 }
  0x8c   : > { %v434_v18 = vpop.permute.xlu0 %433 }
  0x8d   : > { %v595_v51 = vsel %vm593_vm2, %v571_v49, %v434_v18 }
  0x91   : > { %v418_v19 = vpop.permute.xlu1 %417 }
  0x92   : > { %v412_v21 = vpop.permute.xlu0 %411  ;;  %v583_v60 = vsel %vm199_vm0, %v1326_v6, %v418_v19 }
  0x93   : > { %v574_v50 = vsel %vm199_vm0, %v1222_v29, %v412_v21  ;;  %v1035_v29 = vpack.c.bf16 %v1224_v30, %v1205_v22 }
  0x95   : > { %v420_v24 = vpop.permute.xlu1 %419 }
  0x96   : > { %v442_v25 = vpop.permute.xlu0 %441  ;;  %v586_v61 = vsel %vm199_vm0, %v1237_v35, %v420_v24  ;;  %v1037_v24 = vpack.c.bf16 %v392_v12, %v1338_v11 }
  0x97   : > { %v603_v1 = vsel %vm593_vm2, %v583_v60, %v442_v25 }
  0x99   : > { %v436_v26 = vpop.permute.xlu1 %435 }
  0x9a   : > { %v458_v20 = vpop.permute.xlu0 %457  ;;  %v597_v52 = vsel %vm593_vm2, %v574_v50, %v436_v26 }
  0x9b   : > { %v612_v55 = vsel %vm610_vm3, %v595_v51, %v458_v20 }
  0x9d   : > { %v444_v27 = vpop.permute.xlu1 %443 }
  0x9e   : > { %v466_v28 = vpop.permute.xlu0 %465  ;;  %v605_v2 = vsel %vm593_vm2, %v586_v61, %v444_v27 }
  0x9f   : > { %v620_v30 = vsel %vm610_vm3, %v603_v1, %v466_v28 }
  0xa1   : > { %v460_v31 = vpop.permute.xlu1 %459 }
  0xa2   : > { %v482_v32 = vpop.permute.xlu0 %481  ;;  %v614_v56 = vsel %vm610_vm3, %v597_v52, %v460_v31 }
  0xa3   : > { %v629_v57 = vsel %vm627_vm4, %v612_v55, %v482_v32 }
  0xa5   : > { %v468_v33 = vpop.permute.xlu1 %467 }
  0xa6   : > { %v490_v34 = vpop.permute.xlu0 %489  ;;  %v622_v6 = vsel %vm610_vm3, %v605_v2, %v468_v33 }
  0xa7   : > { %v637_v8 = vsel %vm627_vm4, %v620_v30, %v490_v34 }
  0xa9   : > { %v484_v36 = vpop.permute.xlu1 %483 }
  0xaa   : > { %v506_v37 = vpop.permute.xlu0 %505  ;;  %v631_v59 = vsel %vm627_vm4, %v614_v56, %v484_v36 }
  0xab   : > { %v646_v63 = vsel %vm644_vm5, %v629_v57, %v506_v37 }
  0xad   : > { %v492_v23 = vpop.permute.xlu1 %491 }
  0xae   : > { %v514_v39 = vpop.permute.xlu0 %513  ;;  %v639_v9 = vsel %vm627_vm4, %v622_v6, %v492_v23 }
  0xaf   : > { %v654_v13 = vsel %vm644_vm5, %v637_v8, %v514_v39 }
  0xb1   : > { %v508_v40 = vpop.permute.xlu1 %507 }
  0xb2   : > { %v530_v42 = vpop.permute.xlu0 %529  ;;  %v648_v0 = vsel %vm644_vm5, %v631_v59, %v508_v40 }
  0xb3   : > { %v663_v3 = vsel %vm661_vm6, %v646_v63, %v530_v42 }
  0xb5   : > { %v516_v44 = vpop.permute.xlu1 %515 }
  0xb6   : > { %v538_v45 = vpop.permute.xlu0 %537  ;;  %v656_v14 = vsel %vm644_vm5, %v639_v9, %v516_v44 }
  0xb7   : > { %v671_v15 = vsel %vm661_vm6, %v654_v13, %v538_v45 }
  0xb9   : > { %v532_v47 = vpop.permute.xlu1 %531 }
  0xba   : > { %v554_v48 = vpop.permute.xlu0 %553  ;;  %v665_v4 = vsel %vm661_vm6, %v648_v0, %v532_v47 }
  0xbb   : > { %v680_v35 = vsel %vm678_vm7, %v663_v3, %v554_v48 }
  0xbd   : > { %v540_v53 = vpop.permute.xlu1 %539 }
  0xbe   : > { %v562_v54 = vpop.permute.xlu0 %561  ;;  %v673_v16 = vsel %vm661_vm6, %v656_v14, %v540_v53 }
  0xbf   : > { %v688_v19 = vsel %vm678_vm7, %v671_v15, %v562_v54  ;;  %v1028_v15 = vld [vmem:[%s1459_s2] ss:$0 sm:$0xff] }
  0xc1   : > { %v556_v5 = vpop.permute.xlu1 %555 }
  0xc2   : > { %v414_v22 = vpop.permute.xlu0 %413  ;;  %v682_v7 = vsel %vm678_vm7, %v665_v4, %v556_v5 }
  0xc3   : > { %v1007_v10 = vcombine.low %v680_v35, %v682_v7  ;;  %v577_v49 = vsel %vm199_vm0, %v1247_v38, %v414_v22 }
  0xc5   : > { %v564_v17 = vpop.permute.xlu1 %563  ;;  %856 = vmatmul.mubr.bf16.vlgmr.msra.gmra.mrb[0].mxu0 %v1007_v10 }
  0xc6   : > { %v422_v18 = vpop.permute.xlu0 %421  ;;  %v690_v21 = vsel %vm678_vm7, %v673_v16, %v564_v17  ;;  %1025 = vmatprep.mubr.msk.bf16.mxu0 %vm199_vm0, %v1035_v29  ;;  %v1029_v17 = vld [vmem:[%s1460_s3] ss:$0 sm:$0xff] }
  0xc7   : > { %v1011_v25 = vcombine.low %v688_v19, %v690_v21  ;;  %v589_v55 = vsel %vm199_vm0, %v1257_v41, %v422_v18 }
  0xc9   : > { %v416_v26 = vpop.permute.xlu1 %415  ;;  %872 = vmatmul.mubr.bf16.vlgmr.msra.gmra.mrb[0].mxu1 %v1011_v25 }
  0xca   : > { %v438_v20 = vpop.permute.xlu0 %437  ;;  %1027 = vmatprep.mubr.msk.bf16.mxu1 %vm199_vm0, %v1037_v24  ;;  %v580_v50 = vsel %vm199_vm0, %v1298_v58, %v416_v26 }
  0xcb   : > { %v599_v51 = vsel %vm593_vm2, %v577_v49, %v438_v20 }
  0xcd   : > { %v424_v27 = vpop.permute.xlu1 %423 }
  0xce   : > { %v446_v28 = vpop.permute.xlu0 %445  ;;  %v592_v58 = vsel %vm199_vm0, %v1306_v62, %v424_v27 }
  0xcf   : > { %v607_v61 = vsel %vm593_vm2, %v589_v55, %v446_v28 }
  0xd1   : > { %v440_v31 = vpop.permute.xlu1 %439 }
  0xd2   : > { %v462_v32 = vpop.permute.xlu0 %461  ;;  %v601_v52 = vsel %vm593_vm2, %v580_v50, %v440_v31 }
  0xd3   : > { %v616_v56 = vsel %vm610_vm3, %v599_v51, %v462_v32 }
  0xd5   : > { %v448_v33 = vpop.permute.xlu1 %447 }
  0xd6   : > { %v470_v34 = vpop.permute.xlu0 %469  ;;  %v609_v63 = vsel %vm593_vm2, %v592_v58, %v448_v33 }
  0xd7   : > { %v624_v2 = vsel %vm610_vm3, %v607_v61, %v470_v34 }
  0xd9   : > { %v464_v36 = vpop.permute.xlu1 %463 }
  0xda   : > { %v486_v37 = vpop.permute.xlu0 %485  ;;  %v618_v57 = vsel %vm610_vm3, %v601_v52, %v464_v36 }
  0xdb   : > { %v633_v59 = vsel %vm627_vm4, %v616_v56, %v486_v37 }
  0xdd   : > { %v472_v23 = vpop.permute.xlu1 %471 }
  0xde   : > { %v494_v39 = vpop.permute.xlu0 %493  ;;  %v626_v3 = vsel %vm610_vm3, %v609_v63, %v472_v23 }
  0xdf   : > { %v641_v5 = vsel %vm627_vm4, %v624_v2, %v494_v39 }
  0xe1   : > { %v488_v40 = vpop.permute.xlu1 %487 }
  0xe2   : > { %v510_v42 = vpop.permute.xlu0 %509  ;;  %v635_v38 = vsel %vm627_vm4, %v618_v57, %v488_v40 }
  0xe3   : > { %v650_v29 = vsel %vm644_vm5, %v633_v59, %v510_v42 }
  0xe5   : > { %v496_v43 = vpop.permute.xlu1 %495 }
  0xe6   : > { %v518_v11 = vpop.permute.xlu0 %517  ;;  %v643_v22 = vsel %vm627_vm4, %v626_v3, %v496_v43 }
  0xe7   : > { %v658_v35 = vsel %vm644_vm5, %v641_v5, %v518_v11 }
  0xe9   : > { %v512_v44 = vpop.permute.xlu1 %511 }
  0xea   : > { %v534_v45 = vpop.permute.xlu0 %533  ;;  %v652_v60 = vsel %vm644_vm5, %v635_v38, %v512_v44 }
  0xeb   : > { %v667_v41 = vsel %vm661_vm6, %v650_v29, %v534_v45 }
  0xed   : > { %v520_v46 = vpop.permute.xlu1 %519 }
  0xee   : > { %v542_v47 = vpop.permute.xlu0 %541  ;;  %v660_v7 = vsel %vm644_vm5, %v643_v22, %v520_v46 }
  0xef   : > { %v675_v8 = vsel %vm661_vm6, %v658_v35, %v542_v47 }
  0xf1   : > { %v536_v48 = vpop.permute.xlu1 %535 }
  0xf2   : > { %v558_v53 = vpop.permute.xlu0 %557  ;;  %v669_v0 = vsel %vm661_vm6, %v652_v60, %v536_v48 }
  0xf3   : > { %v684_v4 = vsel %vm678_vm7, %v667_v41, %v558_v53 }
  0xf5   : > { %v544_v54 = vpop.permute.xlu1 %543 }
  0xf6   : > { %v566_v30 = vpop.permute.xlu0 %565  ;;  %v677_v9 = vsel %vm661_vm6, %v660_v7, %v544_v54 }
  0xf7   : > { %v692_v12 = vsel %vm678_vm7, %v675_v8, %v566_v30 }
  0xf9   : > { %v560_v1 = vpop.permute.xlu1 %559 }
  0xfa   : > { %v686_v62 = vsel %vm678_vm7, %v669_v0, %v560_v1 }
  0xfb   : > { %v1009_v6 = vcombine.low %v684_v4, %v686_v62 }
  0xfd   : > { %v568_v10 = vpop.permute.xlu1 %567  ;;  %864 = vmatmul.mubr.bf16.gmra.mrb[4].mxu0 %v1009_v6 }
  0xfe   : > { %v694_v13 = vsel %vm678_vm7, %v677_v9, %v568_v10 }
  0xff   : > { %v1013_v14 = vcombine.low %v692_v12, %v694_v13 }
 0x101   : > { %880 = vmatmul.mubr.bf16.gmra.mrb[4].mxu1 %v1013_v14 }
 0x198   : > { %v857_v16 = vpop.f32.mrb[0].mxu0 }
 0x199   : > { %v895_v18 = vmul.f32 %v1028_v15, %v857_v16  ;;  %v859_v19 = vpop.f32.mrb[1].mxu0 }
 0x19a   : > { %v860_v21 = vpop.f32.mrb[2].mxu0 }
 0x19b   : > { %v910_v24 = vadd.f32 %v1029_v17, %v895_v18  ;;  %v896_v25 = vmul.f32 %v1028_v15, %v860_v21  ;;  %v862_v26 = vpop.f32.mrb[3].mxu0 }
 0x19c   : > { %v873_v20 = vpop.f32.mrb[0].mxu1 }
 0x19d   : > { %v918_v27 = vmax.f32 %v910_v24, 0.0  ;;  %v911_v28 = vadd.f32 %v1029_v17, %v896_v25  ;;  %v899_v31 = vmul.f32 %v1028_v15, %v873_v20  ;;  %v875_v32 = vpop.f32.mrb[1].mxu1 }
 0x19e   : > { %v876_v33 = vpop.f32.mrb[2].mxu1 }
 0x19f   : > { %v926_v34 = vpack.c.bf16 %v918_v27, %v918_v27  ;;  %v919_v36 = vmax.f32 %v911_v28, 0.0  ;;  %v914_v37 = vadd.f32 %v1029_v17, %v899_v31  ;;  %v900_v23 = vmul.f32 %v1028_v15, %v876_v33  ;;  %v878_v39 = vpop.f32.mrb[3].mxu1 }
 0x1a1   : > { %935 = vst.msk [vmem:[%s1436_s29] sm:$0xf] %vm934_vm8, %v926_v34  ;;  %v927_v40 = vpack.c.bf16 %v919_v36, %v919_v36  ;;  %v922_v42 = vmax.f32 %v914_v37, 0.0  ;;  %v915_v43 = vadd.f32 %v1029_v17, %v900_v23 }
 0x1a3   : > { %936 = vst.msk [vmem:[%s1436_s29 + $0x4] sm:$0xf] %vm934_vm8, %v927_v40  ;;  %v930_v11 = vpack.c.bf16 %v922_v42, %v922_v42  ;;  %v923_v44 = vmax.f32 %v915_v43, 0.0 }
 0x1a5   : > { %939 = vst.msk [vmem:[%s1436_s29 + $0x10] sm:$0xf] %vm934_vm8, %v930_v11  ;;  %v931_v45 = vpack.c.bf16 %v923_v44, %v923_v44 }
 0x1a7   : > { %940 = vst.msk [vmem:[%s1436_s29 + $0x14] sm:$0xf] %vm934_vm8, %v931_v45 }
 0x1d0   : > { %v865_v46 = vpop.f32.mrb[4].mxu0 }
 0x1d1   : > { %v897_v47 = vmul.f32 %v1028_v15, %v865_v46  ;;  %v867_v48 = vpop.f32.mrb[5].mxu0 }
 0x1d2   : > { %v868_v49 = vpop.f32.mrb[6].mxu0 }
 0x1d3   : > { %v912_v50 = vadd.f32 %v1029_v17, %v897_v47  ;;  %v898_v51 = vmul.f32 %v1028_v15, %v868_v49  ;;  %v870_v52 = vpop.f32.mrb[7].mxu0 }
 0x1d4   : > { %v881_v53 = vpop.f32.mrb[4].mxu1 }
 0x1d5   : > { %v920_v54 = vmax.f32 %v912_v50, 0.0  ;;  %v913_v55 = vadd.f32 %v1029_v17, %v898_v51  ;;  %v901_v56 = vmul.f32 %v1028_v15, %v881_v53  ;;  %v883_v57 = vpop.f32.mrb[5].mxu1 }
 0x1d6   : > { %v884_v59 = vpop.f32.mrb[6].mxu1 }
 0x1d7   : > { %v928_v38 = vpack.c.bf16 %v920_v54, %v920_v54  ;;  %v921_v58 = vmax.f32 %v913_v55, 0.0  ;;  %v916_v29 = vadd.f32 %v1029_v17, %v901_v56  ;;  %v902_v60 = vmul.f32 %v1028_v15, %v884_v59  ;;  %v886_v61 = vpop.f32.mrb[7].mxu1 }
 0x1d9   : > { %937 = vst.msk [vmem:[%s1436_s29 + $0x8] sm:$0xf] %vm934_vm8, %v928_v38  ;;  %v929_v63 = vpack.c.bf16 %v921_v58, %v921_v58  ;;  %v924_v41 = vmax.f32 %v916_v29, 0.0  ;;  %v917_v0 = vadd.f32 %v1029_v17, %v902_v60 }
 0x1db   : > { %938 = vst.msk [vmem:[%s1436_s29 + $0xc] sm:$0xf] %vm934_vm8, %v929_v63  ;;  %v932_v1 = vpack.c.bf16 %v924_v41, %v924_v41  ;;  %v925_v2 = vmax.f32 %v917_v0, 0.0 }
 0x1dd   : > { %941 = vst.msk [vmem:[%s1436_s29 + $0x18] sm:$0xf] %vm934_vm8, %v932_v1  ;;  %v933_v3 = vpack.c.bf16 %v925_v2, %v925_v2 }
 0x1df   : > { %942 = vst.msk [vmem:[%s1436_s29 + $0x1c] sm:$0xf] %vm934_vm8, %v933_v3 }
 0x1e0 PF: > { %s14_s15 = sadd.s32 1, %s1107_s15  }
 0x1e1   : > { %p11_p4 = scmp.ge.s32.totalorder %s14_s15, 4  }
 0x1e3   :  { %13 = sbr.rel (!%p11_p4) target bundleno = 1 (0x1), region = 68 }

// kernel: _lambda_.8
= control target key start
LH: loop header
LB: loop body
LE: loop exit
PB: predicated region body
PF: predicated region fallthrough
CT: control target
= control target key end

     0   :  { %s1004_s15 = smov 0   ;;  %s1176_s0 = inlined_call_operand.vmem [shape: bf16[2,4,4,32], index: 0, kind: input, shape index: {}]   ;;  %s1177_s1 = inlined_call_operand.vmem [shape: bf16[288,64], index: 1, kind: input, shape index: {}]   ;;  %s1178_s2 = inlined_call_operand.vmem [shape: f32[1,64], index: 2, kind: input, shape index: {}]   ;;  %s1179_s3 = inlined_call_operand.vmem [shape: f32[1,64], index: 3, kind: input, shape index: {}]   ;;  %s1180_s4 = inlined_call_operand.vmem [shape: bf16[2,4,4,64], index: 4, kind: output, shape index: {}]  }
   0x1 LB: > { %s862_s16 = sadd.s32 4294967295, %s971_s15   ;;  %p866_p0 = scmp.ge.s32.totalorder %s971_s15, 1  ;;  %s971_s15 = sphi %s1004_s15, %s14_s15  }
   0x2   : > { %p162_p1 = scmp.lt.s32.totalorder %s971_s15, 3 }
   0x4   : > { %p163_p2 = pnand %p866_p0, %p162_p1 }
   0x5   : > { %vm201_vm0 = vcmask (!%p163_p2), 258048   ;;  %vm199_vm1 = vcmask (!%p163_p2), 261120   ;;  %v973_v0 = vmov (!%p163_p2), 0.0   ;;  %p188_p3 = scmp.lt.s32.totalorder (!%p163_p2), %s862_s16, 1  ;;  %vm222_vm2 = vcmask (!%p163_p2), 257024   ;;  %s974_s21 = smov (!%p163_p2), 32  }
   0x6   : > { %166 = sbr.rel (%p163_p2) target bundleno = 430 (0x1ae), region = 36  ;;  %202 = vst.msk [vmem:[#allocation2 + $0x8] sm:$0x1f] (!%p163_p2), %vm201_vm0, %v973_v0  ;;  %204 = vst.msk [vmem:[#allocation2 + $0x18] sm:$0x1f] (!%p163_p2), %vm201_vm0, %v973_v0  ;;  %925 = vmatprep.subr.bf16.mxu1 (!%p163_p2), %v973_v0  ;;  %s975_s22 = smov (!%p163_p2), 64   ;;  %v446_v57 = vlaneseq (!%p163_p2) }
   0x7   : > { %206 = vst.msk [vmem:[#allocation2 + $0x28] sm:$0x1f] (!%p163_p2), %vm201_vm0, %v973_v0  ;;  %208 = vst.msk [vmem:[#allocation2 + $0x38] sm:$0x1f] (!%p163_p2), %vm201_vm0, %v973_v0  ;;  %v947_v31 = vld [vmem:[%s1177_s1 + $0x40] sm:$0xff] (!%p163_p2)   ;;  %v949_v37 = vld [vmem:[%s1177_s1 + $0x48] sm:$0xff] (!%p163_p2)  }
   0x8   : > { %210 = vst.msk [vmem:[#allocation2 + $0x48] sm:$0x1f] (!%p163_p2), %vm201_vm0, %v973_v0  ;;  %212 = vst.msk [vmem:[#allocation2 + $0x58] sm:$0x1f] (!%p163_p2), %vm201_vm0, %v973_v0  ;;  %v948_v32 = vld [vmem:[%s1177_s1] sm:$0xff] (!%p163_p2)   ;;  %900 = vmatprep.subr.bf16.mxu0 (!%p163_p2), %v947_v31  ;;  %v950_v38 = vld [vmem:[%s1177_s1 + $0x8] sm:$0xff] (!%p163_p2)  }
   0x9   : > { %205 = vst.msk [vmem:[#allocation2 + $0x20] sm:$0xff] (!%p163_p2), %vm199_vm1, %v973_v0  ;;  %200 = vst.msk [vmem:[#allocation2] sm:$0xff] (!%p163_p2), %vm199_vm1, %v973_v0  ;;  %901 = vmatpush3.bf16.msra.mxu0 (!%p163_p2), %v948_v32  ;;  %v951_v43 = vld [vmem:[%s1177_s1 + $0x50] sm:$0xff] (!%p163_p2)   ;;  %v953_v49 = vld [vmem:[%s1177_s1 + $0x58] sm:$0xff] (!%p163_p2)   ;;  %s976_s13 = smov (!%p163_p2), 96   ;;  %vm978_vm3 = vmmov (!%p163_p2), 0  }
   0xa   : > { %203 = vst.msk [vmem:[#allocation2 + $0x10] sm:$0xff] (!%p163_p2), %vm199_vm1, %v973_v0  ;;  %207 = vst.msk [vmem:[#allocation2 + $0x30] sm:$0xff] (!%p163_p2), %vm199_vm1, %v973_v0  ;;  %902 = vmatprep.subr.bf16.mxu0 (!%p163_p2), %v949_v37  ;;  %v952_v44 = vld [vmem:[%s1177_s1 + $0x10] sm:$0xff] (!%p163_p2)   ;;  %v954_v50 = vld [vmem:[%s1177_s1 + $0x18] sm:$0xff] (!%p163_p2)   ;;  %v977_v55 = vmov (!%p163_p2), 1983009808   ;;  %929 = vmatprep.mubr.msk.bf16.mxu1 (!%p163_p2), %vm978_vm3, %v973_v0 }
   0xb   : > { %209 = vst.msk [vmem:[#allocation2 + $0x40] sm:$0xff] (!%p163_p2), %vm199_vm1, %v973_v0  ;;  %211 = vst.msk [vmem:[#allocation2 + $0x50] sm:$0xff] (!%p163_p2), %vm199_vm1, %v973_v0  ;;  %v444_v56 = vunpack.c.l.s4 (!%p163_p2), %v977_v55  ;;  %v955_v58 = vld [vmem:[%s1177_s1 + $0x60] sm:$0xff] (!%p163_p2)   ;;  %vm384_vm4 = vcmask (!%p163_p2), 523264   ;;  %vm393_vm5 = vcmask (!%p163_p2), 785408   ;;  %vm802_vm6 = vcmask (!%p163_p2), 517120  }
   0xc   : > { %v956_v59 = vld [vmem:[%s1177_s1 + $0x20] sm:$0xff] (!%p163_p2)  }
   0xd   : > { %s1182_s16 = smov (!%p188_p3, %s862_s16), 1  ;;  %v235_v4 = vld [vmem:[#allocation2 + $0x8] sm:$0xf]  ;;  %903 = vmatpush3.bf16.msra.mxu0 %v950_v38 }
   0xe   : > { %s898_s17 = sshll.u32 %s1182_s16, 3  ;;  %v243_v5 = vld [vmem:[#allocation2 + $0x9] sm:$0xf]  ;;  %v239_v10 = vpack.c.bf16 %v235_v4, %v235_v4  ;;  %904 = vmatprep.subr.bf16.mxu0 %v951_v43 }
   0xf   : > { %s192_s20 = scalar_lea.vmem %s1176_s0, %s898_s17  ;;  %v247_v12 = vpack.c.bf16 %v243_v5, %v243_v5  ;;  %v958_v4 = vld [vmem:[%s1177_s1 + $0x28] sm:$0xff]  }
  0x10   : > { %v214_v1 = vld [vmem:[%s192_s20 + $0x2] sm:$0x3]  ;;  %v213_v2 = vld [vmem:[%s192_s20] sm:$0x3]  ;;  %v215_v3 = vld [vmem:[%s192_s20 + $0x4] sm:$0x3]  ;;  %304 = vrot.lane.b32.xlu0 %v239_v10, %s974_s21 }
  0x11   : > { %v218_v6 = vunpack.c.l.bf16 %v214_v1  ;;  %v217_v7 = vunpack.c.l.bf16 %v213_v2  ;;  %v219_v8 = vunpack.c.l.bf16 %v215_v3  ;;  %v216_v9 = vld [vmem:[%s192_s20 + $0x6] sm:$0x3]  ;;  %905 = vmatpush3.bf16.msra.mxu0 %v952_v44  ;;  %v445_v1 = vunpack.c.0.s8 %v444_v56  ;;  %v957_v3 = vld [vmem:[%s1177_s1 + $0x68] sm:$0xff]   ;;  %s197_s20 = scalar_lea.vmem %s1180_s4, %s898_s17 }
  0x12   : > { %v220_v11 = vunpack.c.l.bf16 %v216_v9  ;;  %v279_v47 = vld [vmem:[#allocation2 + $0x57] sm:$0xf]  ;;  %906 = vmatprep.subr.bf16.mxu0 %v953_v49  ;;  %v447_v2 = vshrl.u32 %v446_v57, 7 }
  0x13   : > { %224 = vst.msk [vmem:[#allocation2 + $0x28] sm:$0xf] %vm222_vm2, %v218_v6  ;;  %223 = vst.msk [vmem:[#allocation2 + $0x18] sm:$0xf] %vm222_vm2, %v217_v7  ;;  %v283_v51 = vpack.c.bf16 %v279_v47, %v279_v47 }
  0x14   : > { %225 = vst.msk [vmem:[#allocation2 + $0x38] sm:$0xf] %vm222_vm2, %v219_v8  ;;  %226 = vst.msk [vmem:[#allocation2 + $0x48] sm:$0xf] %vm222_vm2, %v220_v11  ;;  %316 = vrot.lane.b32.xlu0 %v247_v12, %s975_s22  ;;  %v1099_v11 = vsub.s32 %v445_v1, %v447_v2  ;;  %v959_v12 = vld [vmem:[%s1177_s1 + $0x70] sm:$0xff]  }
  0x15   : > { %907 = vmatpush3.bf16.msra.mxu0 %v954_v50  ;;  %v227_v50 = vld [vmem:[#allocation2 + $0x7] sm:$0xf] }
  0x16   : > { %908 = vmatprep.subr.bf16.mxu0 %v955_v58 }
  0x19   : > { %909 = vmatpush3.bf16.msra.mxu0 %v956_v59 }
  0x1a   : > { %v237_v13 = vld [vmem:[#allocation2 + $0x28] sm:$0xf]  ;;  %v236_v14 = vld [vmem:[#allocation2 + $0x18] sm:$0xf]  ;;  %910 = vmatprep.subr.bf16.mxu0 %v957_v3 }
  0x1b   : > { %v238_v15 = vld [vmem:[#allocation2 + $0x38] sm:$0xf]  ;;  %v241_v16 = vpack.c.bf16 %v237_v13, %v237_v13  ;;  %v240_v17 = vpack.c.bf16 %v236_v14, %v236_v14  ;;  %v268_v21 = vld [vmem:[#allocation2 + $0x29] sm:$0xf] }
  0x1c   : > { %v267_v18 = vld [vmem:[#allocation2 + $0x19] sm:$0xf]  ;;  %v242_v19 = vpack.c.bf16 %v238_v15, %v238_v15  ;;  %v272_v23 = vpack.c.bf16 %v268_v21, %v268_v21  ;;  %v270_v25 = vld [vmem:[#allocation2 + $0x49] sm:$0xf] }
  0x1d   : > { %308 = vrot.lane.b32.xlu1 %v241_v16, %s974_s21  ;;  %306 = vrot.lane.b32.xlu0 %v240_v17, %s974_s21  ;;  %v271_v20 = vpack.c.bf16 %v267_v18, %v267_v18  ;;  %v269_v22 = vld [vmem:[#allocation2 + $0x39] sm:$0xf]  ;;  %v245_v26 = vld [vmem:[#allocation2 + $0x29] sm:$0xf]  ;;  %v274_v27 = vpack.c.bf16 %v270_v25, %v270_v25  ;;  %v960_v17 = vld [vmem:[%s1177_s1 + $0x30] sm:$0xff]  }
  0x1e   : > { %v273_v24 = vpack.c.bf16 %v269_v22, %v269_v22  ;;  %v249_v28 = vpack.c.bf16 %v245_v26, %v245_v26  ;;  %v244_v29 = vld [vmem:[#allocation2 + $0x19] sm:$0xf]  ;;  %v276_v30 = vld [vmem:[#allocation2 + $0x27] sm:$0xf]  ;;  %911 = vmatpush3.bf16.msra.mxu0 %v958_v4 }
  0x1f   : > { %v248_v33 = vpack.c.bf16 %v244_v29, %v244_v29  ;;  %v280_v34 = vpack.c.bf16 %v276_v30, %v276_v30  ;;  %v246_v35 = vld [vmem:[#allocation2 + $0x39] sm:$0xf]  ;;  %v278_v36 = vld [vmem:[#allocation2 + $0x47] sm:$0xf]  ;;  %912 = vmatprep.subr.bf16.mxu0 %v959_v12 }
  0x20   : > { %v250_v39 = vpack.c.bf16 %v246_v35, %v246_v35  ;;  %v282_v40 = vpack.c.bf16 %v278_v36, %v278_v36  ;;  %v277_v41 = vld [vmem:[#allocation2 + $0x37] sm:$0xf]  ;;  %v252_v53 = vld [vmem:[#allocation2 + $0x27] sm:$0xf] }
  0x21   : > { %310 = vrot.lane.b32.xlu1 %v242_v19, %s974_s21  ;;  %340 = vrot.lane.b32.xlu0 %v271_v20, %s974_s21  ;;  %v251_v42 = vld [vmem:[#allocation2 + $0x17] sm:$0xf]  ;;  %v281_v45 = vpack.c.bf16 %v277_v41, %v277_v41  ;;  %v284_v54 = vld [vmem:[#allocation2 + $0x28] sm:$0xf]  ;;  %v256_v60 = vpack.c.bf16 %v252_v53, %v252_v53  ;;  %v961_v18 = vld [vmem:[%s1177_s1 + $0x80] sm:$0xff]  }
  0x22   : > { %v255_v46 = vpack.c.bf16 %v251_v42, %v251_v42  ;;  %v253_v48 = vld [vmem:[#allocation2 + $0x37] sm:$0xf]  ;;  %v288_v61 = vpack.c.bf16 %v284_v54, %v284_v54  ;;  %v254_v62 = vld [vmem:[#allocation2 + $0x47] sm:$0xf]  ;;  %913 = vmatpush3.bf16.msra.mxu0 %v960_v17  ;;  %926 = vmatpush3.bf16.msra.mxu1 %v961_v18  ;;  %v231_v54 = vpack.c.bf16 %v227_v50, %v227_v50 }
  0x23   : > { %v257_v52 = vpack.c.bf16 %v253_v48, %v253_v48  ;;  %v286_v63 = vld [vmem:[#allocation2 + $0x48] sm:$0xf]  ;;  %v258_v5 = vpack.c.bf16 %v254_v62, %v254_v62  ;;  %v293_v8 = vld [vmem:[#allocation2 + $0x39] sm:$0xf]  ;;  %927 = vmatprep.subr.bf16.mxu1 %v973_v0 }
  0x24   : > { %v290_v6 = vpack.c.bf16 %v286_v63, %v286_v63  ;;  %v292_v7 = vld [vmem:[#allocation2 + $0x29] sm:$0xf]  ;;  %v285_v10 = vld [vmem:[#allocation2 + $0x38] sm:$0xf]  ;;  %v297_v15 = vpack.c.bf16 %v293_v8, %v293_v8 }
  0x25   : > { %342 = vrot.lane.b32.xlu1 %v272_v23, %s974_s21  ;;  %344 = vrot.lane.b32.xlu0 %v273_v24, %s974_s21  ;;  %v294_v9 = vld [vmem:[#allocation2 + $0x49] sm:$0xf]  ;;  %v295_v13 = vld [vmem:[#allocation2 + $0x59] sm:$0xf]  ;;  %v296_v14 = vpack.c.bf16 %v292_v7, %v292_v7  ;;  %v289_v24 = vpack.c.bf16 %v285_v10, %v285_v10 }
  0x26   : > { %v298_v16 = vpack.c.bf16 %v294_v9, %v294_v9  ;;  %v962_v19 = vld [vmem:[%s1177_s1 + $0x78] sm:$0xff]   ;;  %v299_v20 = vpack.c.bf16 %v295_v13, %v295_v13  ;;  %v472_v22 = vrot.slane %v297_v15, %v1099_v11  ;;  %v260_v56 = vld [vmem:[#allocation2 + $0x28] sm:$0xf] }
  0x27   : > { %v456_v21 = vrot.slane %v296_v14, %v1099_v11  ;;  %v287_v26 = vld [vmem:[#allocation2 + $0x58] sm:$0xf]  ;;  %914 = vmatprep.subr.bf16.mxu0 %v962_v19  ;;  %v264_v2 = vpack.c.bf16 %v260_v56, %v260_v56  ;;  %v262_v4 = vld [vmem:[#allocation2 + $0x48] sm:$0xf] }
  0x28   : > { %v488_v23 = vrot.slane %v298_v16, %v1099_v11  ;;  %v504_v25 = vrot.slane %v299_v20, %v1099_v11  ;;  %v291_v32 = vpack.c.bf16 %v287_v26, %v287_v26  ;;  %v259_v53 = vld [vmem:[#allocation2 + $0x18] sm:$0xf]  ;;  %v266_v10 = vpack.c.bf16 %v262_v4, %v262_v4 }
  0x29   : > { %346 = vrot.lane.b32.xlu1 %v274_v27, %s974_s21  ;;  %320 = vrot.lane.b32.xlu0 %v249_v28, %s975_s22  ;;  %v963_v27 = vld [vmem:[%s1177_s1 + $0x38] sm:$0xff]   ;;  %v964_v28 = vld [vmem:[%s1177_s1 + $0x88] sm:$0xff]   ;;  %v872_v29 = vcombine.low %v456_v21, %v472_v22 }
  0x2a   : > { %v874_v30 = vcombine.low %v488_v23, %v504_v25  ;;  %915 = vmatpush3.bf16.msra.mxu0 %v963_v27  ;;  %928 = vmatpush3.bf16.msra.mxu1 %v964_v28  ;;  %v228_v55 = vld [vmem:[#allocation2 + $0x17] sm:$0xf] }
  0x2b   : > { %v559_v31 = vrot.slane %v872_v29, %v1099_v11  ;;  %v261_v57 = vld [vmem:[#allocation2 + $0x38] sm:$0xf]  ;;  %v232_v1 = vpack.c.bf16 %v228_v55, %v228_v55 }
  0x2c   : > { %v230_v62 = vld [vmem:[#allocation2 + $0x37] sm:$0xf]  ;;  %v265_v3 = vpack.c.bf16 %v261_v57, %v261_v57  ;;  %v894_v57 = vld [vmem:[%s1178_s2] ss:$0 sm:$0xff] }
  0x2d   : > { %318 = vrot.lane.b32.xlu1 %v248_v33, %s975_s22  ;;  %352 = vrot.lane.b32.xlu0 %v280_v34, %s975_s22  ;;  %v573_v33 = vrot.slane %v874_v30, %v1099_v11  ;;  %v234_v7 = vpack.c.bf16 %v230_v62, %v230_v62 }
  0x2f   : > { %v576_v34 = vcombine.low %v559_v31, %v573_v33 }
  0x31   : > { %322 = vrot.lane.b32.xlu1 %v250_v39, %s975_s22  ;;  %356 = vrot.lane.b32.xlu0 %v282_v40, %s975_s22 }
  0x32   : > { %930 = vmatmul.mubr.msk.bf16.vlgmr.msra.gmra.mrb[0].mxu1 %vm199_vm1, %v576_v34 }
  0x35   : > { %354 = vrot.lane.b32.xlu1 %v281_v45, %s975_s22  ;;  %328 = vrot.lane.b32.xlu0 %v255_v46, %s976_s13 }
  0x39   : > { %358 = vrot.lane.b32.xlu1 %v283_v51, %s975_s22  ;;  %332 = vrot.lane.b32.xlu0 %v257_v52, %s976_s13 }
  0x3d   : > { %330 = vrot.lane.b32.xlu1 %v256_v60, %s976_s13  ;;  %364 = vrot.lane.b32.xlu0 %v288_v61, %s976_s13  ;;  %v229_v60 = vld [vmem:[#allocation2 + $0x27] sm:$0xf]  ;;  %v263_v61 = vpack.c.bf16 %v259_v53, %v259_v53 }
  0x41   : > { %334 = vrot.lane.b32.xlu1 %v258_v5, %s976_s13  ;;  %368 = vrot.lane.b32.xlu0 %v290_v6, %s976_s13  ;;  %v233_v5 = vpack.c.bf16 %v229_v60, %v229_v60  ;;  %v895_v60 = vld [vmem:[%s1179_s3] ss:$0 sm:$0xff] }
  0x45   : > { %366 = vrot.lane.b32.xlu1 %v289_v24, %s976_s13 }
  0x49   : > { %370 = vrot.lane.b32.xlu1 %v291_v32, %s976_s13 }
  0x82   : > { %v305_v35 = vpop.permute.xlu0 %304 }
  0x83   : > { %v374_v63 = vsel %vm199_vm1, %v231_v54, %v305_v35 }
  0x86   : > { %v317_v36 = vpop.permute.xlu0 %316 }
  0x87   : > { %v386_v9 = vsel %vm384_vm4, %v374_v63, %v317_v36 }
  0x8f   : > { %v309_v37 = vpop.permute.xlu1 %308  ;;  %v307_v38 = vpop.permute.xlu0 %306 }
  0x90   : > { %v377_v14 = vsel %vm199_vm1, %v232_v1, %v307_v38  ;;  %v380_v18 = vsel %vm199_vm1, %v233_v5, %v309_v37 }
  0x93   : > { %v311_v39 = vpop.permute.xlu1 %310  ;;  %v341_v40 = vpop.permute.xlu0 %340 }
  0x94   : > { %v404_v8 = vsel %vm199_vm1, %v263_v61, %v341_v40  ;;  %v383_v30 = vsel %vm199_vm1, %v234_v7, %v311_v39 }
  0x97   : > { %v343_v41 = vpop.permute.xlu1 %342  ;;  %v345_v42 = vpop.permute.xlu0 %344 }
  0x98   : > { %v407_v15 = vsel %vm199_vm1, %v264_v2, %v343_v41  ;;  %v410_v16 = vsel %vm199_vm1, %v265_v3, %v345_v42 }
  0x9b   : > { %v347_v43 = vpop.permute.xlu1 %346  ;;  %v321_v44 = vpop.permute.xlu0 %320 }
  0x9c   : > { %v390_v27 = vsel %vm384_vm4, %v380_v18, %v321_v44  ;;  %v413_v31 = vsel %vm199_vm1, %v266_v10, %v347_v43 }
  0x9f   : > { %v319_v45 = vpop.permute.xlu1 %318  ;;  %v353_v46 = vpop.permute.xlu0 %352 }
  0xa0   : > { %v415_v12 = vsel %vm384_vm4, %v404_v8, %v353_v46  ;;  %v388_v19 = vsel %vm384_vm4, %v377_v14, %v319_v45 }
  0xa3   : > { %v323_v47 = vpop.permute.xlu1 %322  ;;  %v357_v48 = vpop.permute.xlu0 %356 }
  0xa4   : > { %v419_v20 = vsel %vm384_vm4, %v410_v16, %v357_v48  ;;  %v392_v33 = vsel %vm384_vm4, %v383_v30, %v323_v47 }
  0xa7   : > { %v355_v0 = vpop.permute.xlu1 %354  ;;  %v329_v49 = vpop.permute.xlu0 %328 }
  0xa8   : > { %v417_v21 = vsel %vm384_vm4, %v407_v15, %v355_v0  ;;  %v395_v23 = vsel %vm393_vm5, %v386_v9, %v329_v49 }
  0xab   : > { %v359_v51 = vpop.permute.xlu1 %358  ;;  %v333_v52 = vpop.permute.xlu0 %332 }
  0xac   : > { %v399_v32 = vsel %vm393_vm5, %v390_v27, %v333_v52  ;;  %v421_v34 = vsel %vm384_vm4, %v413_v31, %v359_v51 }
  0xaf   : > { %v331_v58 = vpop.permute.xlu1 %330  ;;  %v365_v59 = vpop.permute.xlu0 %364 }
  0xb0   : > { %v423_v17 = vsel %vm393_vm5, %v415_v12, %v365_v59  ;;  %v397_v24 = vsel %vm393_vm5, %v388_v19, %v331_v58 }
  0xb1   : > { %v442_v28 = vcombine.low %v395_v23, %v423_v17 }
  0xb3   : > { %v335_v6 = vpop.permute.xlu1 %334  ;;  %v369_v13 = vpop.permute.xlu0 %368  ;;  %v449_v41 = vrot.slane %v442_v28, %v1099_v11 }
  0xb4   : > { %v427_v25 = vsel %vm393_vm5, %v419_v20, %v369_v13  ;;  %v401_v38 = vsel %vm393_vm5, %v392_v33, %v335_v6 }
  0xb5   : > { %v474_v35 = vcombine.low %v399_v32, %v427_v25 }
  0xb7   : > { %v367_v22 = vpop.permute.xlu1 %366  ;;  %v481_v39 = vrot.slane %v474_v35, %v1099_v11 }
  0xb8   : > { %v425_v26 = vsel %vm393_vm5, %v417_v21, %v367_v22 }
  0xb9   : > { %v458_v29 = vcombine.low %v397_v24, %v425_v26 }
  0xbb   : > { %v465_v36 = vrot.slane %v458_v29, %v1099_v11  ;;  %v371_v37 = vpop.permute.xlu1 %370 }
  0xbc   : > { %v429_v40 = vsel %vm393_vm5, %v421_v34, %v371_v37 }
  0xbd   : > { %v490_v42 = vcombine.low %v401_v38, %v429_v40  ;;  %v871_v44 = vcombine.low %v449_v41, %v465_v36 }
  0xbf   : > { %v497_v43 = vrot.slane %v490_v42, %v1099_v11  ;;  %v552_v46 = vrot.slane %v871_v44, %v1099_v11 }
  0xc1   : > { %v873_v45 = vcombine.low %v481_v39, %v497_v43 }
  0xc3   : > { %v566_v47 = vrot.slane %v873_v45, %v1099_v11 }
  0xc5   : > { %v575_v48 = vcombine.high %v552_v46, %v566_v47  ;;  %v574_v0 = vcombine.low %v552_v46, %v566_v47 }
  0xc7   : > { %722 = vmatprep.mubr.bf16.mxu0 %v575_v48 }
  0xc8   : > { %723 = vmatmul.mubr.bf16.vlgmr.msra.gmra.mrb[0].mxu0 %v574_v0 }
 0x105   : > { %v765_v49 = vpop.f32.mrb[0].mxu1 }
 0x106   : > { %v931_v50 = vpop.f32.mrb[1].mxu1 }
 0x107   : > { %v768_v51 = vpop.f32.mrb[2].mxu1 }
 0x108   : > { %v932_v52 = vpop.f32.mrb[3].mxu1 }
 0x19b   : > { %v916_v53 = vpop.f32.mrb[0].mxu0 }
 0x19c   : > { %v917_v54 = vpop.f32.mrb[1].mxu0 }
 0x19d   : > { %v918_v55 = vadd.f32 %v917_v54, %v916_v53  ;;  %v919_v56 = vpop.f32.mrb[2].mxu0 }
 0x19e   : > { %v920_v58 = vpop.f32.mrb[3].mxu0 }
 0x19f   : > { %v766_v59 = vadd.f32 %v918_v55, %v765_v49  ;;  %v921_v11 = vadd.f32 %v920_v58, %v919_v56 }
 0x1a1   : > { %v779_v61 = vmul.f32 %v894_v57, %v766_v59  ;;  %v769_v62 = vadd.f32 %v921_v11, %v768_v51 }
 0x1a3   : > { %v788_v63 = vadd.f32 %v895_v60, %v779_v61  ;;  %v780_v1 = vmul.f32 %v894_v57, %v769_v62 }
 0x1a5   : > { %v790_v2 = vmax.f32 %v788_v63, 0.0  ;;  %v789_v3 = vadd.f32 %v895_v60, %v780_v1 }
 0x1a7   : > { %v794_v4 = vcombine.high %v790_v2, %v790_v2  ;;  %v798_v5 = vpack.c.bf16 %v790_v2, %v790_v2  ;;  %v791_v6 = vmax.f32 %v789_v3, 0.0 }
 0x1a9   : > { %v799_v7 = vpack.c.bf16 %v794_v4, %v794_v4  ;;  %803 = vst.msk [vmem:[%s197_s20] sm:$0x3] %vm802_vm6, %v798_v5  ;;  %v795_v8 = vcombine.high %v791_v6, %v791_v6  ;;  %v800_v9 = vpack.c.bf16 %v791_v6, %v791_v6 }
 0x1ab   : > { %804 = vst.msk [vmem:[%s197_s20 + $0x2] sm:$0x3] %vm802_vm6, %v799_v7  ;;  %v801_v10 = vpack.c.bf16 %v795_v8, %v795_v8  ;;  %805 = vst.msk [vmem:[%s197_s20 + $0x4] sm:$0x3] %vm802_vm6, %v800_v9 }
 0x1ad   : > { %806 = vst.msk [vmem:[%s197_s20 + $0x6] sm:$0x3] %vm802_vm6, %v801_v10 }
 0x1ae PF: > { %s14_s15 = sadd.s32 1, %s971_s15  }
 0x1af   : > { %p11_p4 = scmp.ge.s32.totalorder %s14_s15, 4  }
 0x1b1   :  { %13 = sbr.rel (!%p11_p4) target bundleno = 1 (0x1), region = 68 }

// kernel: _lambda_.6
= control target key start
LH: loop header
LB: loop body
LE: loop exit
PB: predicated region body
PF: predicated region fallthrough
CT: control target
= control target key end

     0   :  { %s2305_s15 = smov 0   ;;  %s3187_s0 = inlined_call_operand.vmem [shape: bf16[2,16,16,3], index: 0, kind: input, shape index: {}]   ;;  %s3188_s1 = inlined_call_operand.vmem [shape: bf16[27,16], index: 1, kind: input, shape index: {}]   ;;  %s3189_s2 = inlined_call_operand.vmem [shape: f32[1,16], index: 2, kind: input, shape index: {}]   ;;  %s3190_s3 = inlined_call_operand.vmem [shape: f32[1,16], index: 3, kind: input, shape index: {}]   ;;  %s3191_s4 = inlined_call_operand.vmem [shape: bf16[2,16,16,16], index: 4, kind: output, shape index: {}]  }
   0x1 LB: > { %s2008_s16 = sadd.s32 4294967295, %s2268_s15   ;;  %p2012_p0 = scmp.ge.s32.totalorder %s2268_s15, 1  ;;  %s2268_s15 = sphi %s2305_s15, %s14_s15  }
   0x2   : > { %p162_p1 = scmp.lt.s32.totalorder %s2268_s15, 3 }
   0x4   : > { %p163_p2 = pnand %p2012_p0, %p162_p1 }
   0x5   : > { %vm199_vm0 = vcmask (!%p163_p2), 23552   ;;  %vm203_vm1 = vcmask (!%p163_p2), 16384   ;;  %v2270_v0 = vmov (!%p163_p2), 0.0   ;;  %p188_p3 = scmp.lt.s32.totalorder (!%p163_p2), %s2008_s16, 1  ;;  %s2271_s21 = smov (!%p163_p2), 3   ;;  %vm1514_vm2 = vcmask (!%p163_p2), 1044480  }
   0x6   : > { %166 = sbr.rel (%p163_p2) target bundleno = 645 (0x285), region = 36  ;;  %201 = vst.msk [vmem:[#allocation2 + $0x8] sm:$0xff] (!%p163_p2), %vm199_vm0, %v2270_v0  ;;  %202 = vst.msk [vmem:[#allocation2 + $0x10] sm:$0xff] (!%p163_p2), %vm199_vm0, %v2270_v0  ;;  %s2272_s22 = smov (!%p163_p2), 6   ;;  %vm1515_vm3 = vcmask (!%p163_p2), 1045504   ;;  %vm1235_vm4 = vcmask (!%p163_p2), 48128  }
   0x7   : > { %200 = vst.msk [vmem:[#allocation2] sm:$0xff] (!%p163_p2), %vm199_vm0, %v2270_v0  ;;  %205 = vst.msk [vmem:[#allocation2 + $0x20] sm:$0xff] (!%p163_p2), %vm199_vm0, %v2270_v0  ;;  %s2273_s23 = smov (!%p163_p2), 9   ;;  %s2274_s24 = smov (!%p163_p2), 12   ;;  %vm1268_vm5 = vcmask (!%p163_p2), 72704   ;;  %vm1301_vm6 = vcmask (!%p163_p2), 97280  }
   0x8   : > { %206 = vst.msk [vmem:[#allocation2 + $0x28] sm:$0xff] (!%p163_p2), %vm199_vm0, %v2270_v0  ;;  %207 = vst.msk [vmem:[#allocation2 + $0x30] sm:$0xff] (!%p163_p2), %vm199_vm0, %v2270_v0  ;;  %s2275_s25 = smov (!%p163_p2), 15   ;;  %s2276_s26 = smov (!%p163_p2), 18   ;;  %vm1334_vm7 = vcmask (!%p163_p2), 121856   ;;  %vm1367_vm8 = vcmask (!%p163_p2), 146432  }
   0x9   : > { %209 = vst.msk [vmem:[#allocation2 + $0x40] sm:$0xff] (!%p163_p2), %vm199_vm0, %v2270_v0  ;;  %210 = vst.msk [vmem:[#allocation2 + $0x48] sm:$0xff] (!%p163_p2), %vm199_vm0, %v2270_v0  ;;  %s2278_s5 = smov (!%p163_p2), 21   ;;  %s2279_s6 = smov (!%p163_p2), 24   ;;  %vm1400_vm9 = vcmask (!%p163_p2), 171008   ;;  %vm1433_vm10 = vcmask (!%p163_p2), 195584  }
   0xa   : > { %211 = vst.msk [vmem:[#allocation2 + $0x50] sm:$0xff] (!%p163_p2), %vm199_vm0, %v2270_v0  ;;  %213 = vst.msk [vmem:[#allocation2 + $0x60] sm:$0xff] (!%p163_p2), %vm199_vm0, %v2270_v0  ;;  %vm1481_vm11 = vcmask (!%p163_p2), 220160   ;;  %vm1920_vm12 = vcmask (!%p163_p2), 125952  }
   0xb   : > { %214 = vst.msk [vmem:[#allocation2 + $0x68] sm:$0xff] (!%p163_p2), %vm199_vm0, %v2270_v0  ;;  %215 = vst.msk [vmem:[#allocation2 + $0x70] sm:$0xff] (!%p163_p2), %vm199_vm0, %v2270_v0 }
   0xc   : > { %217 = vst.msk [vmem:[#allocation2 + $0x80] sm:$0xff] (!%p163_p2), %vm199_vm0, %v2270_v0  ;;  %218 = vst.msk [vmem:[#allocation2 + $0x88] sm:$0xff] (!%p163_p2), %vm199_vm0, %v2270_v0 }
   0xd   : > { %219 = vst.msk [vmem:[#allocation2 + $0x90] sm:$0xff] %vm199_vm0, %v2270_v0  ;;  %221 = vst.msk [vmem:[#allocation2 + $0xa0] sm:$0xff] %vm199_vm0, %v2270_v0  ;;  %s3193_s16 = smov (!%p188_p3, %s2008_s16), 1  ;;  %v418_v4 = vld [vmem:[#allocation2 + $0x8] sm:$0xff]  ;;  %v419_v5 = vld [vmem:[#allocation2 + $0x10] sm:$0xff] }
   0xe   : > { %222 = vst.msk [vmem:[#allocation2 + $0xa8] sm:$0xff] %vm199_vm0, %v2270_v0  ;;  %223 = vst.msk [vmem:[#allocation2 + $0xb0] sm:$0xff] %vm199_vm0, %v2270_v0  ;;  %s2071_s17 = sshll.u32 %s3193_s16, 7  ;;  %v466_v6 = vld [vmem:[#allocation2 + $0x9] sm:$0xff]  ;;  %v450_v11 = vpack.c.bf16 %v419_v5, %v418_v4 }
   0xf   : > { %225 = vst.msk [vmem:[#allocation2 + $0xc0] sm:$0xff] %vm199_vm0, %v2270_v0  ;;  %226 = vst.msk [vmem:[#allocation2 + $0xc8] sm:$0xff] %vm199_vm0, %v2270_v0  ;;  %s2469_s20 = scalar_lea.vmem %s3187_s0, %s2071_s17  ;;  %s3061_s13 = scalar_lea.vmem %s3191_s4, %s2071_s17 }
  0x10   : > { %227 = vst.msk [vmem:[#allocation2 + $0xd0] sm:$0xff] %vm199_vm0, %v2270_v0  ;;  %229 = vst.msk [vmem:[#allocation2 + $0xe0] sm:$0xff] %vm199_vm0, %v2270_v0  ;;  %v2175_v1 = vld [vmem:[%s2469_s20 + $0x38] sm:$0xff]   ;;  %v2106_v2 = vld [vmem:[%s2469_s20] sm:$0xff]   ;;  %819 = vrot.lane.b32.xlu0 %v450_v11, %s2271_s21 }
  0x11   : > { %230 = vst.msk [vmem:[#allocation2 + $0xe8] sm:$0xff] %vm199_vm0, %v2270_v0  ;;  %231 = vst.msk [vmem:[#allocation2 + $0xf0] sm:$0xff] %vm199_vm0, %v2270_v0  ;;  %v2176_v3 = vld [vmem:[%s2469_s20 + $0x40] sm:$0xff]   ;;  %v2135_v7 = vunpack.c.l.bf16 %v2175_v1  ;;  %v2136_v8 = vunpack.c.h.bf16 %v2175_v1  ;;  %v2107_v9 = vunpack.c.l.bf16 %v2106_v2  ;;  %v2108_v10 = vunpack.c.h.bf16 %v2106_v2  ;;  %v2169_v15 = vld [vmem:[%s2469_s20 + $0x8] sm:$0xff]  }
  0x12   : > { %233 = vst.msk [vmem:[#allocation2 + $0x100] sm:$0xff] %vm199_vm0, %v2270_v0  ;;  %234 = vst.msk [vmem:[#allocation2 + $0x108] sm:$0xff] %vm199_vm0, %v2270_v0  ;;  %v2139_v13 = vunpack.c.l.bf16 %v2176_v3  ;;  %v2140_v14 = vunpack.c.h.bf16 %v2176_v3  ;;  %v2177_v16 = vld [vmem:[%s2469_s20 + $0x48] sm:$0xff]   ;;  %v2111_v18 = vunpack.c.l.bf16 %v2169_v15  ;;  %v2112_v19 = vunpack.c.h.bf16 %v2169_v15  ;;  %v2170_v21 = vld [vmem:[%s2469_s20 + $0x10] sm:$0xff]  }
  0x13   : > { %235 = vst.msk [vmem:[#allocation2 + $0x110] sm:$0xff] %vm199_vm0, %v2270_v0  ;;  %237 = vst.msk [vmem:[#allocation2 + $0x120] sm:$0xff] %vm199_vm0, %v2270_v0  ;;  %v2143_v20 = vunpack.c.l.bf16 %v2177_v16  ;;  %v2178_v22 = vld [vmem:[%s2469_s20 + $0x50] sm:$0xff]   ;;  %v2171_v23 = vld [vmem:[%s2469_s20 + $0x18] sm:$0xff]   ;;  %v2144_v24 = vunpack.c.h.bf16 %v2177_v16  ;;  %v2115_v25 = vunpack.c.l.bf16 %v2170_v21  ;;  %v2116_v26 = vunpack.c.h.bf16 %v2170_v21 }
  0x14   : > { %238 = vst.msk [vmem:[#allocation2 + $0x128] sm:$0xff] %vm199_vm0, %v2270_v0  ;;  %239 = vst.msk [vmem:[#allocation2 + $0x130] sm:$0xff] %vm199_vm0, %v2270_v0  ;;  %v2147_v27 = vunpack.c.l.bf16 %v2178_v22  ;;  %v2179_v28 = vld [vmem:[%s2469_s20 + $0x58] sm:$0xff]   ;;  %v2172_v29 = vld [vmem:[%s2469_s20 + $0x20] sm:$0xff]   ;;  %v2148_v30 = vunpack.c.h.bf16 %v2178_v22  ;;  %v2119_v31 = vunpack.c.l.bf16 %v2171_v23  ;;  %v2120_v32 = vunpack.c.h.bf16 %v2171_v23 }
  0x15   : > { %241 = vst.msk [vmem:[#allocation2 + $0x140] sm:$0xff] %vm199_vm0, %v2270_v0  ;;  %242 = vst.msk [vmem:[#allocation2 + $0x148] sm:$0xff] %vm199_vm0, %v2270_v0  ;;  %v2151_v33 = vunpack.c.l.bf16 %v2179_v28  ;;  %v2180_v34 = vld [vmem:[%s2469_s20 + $0x60] sm:$0xff]   ;;  %v2152_v35 = vunpack.c.h.bf16 %v2179_v28  ;;  %v2123_v36 = vunpack.c.l.bf16 %v2172_v29  ;;  %v2124_v37 = vunpack.c.h.bf16 %v2172_v29  ;;  %v2182_v29 = vld [vmem:[%s2469_s20 + $0x70] sm:$0xff]  }
  0x16   : > { %243 = vst.msk [vmem:[#allocation2 + $0x150] sm:$0xff] %vm199_vm0, %v2270_v0  ;;  %245 = vst.msk [vmem:[#allocation2 + $0x160] sm:$0xff] %vm199_vm0, %v2270_v0  ;;  %v2155_v38 = vunpack.c.l.bf16 %v2180_v34  ;;  %v2156_v39 = vunpack.c.h.bf16 %v2180_v34 }
  0x17   : > { %246 = vst.msk [vmem:[#allocation2 + $0x168] sm:$0xff] %vm199_vm0, %v2270_v0  ;;  %247 = vst.msk [vmem:[#allocation2 + $0x170] sm:$0xff] %vm199_vm0, %v2270_v0 }
  0x18   : > { %249 = vst.msk [vmem:[#allocation2 + $0x180] sm:$0xff] %vm199_vm0, %v2270_v0  ;;  %250 = vst.msk [vmem:[#allocation2 + $0x188] sm:$0xff] %vm199_vm0, %v2270_v0 }
  0x19   : > { %251 = vst.msk [vmem:[#allocation2 + $0x190] sm:$0xff] %vm199_vm0, %v2270_v0  ;;  %253 = vst.msk [vmem:[#allocation2 + $0x1a0] sm:$0xff] %vm199_vm0, %v2270_v0 }
  0x1a   : > { %254 = vst.msk [vmem:[#allocation2 + $0x1a8] sm:$0xff] %vm199_vm0, %v2270_v0  ;;  %255 = vst.msk [vmem:[#allocation2 + $0x1b0] sm:$0xff] %vm199_vm0, %v2270_v0 }
  0x1b   : > { %257 = vst.msk [vmem:[#allocation2 + $0x1c0] sm:$0xff] %vm199_vm0, %v2270_v0  ;;  %258 = vst.msk [vmem:[#allocation2 + $0x1c8] sm:$0xff] %vm199_vm0, %v2270_v0 }
  0x1c   : > { %259 = vst.msk [vmem:[#allocation2 + $0x1d0] sm:$0xff] %vm199_vm0, %v2270_v0  ;;  %261 = vst.msk [vmem:[#allocation2 + $0x1e0] sm:$0xff] %vm199_vm0, %v2270_v0 }
  0x1d   : > { %262 = vst.msk [vmem:[#allocation2 + $0x1e8] sm:$0xff] %vm199_vm0, %v2270_v0  ;;  %263 = vst.msk [vmem:[#allocation2 + $0x1f0] sm:$0xff] %vm199_vm0, %v2270_v0 }
  0x1e   : > { %265 = vst.msk [vmem:[#allocation2 + $0x200] sm:$0xff] %vm199_vm0, %v2270_v0  ;;  %266 = vst.msk [vmem:[#allocation2 + $0x208] sm:$0xff] %vm199_vm0, %v2270_v0 }
  0x1f   : > { %267 = vst.msk [vmem:[#allocation2 + $0x210] sm:$0xff] %vm199_vm0, %v2270_v0  ;;  %269 = vst.msk [vmem:[#allocation2 + $0x220] sm:$0xff] %vm199_vm0, %v2270_v0 }
  0x20   : > { %270 = vst.msk [vmem:[#allocation2 + $0x228] sm:$0xff] %vm199_vm0, %v2270_v0  ;;  %271 = vst.msk [vmem:[#allocation2 + $0x230] sm:$0xff] %vm199_vm0, %v2270_v0 }
  0x21   : > { %204 = vst.msk [vmem:[#allocation2 + $0x18] sm:$0x1] %vm203_vm1, %v2270_v0  ;;  %208 = vst.msk [vmem:[#allocation2 + $0x38] sm:$0x1] %vm203_vm1, %v2270_v0 }
  0x22   : > { %212 = vst.msk [vmem:[#allocation2 + $0x58] sm:$0x1] %vm203_vm1, %v2270_v0  ;;  %216 = vst.msk [vmem:[#allocation2 + $0x78] sm:$0x1] %vm203_vm1, %v2270_v0 }
  0x23   : > { %220 = vst.msk [vmem:[#allocation2 + $0x98] sm:$0x1] %vm203_vm1, %v2270_v0  ;;  %224 = vst.msk [vmem:[#allocation2 + $0xb8] sm:$0x1] %vm203_vm1, %v2270_v0 }
  0x24   : > { %228 = vst.msk [vmem:[#allocation2 + $0xd8] sm:$0x1] %vm203_vm1, %v2270_v0  ;;  %232 = vst.msk [vmem:[#allocation2 + $0xf8] sm:$0x1] %vm203_vm1, %v2270_v0 }
  0x25   : > { %236 = vst.msk [vmem:[#allocation2 + $0x118] sm:$0x1] %vm203_vm1, %v2270_v0  ;;  %240 = vst.msk [vmem:[#allocation2 + $0x138] sm:$0x1] %vm203_vm1, %v2270_v0 }
  0x26   : > { %244 = vst.msk [vmem:[#allocation2 + $0x158] sm:$0x1] %vm203_vm1, %v2270_v0  ;;  %248 = vst.msk [vmem:[#allocation2 + $0x178] sm:$0x1] %vm203_vm1, %v2270_v0 }
  0x27   : > { %252 = vst.msk [vmem:[#allocation2 + $0x198] sm:$0x1] %vm203_vm1, %v2270_v0  ;;  %256 = vst.msk [vmem:[#allocation2 + $0x1b8] sm:$0x1] %vm203_vm1, %v2270_v0 }
  0x28   : > { %260 = vst.msk [vmem:[#allocation2 + $0x1d8] sm:$0x1] %vm203_vm1, %v2270_v0  ;;  %264 = vst.msk [vmem:[#allocation2 + $0x1f8] sm:$0x1] %vm203_vm1, %v2270_v0  ;;  %v467_v12 = vld [vmem:[#allocation2 + $0x11] sm:$0xff] }
  0x29   : > { %268 = vst.msk [vmem:[#allocation2 + $0x218] sm:$0x1] %vm203_vm1, %v2270_v0  ;;  %272 = vst.msk [vmem:[#allocation2 + $0x238] sm:$0x1] %vm203_vm1, %v2270_v0  ;;  %v498_v17 = vpack.c.bf16 %v467_v12, %v466_v6 }
  0x2a   : > { %352 = vst.msk [vmem:[#allocation2 + $0x108] sm:$0xff] %vm199_vm0, %v2135_v7  ;;  %353 = vst.msk [vmem:[#allocation2 + $0x110] sm:$0xff] %vm199_vm0, %v2136_v8 }
  0x2b   : > { %338 = vst.msk [vmem:[#allocation2 + $0x28] sm:$0xff] %vm199_vm0, %v2107_v9  ;;  %339 = vst.msk [vmem:[#allocation2 + $0x30] sm:$0xff] %vm199_vm0, %v2108_v10  ;;  %867 = vrot.lane.b32.xlu0 %v498_v17, %s2272_s22  ;;  %v2173_v9 = vld [vmem:[%s2469_s20 + $0x28] sm:$0xff]  }
  0x2c   : > { %354 = vst.msk [vmem:[#allocation2 + $0x128] sm:$0xff] %vm199_vm0, %v2139_v13  ;;  %355 = vst.msk [vmem:[#allocation2 + $0x130] sm:$0xff] %vm199_vm0, %v2140_v14  ;;  %v2181_v10 = vld [vmem:[%s2469_s20 + $0x68] sm:$0xff]   ;;  %v2127_v11 = vunpack.c.l.bf16 %v2173_v9  ;;  %v2128_v12 = vunpack.c.h.bf16 %v2173_v9 }
  0x2d   : > { %340 = vst.msk [vmem:[#allocation2 + $0x48] sm:$0xff] %vm199_vm0, %v2111_v18  ;;  %341 = vst.msk [vmem:[#allocation2 + $0x50] sm:$0xff] %vm199_vm0, %v2112_v19  ;;  %v2159_v13 = vunpack.c.l.bf16 %v2181_v10  ;;  %v2160_v14 = vunpack.c.h.bf16 %v2181_v10 }
  0x2e   : > { %356 = vst.msk [vmem:[#allocation2 + $0x148] sm:$0xff] %vm199_vm0, %v2143_v20  ;;  %357 = vst.msk [vmem:[#allocation2 + $0x150] sm:$0xff] %vm199_vm0, %v2144_v24  ;;  %v2174_v20 = vld [vmem:[%s2469_s20 + $0x30] sm:$0xff]  }
  0x2f   : > { %342 = vst.msk [vmem:[#allocation2 + $0x68] sm:$0xff] %vm199_vm0, %v2115_v25  ;;  %343 = vst.msk [vmem:[#allocation2 + $0x70] sm:$0xff] %vm199_vm0, %v2116_v26  ;;  %v2131_v22 = vunpack.c.l.bf16 %v2174_v20  ;;  %v2132_v23 = vunpack.c.h.bf16 %v2174_v20 }
  0x30   : > { %358 = vst.msk [vmem:[#allocation2 + $0x168] sm:$0xff] %vm199_vm0, %v2147_v27  ;;  %359 = vst.msk [vmem:[#allocation2 + $0x170] sm:$0xff] %vm199_vm0, %v2148_v30 }
  0x31   : > { %344 = vst.msk [vmem:[#allocation2 + $0x88] sm:$0xff] %vm199_vm0, %v2119_v31  ;;  %345 = vst.msk [vmem:[#allocation2 + $0x90] sm:$0xff] %vm199_vm0, %v2120_v32  ;;  %v434_v40 = vld [vmem:[#allocation2 + $0x108] sm:$0xff]  ;;  %v435_v41 = vld [vmem:[#allocation2 + $0x110] sm:$0xff]  ;;  %v2163_v31 = vunpack.c.l.bf16 %v2182_v29  ;;  %v2164_v32 = vunpack.c.h.bf16 %v2182_v29 }
  0x32   : > { %360 = vst.msk [vmem:[#allocation2 + $0x188] sm:$0xff] %vm199_vm0, %v2151_v33  ;;  %361 = vst.msk [vmem:[#allocation2 + $0x190] sm:$0xff] %vm199_vm0, %v2152_v35  ;;  %v420_v42 = vld [vmem:[#allocation2 + $0x28] sm:$0xff]  ;;  %v458_v43 = vpack.c.bf16 %v435_v41, %v434_v40  ;;  %v421_v44 = vld [vmem:[#allocation2 + $0x30] sm:$0xff] }
  0x33   : > { %346 = vst.msk [vmem:[#allocation2 + $0xa8] sm:$0xff] %vm199_vm0, %v2123_v36  ;;  %347 = vst.msk [vmem:[#allocation2 + $0xb0] sm:$0xff] %vm199_vm0, %v2124_v37  ;;  %v468_v45 = vld [vmem:[#allocation2 + $0x29] sm:$0xff]  ;;  %v469_v46 = vld [vmem:[#allocation2 + $0x31] sm:$0xff]  ;;  %v451_v47 = vpack.c.bf16 %v421_v44, %v420_v42  ;;  %v2277_v37 = vmov 65535  }
  0x34   : > { %362 = vst.msk [vmem:[#allocation2 + $0x1a8] sm:$0xff] %vm199_vm0, %v2155_v38  ;;  %363 = vst.msk [vmem:[#allocation2 + $0x1b0] sm:$0xff] %vm199_vm0, %v2156_v39  ;;  %v436_v48 = vld [vmem:[#allocation2 + $0x128] sm:$0xff]  ;;  %v437_v49 = vld [vmem:[#allocation2 + $0x130] sm:$0xff]  ;;  %835 = vrot.lane.b32.xlu0 %v458_v43, %s2271_s21  ;;  %v499_v50 = vpack.c.bf16 %v469_v46, %v468_v45  ;;  %v1516_v38 = vsel %vm1514_vm2, 4294967295, %v2277_v37 }
  0x35   : > { %821 = vrot.lane.b32.xlu1 %v451_v47, %s2271_s21  ;;  %v459_v51 = vpack.c.bf16 %v437_v49, %v436_v48  ;;  %v514_v52 = vld [vmem:[#allocation2 + $0x27] sm:$0xff]  ;;  %v515_v53 = vld [vmem:[#allocation2 + $0x2f] sm:$0xff]  ;;  %348 = vst.msk [vmem:[#allocation2 + $0xc8] sm:$0xff] %vm199_vm0, %v2127_v11  ;;  %349 = vst.msk [vmem:[#allocation2 + $0xd0] sm:$0xff] %vm199_vm0, %v2128_v12  ;;  %v1517_v41 = vsel %vm1515_vm3, %v1516_v38, 0 }
  0x36   : > { %v482_v54 = vld [vmem:[#allocation2 + $0x109] sm:$0xff]  ;;  %v483_v55 = vld [vmem:[#allocation2 + $0x111] sm:$0xff]  ;;  %v2509_v56 = vpack.c.bf16 %v515_v53, %v514_v52  ;;  %364 = vst.msk [vmem:[#allocation2 + $0x1c8] sm:$0xff] %vm199_vm0, %v2159_v13  ;;  %365 = vst.msk [vmem:[#allocation2 + $0x1d0] sm:$0xff] %vm199_vm0, %v2160_v14 }
  0x37   : > { %v506_v57 = vpack.c.bf16 %v483_v55, %v482_v54  ;;  %v516_v58 = vld [vmem:[#allocation2 + $0x47] sm:$0xff]  ;;  %v517_v59 = vld [vmem:[#allocation2 + $0x4f] sm:$0xff]  ;;  %350 = vst.msk [vmem:[#allocation2 + $0xe8] sm:$0xff] %vm199_vm0, %v2131_v22  ;;  %351 = vst.msk [vmem:[#allocation2 + $0xf0] sm:$0xff] %vm199_vm0, %v2132_v23 }
  0x38   : > { %869 = vrot.lane.b32.xlu0 %v499_v50, %s2272_s22  ;;  %v484_v60 = vld [vmem:[#allocation2 + $0x129] sm:$0xff]  ;;  %v485_v61 = vld [vmem:[#allocation2 + $0x131] sm:$0xff]  ;;  %v2514_v62 = vpack.c.bf16 %v517_v59, %v516_v58  ;;  %v2260_v33 = vld [vmem:[%s3188_s1] sm:$0xff]   ;;  %366 = vst.msk [vmem:[#allocation2 + $0x1e8] sm:$0xff] %vm199_vm0, %v2163_v31 }
  0x39   : > { %837 = vrot.lane.b32.xlu1 %v459_v51, %s2271_s21  ;;  %v507_v63 = vpack.c.bf16 %v485_v61, %v484_v60  ;;  %v530_v0 = vld [vmem:[#allocation2 + $0x127] sm:$0xff]  ;;  %v531_v1 = vld [vmem:[#allocation2 + $0x12f] sm:$0xff]  ;;  %367 = vst.msk [vmem:[#allocation2 + $0x1f0] sm:$0xff] %vm199_vm0, %v2164_v32  ;;  %2202 = vmatprep.subr.bf16.mxu0 %v2260_v33  ;;  %v2183_v58 = vld [vmem:[%s2469_s20 + $0x78] sm:$0xff]  }
  0x3a   : > { %v2520_v2 = vpack.c.bf16 %v531_v1, %v530_v0  ;;  %v564_v3 = vld [vmem:[#allocation2 + $0x48] sm:$0xff]  ;;  %v565_v4 = vld [vmem:[#allocation2 + $0x50] sm:$0xff]  ;;  %2203 = vmatpush3.bf16.msra.mxu0 %v2260_v33  ;;  %2238 = vmatprep.subr.bf16.mxu1 %v2260_v33  ;;  %v2167_v59 = vunpack.c.l.bf16 %v2183_v58  ;;  %v2168_v60 = vunpack.c.h.bf16 %v2183_v58 }
  0x3b   : > { %v532_v5 = vld [vmem:[#allocation2 + $0x147] sm:$0xff]  ;;  %v533_v6 = vld [vmem:[#allocation2 + $0x14f] sm:$0xff]  ;;  %v2523_v7 = vpack.c.bf16 %v565_v4, %v564_v3  ;;  %2240 = vmatpush3.bf16.msra.mxu1 %v2260_v33 }
  0x3c   : > { %915 = vrot.lane.b32.xlu0 %v2509_v56, %s2273_s23  ;;  %v2527_v8 = vpack.c.bf16 %v533_v6, %v532_v5  ;;  %v612_v15 = vld [vmem:[#allocation2 + $0x49] sm:$0xff]  ;;  %v613_v16 = vld [vmem:[#allocation2 + $0x51] sm:$0xff]  ;;  %368 = vst.msk [vmem:[#allocation2 + $0x208] sm:$0xff] %vm199_vm0, %v2167_v59  ;;  %369 = vst.msk [vmem:[#allocation2 + $0x210] sm:$0xff] %vm199_vm0, %v2168_v60 }
  0x3d   : > { %883 = vrot.lane.b32.xlu1 %v506_v57, %s2272_s22  ;;  %v580_v17 = vld [vmem:[#allocation2 + $0x148] sm:$0xff]  ;;  %v581_v18 = vld [vmem:[#allocation2 + $0x150] sm:$0xff]  ;;  %v2540_v19 = vpack.c.bf16 %v613_v16, %v612_v15 }
  0x3e   : > { %v2544_v21 = vpack.c.bf16 %v581_v18, %v580_v17  ;;  %v661_v24 = vld [vmem:[#allocation2 + $0x67] sm:$0xff]  ;;  %v662_v25 = vld [vmem:[#allocation2 + $0x6f] sm:$0xff] }
  0x3f   : > { %v628_v26 = vld [vmem:[#allocation2 + $0x149] sm:$0xff]  ;;  %v629_v27 = vld [vmem:[#allocation2 + $0x151] sm:$0xff]  ;;  %v2554_v28 = vpack.c.bf16 %v662_v25, %v661_v24 }
  0x40   : > { %917 = vrot.lane.b32.xlu0 %v2514_v62, %s2273_s23  ;;  %v651_v30 = vpack.c.bf16 %v629_v27, %v628_v26  ;;  %v709_v34 = vld [vmem:[#allocation2 + $0x68] sm:$0xff]  ;;  %v710_v35 = vld [vmem:[#allocation2 + $0x70] sm:$0xff] }
  0x41   : > { %885 = vrot.lane.b32.xlu1 %v507_v63, %s2272_s22  ;;  %v2261_v36 = vld [vmem:[%s3188_s1 + $0x8] sm:$0x3f]   ;;  %v678_v40 = vld [vmem:[#allocation2 + $0x16f] sm:$0xff]  ;;  %v740_v43 = vpack.c.bf16 %v710_v35, %v709_v34 }
  0x42   : > { %v677_v39 = vld [vmem:[#allocation2 + $0x167] sm:$0xff]  ;;  %v1519_v42 = vand.u32 %v2261_v36, %v1517_v41  ;;  %v726_v46 = vld [vmem:[#allocation2 + $0x170] sm:$0xff] }
  0x43   : > { %v2573_v44 = vpack.c.bf16 %v678_v40, %v677_v39  ;;  %v725_v45 = vld [vmem:[#allocation2 + $0x168] sm:$0xff]  ;;  %v758_v49 = vld [vmem:[#allocation2 + $0x71] sm:$0xff] }
  0x44   : > { %963 = vrot.lane.b32.xlu0 %v451_v47, %s2274_s24  ;;  %2204 = vmatprep.subr.bf16.mxu0 %v1519_v42  ;;  %v748_v47 = vpack.c.bf16 %v726_v46, %v725_v45  ;;  %v757_v48 = vld [vmem:[#allocation2 + $0x69] sm:$0xff]  ;;  %v774_v52 = vld [vmem:[#allocation2 + $0x171] sm:$0xff] }
  0x45   : > { %931 = vrot.lane.b32.xlu1 %v2520_v2, %s2273_s23  ;;  %2205 = vmatpush3.bf16.msra.mxu0 %v1519_v42  ;;  %v520_v54 = vld [vmem:[#allocation2 + $0x87] sm:$0xff]  ;;  %v521_v55 = vld [vmem:[#allocation2 + $0x8f] sm:$0xff] }
  0x46   : > { %2239 = vmatprep.subr.bf16.mxu1 %v1519_v42  ;;  %v549_v57 = vpack.c.bf16 %v521_v55, %v520_v54  ;;  %v568_v61 = vld [vmem:[#allocation2 + $0x88] sm:$0xff]  ;;  %v617_v6 = vld [vmem:[#allocation2 + $0x91] sm:$0xff] }
  0x47   : > { %2241 = vmatpush3.bf16.msra.mxu1 %v1519_v42  ;;  %v536_v0 = vld [vmem:[#allocation2 + $0x187] sm:$0xff]  ;;  %v537_v1 = vld [vmem:[#allocation2 + $0x18f] sm:$0xff] }
  0x48   : > { %965 = vrot.lane.b32.xlu0 %v2523_v7, %s2274_s24  ;;  %v557_v4 = vpack.c.bf16 %v537_v1, %v536_v0  ;;  %v616_v5 = vld [vmem:[#allocation2 + $0x89] sm:$0xff]  ;;  %v633_v15 = vld [vmem:[#allocation2 + $0x191] sm:$0xff] }
  0x49   : > { %933 = vrot.lane.b32.xlu1 %v2527_v8, %s2273_s23  ;;  %v585_v9 = vld [vmem:[#allocation2 + $0x190] sm:$0xff]  ;;  %v645_v10 = vpack.c.bf16 %v617_v6, %v616_v5  ;;  %v665_v12 = vld [vmem:[#allocation2 + $0xa7] sm:$0xff] }
  0x4a   : > { %v666_v13 = vld [vmem:[#allocation2 + $0xaf] sm:$0xff]  ;;  %v681_v20 = vld [vmem:[#allocation2 + $0x1a7] sm:$0xff] }
  0x4b   : > { %v632_v14 = vld [vmem:[#allocation2 + $0x189] sm:$0xff]  ;;  %v2613_v16 = vpack.c.bf16 %v666_v13, %v665_v12  ;;  %v762_v31 = vld [vmem:[#allocation2 + $0xb1] sm:$0xff] }
  0x4c   : > { %1011 = vrot.lane.b32.xlu0 %v499_v50, %s2275_s25  ;;  %v788_v50 = vpack.c.bf16 %v758_v49, %v757_v48  ;;  %v653_v17 = vpack.c.bf16 %v633_v15, %v632_v14  ;;  %v713_v18 = vld [vmem:[#allocation2 + $0xa8] sm:$0xff]  ;;  %v730_v27 = vld [vmem:[#allocation2 + $0x1b0] sm:$0xff] }
  0x4d   : > { %979 = vrot.lane.b32.xlu1 %v459_v51, %s2274_s24  ;;  %v773_v51 = vld [vmem:[#allocation2 + $0x169] sm:$0xff]  ;;  %v778_v39 = vld [vmem:[#allocation2 + $0x1b1] sm:$0xff] }
  0x4e   : > { %v796_v53 = vpack.c.bf16 %v774_v52, %v773_v51  ;;  %v729_v26 = vld [vmem:[#allocation2 + $0x1a8] sm:$0xff]  ;;  %v573_v55 = vld [vmem:[#allocation2 + $0xd0] sm:$0xff] }
  0x4f   : > { %v2632_v29 = vpack.c.bf16 %v730_v27, %v729_v26  ;;  %v777_v38 = vld [vmem:[#allocation2 + $0x1a9] sm:$0xff]  ;;  %v621_v6 = vld [vmem:[#allocation2 + $0xd1] sm:$0xff] }
  0x50   : > { %1013 = vrot.lane.b32.xlu0 %v2540_v19, %s2275_s25  ;;  %v2653_v41 = vpack.c.bf16 %v778_v39, %v777_v38  ;;  %v525_v48 = vld [vmem:[#allocation2 + $0xcf] sm:$0xff]  ;;  %v540_v58 = vld [vmem:[#allocation2 + $0x1c7] sm:$0xff] }
  0x51   : > { %981 = vrot.lane.b32.xlu1 %v2544_v21, %s2274_s24  ;;  %v572_v54 = vld [vmem:[#allocation2 + $0xc8] sm:$0xff] }
  0x52   : > { %v541_v59 = vld [vmem:[#allocation2 + $0x1cf] sm:$0xff]  ;;  %v370_v1 = vld [vmem:[#allocation2 + $0x7] sm:$0xff] }
  0x53   : > { %v620_v5 = vld [vmem:[#allocation2 + $0xc9] sm:$0xff] }
  0x54   : > { %1059 = vrot.lane.b32.xlu0 %v2514_v62, %s2276_s26  ;;  %v2706_v13 = vpack.c.bf16 %v621_v6, %v620_v5  ;;  %v670_v26 = vld [vmem:[#allocation2 + $0xef] sm:$0xff] }
  0x55   : > { %1027 = vrot.lane.b32.xlu1 %v507_v63, %s2275_s25  ;;  %v569_v63 = vld [vmem:[#allocation2 + $0x90] sm:$0xff] }
  0x56   : > { %v597_v3 = vpack.c.bf16 %v569_v63, %v568_v61  ;;  %v2689_v61 = vpack.c.bf16 %v573_v55, %v572_v54  ;;  %v2693_v63 = vpack.c.bf16 %v541_v59, %v540_v58  ;;  %v717_v59 = vld [vmem:[#allocation2 + $0xe8] sm:$0xff] }
  0x58   : > { %1061 = vrot.lane.b32.xlu0 %v2554_v28, %s2276_s26 }
  0x59   : > { %1029 = vrot.lane.b32.xlu1 %v651_v30, %s2275_s25 }
  0x5c   : > { %1107 = vrot.lane.b32.xlu0 %v2523_v7, %s2278_s5 }
  0x5d   : > { %1075 = vrot.lane.b32.xlu1 %v2527_v8, %s2276_s26 }
  0x60   : > { %1109 = vrot.lane.b32.xlu0 %v740_v43, %s2278_s5 }
  0x61   : > { %1077 = vrot.lane.b32.xlu1 %v2573_v44, %s2276_s26 }
  0x64   : > { %1155 = vrot.lane.b32.xlu0 %v2540_v19, %s2279_s6 }
  0x65   : > { %1123 = vrot.lane.b32.xlu1 %v2544_v21, %s2278_s5 }
  0x68   : > { %823 = vrot.lane.b32.xlu0 %v2523_v7, %s2271_s21  ;;  %v584_v7 = vld [vmem:[#allocation2 + $0x188] sm:$0xff] }
  0x69   : > { %1125 = vrot.lane.b32.xlu1 %v748_v47, %s2278_s5  ;;  %v605_v11 = vpack.c.bf16 %v585_v9, %v584_v7 }
  0x6c   : > { %1157 = vrot.lane.b32.xlu0 %v788_v50, %s2279_s6 }
  0x6d   : > { %1171 = vrot.lane.b32.xlu1 %v651_v30, %s2279_s6 }
  0x70   : > { %825 = vrot.lane.b32.xlu0 %v740_v43, %s2271_s21 }
  0x71   : > { %839 = vrot.lane.b32.xlu1 %v2544_v21, %s2271_s21  ;;  %v682_v21 = vld [vmem:[#allocation2 + $0x1af] sm:$0xff] }
  0x72   : > { %v2623_v24 = vpack.c.bf16 %v682_v21, %v681_v20  ;;  %v387_v20 = vld [vmem:[#allocation2 + $0x10f] sm:$0xff] }
  0x74   : > { %871 = vrot.lane.b32.xlu0 %v2540_v19, %s2272_s22  ;;  %v714_v19 = vld [vmem:[#allocation2 + $0xb0] sm:$0xff] }
  0x75   : > { %1173 = vrot.lane.b32.xlu1 %v796_v53, %s2279_s6  ;;  %v742_v22 = vpack.c.bf16 %v714_v19, %v713_v18  ;;  %v386_v19 = vld [vmem:[#allocation2 + $0x107] sm:$0xff] }
  0x78   : > { %873 = vrot.lane.b32.xlu0 %v788_v50, %s2272_s22 }
  0x79   : > { %841 = vrot.lane.b32.xlu1 %v748_v47, %s2271_s21 }
  0x7c   : > { %919 = vrot.lane.b32.xlu0 %v2554_v28, %s2273_s23 }
  0x7d   : > { %887 = vrot.lane.b32.xlu1 %v651_v30, %s2272_s22  ;;  %v761_v30 = vld [vmem:[#allocation2 + $0xa9] sm:$0xff] }
  0x7e   : > { %v790_v34 = vpack.c.bf16 %v762_v31, %v761_v30  ;;  %v637_v30 = vld [vmem:[#allocation2 + $0x1d1] sm:$0xff]  ;;  %v2722_v31 = vpack.c.bf16 %v387_v20, %v386_v19 }
  0x80   : > { %921 = vrot.lane.b32.xlu0 %v549_v57, %s2273_s23 }
  0x81   : > { %889 = vrot.lane.b32.xlu1 %v796_v53, %s2272_s22 }
  0x82   : > { %v2621_v23 = vpop.permute.xlu0 %819 }
  0x84   : > { %967 = vrot.lane.b32.xlu0 %v740_v43, %s2274_s24 }
  0x85   : > { %935 = vrot.lane.b32.xlu1 %v2573_v44, %s2273_s23 }
  0x88   : > { %969 = vrot.lane.b32.xlu0 %v597_v3, %s2274_s24 }
  0x89   : > { %937 = vrot.lane.b32.xlu1 %v557_v4, %s2273_s23 }
  0x8c   : > { %1015 = vrot.lane.b32.xlu0 %v788_v50, %s2275_s25 }
  0x8d   : > { %983 = vrot.lane.b32.xlu1 %v748_v47, %s2274_s24  ;;  %v524_v47 = vld [vmem:[#allocation2 + $0xc7] sm:$0xff] }
  0x8e   : > { %v2675_v51 = vpack.c.bf16 %v525_v48, %v524_v47 }
  0x90   : > { %1017 = vrot.lane.b32.xlu0 %v645_v10, %s2275_s25 }
  0x91   : > { %985 = vrot.lane.b32.xlu1 %v605_v11, %s2274_s24 }
  0x94   : > { %1063 = vrot.lane.b32.xlu0 %v549_v57, %s2276_s26 }
  0x95   : > { %1031 = vrot.lane.b32.xlu1 %v796_v53, %s2275_s25 }
  0x98   : > { %1065 = vrot.lane.b32.xlu0 %v2613_v16, %s2276_s26 }
  0x99   : > { %1033 = vrot.lane.b32.xlu1 %v653_v17, %s2275_s25 }
  0x9c   : > { %1111 = vrot.lane.b32.xlu0 %v597_v3, %s2278_s5 }
  0x9d   : > { %1079 = vrot.lane.b32.xlu1 %v557_v4, %s2276_s26  ;;  %v2628_v25 = vpop.permute.xlu0 %867 }
  0xa0   : > { %1113 = vrot.lane.b32.xlu0 %v742_v22, %s2278_s5 }
  0xa1   : > { %1081 = vrot.lane.b32.xlu1 %v2623_v24, %s2276_s26 }
  0xa4   : > { %1159 = vrot.lane.b32.xlu0 %v645_v10, %s2279_s6 }
  0xa5   : > { %1127 = vrot.lane.b32.xlu1 %v605_v11, %s2278_s5 }
  0xa6   : > { %v2634_v32 = vpop.permute.xlu0 %835 }
  0xa7   : > { %v2636_v33 = vpop.permute.xlu1 %821 }
  0xa8   : > { %827 = vrot.lane.b32.xlu0 %v597_v3, %s2271_s21  ;;  %v371_v3 = vld [vmem:[#allocation2 + $0xf] sm:$0xff]  ;;  %v1192_v58 = vsel %vm199_vm0, %v2509_v56, %v2636_v33  ;;  %v685_v33 = vld [vmem:[#allocation2 + $0x1e7] sm:$0xff] }
  0xa9   : > { %1129 = vrot.lane.b32.xlu1 %v2632_v29, %s2278_s5  ;;  %v402_v7 = vpack.c.bf16 %v371_v3, %v370_v1  ;;  %v686_v3 = vld [vmem:[#allocation2 + $0x1ef] sm:$0xff] }
  0xaa   : > { %v2641_v35 = vpop.permute.xlu0 %869 }
  0xab   : > { %v2643_v36 = vpop.permute.xlu1 %837  ;;  %v1189_v15 = vsel %vm199_vm0, %v402_v7, %v2621_v23 }
  0xac   : > { %1161 = vrot.lane.b32.xlu0 %v790_v34, %s2279_s6  ;;  %v1237_v21 = vsel %vm1235_vm4, %v1189_v15, %v2628_v25 }
  0xad   : > { %1175 = vrot.lane.b32.xlu1 %v653_v17, %s2279_s6 }
  0xae   : > { %v2647_v37 = vpop.permute.xlu0 %915 }
  0xaf   : > { %v2649_v40 = vpop.permute.xlu1 %883  ;;  %v1270_v23 = vsel %vm1268_vm5, %v1237_v21, %v2647_v37  ;;  %v733_v21 = vld [vmem:[#allocation2 + $0x1e8] sm:$0xff] }
  0xb0   : > { %829 = vrot.lane.b32.xlu0 %v742_v22, %s2271_s21 }
  0xb1   : > { %843 = vrot.lane.b32.xlu1 %v605_v11, %s2271_s21  ;;  %v589_v11 = vld [vmem:[#allocation2 + $0x1d0] sm:$0xff] }
  0xb2   : > { %v2655_v42 = vpop.permute.xlu0 %917 }
  0xb3   : > { %v2657_v43 = vpop.permute.xlu1 %885 }
  0xb4   : > { %875 = vrot.lane.b32.xlu0 %v645_v10, %s2272_s22  ;;  %v588_v10 = vld [vmem:[#allocation2 + $0x1c8] sm:$0xff] }
  0xb5   : > { %1177 = vrot.lane.b32.xlu1 %v2653_v41, %s2279_s6  ;;  %v2710_v14 = vpack.c.bf16 %v589_v11, %v588_v10 }
  0xb6   : > { %v2662_v45 = vpop.permute.xlu0 %963 }
  0xb7   : > { %v2664_v46 = vpop.permute.xlu1 %931 }
  0xb8   : > { %877 = vrot.lane.b32.xlu0 %v790_v34, %s2272_s22 }
  0xb9   : > { %845 = vrot.lane.b32.xlu1 %v2632_v29, %s2271_s21 }
  0xba   : > { %v2669_v49 = vpop.permute.xlu0 %965 }
  0xbb   : > { %v2671_v50 = vpop.permute.xlu1 %933 }
  0xbc   : > { %923 = vrot.lane.b32.xlu0 %v2613_v16, %s2273_s23 }
  0xbd   : > { %891 = vrot.lane.b32.xlu1 %v653_v17, %s2272_s22 }
  0xbe   : > { %v1012_v52 = vpop.permute.xlu0 %1011 }
  0xbf   : > { %v2678_v53 = vpop.permute.xlu1 %979 }
  0xc0   : > { %925 = vrot.lane.b32.xlu0 %v2675_v51, %s2273_s23 }
  0xc1   : > { %893 = vrot.lane.b32.xlu1 %v2653_v41, %s2272_s22 }
  0xc2   : > { %v2684_v57 = vpop.permute.xlu0 %1013 }
  0xc3   : > { %v2686_v60 = vpop.permute.xlu1 %981 }
  0xc4   : > { %971 = vrot.lane.b32.xlu0 %v742_v22, %s2274_s24  ;;  %v669_v22 = vld [vmem:[#allocation2 + $0xe7] sm:$0xff] }
  0xc5   : > { %939 = vrot.lane.b32.xlu1 %v2623_v24, %s2273_s23  ;;  %v2731_v39 = vpack.c.bf16 %v670_v26, %v669_v22  ;;  %v734_v22 = vld [vmem:[#allocation2 + $0x1f0] sm:$0xff] }
  0xc6   : > { %v1060_v0 = vpop.permute.xlu0 %1059 }
  0xc7   : > { %v2695_v4 = vpop.permute.xlu1 %1027 }
  0xc8   : > { %973 = vrot.lane.b32.xlu0 %v2689_v61, %s2274_s24 }
  0xc9   : > { %941 = vrot.lane.b32.xlu1 %v2693_v63, %s2273_s23 }
  0xca   : > { %v2701_v9 = vpop.permute.xlu0 %1061 }
  0xcb   : > { %v2703_v12 = vpop.permute.xlu1 %1029 }
  0xcc   : > { %1019 = vrot.lane.b32.xlu0 %v790_v34, %s2275_s25  ;;  %v1303_v34 = vsel %vm1301_vm6, %v1270_v23, %v2662_v45 }
  0xcd   : > { %987 = vrot.lane.b32.xlu1 %v2632_v29, %s2274_s24  ;;  %v636_v29 = vld [vmem:[#allocation2 + $0x1c9] sm:$0xff]  ;;  %v1336_v38 = vsel %vm1334_vm7, %v1303_v34, %v1012_v52  ;;  %v1213_v52 = vsel %vm199_vm0, %v2722_v31, %v2634_v32 }
  0xce   : > { %v1108_v17 = vpop.permute.xlu0 %1107  ;;  %v1369_v37 = vsel %vm1367_vm8, %v1336_v38, %v1060_v0  ;;  %v2736_v47 = vpack.c.bf16 %v637_v30, %v636_v29  ;;  %v718_v32 = vld [vmem:[#allocation2 + $0xf0] sm:$0xff]  ;;  %v1253_v0 = vsel %vm1235_vm4, %v1213_v52, %v2649_v40 }
  0xcf   : > { %v1076_v18 = vpop.permute.xlu1 %1075  ;;  %v1402_v45 = vsel %vm1400_vm9, %v1369_v37, %v1108_v17  ;;  %v1286_v5 = vsel %vm1268_vm5, %v1253_v0, %v2664_v46  ;;  %v766_v29 = vld [vmem:[#allocation2 + $0xf1] sm:$0xff] }
  0xd0   : > { %1021 = vrot.lane.b32.xlu0 %v2706_v13, %s2275_s25  ;;  %v1319_v7 = vsel %vm1301_vm6, %v1286_v5, %v2678_v53  ;;  %v782_v52 = vld [vmem:[#allocation2 + $0x1f1] sm:$0xff]  ;;  %v544_v5 = vld [vmem:[#allocation2 + $0x207] sm:$0xff] }
  0xd1   : > { %989 = vrot.lane.b32.xlu1 %v2710_v14, %s2274_s24  ;;  %v1352_v10 = vsel %vm1334_vm7, %v1319_v7, %v2695_v4 }
  0xd2   : > { %v1110_v27 = vpop.permute.xlu0 %1109  ;;  %v1385_v53 = vsel %vm1367_vm8, %v1352_v10, %v1076_v18 }
  0xd3   : > { %v2726_v25 = vpop.permute.xlu1 %1077 }
  0xd4   : > { %1067 = vrot.lane.b32.xlu0 %v2675_v51, %s2276_s26 }
  0xd5   : > { %1035 = vrot.lane.b32.xlu1 %v2653_v41, %s2275_s25  ;;  %v1239_v41 = vsel %vm1235_vm4, %v1192_v58, %v2641_v35 }
  0xd6   : > { %v1156_v48 = vpop.permute.xlu0 %1155  ;;  %v1272_v1 = vsel %vm1268_vm5, %v1239_v41, %v2655_v42  ;;  %v2769_v42 = vpack.c.bf16 %v718_v32, %v717_v59 }
  0xd7   : > { %v1124_v54 = vpop.permute.xlu1 %1123  ;;  %v1435_v55 = vsel %vm1433_vm10, %v1402_v45, %v1156_v48  ;;  %v1305_v35 = vsel %vm1301_vm6, %v1272_v1, %v2669_v49  ;;  %v2777_v49 = vpack.c.bf16 %v686_v3, %v685_v33  ;;  %v781_v48 = vld [vmem:[#allocation2 + $0x1e9] sm:$0xff] }
  0xd8   : > { %1069 = vrot.lane.b32.xlu0 %v2731_v39, %s2276_s26  ;;  %2206 = vmatprep.mubr.msk.bf16.mxu0 %vm1481_vm11, %v1435_v55  ;;  %v1338_v40 = vsel %vm1334_vm7, %v1305_v35, %v2684_v57  ;;  %v1418_v15 = vsel %vm1400_vm9, %v1385_v53, %v1124_v54  ;;  %v576_v1 = vld [vmem:[#allocation2 + $0x108] sm:$0xff]  ;;  %v577_v33 = vld [vmem:[#allocation2 + $0x110] sm:$0xff] }
  0xd9   : > { %1037 = vrot.lane.b32.xlu1 %v2736_v47, %s2275_s25  ;;  %v1371_v46 = vsel %vm1367_vm8, %v1338_v40, %v2701_v9  ;;  %v1216_v9 = vsel %vm199_vm0, %v2520_v2, %v2643_v36  ;;  %v545_v35 = vld [vmem:[#allocation2 + $0x20f] sm:$0xff] }
  0xda   : > { %v2757_v56 = vpop.permute.xlu0 %823  ;;  %v1404_v57 = vsel %vm1400_vm9, %v1371_v46, %v1110_v27  ;;  %v1255_v18 = vsel %vm1235_vm4, %v1216_v9, %v2657_v43  ;;  %v752_v43 = vpack.c.bf16 %v734_v22, %v733_v21  ;;  %v765_v27 = vld [vmem:[#allocation2 + $0xe9] sm:$0xff]  ;;  %v561_v7 = vpack.c.bf16 %v545_v35, %v544_v5  ;;  %v625_v53 = vld [vmem:[#allocation2 + $0x111] sm:$0xff] }
  0xdb   : > { %v1126_v6 = vpop.permute.xlu1 %1125  ;;  %v1288_v26 = vsel %vm1268_vm5, %v1255_v18, %v2671_v50  ;;  %v624_v46 = vld [vmem:[#allocation2 + $0x109] sm:$0xff]  ;;  %v1195_v18 = vsel %vm199_vm0, %v2514_v62, %v2757_v56 }
  0xdc   : > { %1115 = vrot.lane.b32.xlu0 %v2689_v61, %s2278_s5  ;;  %v1321_v2 = vsel %vm1301_vm6, %v1288_v26, %v2686_v60  ;;  %v673_v22 = vld [vmem:[#allocation2 + $0x127] sm:$0xff]  ;;  %v674_v26 = vld [vmem:[#allocation2 + $0x12f] sm:$0xff] }
  0xdd   : > { %1083 = vrot.lane.b32.xlu1 %v2693_v63, %s2276_s26  ;;  %v1354_v36 = vsel %vm1334_vm7, %v1321_v2, %v2703_v12  ;;  %v792_v12 = vpack.c.bf16 %v766_v29, %v765_v27  ;;  %v641_v27 = vld [vmem:[#allocation2 + $0x211] sm:$0xff]  ;;  %v698_v56 = vpack.c.bf16 %v674_v26, %v673_v22 }
  0xde   : > { %v1158_v11 = vpop.permute.xlu0 %1157  ;;  %v1387_v50 = vsel %vm1367_vm8, %v1354_v36, %v2726_v25 }
  0xdf   : > { %v1437_v17 = vsel %vm1433_vm10, %v1404_v57, %v1158_v11  ;;  %v1172_v19 = vpop.permute.xlu1 %1171  ;;  %v1420_v34 = vsel %vm1400_vm9, %v1387_v50, %v1126_v6  ;;  %v592_v11 = vld [vmem:[#allocation2 + $0x208] sm:$0xff] }
  0xe0   : > { %1117 = vrot.lane.b32.xlu0 %v2769_v42, %s2278_s5  ;;  %2207 = vmatmul.mubr.msk.bf16.vlgmr.msra.gmra.mrb[0].mxu0 %vm1481_vm11, %v1437_v17  ;;  %v1451_v4 = vsel %vm1433_vm10, %v1418_v15, %v1172_v19  ;;  %v593_v15 = vld [vmem:[#allocation2 + $0x210] sm:$0xff] }
  0xe1   : > { %1085 = vrot.lane.b32.xlu1 %v2777_v49, %s2276_s26  ;;  %2222 = vmatprep.mubr.msk.bf16.mxu1 %vm1481_vm11, %v1451_v4  ;;  %v2872_v19 = vpack.c.bf16 %v593_v15, %v592_v11 }
  0xe2   : > { %v2795_v20 = vpop.permute.xlu0 %825 }
  0xe3   : > { %v2799_v23 = vpop.permute.xlu1 %839 }
  0xe4   : > { %1163 = vrot.lane.b32.xlu0 %v2706_v13, %s2279_s6 }
  0xe5   : > { %1131 = vrot.lane.b32.xlu1 %v2710_v14, %s2278_s5 }
  0xe6   : > { %v2811_v30 = vpop.permute.xlu0 %871 }
  0xe7   : > { %v1174_v60 = vpop.permute.xlu1 %1173  ;;  %v1241_v21 = vsel %vm1235_vm4, %v1195_v18, %v2811_v30  ;;  %v738_v18 = vld [vmem:[#allocation2 + $0x230] sm:$0xff] }
  0xe8   : > { %v1453_v38 = vsel %vm1433_vm10, %v1420_v34, %v1174_v60  ;;  %831 = vrot.lane.b32.xlu0 %v2689_v61, %s2271_s21  ;;  %v800_v61 = vpack.c.bf16 %v782_v52, %v781_v48  ;;  %v1198_v60 = vsel %vm199_vm0, %v2554_v28, %v2795_v20  ;;  %v721_v28 = vld [vmem:[#allocation2 + $0x128] sm:$0xff]  ;;  %v722_v20 = vld [vmem:[#allocation2 + $0x130] sm:$0xff] }
  0xe9   : > { %1133 = vrot.lane.b32.xlu1 %v752_v43, %s2278_s5  ;;  %2223 = vmatmul.mubr.msk.bf16.vlgmr.msra.gmra.mrb[0].mxu1 %vm1481_vm11, %v1453_v38 }
  0xea   : > { %v2819_v37 = vpop.permute.xlu0 %873 }
  0xeb   : > { %v2821_v45 = vpop.permute.xlu1 %841  ;;  %v1243_v52 = vsel %vm1235_vm4, %v1198_v60, %v2819_v37 }
  0xec   : > { %1165 = vrot.lane.b32.xlu0 %v792_v12, %s2279_s6 }
  0xed   : > { %1179 = vrot.lane.b32.xlu1 %v2736_v47, %s2279_s6 }
  0xee   : > { %v920_v25 = vpop.permute.xlu0 %919 }
  0xef   : > { %v2826_v54 = vpop.permute.xlu1 %887  ;;  %v1274_v2 = vsel %vm1268_vm5, %v1241_v21, %v920_v25 }
  0xf0   : > { %833 = vrot.lane.b32.xlu0 %v2769_v42, %s2271_s21 }
  0xf1   : > { %847 = vrot.lane.b32.xlu1 %v2710_v14, %s2271_s21 }
  0xf2   : > { %v2832_v55 = vpop.permute.xlu0 %921 }
  0xf3   : > { %v2834_v58 = vpop.permute.xlu1 %889 }
  0xf4   : > { %879 = vrot.lane.b32.xlu0 %v2706_v13, %s2272_s22 }
  0xf5   : > { %1181 = vrot.lane.b32.xlu1 %v800_v61, %s2279_s6 }
  0xf6   : > { %v968_v41 = vpop.permute.xlu0 %967 }
  0xf7   : > { %v2839_v59 = vpop.permute.xlu1 %935  ;;  %v1307_v29 = vsel %vm1301_vm6, %v1274_v2, %v968_v41  ;;  %v1276_v41 = vsel %vm1268_vm5, %v1243_v52, %v2832_v55  ;;  %v746_v55 = vpack.c.bf16 %v722_v20, %v721_v28 }
  0xf8   : > { %881 = vrot.lane.b32.xlu0 %v792_v12, %s2272_s22 }
  0xf9   : > { %849 = vrot.lane.b32.xlu1 %v752_v43, %s2271_s21 }
  0xfa   : > { %v2843_v32 = vpop.permute.xlu0 %969 }
  0xfb   : > { %v2845_v14 = vpop.permute.xlu1 %937 }
  0xfc   : > { %927 = vrot.lane.b32.xlu0 %v2731_v39, %s2273_s23 }
  0xfd   : > { %895 = vrot.lane.b32.xlu1 %v2736_v47, %s2272_s22  ;;  %v601_v47 = vpack.c.bf16 %v577_v33, %v576_v1  ;;  %v689_v1 = vld [vmem:[#allocation2 + $0x227] sm:$0xff]  ;;  %v690_v33 = vld [vmem:[#allocation2 + $0x22f] sm:$0xff] }
  0xfe   : > { %v1016_v13 = vpop.permute.xlu0 %1015 }
  0xff   : > { %v2851_v0 = vpop.permute.xlu1 %983  ;;  %v1340_v62 = vsel %vm1334_vm7, %v1307_v29, %v1016_v13 }
 0x100   : > { %929 = vrot.lane.b32.xlu0 %v2722_v31, %s2273_s23 }
 0x101   : > { %897 = vrot.lane.b32.xlu1 %v800_v61, %s2272_s22 }
 0x102   : > { %v2856_v3 = vpop.permute.xlu0 %1017 }
 0x103   : > { %v2858_v6 = vpop.permute.xlu1 %985 }
 0x104   : > { %975 = vrot.lane.b32.xlu0 %v2769_v42, %s2274_s24  ;;  %v2869_v42 = vpack.c.bf16 %v625_v53, %v624_v46 }
 0x105   : > { %943 = vrot.lane.b32.xlu1 %v2777_v49, %s2273_s23 }
 0x106   : > { %v1064_v40 = vpop.permute.xlu0 %1063 }
 0x107   : > { %v1032_v10 = vpop.permute.xlu1 %1031  ;;  %v1373_v30 = vsel %vm1367_vm8, %v1340_v62, %v1064_v40 }
 0x108   : > { %977 = vrot.lane.b32.xlu0 %v601_v47, %s2274_s24 }
 0x109   : > { %945 = vrot.lane.b32.xlu1 %v561_v7, %s2273_s23 }
 0x10a   : > { %v1066_v57 = vpop.permute.xlu0 %1065 }
 0x10b   : > { %v2866_v17 = vpop.permute.xlu1 %1033 }
 0x10c   : > { %1023 = vrot.lane.b32.xlu0 %v792_v12, %s2275_s25 }
 0x10d   : > { %991 = vrot.lane.b32.xlu1 %v752_v43, %s2274_s24  ;;  %v640_v43 = vld [vmem:[#allocation2 + $0x209] sm:$0xff] }
 0x10e   : > { %v1112_v4 = vpop.permute.xlu0 %1111  ;;  %v2890_v34 = vpack.c.bf16 %v641_v27, %v640_v43 }
 0x10f   : > { %v1080_v9 = vpop.permute.xlu1 %1079  ;;  %v1406_v38 = vsel %vm1400_vm9, %v1373_v30, %v1112_v4 }
 0x110   : > { %1025 = vrot.lane.b32.xlu0 %v2869_v42, %s2275_s25 }
 0x111   : > { %993 = vrot.lane.b32.xlu1 %v2872_v19, %s2274_s24 }
 0x112   : > { %v1114_v36 = vpop.permute.xlu0 %1113 }
 0x113   : > { %v1082_v50 = vpop.permute.xlu1 %1081 }
 0x114   : > { %1071 = vrot.lane.b32.xlu0 %v2722_v31, %s2276_s26  ;;  %v1219_v31 = vsel %vm199_vm0, %v2527_v8, %v2799_v23  ;;  %v1309_v23 = vsel %vm1301_vm6, %v1276_v41, %v2843_v32  ;;  %v378_v41 = vld [vmem:[#allocation2 + $0x87] sm:$0xff] }
 0x115   : > { %1039 = vrot.lane.b32.xlu1 %v800_v61, %s2275_s25  ;;  %v1257_v61 = vsel %vm1235_vm4, %v1219_v31, %v2826_v54  ;;  %v1342_v54 = vsel %vm1334_vm7, %v1309_v23, %v2856_v3 }
 0x116   : > { %v1160_v12 = vpop.permute.xlu0 %1159  ;;  %v1290_v8 = vsel %vm1268_vm5, %v1257_v61, %v2839_v59  ;;  %v1375_v40 = vsel %vm1367_vm8, %v1342_v54, %v1066_v57  ;;  %v706_v59 = vpack.c.bf16 %v690_v33, %v689_v1  ;;  %v770_v57 = vld [vmem:[#allocation2 + $0x131] sm:$0xff] }
 0x117   : > { %v1439_v25 = vsel %vm1433_vm10, %v1406_v38, %v1160_v12  ;;  %v1128_v48 = vpop.permute.xlu1 %1127  ;;  %v1323_v5 = vsel %vm1301_vm6, %v1290_v8, %v2851_v0  ;;  %v1408_v32 = vsel %vm1400_vm9, %v1375_v40, %v1114_v36  ;;  %v379_v1 = vld [vmem:[#allocation2 + $0x8f] sm:$0xff] }
 0x118   : > { %1073 = vrot.lane.b32.xlu0 %v698_v56, %s2276_s26  ;;  %2210 = vmatprep.mubr.msk.bf16.mxu0 %vm1481_vm11, %v1439_v25  ;;  %v1356_v35 = vsel %vm1334_vm7, %v1323_v5, %v1032_v10  ;;  %v769_v10 = vld [vmem:[#allocation2 + $0x129] sm:$0xff]  ;;  %v406_v8 = vpack.c.bf16 %v379_v1, %v378_v41 }
 0x119   : > { %1041 = vrot.lane.b32.xlu1 %v2890_v34, %s2275_s25  ;;  %v1389_v46 = vsel %vm1367_vm8, %v1356_v35, %v1080_v9  ;;  %v737_v9 = vld [vmem:[#allocation2 + $0x228] sm:$0xff] }
 0x11a   : > { %v2910_v13 = vpop.permute.xlu0 %827  ;;  %v1422_v0 = vsel %vm1400_vm9, %v1389_v46, %v1128_v48  ;;  %v395_v35 = vld [vmem:[#allocation2 + $0x18f] sm:$0xff] }
 0x11b   : > { %v1130_v37 = vpop.permute.xlu1 %1129  ;;  %v1201_v5 = vsel %vm199_vm0, %v406_v8, %v2910_v13 }
 0x11c   : > { %1119 = vrot.lane.b32.xlu0 %v601_v47, %s2278_s5 }
 0x11d   : > { %1087 = vrot.lane.b32.xlu1 %v561_v7, %s2276_s26  ;;  %v1222_v7 = vsel %vm199_vm0, %v2573_v44, %v2821_v45  ;;  %v794_v44 = vpack.c.bf16 %v770_v57, %v769_v10 }
 0x11e   : > { %v1162_v53 = vpop.permute.xlu0 %1161  ;;  %v1259_v15 = vsel %vm1235_vm4, %v1222_v7, %v2834_v58  ;;  %v754_v58 = vpack.c.bf16 %v738_v18, %v737_v9 }
 0x11f   : > { %v1441_v11 = vsel %vm1433_vm10, %v1408_v32, %v1162_v53  ;;  %v1176_v3 = vpop.permute.xlu1 %1175  ;;  %v1292_v21 = vsel %vm1268_vm5, %v1259_v15, %v2845_v14 }
 0x120   : > { %v1455_v47 = vsel %vm1433_vm10, %v1422_v0, %v1176_v3  ;;  %1121 = vrot.lane.b32.xlu0 %v746_v55, %s2278_s5  ;;  %2211 = vmatmul.mubr.msk.bf16.gmra.mrb[4].mxu0 %vm1481_vm11, %v1441_v11  ;;  %v1325_v26 = vsel %vm1301_vm6, %v1292_v21, %v2858_v6  ;;  %v394_v55 = vld [vmem:[#allocation2 + $0x187] sm:$0xff] }
 0x121   : > { %1089 = vrot.lane.b32.xlu1 %v706_v59, %s2276_s26  ;;  %2226 = vmatprep.mubr.msk.bf16.mxu1 %vm1481_vm11, %v1455_v47  ;;  %v1358_v45 = vsel %vm1334_vm7, %v1325_v26, %v2866_v17  ;;  %v785_v17 = vld [vmem:[#allocation2 + $0x229] sm:$0xff]  ;;  %v414_v0 = vpack.c.bf16 %v395_v35, %v394_v55 }
 0x122   : > { %v830_v4 = vpop.permute.xlu0 %829  ;;  %v1391_v2 = vsel %vm1367_vm8, %v1358_v45, %v1082_v50 }
 0x123   : > { %v844_v22 = vpop.permute.xlu1 %843  ;;  %v1424_v14 = vsel %vm1400_vm9, %v1391_v2, %v1130_v37  ;;  %v1204_v3 = vsel %vm199_vm0, %v2613_v16, %v830_v4 }
 0x124   : > { %1167 = vrot.lane.b32.xlu0 %v2869_v42, %s2279_s6  ;;  %v786_v42 = vld [vmem:[#allocation2 + $0x231] sm:$0xff]  ;;  %v1225_v57 = vsel %vm199_vm0, %v414_v0, %v844_v22 }
 0x125   : > { %1135 = vrot.lane.b32.xlu1 %v2872_v19, %s2278_s5  ;;  %v802_v19 = vpack.c.bf16 %v786_v42, %v785_v17 }
 0x126   : > { %v876_v36 = vpop.permute.xlu0 %875 }
 0x127   : > { %v1178_v43 = vpop.permute.xlu1 %1177  ;;  %v1245_v54 = vsel %vm1235_vm4, %v1201_v5, %v876_v36 }
 0x128   : > { %v1457_v27 = vsel %vm1433_vm10, %v1424_v14, %v1178_v43  ;;  %1169 = vrot.lane.b32.xlu0 %v794_v44, %s2279_s6 }
 0x129   : > { %1137 = vrot.lane.b32.xlu1 %v754_v58, %s2278_s5  ;;  %2227 = vmatmul.mubr.msk.bf16.gmra.mrb[4].mxu1 %vm1481_vm11, %v1457_v27 }
 0x12a   : > { %v878_v6 = vpop.permute.xlu0 %877 }
 0x12b   : > { %v2954_v29 = vpop.permute.xlu1 %845  ;;  %v1247_v15 = vsel %vm1235_vm4, %v1204_v3, %v878_v6 }
 0x12c   : > { %v1228_v42 = vsel %vm199_vm0, %v2623_v24, %v2954_v29 }
 0x12d   : > { %1183 = vrot.lane.b32.xlu1 %v2890_v34, %s2279_s6 }
 0x12e   : > { %v924_v50 = vpop.permute.xlu0 %923 }
 0x12f   : > { %v892_v62 = vpop.permute.xlu1 %891  ;;  %v1278_v40 = vsel %vm1268_vm5, %v1245_v54, %v924_v50 }
 0x130   : > { %v1261_v9 = vsel %vm1235_vm4, %v1225_v57, %v892_v62 }
 0x131   : > { %1185 = vrot.lane.b32.xlu1 %v802_v19, %s2279_s6 }
 0x132   : > { %v926_v56 = vpop.permute.xlu0 %925 }
 0x133   : > { %v894_v30 = vpop.permute.xlu1 %893  ;;  %v1280_v18 = vsel %vm1268_vm5, %v1247_v15, %v926_v56 }
 0x134   : > { %v1263_v19 = vsel %vm1235_vm4, %v1228_v42, %v894_v30 }
 0x136   : > { %v972_v60 = vpop.permute.xlu0 %971 }
 0x137   : > { %v940_v38 = vpop.permute.xlu1 %939  ;;  %v1311_v46 = vsel %vm1301_vm6, %v1278_v40, %v972_v60 }
 0x138   : > { %v1294_v26 = vsel %vm1268_vm5, %v1261_v9, %v940_v38 }
 0x13a   : > { %v974_v12 = vpop.permute.xlu0 %973 }
 0x13b   : > { %v942_v25 = vpop.permute.xlu1 %941  ;;  %v1313_v16 = vsel %vm1301_vm6, %v1280_v18, %v974_v12 }
 0x13c   : > { %v1296_v62 = vsel %vm1268_vm5, %v1263_v19, %v942_v25 }
 0x13e   : > { %v1020_v48 = vpop.permute.xlu0 %1019 }
 0x13f   : > { %v988_v31 = vpop.permute.xlu1 %987  ;;  %v1344_v53 = vsel %vm1334_vm7, %v1311_v46, %v1020_v48 }
 0x140   : > { %v1327_v44 = vsel %vm1301_vm6, %v1294_v26, %v988_v31 }
 0x142   : > { %v1022_v52 = vpop.permute.xlu0 %1021 }
 0x143   : > { %v990_v28 = vpop.permute.xlu1 %989  ;;  %v1346_v45 = vsel %vm1334_vm7, %v1313_v16, %v1022_v52 }
 0x144   : > { %v1329_v60 = vsel %vm1301_vm6, %v1296_v62, %v990_v28 }
 0x146   : > { %v1068_v20 = vpop.permute.xlu0 %1067 }
 0x147   : > { %v1036_v61 = vpop.permute.xlu1 %1035  ;;  %v1377_v11 = vsel %vm1367_vm8, %v1344_v53, %v1068_v20 }
 0x148   : > { %v1360_v58 = vsel %vm1334_vm7, %v1327_v44, %v1036_v61 }
 0x14a   : > { %v1070_v34 = vpop.permute.xlu0 %1069 }
 0x14b   : > { %v1038_v33 = vpop.permute.xlu1 %1037  ;;  %v1379_v22 = vsel %vm1367_vm8, %v1346_v45, %v1070_v34 }
 0x14c   : > { %v1362_v38 = vsel %vm1334_vm7, %v1329_v60, %v1038_v33 }
 0x14e   : > { %v1116_v23 = vpop.permute.xlu0 %1115 }
 0x14f   : > { %v1084_v37 = vpop.permute.xlu1 %1083  ;;  %v1410_v13 = vsel %vm1400_vm9, %v1377_v11, %v1116_v23 }
 0x150   : > { %v1393_v2 = vsel %vm1367_vm8, %v1360_v58, %v1084_v37 }
 0x152   : > { %v1118_v59 = vpop.permute.xlu0 %1117 }
 0x153   : > { %v1086_v32 = vpop.permute.xlu1 %1085  ;;  %v1412_v36 = vsel %vm1400_vm9, %v1379_v22, %v1118_v59 }
 0x154   : > { %v1395_v12 = vsel %vm1367_vm8, %v1362_v38, %v1086_v32 }
 0x156   : > { %v1164_v47 = vpop.permute.xlu0 %1163 }
 0x157   : > { %v1443_v7 = vsel %vm1433_vm10, %v1410_v13, %v1164_v47  ;;  %v1132_v10 = vpop.permute.xlu1 %1131 }
 0x158   : > { %2214 = vmatprep.mubr.msk.bf16.mxu0 %vm1481_vm11, %v1443_v7  ;;  %v1426_v43 = vsel %vm1400_vm9, %v1393_v2, %v1132_v10 }
 0x15a   : > { %v832_v21 = vpop.permute.xlu0 %831 }
 0x15b   : > { %v1134_v4 = vpop.permute.xlu1 %1133  ;;  %v1207_v32 = vsel %vm199_vm0, %v2675_v51, %v832_v21 }
 0x15c   : > { %v1428_v31 = vsel %vm1400_vm9, %v1395_v12, %v1134_v4 }
 0x15e   : > { %v1166_v14 = vpop.permute.xlu0 %1165 }
 0x15f   : > { %v1445_v27 = vsel %vm1433_vm10, %v1412_v36, %v1166_v14  ;;  %v1180_v6 = vpop.permute.xlu1 %1179 }
 0x160   : > { %v1459_v17 = vsel %vm1433_vm10, %v1426_v43, %v1180_v6  ;;  %2215 = vmatmul.mubr.msk.bf16.gmra.mrb[8].mxu0 %vm1481_vm11, %v1445_v27 }
 0x161   : > { %2230 = vmatprep.mubr.msk.bf16.mxu1 %vm1481_vm11, %v1459_v17 }
 0x162   : > { %v834_v50 = vpop.permute.xlu0 %833 }
 0x163   : > { %v848_v56 = vpop.permute.xlu1 %847  ;;  %v1210_v0 = vsel %vm199_vm0, %v2731_v39, %v834_v50 }
 0x164   : > { %v1231_v16 = vsel %vm199_vm0, %v2693_v63, %v848_v56 }
 0x166   : > { %v880_v48 = vpop.permute.xlu0 %879 }
 0x167   : > { %v1182_v52 = vpop.permute.xlu1 %1181  ;;  %v1249_v53 = vsel %vm1235_vm4, %v1207_v32, %v880_v48  ;;  %v3042_v48 = vld [vmem:[%s3189_s2] ss:$0 sm:$0xff] }
 0x168   : > { %v1461_v24 = vsel %vm1433_vm10, %v1428_v31, %v1182_v52  ;;  %v3047_v52 = vld [vmem:[%s3190_s3] ss:$0 sm:$0xff] }
 0x169   : > { %2231 = vmatmul.mubr.msk.bf16.gmra.mrb[8].mxu1 %vm1481_vm11, %v1461_v24 }
 0x16a   : > { %v882_v29 = vpop.permute.xlu0 %881 }
 0x16b   : > { %v850_v30 = vpop.permute.xlu1 %849  ;;  %v1251_v10 = vsel %vm1235_vm4, %v1210_v0, %v882_v29 }
 0x16c   : > { %v1234_v43 = vsel %vm199_vm0, %v2777_v49, %v850_v30 }
 0x16e   : > { %v928_v20 = vpop.permute.xlu0 %927 }
 0x16f   : > { %v896_v61 = vpop.permute.xlu1 %895  ;;  %v1282_v11 = vsel %vm1268_vm5, %v1249_v53, %v928_v20 }
 0x170   : > { %v1265_v44 = vsel %vm1235_vm4, %v1231_v16, %v896_v61 }
 0x172   : > { %v930_v25 = vpop.permute.xlu0 %929 }
 0x173   : > { %v898_v41 = vpop.permute.xlu1 %897  ;;  %v1284_v15 = vsel %vm1268_vm5, %v1251_v10, %v930_v25 }
 0x174   : > { %v1267_v27 = vsel %vm1235_vm4, %v1234_v43, %v898_v41 }
 0x176   : > { %v976_v1 = vpop.permute.xlu0 %975 }
 0x177   : > { %v944_v28 = vpop.permute.xlu1 %943  ;;  %v1315_v13 = vsel %vm1301_vm6, %v1282_v11, %v976_v1 }
 0x178   : > { %v1298_v22 = vsel %vm1268_vm5, %v1265_v44, %v944_v28 }
 0x17a   : > { %v978_v34 = vpop.permute.xlu0 %977 }
 0x17b   : > { %v946_v33 = vpop.permute.xlu1 %945  ;;  %v1317_v18 = vsel %vm1301_vm6, %v1284_v15, %v978_v34 }
 0x17c   : > { %v1300_v17 = vsel %vm1268_vm5, %v1267_v27, %v946_v33 }
 0x17e   : > { %v1024_v8 = vpop.permute.xlu0 %1023 }
 0x17f   : > { %v992_v23 = vpop.permute.xlu1 %991  ;;  %v1348_v7 = vsel %vm1334_vm7, %v1315_v13, %v1024_v8 }
 0x180   : > { %v1331_v14 = vsel %vm1301_vm6, %v1298_v22, %v992_v23 }
 0x182   : > { %v1026_v37 = vpop.permute.xlu0 %1025 }
 0x183   : > { %v994_v5 = vpop.permute.xlu1 %993  ;;  %v1350_v26 = vsel %vm1334_vm7, %v1317_v18, %v1026_v37 }
 0x184   : > { %v1333_v50 = vsel %vm1301_vm6, %v1300_v17, %v994_v5 }
 0x186   : > { %v1072_v54 = vpop.permute.xlu0 %1071 }
 0x187   : > { %v1040_v55 = vpop.permute.xlu1 %1039  ;;  %v1381_v57 = vsel %vm1367_vm8, %v1348_v7, %v1072_v54 }
 0x188   : > { %v1364_v63 = vsel %vm1334_vm7, %v1331_v14, %v1040_v55 }
 0x18a   : > { %v1074_v35 = vpop.permute.xlu0 %1073 }
 0x18b   : > { %v1042_v40 = vpop.permute.xlu1 %1041  ;;  %v1383_v4 = vsel %vm1367_vm8, %v1350_v26, %v1074_v35 }
 0x18c   : > { %v1366_v56 = vsel %vm1334_vm7, %v1333_v50, %v1042_v40 }
 0x18e   : > { %v1120_v59 = vpop.permute.xlu0 %1119 }
 0x18f   : > { %v1088_v46 = vpop.permute.xlu1 %1087  ;;  %v1414_v51 = vsel %vm1400_vm9, %v1381_v57, %v1120_v59 }
 0x190   : > { %v1397_v6 = vsel %vm1367_vm8, %v1364_v63, %v1088_v46 }
 0x192   : > { %v1122_v3 = vpop.permute.xlu0 %1121 }
 0x193   : > { %v1090_v47 = vpop.permute.xlu1 %1089  ;;  %v1416_v45 = vsel %vm1400_vm9, %v1383_v4, %v1122_v3 }
 0x194   : > { %v1399_v49 = vsel %vm1367_vm8, %v1366_v56, %v1090_v47 }
 0x196   : > { %v1168_v9 = vpop.permute.xlu0 %1167 }
 0x197   : > { %v1447_v39 = vsel %vm1433_vm10, %v1414_v51, %v1168_v9  ;;  %v1136_v21 = vpop.permute.xlu1 %1135 }
 0x198   : > { %2218 = vmatprep.mubr.msk.bf16.mxu0 %vm1481_vm11, %v1447_v39  ;;  %v1430_v42 = vsel %vm1400_vm9, %v1397_v6, %v1136_v21 }
 0x19a   : > { %v1170_v58 = vpop.permute.xlu0 %1169 }
 0x19b   : > { %v1449_v2 = vsel %vm1433_vm10, %v1416_v45, %v1170_v58  ;;  %v1138_v36 = vpop.permute.xlu1 %1137 }
 0x19c   : > { %2219 = vmatmul.mubr.msk.bf16.gmra.mrb[12].mxu0 %vm1481_vm11, %v1449_v2  ;;  %v1432_v60 = vsel %vm1400_vm9, %v1399_v49, %v1138_v36 }
 0x19f   : > { %v1184_v19 = vpop.permute.xlu1 %1183 }
 0x1a0   : > { %v1463_v62 = vsel %vm1433_vm10, %v1430_v42, %v1184_v19 }
 0x1a1   : > { %2234 = vmatprep.mubr.msk.bf16.mxu1 %vm1481_vm11, %v1463_v62 }
 0x1a3   : > { %v1186_v38 = vpop.permute.xlu1 %1185 }
 0x1a4   : > { %v1465_v12 = vsel %vm1433_vm10, %v1432_v60, %v1186_v38 }
 0x1a5   : > { %2235 = vmatmul.mubr.msk.bf16.gmra.mrb[12].mxu1 %vm1481_vm11, %v1465_v12 }
 0x1b3   : > { %v2208_v31 = vpop.f32.mrb[0].mxu0 }
 0x1b4   : > { %v1691_v24 = vmul.f32 %v2208_v31, %v3042_v48  ;;  %v1555_v29 = vpop.f32.mrb[1].mxu0 }
 0x1b5   : > { %v1689_v30 = vmul.f32 %v3042_v48, %v1555_v29  ;;  %v2209_v20 = vpop.f32.mrb[2].mxu0 }
 0x1b6   : > { %v1730_v61 = vadd.f32 %v3047_v52, %v1691_v24  ;;  %v1692_v25 = vmul.f32 %v2209_v20, %v3042_v48  ;;  %v1558_v41 = vpop.f32.mrb[3].mxu0 }
 0x1b7   : > { %v1728_v1 = vadd.f32 %v3047_v52, %v1689_v30  ;;  %v1690_v28 = vmul.f32 %v3042_v48, %v1558_v41 }
 0x1b8   : > { %v1762_v34 = vmax.f32 %v1730_v61, 0.0  ;;  %v1731_v33 = vadd.f32 %v3047_v52, %v1692_v25 }
 0x1b9   : > { %v1760_v8 = vmax.f32 %v1728_v1, 0.0  ;;  %v1729_v23 = vadd.f32 %v3047_v52, %v1690_v28 }
 0x1ba   : > { %v2075_v37 = vpack.c.bf16 %v1762_v34, %v1762_v34  ;;  %v1763_v5 = vmax.f32 %v1731_v33, 0.0 }
 0x1bb   : > { %v2073_v54 = vpack.c.bf16 %v1760_v8, %v1760_v8  ;;  %v1761_v55 = vmax.f32 %v1729_v23, 0.0 }
 0x1bc   : > { %1923 = vst.msk [vmem:[%s3061_s13 + $0x8] sm:$0xf] %vm1920_vm12, %v2075_v37  ;;  %v2076_v35 = vpack.c.bf16 %v1763_v5, %v1763_v5  ;;  %v2224_v40 = vpop.f32.mrb[0].mxu1 }
 0x1bd   : > { %1921 = vst.msk [vmem:[%s3061_s13] sm:$0xf] %vm1920_vm12, %v2073_v54  ;;  %v2074_v59 = vpack.c.bf16 %v1761_v55, %v1761_v55  ;;  %v1707_v46 = vmul.f32 %v2224_v40, %v3042_v48  ;;  %v1619_v32 = vpop.f32.mrb[1].mxu1 }
 0x1be   : > { %1924 = vst.msk [vmem:[%s3061_s13 + $0xc] sm:$0xf] %vm1920_vm12, %v2076_v35  ;;  %v1705_v53 = vmul.f32 %v3042_v48, %v1619_v32  ;;  %v2225_v0 = vpop.f32.mrb[2].mxu1 }
 0x1bf   : > { %1922 = vst.msk [vmem:[%s3061_s13 + $0x4] sm:$0xf] %vm1920_vm12, %v2074_v59  ;;  %v1746_v11 = vadd.f32 %v3047_v52, %v1707_v46  ;;  %v1708_v3 = vmul.f32 %v2225_v0, %v3042_v48  ;;  %v1622_v13 = vpop.f32.mrb[3].mxu1 }
 0x1c0   : > { %v1744_v47 = vadd.f32 %v3047_v52, %v1705_v53  ;;  %v1706_v7 = vmul.f32 %v3042_v48, %v1622_v13 }
 0x1c1   : > { %v1778_v10 = vmax.f32 %v1746_v11, 0.0  ;;  %v1747_v57 = vadd.f32 %v3047_v52, %v1708_v3 }
 0x1c2   : > { %v1776_v15 = vmax.f32 %v1744_v47, 0.0  ;;  %v1745_v51 = vadd.f32 %v3047_v52, %v1706_v7 }
 0x1c3   : > { %v2091_v9 = vpack.c.bf16 %v1778_v10, %v1778_v10  ;;  %v1779_v18 = vmax.f32 %v1747_v57, 0.0 }
 0x1c4   : > { %v2089_v39 = vpack.c.bf16 %v1776_v15, %v1776_v15  ;;  %v1777_v21 = vmax.f32 %v1745_v51, 0.0 }
 0x1c5   : > { %1939 = vst.msk [vmem:[%s3061_s13 + $0x48] sm:$0xf] %vm1920_vm12, %v2091_v9  ;;  %v2092_v26 = vpack.c.bf16 %v1779_v18, %v1779_v18 }
 0x1c6   : > { %1937 = vst.msk [vmem:[%s3061_s13 + $0x40] sm:$0xf] %vm1920_vm12, %v2089_v39  ;;  %v2090_v16 = vpack.c.bf16 %v1777_v21, %v1777_v21 }
 0x1c7   : > { %1940 = vst.msk [vmem:[%s3061_s13 + $0x4c] sm:$0xf] %vm1920_vm12, %v2092_v26 }
 0x1c8   : > { %1938 = vst.msk [vmem:[%s3061_s13 + $0x44] sm:$0xf] %vm1920_vm12, %v2090_v16 }
 0x1f3   : > { %v2212_v4 = vpop.f32.mrb[4].mxu0 }
 0x1f4   : > { %v1695_v44 = vmul.f32 %v2212_v4, %v3042_v48  ;;  %v1571_v45 = vpop.f32.mrb[5].mxu0 }
 0x1f5   : > { %v1693_v58 = vmul.f32 %v3042_v48, %v1571_v45  ;;  %v2213_v22 = vpop.f32.mrb[6].mxu0 }
 0x1f6   : > { %v1734_v2 = vadd.f32 %v3047_v52, %v1695_v44  ;;  %v1696_v36 = vmul.f32 %v2213_v22, %v3042_v48  ;;  %v1574_v14 = vpop.f32.mrb[7].mxu0 }
 0x1f7   : > { %v1732_v43 = vadd.f32 %v3047_v52, %v1693_v58  ;;  %v1694_v63 = vmul.f32 %v3042_v48, %v1574_v14 }
 0x1f8   : > { %v1766_v27 = vmax.f32 %v1734_v2, 0.0  ;;  %v1735_v6 = vadd.f32 %v3047_v52, %v1696_v36 }
 0x1f9   : > { %v1764_v17 = vmax.f32 %v1732_v43, 0.0  ;;  %v1733_v42 = vadd.f32 %v3047_v52, %v1694_v63 }
 0x1fa   : > { %v2079_v19 = vpack.c.bf16 %v1766_v27, %v1766_v27  ;;  %v1767_v50 = vmax.f32 %v1735_v6, 0.0 }
 0x1fb   : > { %v2077_v62 = vpack.c.bf16 %v1764_v17, %v1764_v17  ;;  %v1765_v56 = vmax.f32 %v1733_v42, 0.0 }
 0x1fc   : > { %1927 = vst.msk [vmem:[%s3061_s13 + $0x18] sm:$0xf] %vm1920_vm12, %v2079_v19  ;;  %v2080_v49 = vpack.c.bf16 %v1767_v50, %v1767_v50  ;;  %v2228_v60 = vpop.f32.mrb[4].mxu1 }
 0x1fd   : > { %1925 = vst.msk [vmem:[%s3061_s13 + $0x10] sm:$0xf] %vm1920_vm12, %v2077_v62  ;;  %v2078_v38 = vpack.c.bf16 %v1765_v56, %v1765_v56  ;;  %v1711_v12 = vmul.f32 %v2228_v60, %v3042_v48  ;;  %v1635_v31 = vpop.f32.mrb[5].mxu1 }
 0x1fe   : > { %1928 = vst.msk [vmem:[%s3061_s13 + $0x1c] sm:$0xf] %vm1920_vm12, %v2080_v49  ;;  %v1709_v24 = vmul.f32 %v3042_v48, %v1635_v31  ;;  %v2229_v29 = vpop.f32.mrb[6].mxu1 }
 0x1ff   : > { %1926 = vst.msk [vmem:[%s3061_s13 + $0x14] sm:$0xf] %vm1920_vm12, %v2078_v38  ;;  %v1750_v30 = vadd.f32 %v3047_v52, %v1711_v12  ;;  %v1712_v20 = vmul.f32 %v2229_v29, %v3042_v48  ;;  %v1638_v61 = vpop.f32.mrb[7].mxu1 }
 0x200   : > { %v1748_v25 = vadd.f32 %v3047_v52, %v1709_v24  ;;  %v1710_v41 = vmul.f32 %v3042_v48, %v1638_v61 }
 0x201   : > { %v1782_v1 = vmax.f32 %v1750_v30, 0.0  ;;  %v1751_v28 = vadd.f32 %v3047_v52, %v1712_v20 }
 0x202   : > { %v1780_v34 = vmax.f32 %v1748_v25, 0.0  ;;  %v1749_v33 = vadd.f32 %v3047_v52, %v1710_v41 }
 0x203   : > { %v2095_v8 = vpack.c.bf16 %v1782_v1, %v1782_v1  ;;  %v1783_v23 = vmax.f32 %v1751_v28, 0.0 }
 0x204   : > { %v2093_v37 = vpack.c.bf16 %v1780_v34, %v1780_v34  ;;  %v1781_v5 = vmax.f32 %v1749_v33, 0.0 }
 0x205   : > { %1943 = vst.msk [vmem:[%s3061_s13 + $0x58] sm:$0xf] %vm1920_vm12, %v2095_v8  ;;  %v2096_v54 = vpack.c.bf16 %v1783_v23, %v1783_v23 }
 0x206   : > { %1941 = vst.msk [vmem:[%s3061_s13 + $0x50] sm:$0xf] %vm1920_vm12, %v2093_v37  ;;  %v2094_v55 = vpack.c.bf16 %v1781_v5, %v1781_v5 }
 0x207   : > { %1944 = vst.msk [vmem:[%s3061_s13 + $0x5c] sm:$0xf] %vm1920_vm12, %v2096_v54 }
 0x208   : > { %1942 = vst.msk [vmem:[%s3061_s13 + $0x54] sm:$0xf] %vm1920_vm12, %v2094_v55 }
 0x233   : > { %v2216_v35 = vpop.f32.mrb[8].mxu0 }
 0x234   : > { %v1699_v40 = vmul.f32 %v2216_v35, %v3042_v48  ;;  %v1587_v59 = vpop.f32.mrb[9].mxu0 }
 0x235   : > { %v1697_v46 = vmul.f32 %v3042_v48, %v1587_v59  ;;  %v2217_v32 = vpop.f32.mrb[10].mxu0 }
 0x236   : > { %v1738_v53 = vadd.f32 %v3047_v52, %v1699_v40  ;;  %v1700_v0 = vmul.f32 %v2217_v32, %v3042_v48  ;;  %v1590_v11 = vpop.f32.mrb[11].mxu0 }
 0x237   : > { %v1736_v3 = vadd.f32 %v3047_v52, %v1697_v46  ;;  %v1698_v13 = vmul.f32 %v3042_v48, %v1590_v11 }
 0x238   : > { %v1770_v47 = vmax.f32 %v1738_v53, 0.0  ;;  %v1739_v7 = vadd.f32 %v3047_v52, %v1700_v0 }
 0x239   : > { %v1768_v10 = vmax.f32 %v1736_v3, 0.0  ;;  %v1737_v57 = vadd.f32 %v3047_v52, %v1698_v13 }
 0x23a   : > { %v2083_v15 = vpack.c.bf16 %v1770_v47, %v1770_v47  ;;  %v1771_v51 = vmax.f32 %v1739_v7, 0.0 }
 0x23b   : > { %v2081_v9 = vpack.c.bf16 %v1768_v10, %v1768_v10  ;;  %v1769_v18 = vmax.f32 %v1737_v57, 0.0 }
 0x23c   : > { %1931 = vst.msk [vmem:[%s3061_s13 + $0x28] sm:$0xf] %vm1920_vm12, %v2083_v15  ;;  %v2084_v39 = vpack.c.bf16 %v1771_v51, %v1771_v51  ;;  %v2232_v21 = vpop.f32.mrb[8].mxu1 }
 0x23d   : > { %1929 = vst.msk [vmem:[%s3061_s13 + $0x20] sm:$0xf] %vm1920_vm12, %v2081_v9  ;;  %v2082_v26 = vpack.c.bf16 %v1769_v18, %v1769_v18  ;;  %v1715_v16 = vmul.f32 %v2232_v21, %v3042_v48  ;;  %v1651_v4 = vpop.f32.mrb[9].mxu1 }
 0x23e   : > { %1932 = vst.msk [vmem:[%s3061_s13 + $0x2c] sm:$0xf] %vm1920_vm12, %v2084_v39  ;;  %v1713_v44 = vmul.f32 %v3042_v48, %v1651_v4  ;;  %v2233_v45 = vpop.f32.mrb[10].mxu1 }
 0x23f   : > { %1930 = vst.msk [vmem:[%s3061_s13 + $0x24] sm:$0xf] %vm1920_vm12, %v2082_v26  ;;  %v1754_v58 = vadd.f32 %v3047_v52, %v1715_v16  ;;  %v1716_v22 = vmul.f32 %v2233_v45, %v3042_v48  ;;  %v1654_v2 = vpop.f32.mrb[11].mxu1 }
 0x240   : > { %v1752_v36 = vadd.f32 %v3047_v52, %v1713_v44  ;;  %v1714_v14 = vmul.f32 %v3042_v48, %v1654_v2 }
 0x241   : > { %v1786_v43 = vmax.f32 %v1754_v58, 0.0  ;;  %v1755_v63 = vadd.f32 %v3047_v52, %v1716_v22 }
 0x242   : > { %v1784_v27 = vmax.f32 %v1752_v36, 0.0  ;;  %v1753_v6 = vadd.f32 %v3047_v52, %v1714_v14 }
 0x243   : > { %v2099_v17 = vpack.c.bf16 %v1786_v43, %v1786_v43  ;;  %v1787_v42 = vmax.f32 %v1755_v63, 0.0 }
 0x244   : > { %v2097_v19 = vpack.c.bf16 %v1784_v27, %v1784_v27  ;;  %v1785_v50 = vmax.f32 %v1753_v6, 0.0 }
 0x245   : > { %1947 = vst.msk [vmem:[%s3061_s13 + $0x68] sm:$0xf] %vm1920_vm12, %v2099_v17  ;;  %v2100_v62 = vpack.c.bf16 %v1787_v42, %v1787_v42 }
 0x246   : > { %1945 = vst.msk [vmem:[%s3061_s13 + $0x60] sm:$0xf] %vm1920_vm12, %v2097_v19  ;;  %v2098_v56 = vpack.c.bf16 %v1785_v50, %v1785_v50 }
 0x247   : > { %1948 = vst.msk [vmem:[%s3061_s13 + $0x6c] sm:$0xf] %vm1920_vm12, %v2100_v62 }
 0x248   : > { %1946 = vst.msk [vmem:[%s3061_s13 + $0x64] sm:$0xf] %vm1920_vm12, %v2098_v56 }
 0x26f   : > { %v2220_v49 = vpop.f32.mrb[12].mxu0 }
 0x270   : > { %v1703_v60 = vmul.f32 %v2220_v49, %v3042_v48  ;;  %v1603_v38 = vpop.f32.mrb[13].mxu0 }
 0x271   : > { %v1701_v12 = vmul.f32 %v3042_v48, %v1603_v38  ;;  %v2221_v31 = vpop.f32.mrb[14].mxu0 }
 0x272   : > { %v1742_v24 = vadd.f32 %v3047_v52, %v1703_v60  ;;  %v1704_v29 = vmul.f32 %v2221_v31, %v3042_v48  ;;  %v1606_v30 = vpop.f32.mrb[15].mxu0 }
 0x273   : > { %v1740_v20 = vadd.f32 %v3047_v52, %v1701_v12  ;;  %v1702_v61 = vmul.f32 %v3042_v48, %v1606_v30 }
 0x274   : > { %v1774_v25 = vmax.f32 %v1742_v24, 0.0  ;;  %v1743_v41 = vadd.f32 %v3047_v52, %v1704_v29 }
 0x275   : > { %v1772_v1 = vmax.f32 %v1740_v20, 0.0  ;;  %v1741_v28 = vadd.f32 %v3047_v52, %v1702_v61 }
 0x276   : > { %v2087_v34 = vpack.c.bf16 %v1774_v25, %v1774_v25  ;;  %v1775_v33 = vmax.f32 %v1743_v41, 0.0 }
 0x277   : > { %v2085_v8 = vpack.c.bf16 %v1772_v1, %v1772_v1  ;;  %v1773_v23 = vmax.f32 %v1741_v28, 0.0 }
 0x278   : > { %1935 = vst.msk [vmem:[%s3061_s13 + $0x38] sm:$0xf] %vm1920_vm12, %v2087_v34  ;;  %v2088_v37 = vpack.c.bf16 %v1775_v33, %v1775_v33  ;;  %v2236_v5 = vpop.f32.mrb[12].mxu1 }
 0x279   : > { %1933 = vst.msk [vmem:[%s3061_s13 + $0x30] sm:$0xf] %vm1920_vm12, %v2085_v8  ;;  %v2086_v54 = vpack.c.bf16 %v1773_v23, %v1773_v23  ;;  %v1719_v55 = vmul.f32 %v2236_v5, %v3042_v48  ;;  %v1667_v35 = vpop.f32.mrb[13].mxu1 }
 0x27a   : > { %1936 = vst.msk [vmem:[%s3061_s13 + $0x3c] sm:$0xf] %vm1920_vm12, %v2088_v37  ;;  %v1717_v40 = vmul.f32 %v3042_v48, %v1667_v35  ;;  %v2237_v59 = vpop.f32.mrb[14].mxu1 }
 0x27b   : > { %1934 = vst.msk [vmem:[%s3061_s13 + $0x34] sm:$0xf] %vm1920_vm12, %v2086_v54  ;;  %v1758_v46 = vadd.f32 %v3047_v52, %v1719_v55  ;;  %v1720_v32 = vmul.f32 %v2237_v59, %v3042_v48  ;;  %v1670_v53 = vpop.f32.mrb[15].mxu1 }
 0x27c   : > { %v1756_v0 = vadd.f32 %v3047_v52, %v1717_v40  ;;  %v1718_v11 = vmul.f32 %v3042_v48, %v1670_v53 }
 0x27d   : > { %v1790_v3 = vmax.f32 %v1758_v46, 0.0  ;;  %v1759_v13 = vadd.f32 %v3047_v52, %v1720_v32 }
 0x27e   : > { %v1788_v47 = vmax.f32 %v1756_v0, 0.0  ;;  %v1757_v7 = vadd.f32 %v3047_v52, %v1718_v11 }
 0x27f   : > { %v2103_v10 = vpack.c.bf16 %v1790_v3, %v1790_v3  ;;  %v1791_v57 = vmax.f32 %v1759_v13, 0.0 }
 0x280   : > { %v2101_v15 = vpack.c.bf16 %v1788_v47, %v1788_v47  ;;  %v1789_v51 = vmax.f32 %v1757_v7, 0.0 }
 0x281   : > { %1951 = vst.msk [vmem:[%s3061_s13 + $0x78] sm:$0xf] %vm1920_vm12, %v2103_v10  ;;  %v2104_v9 = vpack.c.bf16 %v1791_v57, %v1791_v57 }
 0x282   : > { %1949 = vst.msk [vmem:[%s3061_s13 + $0x70] sm:$0xf] %vm1920_vm12, %v2101_v15  ;;  %v2102_v18 = vpack.c.bf16 %v1789_v51, %v1789_v51 }
 0x283   : > { %1952 = vst.msk [vmem:[%s3061_s13 + $0x7c] sm:$0xf] %vm1920_vm12, %v2104_v9 }
 0x284   : > { %1950 = vst.msk [vmem:[%s3061_s13 + $0x74] sm:$0xf] %vm1920_vm12, %v2102_v18 }
 0x285 PF: > { %s14_s15 = sadd.s32 1, %s2268_s15  }
 0x286   : > { %p11_p4 = scmp.ge.s32.totalorder %s14_s15, 4  }
 0x288   :  { %13 = sbr.rel (!%p11_p4) target bundleno = 1 (0x1), region = 68 }

// kernel: _lambda_.9
= control target key start
LH: loop header
LB: loop body
LE: loop exit
PB: predicated region body
PF: predicated region fallthrough
CT: control target
= control target key end

     0   :  { %s2601_s18 = smov 0   ;;  %s3403_s0 = inlined_call_operand.vmem [shape: bf16[2,8,8,64], index: 0, kind: input, shape index: {}]   ;;  %s3404_s1 = inlined_call_operand.vmem [shape: bf16[2,8,8,32], index: 1, kind: input, shape index: {}]   ;;  %s3405_s2 = inlined_call_operand.vmem [shape: bf16[864,32], index: 2, kind: input, shape index: {}]   ;;  %s3406_s3 = inlined_call_operand.vmem [shape: f32[1,32], index: 3, kind: input, shape index: {}]   ;;  %s3407_s4 = inlined_call_operand.vmem [shape: f32[1,32], index: 4, kind: input, shape index: {}]   ;;  %s3408_s5 = inlined_call_operand.vmem [shape: bf16[2,8,8,32], index: 5, kind: output, shape index: {}]  }
   0x1 LB: > { %s2201_s19 = sadd.s32 4294967295, %s2565_s18   ;;  %p2205_p0 = scmp.ge.s32.totalorder %s2565_s18, 1  ;;  %s2565_s18 = sphi %s2601_s18, %s15_s18  }
   0x2   : > { %p197_p1 = scmp.lt.s32.totalorder %s2565_s18, 3 }
   0x4   : > { %p198_p2 = pnand %p2205_p0, %p197_p1 }
   0x5   : > { %vm246_vm0 = vcmask (!%p198_p2), 523264   ;;  %vm303_vm1 = vcmask (!%p198_p2), 261120   ;;  %vm249_vm2 = vcmask (!%p198_p2), 516096   ;;  %v2567_v0 = vmov (!%p198_p2), 0.0   ;;  %p230_p3 = scmp.lt.s32.totalorder (!%p198_p2), %s2201_s19, 1  ;;  %v2505_v1 = vld [vmem:[%s3405_s2 + $0x40] sm:$0xff] (!%p198_p2)  }
   0x6   : > { %201 = sbr.rel (%p198_p2) target bundleno = 590 (0x24e), region = 40  ;;  %248 = vst.msk [vmem:[#allocation2 + $0x8] sm:$0xff] (!%p198_p2), %vm246_vm0, %v2567_v0  ;;  %247 = vst.msk [vmem:[#allocation2] sm:$0xff] (!%p198_p2), %vm246_vm0, %v2567_v0  ;;  %vm306_vm3 = vcmask (!%p198_p2), 253952   ;;  %2343 = vmatprep.subr.bf16.mxu0 (!%p198_p2), %v2505_v1  ;;  %v2506_v2 = vld [vmem:[%s3405_s2] sm:$0xff] (!%p198_p2)   ;;  %v2507_v3 = vld [vmem:[%s3405_s2 + $0x48] sm:$0xff] (!%p198_p2)  }
   0x7   : > { %251 = vst.msk [vmem:[#allocation2 + $0x18] sm:$0xff] (!%p198_p2), %vm246_vm0, %v2567_v0  ;;  %252 = vst.msk [vmem:[#allocation2 + $0x20] sm:$0xff] (!%p198_p2), %vm246_vm0, %v2567_v0  ;;  %2344 = vmatpush3.bf16.msra.mxu0 (!%p198_p2), %v2506_v2  ;;  %v2508_v4 = vld [vmem:[%s3405_s2 + $0x8] sm:$0xff] (!%p198_p2)   ;;  %v2509_v5 = vld [vmem:[%s3405_s2 + $0x50] sm:$0xff] (!%p198_p2)   ;;  %s2568_s12 = smov (!%p198_p2), 96   ;;  %s2569_s13 = smov (!%p198_p2), 32  }
   0x8   : > { %254 = vst.msk [vmem:[#allocation2 + $0x30] sm:$0xff] (!%p198_p2), %vm246_vm0, %v2567_v0  ;;  %255 = vst.msk [vmem:[#allocation2 + $0x38] sm:$0xff] (!%p198_p2), %vm246_vm0, %v2567_v0  ;;  %2345 = vmatprep.subr.bf16.mxu0 (!%p198_p2), %v2507_v3  ;;  %v2510_v33 = vld [vmem:[%s3405_s2 + $0x10] sm:$0xff] (!%p198_p2)   ;;  %v2511_v36 = vld [vmem:[%s3405_s2 + $0x58] sm:$0xff] (!%p198_p2)   ;;  %s2570_s23 = smov (!%p198_p2), 64   ;;  %vm962_vm4 = vcmask (!%p198_p2), 785408  }
   0x9   : > { %257 = vst.msk [vmem:[#allocation2 + $0x48] sm:$0xff] (!%p198_p2), %vm246_vm0, %v2567_v0  ;;  %258 = vst.msk [vmem:[#allocation2 + $0x50] sm:$0xff] (!%p198_p2), %vm246_vm0, %v2567_v0  ;;  %v2512_v37 = vld [vmem:[%s3405_s2 + $0x18] sm:$0xff] (!%p198_p2)   ;;  %v2513_v38 = vld [vmem:[%s3405_s2 + $0x60] sm:$0xff] (!%p198_p2)   ;;  %vm2125_vm5 = vcmask (!%p198_p2), 257024  }
   0xa   : > { %260 = vst.msk [vmem:[#allocation2 + $0x60] sm:$0xff] (!%p198_p2), %vm246_vm0, %v2567_v0  ;;  %261 = vst.msk [vmem:[#allocation2 + $0x68] sm:$0xff] (!%p198_p2), %vm246_vm0, %v2567_v0  ;;  %v2514_v40 = vld [vmem:[%s3405_s2 + $0x20] sm:$0xff] (!%p198_p2)   ;;  %v2515_v45 = vld [vmem:[%s3405_s2 + $0x68] sm:$0xff] (!%p198_p2)  }
   0xb   : > { %263 = vst.msk [vmem:[#allocation2 + $0x78] sm:$0xff] (!%p198_p2), %vm246_vm0, %v2567_v0  ;;  %264 = vst.msk [vmem:[#allocation2 + $0x80] sm:$0xff] (!%p198_p2), %vm246_vm0, %v2567_v0  ;;  %2346 = vmatpush3.bf16.msra.mxu0 (!%p198_p2), %v2508_v4  ;;  %v2516_v60 = vld [vmem:[%s3405_s2 + $0x28] sm:$0xff] (!%p198_p2)   ;;  %v2517_v62 = vld [vmem:[%s3405_s2 + $0x70] sm:$0xff] (!%p198_p2)  }
   0xc   : > { %266 = vst.msk [vmem:[#allocation2 + $0x90] sm:$0xff] (!%p198_p2), %vm246_vm0, %v2567_v0  ;;  %267 = vst.msk [vmem:[#allocation2 + $0x98] sm:$0xff] (!%p198_p2), %vm246_vm0, %v2567_v0  ;;  %2347 = vmatprep.subr.bf16.mxu0 (!%p198_p2), %v2509_v5  ;;  %v2519_v2 = vld [vmem:[%s3405_s2 + $0x78] sm:$0xff] (!%p198_p2)  }
   0xd   : > { %269 = vst.msk [vmem:[#allocation2 + $0xa8] sm:$0xff] %vm246_vm0, %v2567_v0  ;;  %270 = vst.msk [vmem:[#allocation2 + $0xb0] sm:$0xff] %vm246_vm0, %v2567_v0  ;;  %s3410_s19 = smov (!%p230_p3, %s2201_s19), 1  ;;  %v392_v9 = vld [vmem:[#allocation2 + $0x8] sm:$0xff]  ;;  %v2520_v5 = vld [vmem:[%s3405_s2 + $0x38] sm:$0xff]  }
   0xe   : > { %272 = vst.msk [vmem:[#allocation2 + $0xc0] sm:$0xff] %vm246_vm0, %v2567_v0  ;;  %273 = vst.msk [vmem:[#allocation2 + $0xc8] sm:$0xff] %vm246_vm0, %v2567_v0  ;;  %s2732_s26 = sshll.u32 %s3410_s19, 5  ;;  %v400_v16 = vpack.c.bf16 %v392_v9, %v392_v9  ;;  %v2522_v9 = vld [vmem:[%s3405_s2 + $0x80] sm:$0xff]  }
   0xf   : > { %275 = vst.msk [vmem:[#allocation2 + $0xd8] sm:$0xff] %vm246_vm0, %v2567_v0  ;;  %276 = vst.msk [vmem:[#allocation2 + $0xe0] sm:$0xff] %vm246_vm0, %v2567_v0  ;;  %s2741_s6 = scalar_lea.vmem %s3404_s1, %s2732_s26  ;;  %s234_s9 = scalar_lea.vmem %s3403_s0, %s2732_s26  ;;  %2348 = vmatpush3.bf16.msra.mxu0 %v2510_v33 }
  0x10   : > { %305 = vst.msk [vmem:[#allocation3 + $0x8] sm:$0xff] %vm303_vm1, %v2567_v0  ;;  %304 = vst.msk [vmem:[#allocation3] sm:$0xff] %vm303_vm1, %v2567_v0  ;;  %v2322_v6 = vld [vmem:[%s2741_s6] sm:$0xff]   ;;  %v2337_v8 = vld [vmem:[%s234_s9 + $0x8] sm:$0xff]   ;;  %682 = vrot.lane.b32.xlu0 %v400_v16, %s2568_s12  ;;  %2349 = vmatprep.subr.bf16.mxu0 %v2511_v36  ;;  %s3382_s15 = scalar_lea.vmem %s3408_s5, %s2732_s26 }
  0x11   : > { %308 = vst.msk [vmem:[#allocation3 + $0x18] sm:$0xff] %vm303_vm1, %v2567_v0  ;;  %309 = vst.msk [vmem:[#allocation3 + $0x20] sm:$0xff] %vm303_vm1, %v2567_v0  ;;  %v2306_v7 = vld [vmem:[%s234_s9] sm:$0xff]   ;;  %v2323_v12 = vunpack.c.l.bf16 %v2322_v6  ;;  %v2311_v15 = vunpack.c.l.bf16 %v2337_v8  ;;  %v2324_v18 = vunpack.c.h.bf16 %v2322_v6  ;;  %v2340_v19 = vld [vmem:[%s2741_s6 + $0x8] sm:$0xff]   ;;  %v2312_v23 = vunpack.c.h.bf16 %v2337_v8 }
  0x12   : > { %311 = vst.msk [vmem:[#allocation3 + $0x30] sm:$0xff] %vm303_vm1, %v2567_v0  ;;  %312 = vst.msk [vmem:[#allocation3 + $0x38] sm:$0xff] %vm303_vm1, %v2567_v0  ;;  %v2307_v13 = vunpack.c.l.bf16 %v2306_v7  ;;  %v2308_v14 = vunpack.c.h.bf16 %v2306_v7  ;;  %v2338_v20 = vld [vmem:[%s234_s9 + $0x10] sm:$0xff]   ;;  %v2327_v22 = vunpack.c.l.bf16 %v2340_v19  ;;  %v2339_v26 = vld [vmem:[%s234_s9 + $0x18] sm:$0xff]   ;;  %v2328_v29 = vunpack.c.h.bf16 %v2340_v19 }
  0x13   : > { %314 = vst.msk [vmem:[#allocation3 + $0x48] sm:$0xff] %vm303_vm1, %v2567_v0  ;;  %315 = vst.msk [vmem:[#allocation3 + $0x50] sm:$0xff] %vm303_vm1, %v2567_v0  ;;  %v2315_v24 = vunpack.c.l.bf16 %v2338_v20  ;;  %v2341_v25 = vld [vmem:[%s2741_s6 + $0x10] sm:$0xff]   ;;  %v2342_v27 = vld [vmem:[%s2741_s6 + $0x18] sm:$0xff]   ;;  %v2316_v31 = vunpack.c.h.bf16 %v2338_v20  ;;  %v2319_v32 = vunpack.c.l.bf16 %v2339_v26  ;;  %2350 = vmatpush3.bf16.msra.mxu0 %v2512_v37  ;;  %v2320_v54 = vunpack.c.h.bf16 %v2339_v26 }
  0x14   : > { %317 = vst.msk [vmem:[#allocation3 + $0x60] sm:$0xff] %vm303_vm1, %v2567_v0  ;;  %318 = vst.msk [vmem:[#allocation3 + $0x68] sm:$0xff] %vm303_vm1, %v2567_v0  ;;  %v2331_v30 = vunpack.c.l.bf16 %v2341_v25  ;;  %v2332_v34 = vunpack.c.h.bf16 %v2341_v25  ;;  %v2335_v35 = vunpack.c.l.bf16 %v2342_v27  ;;  %2351 = vmatprep.subr.bf16.mxu0 %v2513_v38  ;;  %v2336_v49 = vunpack.c.h.bf16 %v2342_v27  ;;  %v2521_v7 = vld [vmem:[%s3405_s2 + $0xc0] sm:$0xff]   ;;  %v2525_v16 = vld [vmem:[%s3405_s2 + $0xd0] sm:$0xff]  }
  0x15   : > { %320 = vst.msk [vmem:[#allocation3 + $0x78] sm:$0xff] %vm303_vm1, %v2567_v0  ;;  %321 = vst.msk [vmem:[#allocation3 + $0x80] sm:$0xff] %vm303_vm1, %v2567_v0  ;;  %2383 = vmatprep.subr.bf16.mxu1 %v2521_v7  ;;  %v2533_v38 = vld [vmem:[%s3405_s2 + $0xf0] sm:$0xff]  }
  0x16   : > { %323 = vst.msk [vmem:[#allocation3 + $0x90] sm:$0xff] %vm303_vm1, %v2567_v0  ;;  %324 = vst.msk [vmem:[#allocation3 + $0x98] sm:$0xff] %vm303_vm1, %v2567_v0  ;;  %2384 = vmatpush3.bf16.msra.mxu1 %v2522_v9 }
  0x17   : > { %326 = vst.msk [vmem:[#allocation3 + $0xa8] sm:$0xff] %vm303_vm1, %v2567_v0  ;;  %327 = vst.msk [vmem:[#allocation3 + $0xb0] sm:$0xff] %vm303_vm1, %v2567_v0  ;;  %v408_v10 = vld [vmem:[#allocation3 + $0x8] sm:$0xff]  ;;  %2352 = vmatpush3.bf16.msra.mxu0 %v2514_v40 }
  0x18   : > { %329 = vst.msk [vmem:[#allocation3 + $0xc0] sm:$0xff] %vm303_vm1, %v2567_v0  ;;  %330 = vst.msk [vmem:[#allocation3 + $0xc8] sm:$0xff] %vm303_vm1, %v2567_v0  ;;  %v376_v11 = vld [vmem:[#allocation3 + $0x7] sm:$0xff]  ;;  %v416_v17 = vpack.c.bf16 %v408_v10, %v408_v10  ;;  %2353 = vmatprep.subr.bf16.mxu0 %v2515_v45 }
  0x19   : > { %332 = vst.msk [vmem:[#allocation3 + $0xd8] sm:$0xff] %vm303_vm1, %v2567_v0  ;;  %333 = vst.msk [vmem:[#allocation3 + $0xe0] sm:$0xff] %vm303_vm1, %v2567_v0  ;;  %v384_v21 = vpack.c.bf16 %v376_v11, %v376_v11  ;;  %v2523_v11 = vld [vmem:[%s3405_s2 + $0xc8] sm:$0xff]  }
  0x1a   : > { %250 = vst.msk [vmem:[#allocation2 + $0x10] sm:$0x1] %vm249_vm2, %v2567_v0  ;;  %253 = vst.msk [vmem:[#allocation2 + $0x28] sm:$0x1] %vm249_vm2, %v2567_v0  ;;  %706 = vrot.lane.b32.xlu1 %v416_v17, %s2569_s13  ;;  %2385 = vmatprep.subr.bf16.mxu1 %v2523_v11 }
  0x1b   : > { %256 = vst.msk [vmem:[#allocation2 + $0x40] sm:$0x1] %vm249_vm2, %v2567_v0  ;;  %259 = vst.msk [vmem:[#allocation2 + $0x58] sm:$0x1] %vm249_vm2, %v2567_v0  ;;  %658 = vrot.lane.b32.xlu0 %v384_v21, %s2570_s23  ;;  %2354 = vmatpush3.bf16.msra.mxu0 %v2516_v60  ;;  %v2537_v60 = vld [vmem:[%s3405_s2 + $0x140] sm:$0xff]  }
  0x1c   : > { %262 = vst.msk [vmem:[#allocation2 + $0x70] sm:$0x1] %vm249_vm2, %v2567_v0  ;;  %265 = vst.msk [vmem:[#allocation2 + $0x88] sm:$0x1] %vm249_vm2, %v2567_v0  ;;  %2355 = vmatprep.subr.bf16.mxu0 %v2517_v62 }
  0x1d   : > { %268 = vst.msk [vmem:[#allocation2 + $0xa0] sm:$0x1] %vm249_vm2, %v2567_v0  ;;  %271 = vst.msk [vmem:[#allocation2 + $0xb8] sm:$0x1] %vm249_vm2, %v2567_v0 }
  0x1e   : > { %274 = vst.msk [vmem:[#allocation2 + $0xd0] sm:$0x1] %vm249_vm2, %v2567_v0  ;;  %277 = vst.msk [vmem:[#allocation2 + $0xe8] sm:$0x1] %vm249_vm2, %v2567_v0 }
  0x1f   : > { %310 = vst.msk [vmem:[#allocation3 + $0x28] sm:$0x1] %vm306_vm3, %v2567_v0  ;;  %307 = vst.msk [vmem:[#allocation3 + $0x10] sm:$0x1] %vm306_vm3, %v2567_v0 }
  0x20   : > { %313 = vst.msk [vmem:[#allocation3 + $0x40] sm:$0x1] %vm306_vm3, %v2567_v0  ;;  %316 = vst.msk [vmem:[#allocation3 + $0x58] sm:$0x1] %vm306_vm3, %v2567_v0 }
  0x21   : > { %319 = vst.msk [vmem:[#allocation3 + $0x70] sm:$0x1] %vm306_vm3, %v2567_v0  ;;  %322 = vst.msk [vmem:[#allocation3 + $0x88] sm:$0x1] %vm306_vm3, %v2567_v0  ;;  %v424_v28 = vld [vmem:[#allocation2 + $0x9] sm:$0xff] }
  0x22   : > { %325 = vst.msk [vmem:[#allocation3 + $0xa0] sm:$0x1] %vm306_vm3, %v2567_v0  ;;  %328 = vst.msk [vmem:[#allocation3 + $0xb8] sm:$0x1] %vm306_vm3, %v2567_v0  ;;  %v432_v39 = vpack.c.bf16 %v424_v28, %v424_v28  ;;  %v2529_v28 = vld [vmem:[%s3405_s2 + $0xe0] sm:$0xff]  }
  0x23   : > { %331 = vst.msk [vmem:[#allocation3 + $0xd0] sm:$0x1] %vm306_vm3, %v2567_v0  ;;  %334 = vst.msk [vmem:[#allocation3 + $0xe8] sm:$0x1] %vm306_vm3, %v2567_v0  ;;  %v2518_v0 = vld [vmem:[%s3405_s2 + $0x30] sm:$0xff]  }
  0x24   : > { %352 = vst.msk [vmem:[#allocation3 + $0x20] sm:$0xff] %vm303_vm1, %v2323_v12  ;;  %353 = vst.msk [vmem:[#allocation3 + $0x38] sm:$0xff] %vm303_vm1, %v2324_v18  ;;  %730 = vrot.lane.b32.xlu0 %v432_v39, %s2570_s23  ;;  %2356 = vmatpush3.bf16.msra.mxu0 %v2518_v0  ;;  %v2526_v18 = vld [vmem:[%s3405_s2 + $0x90] sm:$0xff]  }
  0x25   : > { %295 = vst.msk [vmem:[#allocation2 + $0x20] sm:$0xff] %vm246_vm0, %v2307_v13  ;;  %296 = vst.msk [vmem:[#allocation2 + $0x38] sm:$0xff] %vm246_vm0, %v2308_v14  ;;  %2357 = vmatprep.subr.bf16.mxu0 %v2519_v2  ;;  %v2524_v14 = vld [vmem:[%s3405_s2 + $0x88] sm:$0xff]   ;;  %v2534_v39 = vld [vmem:[%s3405_s2 + $0xb0] sm:$0xff]  }
  0x26   : > { %297 = vst.msk [vmem:[#allocation2 + $0x50] sm:$0xff] %vm246_vm0, %v2311_v15  ;;  %298 = vst.msk [vmem:[#allocation2 + $0x68] sm:$0xff] %vm246_vm0, %v2312_v23  ;;  %2386 = vmatpush3.bf16.msra.mxu1 %v2524_v14 }
  0x27   : > { %354 = vst.msk [vmem:[#allocation3 + $0x50] sm:$0xff] %vm303_vm1, %v2327_v22  ;;  %355 = vst.msk [vmem:[#allocation3 + $0x68] sm:$0xff] %vm303_vm1, %v2328_v29  ;;  %2387 = vmatprep.subr.bf16.mxu1 %v2525_v16  ;;  %v2527_v22 = vld [vmem:[%s3405_s2 + $0xd8] sm:$0xff]  }
  0x28   : > { %299 = vst.msk [vmem:[#allocation2 + $0x80] sm:$0xff] %vm246_vm0, %v2315_v24  ;;  %300 = vst.msk [vmem:[#allocation2 + $0x98] sm:$0xff] %vm246_vm0, %v2316_v31  ;;  %2358 = vmatpush3.bf16.msra.mxu0 %v2520_v5  ;;  %v2528_v24 = vld [vmem:[%s3405_s2 + $0x98] sm:$0xff]  }
  0x29   : > { %356 = vst.msk [vmem:[#allocation3 + $0x80] sm:$0xff] %vm303_vm1, %v2331_v30  ;;  %357 = vst.msk [vmem:[#allocation3 + $0x98] sm:$0xff] %vm303_vm1, %v2332_v34  ;;  %v2530_v30 = vld [vmem:[%s3405_s2 + $0xa0] sm:$0xff]   ;;  %v2531_v34 = vld [vmem:[%s3405_s2 + $0xe8] sm:$0xff]   ;;  %2423 = vmatprep.subr.bf16.mxu0 %v2537_v60 }
  0x2a   : > { %301 = vst.msk [vmem:[#allocation2 + $0xb0] sm:$0xff] %vm246_vm0, %v2319_v32  ;;  %302 = vst.msk [vmem:[#allocation2 + $0xc8] sm:$0xff] %vm246_vm0, %v2320_v54  ;;  %2388 = vmatpush3.bf16.msra.mxu1 %v2526_v18 }
  0x2b   : > { %358 = vst.msk [vmem:[#allocation3 + $0xb0] sm:$0xff] %vm303_vm1, %v2335_v35  ;;  %v409_v41 = vld [vmem:[#allocation3 + $0x20] sm:$0xff]  ;;  %359 = vst.msk [vmem:[#allocation3 + $0xc8] sm:$0xff] %vm303_vm1, %v2336_v49  ;;  %v410_v53 = vld [vmem:[#allocation3 + $0x38] sm:$0xff]  ;;  %2389 = vmatprep.subr.bf16.mxu1 %v2527_v22 }
  0x2c   : > { %v377_v42 = vld [vmem:[#allocation3 + $0x1f] sm:$0xff]  ;;  %v393_v43 = vld [vmem:[#allocation2 + $0x20] sm:$0xff]  ;;  %v2786_v44 = vpack.c.bf16 %v409_v41, %v409_v41  ;;  %v394_v48 = vld [vmem:[#allocation2 + $0x38] sm:$0xff]  ;;  %v2810_v56 = vpack.c.bf16 %v410_v53, %v410_v53 }
  0x2d   : > { %v2792_v46 = vpack.c.bf16 %v393_v43, %v393_v43  ;;  %v2796_v47 = vpack.c.bf16 %v377_v42, %v377_v42  ;;  %v425_v50 = vld [vmem:[#allocation2 + $0x21] sm:$0xff]  ;;  %v2801_v51 = vpack.c.bf16 %v394_v48, %v394_v48  ;;  %v395_v55 = vld [vmem:[#allocation2 + $0x50] sm:$0xff]  ;;  %v426_v61 = vld [vmem:[#allocation2 + $0x39] sm:$0xff] }
  0x2e   : > { %708 = vrot.lane.b32.xlu1 %v2786_v44, %s2569_s13  ;;  %v2805_v52 = vpack.c.bf16 %v425_v50, %v425_v50  ;;  %v2814_v57 = vpack.c.bf16 %v395_v55, %v395_v55  ;;  %v411_v58 = vld [vmem:[#allocation3 + $0x50] sm:$0xff]  ;;  %v396_v4 = vld [vmem:[#allocation2 + $0x68] sm:$0xff]  ;;  %v2841_v6 = vpack.c.bf16 %v426_v61, %v426_v61  ;;  %v427_v10 = vld [vmem:[#allocation2 + $0x51] sm:$0xff]  ;;  %2390 = vmatpush3.bf16.msra.mxu1 %v2528_v24 }
  0x2f   : > { %684 = vrot.lane.b32.xlu0 %v2792_v46, %s2568_s12  ;;  %v378_v59 = vld [vmem:[#allocation3 + $0x37] sm:$0xff]  ;;  %v2831_v1 = vpack.c.bf16 %v411_v58, %v411_v58  ;;  %v379_v3 = vld [vmem:[#allocation3 + $0x4f] sm:$0xff]  ;;  %v2858_v12 = vpack.c.bf16 %v396_v4, %v396_v4  ;;  %v2865_v15 = vpack.c.bf16 %v427_v10, %v427_v10  ;;  %v380_v19 = vld [vmem:[#allocation3 + $0x67] sm:$0xff]  ;;  %2391 = vmatprep.subr.bf16.mxu1 %v2529_v28 }
  0x30   : > { %v2824_v63 = vpack.c.bf16 %v378_v59, %v378_v59  ;;  %v2848_v8 = vpack.c.bf16 %v379_v3, %v379_v3  ;;  %v412_v13 = vld [vmem:[#allocation3 + $0x68] sm:$0xff]  ;;  %v397_v17 = vld [vmem:[#allocation2 + $0x80] sm:$0xff]  ;;  %v413_v23 = vld [vmem:[#allocation3 + $0x80] sm:$0xff]  ;;  %v2889_v26 = vpack.c.bf16 %v380_v19, %v380_v19 }
  0x31   : > { %v2875_v20 = vpack.c.bf16 %v412_v13, %v412_v13  ;;  %v2879_v21 = vpack.c.bf16 %v397_v17, %v397_v17  ;;  %v428_v25 = vld [vmem:[#allocation2 + $0x69] sm:$0xff]  ;;  %v2893_v27 = vpack.c.bf16 %v413_v23, %v413_v23  ;;  %v429_v32 = vld [vmem:[#allocation2 + $0x81] sm:$0xff]  ;;  %v457_v41 = vld [vmem:[#allocation2 + $0x37] sm:$0xff] }
  0x32   : > { %660 = vrot.lane.b32.xlu1 %v2796_v47, %s2570_s23  ;;  %v381_v29 = vld [vmem:[#allocation3 + $0x7f] sm:$0xff]  ;;  %v2903_v31 = vpack.c.bf16 %v428_v25, %v428_v25  ;;  %v456_v36 = vld [vmem:[#allocation2 + $0x1f] sm:$0xff]  ;;  %2392 = vmatpush3.bf16.msra.mxu1 %v2530_v30  ;;  %v2919_v37 = vpack.c.bf16 %v429_v32, %v429_v32  ;;  %v382_v54 = vld [vmem:[#allocation3 + $0x97] sm:$0xff] }
  0x33   : > { %686 = vrot.lane.b32.xlu0 %v2801_v51, %s2568_s12  ;;  %v2907_v33 = vpack.c.bf16 %v381_v29, %v381_v29  ;;  %v2532_v35 = vld [vmem:[%s3405_s2 + $0xa8] sm:$0xff]   ;;  %2393 = vmatprep.subr.bf16.mxu1 %v2531_v34  ;;  %v2929_v40 = vpack.c.bf16 %v456_v36, %v456_v36  ;;  %v2535_v42 = vld [vmem:[%s3405_s2 + $0xf8] sm:$0xff]   ;;  %v399_v50 = vld [vmem:[#allocation2 + $0xb0] sm:$0xff] }
  0x34   : > { %v2536_v43 = vld [vmem:[%s3405_s2 + $0xb8] sm:$0xff]   ;;  %v414_v49 = vld [vmem:[#allocation3 + $0x98] sm:$0xff]  ;;  %v415_v55 = vld [vmem:[#allocation3 + $0xb0] sm:$0xff] }
  0x35   : > { %v398_v45 = vld [vmem:[#allocation2 + $0x98] sm:$0xff]  ;;  %v2957_v53 = vpack.c.bf16 %v414_v49, %v414_v49  ;;  %v2969_v58 = vpack.c.bf16 %v415_v55, %v415_v55  ;;  %v458_v3 = vld [vmem:[#allocation2 + $0x4f] sm:$0xff]  ;;  %v459_v5 = vld [vmem:[#allocation2 + $0x67] sm:$0xff] }
  0x36   : > { %732 = vrot.lane.b32.xlu1 %v2805_v52, %s2570_s23  ;;  %2394 = vmatpush3.bf16.msra.mxu1 %v2532_v35  ;;  %v2951_v48 = vpack.c.bf16 %v398_v45, %v398_v45  ;;  %v430_v59 = vld [vmem:[#allocation2 + $0x99] sm:$0xff]  ;;  %v431_v0 = vld [vmem:[#allocation2 + $0xb1] sm:$0xff]  ;;  %v2987_v4 = vpack.c.bf16 %v458_v3, %v458_v3  ;;  %v537_v10 = vld [vmem:[#allocation3 + $0x39] sm:$0xff] }
  0x37   : > { %710 = vrot.lane.b32.xlu0 %v2810_v56, %s2569_s13  ;;  %2395 = vmatprep.subr.bf16.mxu1 %v2533_v38  ;;  %v383_v61 = vld [vmem:[#allocation3 + $0xaf] sm:$0xff]  ;;  %v438_v62 = vpack.c.bf16 %v430_v59, %v430_v59  ;;  %v2983_v2 = vpack.c.bf16 %v431_v0, %v431_v0  ;;  %v536_v7 = vld [vmem:[#allocation3 + $0x21] sm:$0xff]  ;;  %v360_v17 = vld [vmem:[#allocation2 + $0x7] sm:$0xff] }
  0x38   : > { %v3007_v9 = vpack.c.bf16 %v536_v7, %v536_v7  ;;  %v460_v11 = vld [vmem:[#allocation2 + $0x7f] sm:$0xff]  ;;  %v368_v22 = vpack.c.bf16 %v360_v17, %v360_v17  ;;  %v2541_v49 = vld [vmem:[%s3405_s2 + $0x150] sm:$0xff]  }
  0x39   : > { %v3027_v13 = vpack.c.bf16 %v460_v11, %v460_v11  ;;  %v538_v19 = vld [vmem:[#allocation3 + $0x51] sm:$0xff]  ;;  %v539_v30 = vld [vmem:[#allocation3 + $0x69] sm:$0xff] }
  0x3a   : > { %688 = vrot.lane.b32.xlu1 %v2814_v57, %s2568_s12  ;;  %2396 = vmatpush3.bf16.msra.mxu1 %v2534_v39  ;;  %v3063_v38 = vpack.c.bf16 %v539_v30, %v539_v30  ;;  %v2538_v39 = vld [vmem:[%s3405_s2 + $0x100] sm:$0xff]   ;;  %v2543_v59 = vld [vmem:[%s3405_s2 + $0x158] sm:$0xff]   ;;  %v2548_v30 = vld [vmem:[%s3405_s2 + $0x128] sm:$0xff]  }
  0x3b   : > { %662 = vrot.lane.b32.xlu0 %v2824_v63, %s2570_s23  ;;  %2397 = vmatprep.subr.bf16.mxu1 %v2535_v42  ;;  %v2539_v42 = vld [vmem:[%s3405_s2 + $0x148] sm:$0xff]   ;;  %v2544_v0 = vld [vmem:[%s3405_s2 + $0x118] sm:$0xff]   ;;  %v2545_v7 = vld [vmem:[%s3405_s2 + $0x160] sm:$0xff]  }
  0x3e   : > { %712 = vrot.lane.b32.xlu1 %v2831_v1, %s2569_s13  ;;  %2398 = vmatpush3.bf16.msra.mxu1 %v2536_v43 }
  0x3f   : > { %734 = vrot.lane.b32.xlu0 %v2841_v6, %s2570_s23 }
  0x42   : > { %664 = vrot.lane.b32.xlu1 %v2848_v8, %s2570_s23 }
  0x43   : > { %690 = vrot.lane.b32.xlu0 %v2858_v12, %s2568_s12 }
  0x46   : > { %736 = vrot.lane.b32.xlu1 %v2865_v15, %s2570_s23 }
  0x47   : > { %714 = vrot.lane.b32.xlu0 %v2875_v20, %s2569_s13 }
  0x4a   : > { %692 = vrot.lane.b32.xlu1 %v2879_v21, %s2568_s12 }
  0x4b   : > { %666 = vrot.lane.b32.xlu0 %v2889_v26, %s2570_s23 }
  0x4e   : > { %716 = vrot.lane.b32.xlu1 %v2893_v27, %s2569_s13 }
  0x4f   : > { %738 = vrot.lane.b32.xlu0 %v2903_v31, %s2570_s23 }
  0x52   : > { %668 = vrot.lane.b32.xlu1 %v2907_v33, %s2570_s23 }
  0x53   : > { %802 = vrot.lane.b32.xlu0 %v2786_v44, %s2570_s23  ;;  %v2943_v44 = vpack.c.bf16 %v457_v41, %v457_v41 }
  0x56   : > { %740 = vrot.lane.b32.xlu1 %v2919_v37, %s2570_s23 }
  0x57   : > { %754 = vrot.lane.b32.xlu0 %v2929_v40, %s2569_s13 }
  0x5a   : > { %804 = vrot.lane.b32.xlu1 %v2810_v56, %s2570_s23 }
  0x5b   : > { %826 = vrot.lane.b32.xlu0 %v2805_v52, %s2568_s12  ;;  %v2961_v52 = vpack.c.bf16 %v399_v50, %v399_v50 }
  0x5e   : > { %756 = vrot.lane.b32.xlu1 %v2943_v44, %s2569_s13 }
  0x5f   : > { %778 = vrot.lane.b32.xlu0 %v2796_v47, %s2568_s12  ;;  %v2965_v47 = vpack.c.bf16 %v382_v54, %v382_v54  ;;  %v2542_v54 = vld [vmem:[%s3405_s2 + $0x110] sm:$0xff]  }
  0x62   : > { %828 = vrot.lane.b32.xlu1 %v2841_v6, %s2568_s12  ;;  %v2995_v6 = vpack.c.bf16 %v459_v5, %v459_v5 }
  0x63   : > { %694 = vrot.lane.b32.xlu0 %v2951_v48, %s2568_s12 }
  0x66   : > { %780 = vrot.lane.b32.xlu1 %v2824_v63, %s2568_s12  ;;  %v2978_v63 = vpack.c.bf16 %v383_v61, %v383_v61 }
  0x67   : > { %718 = vrot.lane.b32.xlu0 %v2957_v53, %s2569_s13 }
  0x6a   : > { %696 = vrot.lane.b32.xlu1 %v2961_v52, %s2568_s12 }
  0x6b   : > { %670 = vrot.lane.b32.xlu0 %v2965_v47, %s2570_s23 }
  0x6e   : > { %720 = vrot.lane.b32.xlu1 %v2969_v58, %s2569_s13 }
  0x6f   : > { %742 = vrot.lane.b32.xlu0 %v438_v62, %s2570_s23 }
  0x72   : > { %672 = vrot.lane.b32.xlu1 %v2978_v63, %s2570_s23 }
  0x73   : > { %806 = vrot.lane.b32.xlu0 %v2831_v1, %s2570_s23 }
  0x76   : > { %744 = vrot.lane.b32.xlu1 %v2983_v2, %s2570_s23 }
  0x77   : > { %758 = vrot.lane.b32.xlu0 %v2987_v4, %s2569_s13 }
  0x7a   : > { %808 = vrot.lane.b32.xlu1 %v2875_v20, %s2570_s23 }
  0x7b   : > { %830 = vrot.lane.b32.xlu0 %v2865_v15, %s2568_s12 }
  0x7e   : > { %760 = vrot.lane.b32.xlu1 %v2995_v6, %s2569_s13 }
  0x7f   : > { %782 = vrot.lane.b32.xlu0 %v2848_v8, %s2568_s12  ;;  %v3015_v8 = vpack.c.bf16 %v537_v10, %v537_v10 }
  0x82   : > { %832 = vrot.lane.b32.xlu1 %v2903_v31, %s2568_s12 }
  0x83   : > { %898 = vrot.lane.b32.xlu0 %v2801_v51, %s2569_s13 }
  0x86   : > { %784 = vrot.lane.b32.xlu1 %v2889_v26, %s2568_s12  ;;  %v3048_v26 = vpack.c.bf16 %v538_v19, %v538_v19  ;;  %v3129_v19 = vld [vmem:[%s3405_s2 + $0x180] sm:$0xff]  }
  0x87   : > { %850 = vrot.lane.b32.xlu0 %v3007_v9, %s2569_s13  ;;  %2473 = vmatprep.subr.bf16.mxu1 %v3129_v19 }
  0x8a   : > { %900 = vrot.lane.b32.xlu1 %v2814_v57, %s2569_s13  ;;  %v683_v57 = vpop.permute.xlu0 %682 }
  0x8b   : > { %922 = vrot.lane.b32.xlu0 %v2810_v56, %s2568_s12  ;;  %v461_v56 = vld [vmem:[#allocation2 + $0x97] sm:$0xff] }
  0x8c   : > { %v707_v14 = vpop.permute.xlu1 %706  ;;  %v3035_v15 = vpack.c.bf16 %v461_v56, %v461_v56 }
  0x8d   : > { %v980_v31 = vsel %vm303_vm1, %v683_v57, %v707_v14 }
  0x8e   : > { %852 = vrot.lane.b32.xlu1 %v3015_v8, %s2569_s13 }
  0x8f   : > { %874 = vrot.lane.b32.xlu0 %v2943_v44, %s2570_s23 }
  0x92   : > { %924 = vrot.lane.b32.xlu1 %v2831_v1, %s2568_s12  ;;  %v659_v1 = vpop.permute.xlu0 %658 }
  0x93   : > { %810 = vrot.lane.b32.xlu0 %v2893_v27, %s2570_s23  ;;  %v940_v28 = vsel %vm246_vm0, %v368_v22, %v659_v1 }
  0x94   : > { %v964_v36 = vsel %vm962_vm4, %v940_v28, %v683_v57 }
  0x96   : > { %876 = vrot.lane.b32.xlu1 %v2987_v4, %s2570_s23  ;;  %v731_v16 = vpop.permute.xlu0 %730 }
  0x97   : > { %762 = vrot.lane.b32.xlu0 %v3027_v13, %s2569_s13 }
  0x9a   : > { %812 = vrot.lane.b32.xlu1 %v2957_v53, %s2570_s23 }
  0x9b   : > { %834 = vrot.lane.b32.xlu0 %v2919_v37, %s2568_s12 }
  0x9e   : > { %764 = vrot.lane.b32.xlu1 %v3035_v15, %s2569_s13 }
  0x9f   : > { %786 = vrot.lane.b32.xlu0 %v2907_v33, %s2568_s12 }
  0xa0   : > { %v709_v18 = vpop.permute.xlu1 %708 }
  0xa1   : > { %v685_v23 = vpop.permute.xlu0 %684 }
  0xa2   : > { %836 = vrot.lane.b32.xlu1 %v438_v62, %s2568_s12  ;;  %v982_v33 = vsel %vm303_vm1, %v685_v23, %v709_v18  ;;  %v2546_v18 = vld [vmem:[%s3405_s2 + $0x120] sm:$0xff]  }
  0xa3   : > { %902 = vrot.lane.b32.xlu0 %v2858_v12, %s2569_s13  ;;  %v996_v12 = vsel %vm246_vm0, %v980_v31, %v731_v16 }
  0xa4   : > { %v661_v24 = vpop.permute.xlu1 %660 }
  0xa5   : > { %v943_v25 = vsel %vm246_vm0, %v2929_v40, %v661_v24  ;;  %v687_v29 = vpop.permute.xlu0 %686  ;;  %v527_v24 = vld [vmem:[#allocation2 + $0xc9] sm:$0xff] }
  0xa6   : > { %788 = vrot.lane.b32.xlu1 %v2965_v47, %s2568_s12  ;;  %v966_v32 = vsel %vm962_vm4, %v943_v25, %v685_v23  ;;  %v511_v47 = vld [vmem:[#allocation3 + $0xc8] sm:$0xff]  ;;  %v2547_v25 = vld [vmem:[%s3405_s2 + $0x168] sm:$0xff]  }
  0xa7   : > { %854 = vrot.lane.b32.xlu0 %v3048_v26, %s2569_s13  ;;  %v2212_v40 = vcombine.low %v964_v36, %v966_v32  ;;  %v3099_v62 = vpack.c.bf16 %v511_v47, %v511_v47  ;;  %v479_v32 = vld [vmem:[#allocation3 + $0xc7] sm:$0xff] }
  0xa8   : > { %v733_v34 = vpop.permute.xlu1 %732 }
  0xa9   : > { %v998_v35 = vsel %vm246_vm0, %v982_v33, %v733_v34  ;;  %v711_v41 = vpop.permute.xlu0 %710  ;;  %v2549_v33 = vld [vmem:[%s3405_s2 + $0x170] sm:$0xff]  }
  0xaa   : > { %904 = vrot.lane.b32.xlu1 %v2879_v21, %s2569_s13  ;;  %v2213_v37 = vcombine.low %v996_v12, %v998_v35  ;;  %v2540_v21 = vld [vmem:[%s3405_s2 + $0x108] sm:$0xff]   ;;  %v984_v10 = vsel %vm303_vm1, %v687_v29, %v711_v41  ;;  %v540_v12 = vld [vmem:[#allocation3 + $0x81] sm:$0xff] }
  0xab   : > { %926 = vrot.lane.b32.xlu0 %v2875_v20, %s2568_s12  ;;  %v462_v20 = vld [vmem:[#allocation2 + $0xaf] sm:$0xff]  ;;  %v2552_v41 = vld [vmem:[%s3405_s2 + $0x138] sm:$0xff]  }
  0xac   : > { %v689_v43 = vpop.permute.xlu1 %688  ;;  %1851 = vmatprep.mubr.bf16.mxu0 %v2213_v37  ;;  %v2550_v35 = vld [vmem:[%s3405_s2 + $0x130] sm:$0xff]   ;;  %v2551_v37 = vld [vmem:[%s3405_s2 + $0x178] sm:$0xff]  }
  0xad   : > { %1852 = vmatmul.mubr.bf16.vlgmr.msra.gmra.mrb[0].mxu0 %v2212_v40  ;;  %v663_v45 = vpop.permute.xlu0 %662  ;;  %v3163_v40 = vpack.c.bf16 %v540_v12, %v540_v12 }
  0xae   : > { %856 = vrot.lane.b32.xlu1 %v3063_v38, %s2569_s13  ;;  %2424 = vmatpush3.bf16.msra.mxu0 %v2538_v39  ;;  %v946_v3 = vsel %vm246_vm0, %v2943_v44, %v663_v45 }
  0xaf   : > { %2425 = vmatprep.subr.bf16.mxu0 %v2539_v42  ;;  %878 = vrot.lane.b32.xlu0 %v2995_v6, %s2570_s23  ;;  %v968_v44 = vsel %vm962_vm4, %v946_v3, %v687_v29  ;;  %v3139_v29 = vpack.c.bf16 %v527_v24, %v527_v24  ;;  %v440_v3 = vld [vmem:[#allocation3 + $0x9] sm:$0xff] }
  0xb0   : > { %v713_v50 = vpop.permute.xlu1 %712  ;;  %v593_v24 = vld [vmem:[#allocation2 + $0xe0] sm:$0xff] }
  0xb1   : > { %v735_v55 = vpop.permute.xlu0 %734  ;;  %v986_v11 = vsel %vm303_vm1, %v689_v43, %v713_v50 }
  0xb2   : > { %928 = vrot.lane.b32.xlu1 %v2893_v27, %s2568_s12  ;;  %2426 = vmatpush3.bf16.msra.mxu0 %v2540_v21  ;;  %v3095_v27 = vpack.c.bf16 %v462_v20, %v462_v20  ;;  %v1000_v14 = vsel %vm246_vm0, %v984_v10, %v735_v55  ;;  %v541_v21 = vld [vmem:[#allocation3 + $0x99] sm:$0xff] }
  0xb3   : > { %2427 = vmatprep.subr.bf16.mxu0 %v2541_v49  ;;  %814 = vrot.lane.b32.xlu0 %v2969_v58, %s2570_s23  ;;  %v3184_v55 = vpack.c.bf16 %v541_v21, %v541_v21  ;;  %v560_v21 = vld [vmem:[#allocation2 + $0xdf] sm:$0xff] }
  0xb4   : > { %v665_v60 = vpop.permute.xlu1 %664 }
  0xb5   : > { %v949_v61 = vsel %vm246_vm0, %v2987_v4, %v665_v60  ;;  %v3106_v5 = vpop.permute.xlu0 %690  ;;  %v463_v4 = vld [vmem:[#allocation2 + $0xc7] sm:$0xff] }
  0xb6   : > { %880 = vrot.lane.b32.xlu1 %v3027_v13, %s2570_s23  ;;  %2428 = vmatpush3.bf16.msra.mxu0 %v2542_v54  ;;  %v970_v57 = vsel %vm962_vm4, %v949_v61, %v689_v43  ;;  %v3121_v17 = vpack.c.bf16 %v463_v4, %v463_v4  ;;  %v448_v4 = vpack.c.bf16 %v440_v3, %v440_v3  ;;  %v641_v3 = vld [vmem:[#allocation3 + $0xe1] sm:$0xff] }
  0xb7   : > { %2429 = vmatprep.subr.bf16.mxu0 %v2543_v59  ;;  %766 = vrot.lane.b32.xlu0 %v3095_v27, %s2569_s13  ;;  %v2219_v23 = vcombine.low %v968_v44, %v970_v57 }
  0xb8   : > { %v737_v56 = vpop.permute.xlu1 %736 }
  0xb9   : > { %v1002_v1 = vsel %vm246_vm0, %v986_v11, %v737_v56  ;;  %v715_v22 = vpop.permute.xlu0 %714 }
  0xba   : > { %v2220_v16 = vcombine.low %v1000_v14, %v1002_v1  ;;  %816 = vrot.lane.b32.xlu1 %v3099_v62, %s2570_s23  ;;  %2430 = vmatpush3.bf16.msra.mxu0 %v2544_v0 }
  0xbb   : > { %2431 = vmatprep.subr.bf16.mxu0 %v2545_v7  ;;  %838 = vrot.lane.b32.xlu0 %v2983_v2, %s2568_s12  ;;  %v3151_v2 = vpack.c.bf16 %v479_v32, %v479_v32 }
  0xbc   : > { %v693_v28 = vpop.permute.xlu1 %692  ;;  %1859 = vmatprep.mubr.bf16.mxu0 %v2220_v16 }
  0xbd   : > { %1860 = vmatmul.mubr.bf16.gmra.mrb[4].mxu0 %v2219_v23  ;;  %v667_v31 = vpop.permute.xlu0 %666 }
  0xbe   : > { %768 = vrot.lane.b32.xlu1 %v3121_v17, %s2569_s13  ;;  %2432 = vmatpush3.bf16.msra.mxu0 %v2546_v18  ;;  %v952_v42 = vsel %vm246_vm0, %v2995_v6, %v667_v31  ;;  %v2555_v31 = vld [vmem:[%s3405_s2 + $0x190] sm:$0xff]  }
  0xbf   : > { %2433 = vmatprep.subr.bf16.mxu0 %v2547_v25  ;;  %790 = vrot.lane.b32.xlu0 %v2978_v63, %s2568_s12  ;;  %v972_v6 = vsel %vm962_vm4, %v952_v42, %v3106_v5 }
  0xc0   : > { %v717_v34 = vpop.permute.xlu1 %716 }
  0xc1   : > { %v739_v36 = vpop.permute.xlu0 %738 }
  0xc2   : > { %840 = vrot.lane.b32.xlu1 %v3139_v29, %s2568_s12  ;;  %2434 = vmatpush3.bf16.msra.mxu0 %v2548_v30  ;;  %v601_v30 = vpack.c.bf16 %v593_v24, %v593_v24 }
  0xc3   : > { %2435 = vmatprep.subr.bf16.mxu0 %v2549_v33  ;;  %906 = vrot.lane.b32.xlu0 %v2951_v48, %s2569_s13  ;;  %v990_v48 = vsel %vm303_vm1, %v693_v28, %v717_v34  ;;  %v543_v33 = vld [vmem:[#allocation3 + $0xc9] sm:$0xff] }
  0xc4   : > { %v669_v39 = vpop.permute.xlu1 %668  ;;  %v551_v12 = vpack.c.bf16 %v543_v33, %v543_v33 }
  0xc5   : > { %v955_v63 = vsel %vm246_vm0, %v3027_v13, %v669_v39  ;;  %v803_v43 = vpop.permute.xlu0 %802  ;;  %v988_v13 = vsel %vm303_vm1, %v3106_v5, %v715_v22  ;;  %v542_v22 = vld [vmem:[#allocation3 + $0xb1] sm:$0xff] }
  0xc6   : > { %792 = vrot.lane.b32.xlu1 %v3151_v2, %s2568_s12  ;;  %2436 = vmatpush3.bf16.msra.mxu0 %v2550_v35  ;;  %v974_v45 = vsel %vm962_vm4, %v955_v63, %v693_v28  ;;  %v1004_v50 = vsel %vm246_vm0, %v988_v13, %v739_v36  ;;  %v1053_v5 = vsel %vm246_vm0, %v2792_v46, %v803_v43  ;;  %v592_v46 = vld [vmem:[#allocation2 + $0xc8] sm:$0xff]  ;;  %v609_v36 = vld [vmem:[#allocation3 + $0xe0] sm:$0xff] }
  0xc7   : > { %2437 = vmatprep.subr.bf16.mxu0 %v2551_v37  ;;  %858 = vrot.lane.b32.xlu0 %v3163_v40, %s2569_s13  ;;  %v2226_v59 = vcombine.low %v972_v6, %v974_v45  ;;  %v3217_v16 = vpack.c.bf16 %v592_v46, %v592_v46  ;;  %v3226_v28 = vpack.c.bf16 %v542_v22, %v542_v22 }
  0xc8   : > { %v741_v49 = vpop.permute.xlu1 %740  ;;  %v617_v63 = vpack.c.bf16 %v609_v36, %v609_v36 }
  0xc9   : > { %v1006_v20 = vsel %vm246_vm0, %v990_v48, %v741_v49  ;;  %v755_v47 = vpop.permute.xlu0 %754 }
  0xca   : > { %v2227_v54 = vcombine.low %v1004_v50, %v1006_v20  ;;  %908 = vrot.lane.b32.xlu1 %v2961_v52, %s2569_s13  ;;  %2438 = vmatpush3.bf16.msra.mxu0 %v2552_v41  ;;  %v2557_v41 = vld [vmem:[%s3405_s2 + $0x1a0] sm:$0xff]   ;;  %v568_v20 = vpack.c.bf16 %v560_v21, %v560_v21 }
  0xcb   : > { %930 = vrot.lane.b32.xlu0 %v2957_v53, %s2568_s12 }
  0xcc   : > { %v805_v60 = vpop.permute.xlu1 %804  ;;  %1867 = vmatprep.mubr.bf16.mxu0 %v2227_v54 }
  0xcd   : > { %1868 = vmatmul.mubr.bf16.gmra.mrb[8].mxu0 %v2226_v59  ;;  %v3190_v61 = vpop.permute.xlu0 %826  ;;  %v1056_v53 = vsel %vm246_vm0, %v2801_v51, %v805_v60  ;;  %v1013_v51 = vsel %vm303_vm1, %v448_v4, %v755_v47  ;;  %v2558_v47 = vld [vmem:[%s3405_s2 + $0x1a8] sm:$0xff]   ;;  %v490_v60 = vld [vmem:[#allocation2 + $0x50] sm:$0xff]  ;;  %v649_v4 = vpack.c.bf16 %v641_v3, %v641_v3 }
  0xce   : > { %860 = vrot.lane.b32.xlu1 %v3184_v55, %s2569_s13  ;;  %v1076_v10 = vsel %vm962_vm4, %v1053_v5, %v3190_v61 }
  0xcf   : > { %882 = vrot.lane.b32.xlu0 %v3035_v15, %s2570_s23 }
  0xd0   : > { %v757_v0 = vpop.permute.xlu1 %756 }
  0xd1   : > { %v779_v52 = vpop.permute.xlu0 %778  ;;  %v1016_v56 = vsel %vm303_vm1, %v3007_v9, %v757_v0  ;;  %v2554_v9 = vld [vmem:[%s3405_s2 + $0x188] sm:$0xff]  }
  0xd2   : > { %932 = vrot.lane.b32.xlu1 %v2969_v58, %s2568_s12  ;;  %v1036_v1 = vsel %vm962_vm4, %v1013_v51, %v779_v52  ;;  %v491_v0 = vld [vmem:[#allocation2 + $0x68] sm:$0xff]  ;;  %v498_v52 = vpack.c.bf16 %v490_v60, %v490_v60 }
  0xd3   : > { %1171 = vrot.lane.b32.xlu0 %v3015_v8, %s2570_s23  ;;  %v499_v5 = vpack.c.bf16 %v491_v0, %v491_v0 }
  0xd4   : > { %v3200_v7 = vpop.permute.xlu1 %828 }
  0xd5   : > { %v1078_v11 = vsel %vm962_vm4, %v1056_v53, %v3200_v7  ;;  %v695_v57 = vpop.permute.xlu0 %694 }
  0xd6   : > { %884 = vrot.lane.b32.xlu1 %v3095_v27, %s2570_s23  ;;  %v2215_v58 = vcombine.low %v1076_v10, %v1078_v11 }
  0xd7   : > { %1175 = vrot.lane.b32.xlu0 %v3063_v38, %s2570_s23 }
  0xd8   : > { %v781_v14 = vpop.permute.xlu1 %780  ;;  %1916 = vmatprep.mubr.bf16.mxu1 %v2215_v58 }
  0xd9   : > { %v1038_v44 = vsel %vm962_vm4, %v1016_v56, %v781_v14  ;;  %v719_v23 = vpop.permute.xlu0 %718 }
  0xda   : > { %v2214_v18 = vcombine.low %v1036_v1, %v1038_v44  ;;  %1173 = vrot.lane.b32.xlu1 %v3048_v26, %s2570_s23  ;;  %v992_v13 = vsel %vm303_vm1, %v695_v57, %v719_v23 }
  0xdb   : > { %910 = vrot.lane.b32.xlu0 %v3217_v16, %s2569_s13 }
  0xdc   : > { %v697_v25 = vpop.permute.xlu1 %696  ;;  %1917 = vmatmul.mubr.bf16.vlgmr.msra.gmra.mrb[0].mxu1 %v2214_v18 }
  0xdd   : > { %2474 = vmatpush3.bf16.msra.mxu1 %v3129_v19  ;;  %v671_v32 = vpop.permute.xlu0 %670  ;;  %v2556_v19 = vld [vmem:[%s3405_s2 + $0x198] sm:$0xff]  }
  0xde   : > { %1177 = vrot.lane.b32.xlu1 %v3163_v40, %s2570_s23  ;;  %2475 = vmatprep.subr.bf16.mxu1 %v2554_v9  ;;  %v958_v42 = vsel %vm246_vm0, %v3035_v15, %v671_v32 }
  0xdf   : > { %862 = vrot.lane.b32.xlu0 %v3226_v28, %s2569_s13  ;;  %v976_v50 = vsel %vm962_vm4, %v958_v42, %v695_v57 }
  0xe0   : > { %v721_v34 = vpop.permute.xlu1 %720 }
  0xe1   : > { %2476 = vmatpush3.bf16.msra.mxu1 %v2554_v9  ;;  %v743_v35 = vpop.permute.xlu0 %742 }
  0xe2   : > { %912 = vrot.lane.b32.xlu1 %v601_v30, %s2569_s13  ;;  %2477 = vmatprep.subr.bf16.mxu1 %v2555_v31  ;;  %v1008_v45 = vsel %vm246_vm0, %v992_v13, %v743_v35  ;;  %v570_v30 = vld [vmem:[#allocation3 + $0x37] sm:$0xff] }
  0xe3   : > { %934 = vrot.lane.b32.xlu0 %v3099_v62, %s2568_s12  ;;  %v578_v33 = vpack.c.bf16 %v570_v30, %v570_v30 }
  0xe4   : > { %v673_v37 = vpop.permute.xlu1 %672 }
  0xe5   : > { %v961_v39 = vsel %vm246_vm0, %v3095_v27, %v673_v37  ;;  %2478 = vmatpush3.bf16.msra.mxu1 %v2555_v31  ;;  %v807_v43 = vpop.permute.xlu0 %806  ;;  %v994_v27 = vsel %vm303_vm1, %v697_v25, %v721_v34  ;;  %v571_v31 = vld [vmem:[#allocation3 + $0x4f] sm:$0xff] }
  0xe6   : > { %864 = vrot.lane.b32.xlu1 %v551_v12, %s2569_s13  ;;  %2479 = vmatprep.subr.bf16.mxu1 %v2556_v19  ;;  %v978_v62 = vsel %vm962_vm4, %v961_v39, %v697_v25  ;;  %v1059_v11 = vsel %vm246_vm0, %v498_v52, %v807_v43  ;;  %v579_v34 = vpack.c.bf16 %v571_v31, %v571_v31 }
  0xe7   : > { %886 = vrot.lane.b32.xlu0 %v3121_v17, %s2570_s23  ;;  %v2233_v54 = vcombine.low %v976_v50, %v978_v62 }
  0xe8   : > { %v745_v48 = vpop.permute.xlu1 %744 }
  0xe9   : > { %v1010_v49 = vsel %vm246_vm0, %v994_v27, %v745_v48  ;;  %2480 = vmatpush3.bf16.msra.mxu1 %v2556_v19  ;;  %v759_v6 = vpop.permute.xlu0 %758 }
  0xea   : > { %v2234_v15 = vcombine.low %v1008_v45, %v1010_v49  ;;  %936 = vrot.lane.b32.xlu1 %v617_v63, %s2568_s12  ;;  %2481 = vmatprep.subr.bf16.mxu1 %v2557_v41  ;;  %v1019_v1 = vsel %vm303_vm1, %v3015_v8, %v759_v6  ;;  %v492_v45 = vld [vmem:[#allocation2 + $0x80] sm:$0xff]  ;;  %v493_v49 = vld [vmem:[#allocation2 + $0x98] sm:$0xff] }
  0xeb   : > { %1179 = vrot.lane.b32.xlu0 %v3184_v55, %s2570_s23 }
  0xec   : > { %v809_v59 = vpop.permute.xlu1 %808  ;;  %1875 = vmatprep.mubr.bf16.mxu0 %v2234_v15  ;;  %v500_v15 = vpack.c.bf16 %v492_v45, %v492_v45 }
  0xed   : > { %1876 = vmatmul.mubr.bf16.gmra.mrb[12].mxu0 %v2233_v54  ;;  %2482 = vmatpush3.bf16.msra.mxu1 %v2557_v41  ;;  %v3265_v17 = vpop.permute.xlu0 %830  ;;  %v1062_v58 = vsel %vm246_vm0, %v499_v5, %v809_v59 }
  0xee   : > { %888 = vrot.lane.b32.xlu1 %v568_v20, %s2570_s23  ;;  %2483 = vmatprep.subr.bf16.mxu1 %v2558_v47  ;;  %v1080_v57 = vsel %vm962_vm4, %v1059_v11, %v3265_v17  ;;  %v501_v20 = vpack.c.bf16 %v493_v49, %v493_v49 }
  0xef   : > { %1183 = vrot.lane.b32.xlu0 %v551_v12, %s2570_s23 }
  0xf0   : > { %v761_v53 = vpop.permute.xlu1 %760 }
  0xf1   : > { %2484 = vmatpush3.bf16.msra.mxu1 %v2558_v47  ;;  %v783_v10 = vpop.permute.xlu0 %782  ;;  %v1022_v44 = vsel %vm303_vm1, %v3048_v26, %v761_v53 }
  0xf2   : > { %1181 = vrot.lane.b32.xlu1 %v3226_v28, %s2570_s23  ;;  %v1040_v22 = vsel %vm962_vm4, %v1019_v1, %v783_v10 }
  0xf4   : > { %v3272_v46 = vpop.permute.xlu1 %832 }
  0xf5   : > { %v1082_v51 = vsel %vm962_vm4, %v1062_v58, %v3272_v46  ;;  %v899_v14 = vpop.permute.xlu0 %898 }
  0xf6   : > { %v2222_v56 = vcombine.low %v1080_v57, %v1082_v51  ;;  %1185 = vrot.lane.b32.xlu1 %v649_v4, %s2570_s23  ;;  %v1125_v19 = vsel %vm303_vm1, %v578_v33, %v899_v14  ;;  %v572_v51 = vld [vmem:[#allocation3 + $0x67] sm:$0xff] }
  0xf7   : > { %v580_v1 = vpack.c.bf16 %v572_v51, %v572_v51 }
  0xf8   : > { %v785_v18 = vpop.permute.xlu1 %784  ;;  %1924 = vmatprep.mubr.bf16.mxu1 %v2222_v56  ;;  %v573_v56 = vld [vmem:[#allocation3 + $0x7f] sm:$0xff] }
  0xf9   : > { %v1042_v9 = vsel %vm962_vm4, %v1022_v44, %v785_v18  ;;  %v851_v24 = vpop.permute.xlu0 %850  ;;  %v581_v44 = vpack.c.bf16 %v573_v56, %v573_v56 }
  0xfa   : > { %v2221_v23 = vcombine.low %v1040_v22, %v1042_v9  ;;  %v1092_v41 = vsel %vm303_vm1, %v3190_v61, %v851_v24 }
  0xfc   : > { %v901_v25 = vpop.permute.xlu1 %900  ;;  %1925 = vmatmul.mubr.bf16.gmra.mrb[4].mxu1 %v2221_v23 }
  0xfd   : > { %v923_v32 = vpop.permute.xlu0 %922  ;;  %v1128_v26 = vsel %vm303_vm1, %v579_v34, %v901_v25 }
  0xfe   : > { %v1148_v36 = vsel %vm962_vm4, %v1125_v19, %v923_v32 }
 0x100   : > { %v853_v12 = vpop.permute.xlu1 %852 }
 0x101   : > { %v875_v8 = vpop.permute.xlu0 %874  ;;  %v1094_v42 = vsel %vm303_vm1, %v3200_v7, %v853_v12 }
 0x102   : > { %v1108_v21 = vsel %vm246_vm0, %v1092_v41, %v875_v8 }
 0x104   : > { %v925_v35 = vpop.permute.xlu1 %924 }
 0x105   : > { %v1150_v37 = vsel %vm962_vm4, %v1128_v26, %v925_v35  ;;  %v811_v63 = vpop.permute.xlu0 %810  ;;  %v494_v35 = vld [vmem:[#allocation2 + $0xb0] sm:$0xff] }
 0x106   : > { %v2217_v39 = vcombine.low %v1148_v36, %v1150_v37  ;;  %v1065_v7 = vsel %vm246_vm0, %v500_v15, %v811_v63  ;;  %v502_v37 = vpack.c.bf16 %v494_v35, %v494_v35 }
 0x108   : > { %v877_v43 = vpop.permute.xlu1 %876  ;;  %1981 = vmatprep.mubr.bf16.mxu0 %v2217_v39 }
 0x109   : > { %v1110_v13 = vsel %vm246_vm0, %v1094_v42, %v877_v43  ;;  %v763_v62 = vpop.permute.xlu0 %762 }
 0x10a   : > { %v2216_v27 = vcombine.low %v1108_v21, %v1110_v13  ;;  %v1025_v52 = vsel %vm303_vm1, %v3063_v38, %v763_v62 }
 0x10c   : > { %v813_v48 = vpop.permute.xlu1 %812  ;;  %1982 = vmatmul.mubr.bf16.vlgmr.msra.gmra.mrb[16].mxu0 %v2216_v27 }
 0x10d   : > { %v3295_v50 = vpop.permute.xlu0 %834  ;;  %v1068_v54 = vsel %vm246_vm0, %v501_v20, %v813_v48 }
 0x10e   : > { %v1084_v59 = vsel %vm962_vm4, %v1065_v7, %v3295_v50 }
 0x110   : > { %v765_v61 = vpop.permute.xlu1 %764 }
 0x111   : > { %v787_v6 = vpop.permute.xlu0 %786  ;;  %v1028_v5 = vsel %vm303_vm1, %v3163_v40, %v765_v61  ;;  %v574_v61 = vld [vmem:[#allocation3 + $0x97] sm:$0xff] }
 0x112   : > { %v1044_v4 = vsel %vm962_vm4, %v1025_v52, %v787_v6  ;;  %v575_v6 = vld [vmem:[#allocation3 + $0xaf] sm:$0xff] }
 0x113   : > { %v618_v52 = vld [vmem:[#allocation2 + $0x39] sm:$0xff] }
 0x114   : > { %v3299_v47 = vpop.permute.xlu1 %836 }
 0x115   : > { %v1086_v60 = vsel %vm962_vm4, %v1068_v54, %v3299_v47  ;;  %v903_v3 = vpop.permute.xlu0 %902  ;;  %v582_v54 = vpack.c.bf16 %v574_v61, %v574_v61 }
 0x116   : > { %v2229_v0 = vcombine.low %v1084_v59, %v1086_v60  ;;  %v1131_v22 = vsel %vm303_vm1, %v580_v1, %v903_v3  ;;  %v583_v59 = vpack.c.bf16 %v575_v6, %v575_v6  ;;  %v625_v6 = vld [vmem:[#allocation2 + $0xe1] sm:$0xff] }
 0x118   : > { %v789_v53 = vpop.permute.xlu1 %788  ;;  %1932 = vmatprep.mubr.bf16.mxu1 %v2229_v0 }
 0x119   : > { %v1046_v10 = vsel %vm962_vm4, %v1028_v5, %v789_v53  ;;  %v855_v58 = vpop.permute.xlu0 %854 }
 0x11a   : > { %v2228_v11 = vcombine.low %v1044_v4, %v1046_v10  ;;  %v1096_v31 = vsel %vm303_vm1, %v3265_v17, %v855_v58  ;;  %v619_v10 = vld [vmem:[#allocation2 + $0x51] sm:$0xff] }
 0x11c   : > { %v905_v57 = vpop.permute.xlu1 %904  ;;  %1933 = vmatmul.mubr.bf16.gmra.mrb[8].mxu1 %v2228_v11  ;;  %v626_v11 = vpack.c.bf16 %v618_v52, %v618_v52 }
 0x11d   : > { %v927_v14 = vpop.permute.xlu0 %926  ;;  %v1134_v40 = vsel %vm303_vm1, %v581_v44, %v905_v57 }
 0x11e   : > { %v1152_v23 = vsel %vm962_vm4, %v1131_v22, %v927_v14  ;;  %v620_v14 = vld [vmem:[#allocation2 + $0x69] sm:$0xff]  ;;  %v621_v22 = vld [vmem:[#allocation2 + $0x81] sm:$0xff] }
 0x120   : > { %v857_v18 = vpop.permute.xlu1 %856 }
 0x121   : > { %v879_v38 = vpop.permute.xlu0 %878  ;;  %v1098_v32 = vsel %vm303_vm1, %v3272_v46, %v857_v18  ;;  %v627_v18 = vpack.c.bf16 %v619_v10, %v619_v10 }
 0x122   : > { %v1112_v34 = vsel %vm246_vm0, %v1096_v31, %v879_v38 }
 0x124   : > { %v929_v9 = vpop.permute.xlu1 %928 }
 0x125   : > { %v1154_v24 = vsel %vm962_vm4, %v1134_v40, %v929_v9  ;;  %v815_v30 = vpop.permute.xlu0 %814  ;;  %v628_v9 = vpack.c.bf16 %v620_v14, %v620_v14 }
 0x126   : > { %v2224_v25 = vcombine.low %v1152_v23, %v1154_v24  ;;  %v1071_v17 = vsel %vm246_vm0, %v502_v37, %v815_v30 }
 0x128   : > { %v881_v33 = vpop.permute.xlu1 %880  ;;  %1989 = vmatprep.mubr.bf16.mxu0 %v2224_v25  ;;  %v629_v25 = vpack.c.bf16 %v621_v22, %v621_v22 }
 0x129   : > { %v1114_v12 = vsel %vm246_vm0, %v1098_v32, %v881_v33  ;;  %v767_v19 = vpop.permute.xlu0 %766 }
 0x12a   : > { %v2223_v8 = vcombine.low %v1112_v34, %v1114_v12  ;;  %v1031_v27 = vsel %vm303_vm1, %v3184_v55, %v767_v19  ;;  %v577_v19 = vld [vmem:[#allocation3 + $0xdf] sm:$0xff] }
 0x12b   : > { %v585_v35 = vpack.c.bf16 %v577_v19, %v577_v19 }
 0x12c   : > { %v817_v26 = vpop.permute.xlu1 %816  ;;  %1990 = vmatmul.mubr.bf16.gmra.mrb[20].mxu0 %v2223_v8 }
 0x12d   : > { %v3321_v36 = vpop.permute.xlu0 %838  ;;  %v1074_v46 = vsel %vm246_vm0, %v3217_v16, %v817_v26 }
 0x12e   : > { %v1088_v42 = vsel %vm962_vm4, %v1071_v17, %v3321_v36 }
 0x130   : > { %v769_v39 = vpop.permute.xlu1 %768 }
 0x131   : > { %v791_v63 = vpop.permute.xlu0 %790  ;;  %v1034_v62 = vsel %vm303_vm1, %v3226_v28, %v769_v39 }
 0x132   : > { %v1048_v16 = vsel %vm962_vm4, %v1031_v27, %v791_v63  ;;  %v623_v27 = vld [vmem:[#allocation2 + $0xb1] sm:$0xff] }
 0x134   : > { %v3326_v41 = vpop.permute.xlu1 %840 }
 0x135   : > { %v1090_v43 = vsel %vm962_vm4, %v1074_v46, %v3326_v41  ;;  %v907_v13 = vpop.permute.xlu0 %906 }
 0x136   : > { %v2236_v21 = vcombine.low %v1088_v42, %v1090_v43  ;;  %v1137_v0 = vsel %vm303_vm1, %v582_v54, %v907_v13  ;;  %v622_v42 = vld [vmem:[#allocation2 + $0x99] sm:$0xff] }
 0x138   : > { %v793_v48 = vpop.permute.xlu1 %792  ;;  %1940 = vmatprep.mubr.bf16.mxu1 %v2236_v21 }
 0x139   : > { %v1050_v45 = vsel %vm962_vm4, %v1034_v62, %v793_v48  ;;  %v859_v15 = vpop.permute.xlu0 %858  ;;  %v630_v62 = vpack.c.bf16 %v622_v42, %v622_v42 }
 0x13a   : > { %v2235_v49 = vcombine.low %v1048_v16, %v1050_v45  ;;  %v1100_v57 = vsel %vm303_vm1, %v3295_v50, %v859_v15 }
 0x13c   : > { %v909_v20 = vpop.permute.xlu1 %908  ;;  %1941 = vmatmul.mubr.bf16.gmra.mrb[12].mxu1 %v2235_v49 }
 0x13d   : > { %v931_v7 = vpop.permute.xlu0 %930  ;;  %v1140_v28 = vsel %vm303_vm1, %v583_v59, %v909_v20  ;;  %v631_v20 = vpack.c.bf16 %v623_v27, %v623_v27 }
 0x13e   : > { %v1156_v5 = vsel %vm962_vm4, %v1137_v0, %v931_v7 }
 0x140   : > { %v861_v60 = vpop.permute.xlu1 %860 }
 0x141   : > { %v883_v55 = vpop.permute.xlu0 %882  ;;  %v1102_v51 = vsel %vm303_vm1, %v3299_v47, %v861_v60 }
 0x142   : > { %v1116_v1 = vsel %vm246_vm0, %v1100_v57, %v883_v55 }
 0x144   : > { %v933_v3 = vpop.permute.xlu1 %932 }
 0x145   : > { %v1158_v53 = vsel %vm962_vm4, %v1140_v28, %v933_v3  ;;  %v1172_v58 = vpop.permute.xlu0 %1171 }
 0x146   : > { %v2231_v4 = vcombine.low %v1156_v5, %v1158_v53  ;;  %v1189_v40 = vsel %vm246_vm0, %v626_v11, %v1172_v58 }
 0x148   : > { %v885_v56 = vpop.permute.xlu1 %884  ;;  %1997 = vmatprep.mubr.bf16.mxu0 %v2231_v4 }
 0x149   : > { %v1118_v44 = vsel %vm246_vm0, %v1102_v51, %v885_v56  ;;  %v1176_v23 = vpop.permute.xlu0 %1175 }
 0x14a   : > { %v2230_v38 = vcombine.low %v1116_v1, %v1118_v44  ;;  %v1195_v30 = vsel %vm246_vm0, %v628_v9, %v1176_v23 }
 0x14c   : > { %v1174_v24 = vpop.permute.xlu1 %1173  ;;  %1998 = vmatmul.mubr.bf16.gmra.mrb[24].mxu0 %v2230_v38 }
 0x14d   : > { %v1192_v50 = vsel %vm246_vm0, %v627_v18, %v1174_v24  ;;  %v911_v31 = vpop.permute.xlu0 %910 }
 0x14e   : > { %v2218_v47 = vcombine.low %v1189_v40, %v1192_v50  ;;  %v1143_v63 = vsel %vm303_vm1, %v3151_v2, %v911_v31 }
 0x150   : > { %v1178_v32 = vpop.permute.xlu1 %1177  ;;  %2485 = vmatprep.mubr.msk.bf16.mxu1 %vm962_vm4, %v2218_v47 }
 0x151   : > { %v1198_v33 = vsel %vm246_vm0, %v629_v25, %v1178_v32  ;;  %v863_v12 = vpop.permute.xlu0 %862 }
 0x152   : > { %v2225_v34 = vcombine.low %v1195_v30, %v1198_v33  ;;  %v1104_v16 = vsel %vm303_vm1, %v3321_v36, %v863_v12  ;;  %v633_v36 = vpack.c.bf16 %v625_v6, %v625_v6 }
 0x154   : > { %v913_v8 = vpop.permute.xlu1 %912  ;;  %2486 = vmatmul.mubr.msk.bf16.vlgmr.msra.gmra.mrb[16].mxu1 %vm962_vm4, %v2225_v34 }
 0x155   : > { %v935_v26 = vpop.permute.xlu0 %934  ;;  %v1146_v17 = vsel %vm303_vm1, %v585_v35, %v913_v8 }
 0x156   : > { %v1160_v43 = vsel %vm962_vm4, %v1143_v63, %v935_v26 }
 0x158   : > { %v865_v37 = vpop.permute.xlu1 %864 }
 0x159   : > { %v887_v39 = vpop.permute.xlu0 %886  ;;  %v1106_v45 = vsel %vm303_vm1, %v3326_v41, %v865_v37 }
 0x15a   : > { %v1120_v2 = vsel %vm246_vm0, %v1104_v16, %v887_v39 }
 0x15c   : > { %v937_v46 = vpop.permute.xlu1 %936 }
 0x15d   : > { %v1162_v21 = vsel %vm962_vm4, %v1146_v17, %v937_v46  ;;  %v1180_v48 = vpop.permute.xlu0 %1179 }
 0x15e   : > { %v2238_v13 = vcombine.low %v1160_v43, %v1162_v21  ;;  %v1201_v7 = vsel %vm246_vm0, %v630_v62, %v1180_v48 }
 0x160   : > { %v889_v49 = vpop.permute.xlu1 %888  ;;  %2005 = vmatprep.mubr.bf16.mxu0 %v2238_v13 }
 0x161   : > { %v1122_v15 = vsel %vm246_vm0, %v1106_v45, %v889_v49  ;;  %v1184_v59 = vpop.permute.xlu0 %1183 }
 0x162   : > { %v2237_v61 = vcombine.low %v1120_v2, %v1122_v15  ;;  %v1207_v41 = vsel %vm246_vm0, %v3139_v29, %v1184_v59 }
 0x164   : > { %v1182_v54 = vpop.permute.xlu1 %1181  ;;  %2006 = vmatmul.mubr.bf16.gmra.mrb[28].mxu0 %v2237_v61 }
 0x165   : > { %v1204_v60 = vsel %vm246_vm0, %v631_v20, %v1182_v54 }
 0x166   : > { %v2232_v55 = vcombine.low %v1201_v7, %v1204_v60 }
 0x168   : > { %v1186_v0 = vpop.permute.xlu1 %1185  ;;  %2489 = vmatprep.mubr.msk.bf16.mxu1 %vm962_vm4, %v2232_v55 }
 0x169   : > { %v1210_v28 = vsel %vm246_vm0, %v633_v36, %v1186_v0 }
 0x16a   : > { %v2239_v3 = vcombine.low %v1207_v41, %v1210_v28 }
 0x16c   : > { %2490 = vmatmul.mubr.msk.bf16.gmra.mrb[20].mxu1 %vm962_vm4, %v2239_v3 }
 0x180   : > { %v2359_v52 = vpop.f32.mrb[0].mxu0 }
 0x181   : > { %v2360_v5 = vpop.f32.mrb[1].mxu0 }
 0x182   : > { %v2361_v53 = vadd.f32 %v2360_v5, %v2359_v52  ;;  %v2362_v4 = vpop.f32.mrb[2].mxu0 }
 0x183   : > { %v2363_v10 = vpop.f32.mrb[3].mxu0 }
 0x184   : > { %v2364_v11 = vadd.f32 %v2363_v10, %v2362_v4 }
 0x190   : > { %v2365_v58 = vpop.f32.mrb[4].mxu0 }
 0x191   : > { %v2366_v57 = vpop.f32.mrb[5].mxu0 }
 0x192   : > { %v2367_v51 = vadd.f32 %v2366_v57, %v2365_v58  ;;  %v2368_v56 = vpop.f32.mrb[6].mxu0 }
 0x193   : > { %v2369_v14 = vpop.f32.mrb[7].mxu0 }
 0x194   : > { %v2370_v29 = vadd.f32 %v2369_v14, %v2368_v56 }
 0x1a0   : > { %v2371_v1 = vpop.f32.mrb[8].mxu0 }
 0x1a1   : > { %v2372_v44 = vpop.f32.mrb[9].mxu0 }
 0x1a2   : > { %v2373_v18 = vadd.f32 %v2372_v44, %v2371_v1  ;;  %v2374_v38 = vpop.f32.mrb[10].mxu0 }
 0x1a3   : > { %v2375_v22 = vpop.f32.mrb[11].mxu0 }
 0x1a4   : > { %v2376_v40 = vadd.f32 %v2375_v22, %v2374_v38 }
 0x1af   : > { %v2399_v9 = vpop.f32.mrb[0].mxu1 }
 0x1b0   : > { %v2400_v23 = vpop.f32.mrb[1].mxu1 }
 0x1b1   : > { %v2401_v24 = vadd.f32 %v2400_v23, %v2399_v9  ;;  %v2402_v50 = vpop.f32.mrb[2].mxu1 }
 0x1b2   : > { %v2403_v25 = vpop.f32.mrb[3].mxu1 }
 0x1b3   : > { %v1919_v47 = vadd.f32 %v2401_v24, %v2361_v53  ;;  %v2404_v30 = vadd.f32 %v2403_v25, %v2402_v50  ;;  %v2299_v24 = vld [vmem:[%s3407_s4] ss:$0 sm:$0xff] }
 0x1b5   : > { %v1922_v31 = vadd.f32 %v2404_v30, %v2364_v11 }
 0x1c0   : > { %v2377_v32 = vpop.f32.mrb[12].mxu0 }
 0x1c1   : > { %v2378_v33 = vpop.f32.mrb[13].mxu0 }
 0x1c2   : > { %v2379_v34 = vadd.f32 %v2378_v33, %v2377_v32  ;;  %v2380_v12 = vpop.f32.mrb[14].mxu0 }
 0x1c3   : > { %v2381_v8 = vpop.f32.mrb[15].mxu0 }
 0x1c4   : > { %v2382_v19 = vadd.f32 %v2381_v8, %v2380_v12 }
 0x1cf   : > { %v2405_v26 = vpop.f32.mrb[4].mxu1 }
 0x1d0   : > { %v2406_v35 = vpop.f32.mrb[5].mxu1 }
 0x1d1   : > { %v2407_v37 = vadd.f32 %v2406_v35, %v2405_v26  ;;  %v2408_v39 = vpop.f32.mrb[6].mxu1 }
 0x1d2   : > { %v2409_v63 = vpop.f32.mrb[7].mxu1 }
 0x1d3   : > { %v1927_v17 = vadd.f32 %v2407_v37, %v2367_v51  ;;  %v2410_v46 = vadd.f32 %v2409_v63, %v2408_v39 }
 0x1d5   : > { %v1930_v42 = vadd.f32 %v2410_v46, %v2370_v29 }
 0x1df   : > { %v2439_v43 = vpop.f32.mrb[16].mxu0 }
 0x1e0   : > { %v2440_v21 = vpop.f32.mrb[17].mxu0 }
 0x1e1   : > { %v2441_v13 = vadd.f32 %v2440_v21, %v2439_v43  ;;  %v2442_v27 = vpop.f32.mrb[18].mxu0 }
 0x1e2   : > { %v2443_v62 = vpop.f32.mrb[19].mxu0 }
 0x1e3   : > { %v2444_v48 = vadd.f32 %v2443_v62, %v2442_v27  ;;  %v1984_v16 = vadd.f32 %v2441_v13, %v1919_v47 }
 0x1e5   : > { %v1987_v45 = vadd.f32 %v2444_v48, %v1922_v31 }
 0x1ef   : > { %v2411_v49 = vpop.f32.mrb[8].mxu1 }
 0x1f0   : > { %v2412_v2 = vpop.f32.mrb[9].mxu1 }
 0x1f1   : > { %v2413_v15 = vadd.f32 %v2412_v2, %v2411_v49  ;;  %v2414_v20 = vpop.f32.mrb[10].mxu1 }
 0x1f2   : > { %v2415_v61 = vpop.f32.mrb[11].mxu1 }
 0x1f3   : > { %v1935_v6 = vadd.f32 %v2413_v15, %v2373_v18  ;;  %v2416_v7 = vadd.f32 %v2415_v61, %v2414_v20 }
 0x1f5   : > { %v1938_v54 = vadd.f32 %v2416_v7, %v2376_v40  ;;  %v2298_v40 = vld [vmem:[%s3406_s3] ss:$0 sm:$0xff] }
 0x1ff   : > { %v2445_v59 = vpop.f32.mrb[20].mxu0 }
 0x200   : > { %v2446_v60 = vpop.f32.mrb[21].mxu0 }
 0x201   : > { %v2447_v36 = vadd.f32 %v2446_v60, %v2445_v59  ;;  %v2448_v55 = vpop.f32.mrb[22].mxu0 }
 0x202   : > { %v2449_v41 = vpop.f32.mrb[23].mxu0 }
 0x203   : > { %v2450_v0 = vadd.f32 %v2449_v41, %v2448_v55  ;;  %v1992_v28 = vadd.f32 %v2447_v36, %v1927_v17 }
 0x205   : > { %v1995_v3 = vadd.f32 %v2450_v0, %v1930_v42 }
 0x20f   : > { %v2417_v52 = vpop.f32.mrb[12].mxu1 }
 0x210   : > { %v2418_v5 = vpop.f32.mrb[13].mxu1 }
 0x211   : > { %v2419_v53 = vadd.f32 %v2418_v5, %v2417_v52  ;;  %v2420_v4 = vpop.f32.mrb[14].mxu1 }
 0x212   : > { %v2421_v10 = vpop.f32.mrb[15].mxu1 }
 0x213   : > { %v1943_v11 = vadd.f32 %v2419_v53, %v2379_v34  ;;  %v2422_v58 = vadd.f32 %v2421_v10, %v2420_v4 }
 0x215   : > { %v1946_v57 = vadd.f32 %v2422_v58, %v2382_v19 }
 0x21f   : > { %v2451_v51 = vpop.f32.mrb[24].mxu0 }
 0x220   : > { %v2452_v56 = vpop.f32.mrb[25].mxu0 }
 0x221   : > { %v2453_v14 = vadd.f32 %v2452_v56, %v2451_v51  ;;  %v2454_v29 = vpop.f32.mrb[26].mxu0 }
 0x222   : > { %v2455_v1 = vpop.f32.mrb[27].mxu0 }
 0x223   : > { %v2456_v44 = vadd.f32 %v2455_v1, %v2454_v29  ;;  %v2000_v18 = vadd.f32 %v2453_v14, %v1935_v6 }
 0x225   : > { %v2003_v38 = vadd.f32 %v2456_v44, %v1938_v54 }
 0x227   : > { %v2487_v22 = vpop.f32.mrb[16].mxu1 }
 0x228   : > { %v2057_v9 = vadd.f32 %v2487_v22, %v1992_v28  ;;  %v2048_v23 = vpop.f32.mrb[17].mxu1 }
 0x229   : > { %v2049_v50 = vadd.f32 %v2048_v23, %v1984_v16  ;;  %v2488_v25 = vpop.f32.mrb[18].mxu1 }
 0x22a   : > { %v2088_v47 = vmul.f32 %v2298_v40, %v2057_v9  ;;  %v2060_v30 = vadd.f32 %v2488_v25, %v1995_v3  ;;  %v2051_v31 = vpop.f32.mrb[19].mxu1 }
 0x22b   : > { %v2086_v32 = vmul.f32 %v2298_v40, %v2049_v50  ;;  %v2052_v33 = vadd.f32 %v2051_v31, %v1987_v45 }
 0x22c   : > { %v2103_v34 = vadd.f32 %v2299_v24, %v2088_v47  ;;  %v2089_v12 = vmul.f32 %v2298_v40, %v2060_v30 }
 0x22d   : > { %v2101_v8 = vadd.f32 %v2299_v24, %v2086_v32  ;;  %v2087_v19 = vmul.f32 %v2298_v40, %v2052_v33 }
 0x22e   : > { %v2111_v26 = vmax.f32 %v2103_v34, 0.0  ;;  %v2104_v35 = vadd.f32 %v2299_v24, %v2089_v12 }
 0x22f   : > { %v2109_v37 = vmax.f32 %v2101_v8, 0.0  ;;  %v2102_v39 = vadd.f32 %v2299_v24, %v2087_v19 }
 0x230   : > { %v2119_v63 = vpack.c.bf16 %v2111_v26, %v2111_v26  ;;  %v2112_v17 = vmax.f32 %v2104_v35, 0.0 }
 0x231   : > { %v2117_v46 = vpack.c.bf16 %v2109_v37, %v2109_v37  ;;  %v2110_v42 = vmax.f32 %v2102_v39, 0.0 }
 0x232   : > { %2128 = vst.msk [vmem:[%s3382_s15 + $0x8] sm:$0xf] %vm2125_vm5, %v2119_v63  ;;  %v2120_v43 = vpack.c.bf16 %v2112_v17, %v2112_v17 }
 0x233   : > { %2126 = vst.msk [vmem:[%s3382_s15] sm:$0xf] %vm2125_vm5, %v2117_v46  ;;  %v2118_v21 = vpack.c.bf16 %v2110_v42, %v2110_v42 }
 0x234   : > { %2129 = vst.msk [vmem:[%s3382_s15 + $0xc] sm:$0xf] %vm2125_vm5, %v2120_v43 }
 0x235   : > { %2127 = vst.msk [vmem:[%s3382_s15 + $0x4] sm:$0xf] %vm2125_vm5, %v2118_v21 }
 0x237   : > { %v2457_v13 = vpop.f32.mrb[28].mxu0 }
 0x238   : > { %v2458_v27 = vpop.f32.mrb[29].mxu0 }
 0x239   : > { %v2459_v62 = vadd.f32 %v2458_v27, %v2457_v13  ;;  %v2460_v48 = vpop.f32.mrb[30].mxu0 }
 0x23a   : > { %v2461_v16 = vpop.f32.mrb[31].mxu0 }
 0x23b   : > { %v2462_v45 = vadd.f32 %v2461_v16, %v2460_v48  ;;  %v2008_v49 = vadd.f32 %v2459_v62, %v1943_v11 }
 0x23d   : > { %v2011_v2 = vadd.f32 %v2462_v45, %v1946_v57 }
 0x23f   : > { %v2491_v15 = vpop.f32.mrb[20].mxu1 }
 0x240   : > { %v2073_v20 = vadd.f32 %v2491_v15, %v2008_v49  ;;  %v2064_v61 = vpop.f32.mrb[21].mxu1 }
 0x241   : > { %v2065_v6 = vadd.f32 %v2064_v61, %v2000_v18  ;;  %v2492_v7 = vpop.f32.mrb[22].mxu1 }
 0x242   : > { %v2092_v54 = vmul.f32 %v2298_v40, %v2073_v20  ;;  %v2076_v59 = vadd.f32 %v2492_v7, %v2011_v2  ;;  %v2067_v60 = vpop.f32.mrb[23].mxu1 }
 0x243   : > { %v2090_v36 = vmul.f32 %v2298_v40, %v2065_v6  ;;  %v2068_v55 = vadd.f32 %v2067_v60, %v2003_v38 }
 0x244   : > { %v2107_v41 = vadd.f32 %v2299_v24, %v2092_v54  ;;  %v2093_v0 = vmul.f32 %v2298_v40, %v2076_v59 }
 0x245   : > { %v2105_v28 = vadd.f32 %v2299_v24, %v2090_v36  ;;  %v2091_v3 = vmul.f32 %v2298_v40, %v2068_v55 }
 0x246   : > { %v2115_v52 = vmax.f32 %v2107_v41, 0.0  ;;  %v2108_v5 = vadd.f32 %v2299_v24, %v2093_v0 }
 0x247   : > { %v2113_v53 = vmax.f32 %v2105_v28, 0.0  ;;  %v2106_v4 = vadd.f32 %v2299_v24, %v2091_v3 }
 0x248   : > { %v2123_v10 = vpack.c.bf16 %v2115_v52, %v2115_v52  ;;  %v2116_v11 = vmax.f32 %v2108_v5, 0.0 }
 0x249   : > { %v2121_v58 = vpack.c.bf16 %v2113_v53, %v2113_v53  ;;  %v2114_v57 = vmax.f32 %v2106_v4, 0.0 }
 0x24a   : > { %2132 = vst.msk [vmem:[%s3382_s15 + $0x18] sm:$0xf] %vm2125_vm5, %v2123_v10  ;;  %v2124_v51 = vpack.c.bf16 %v2116_v11, %v2116_v11 }
 0x24b   : > { %2130 = vst.msk [vmem:[%s3382_s15 + $0x10] sm:$0xf] %vm2125_vm5, %v2121_v58  ;;  %v2122_v56 = vpack.c.bf16 %v2114_v57, %v2114_v57 }
 0x24c   : > { %2133 = vst.msk [vmem:[%s3382_s15 + $0x1c] sm:$0xf] %vm2125_vm5, %v2124_v51 }
 0x24d   : > { %2131 = vst.msk [vmem:[%s3382_s15 + $0x14] sm:$0xf] %vm2125_vm5, %v2122_v56 }
 0x24e PF: > { %s15_s18 = sadd.s32 1, %s2565_s18  }
 0x24f   : > { %p12_p4 = scmp.ge.s32.totalorder %s15_s18, 4  }
 0x251   :  { %14 = sbr.rel (!%p12_p4) target bundleno = 1 (0x1), region = 77 }

// kernel: _lambda_.11
= control target key start
LH: loop header
LB: loop body
LE: loop exit
PB: predicated region body
PF: predicated region fallthrough
CT: control target
= control target key end

     0   :  { %s2053_s15 = smov 0   ;;  %s2828_s0 = inlined_call_operand.vmem [shape: bf16[2,16,16,16], index: 0, kind: input, shape index: {}]   ;;  %s2829_s1 = inlined_call_operand.vmem [shape: bf16[144,10], index: 1, kind: input, shape index: {}]   ;;  %s2830_s2 = inlined_call_operand.vmem [shape: f32[1,10], index: 2, kind: input, shape index: {}]   ;;  %s2831_s3 = inlined_call_operand.vmem [shape: f32[1,10], index: 3, kind: input, shape index: {}]   ;;  %s2832_s4 = inlined_call_operand.vmem [shape: f32[2,16,16,10], index: 4, kind: output, shape index: {}]  }
   0x1 LB: > { %s1848_s16 = sadd.s32 4294967295, %s2017_s15   ;;  %p1852_p0 = scmp.ge.s32.totalorder %s2017_s15, 1  ;;  %s2017_s15 = sphi %s2053_s15, %s14_s15  }
   0x2   : > { %p162_p1 = scmp.lt.s32.totalorder %s2017_s15, 3 }
   0x4   : > { %p163_p2 = pnand %p1852_p0, %p162_p1 }
   0x5   : > { %vm199_vm0 = vcmask (!%p163_p2), 130048   ;;  %vm203_vm1 = vcmask (!%p163_p2), 122880   ;;  %v2019_v0 = vmov (!%p163_p2), 0.0   ;;  %p188_p3 = scmp.lt.s32.totalorder (!%p163_p2), %s1848_s16, 1  ;;  %v2020_v1 = vmov (!%p163_p2), 0   ;;  %v2002_v2 = vld [vmem:[%s2829_s1] sm:$0xff] (!%p163_p2)  }
   0x6   : > { %166 = sbr.rel (%p163_p2) target bundleno = 604 (0x25c), region = 36  ;;  %201 = vst.msk [vmem:[#allocation2 + $0x8] sm:$0xff] (!%p163_p2), %vm199_vm0, %v2019_v0  ;;  %202 = vst.msk [vmem:[#allocation2 + $0x10] sm:$0xff] (!%p163_p2), %vm199_vm0, %v2019_v0  ;;  %1521 = vmatprep.subr.bf16.mxu0 (!%p163_p2), %v2020_v1  ;;  %1967 = vmatprep.subr.bf16.mxu1 (!%p163_p2), %v2020_v1  ;;  %v2003_v3 = vld [vmem:[%s2829_s1 + $0x8] sm:$0xff] (!%p163_p2)   ;;  %v2004_v4 = vld [vmem:[%s2829_s1 + $0x10] sm:$0xff] (!%p163_p2)   ;;  %s2021_s27 = smov (!%p163_p2), 16  }
   0x7   : > { %200 = vst.msk [vmem:[#allocation2] sm:$0xff] (!%p163_p2), %vm199_vm0, %v2019_v0  ;;  %205 = vst.msk [vmem:[#allocation2 + $0x20] sm:$0xff] (!%p163_p2), %vm199_vm0, %v2019_v0  ;;  %1522 = vmatpush1.bf16.msra.mxu0 (!%p163_p2), %v2002_v2  ;;  %1976 = vmatpush1.bf16.msra.mxu1 (!%p163_p2), %v2002_v2  ;;  %s2022_s28 = smov (!%p163_p2), 32   ;;  %v2005_v39 = vld [vmem:[%s2829_s1 + $0x18] sm:$0xff] (!%p163_p2)   ;;  %v2006_v51 = vld [vmem:[%s2829_s1 + $0x20] sm:$0xff] (!%p163_p2)   ;;  %s2023_s9 = smov (!%p163_p2), 48  }
   0x8   : > { %206 = vst.msk [vmem:[#allocation2 + $0x28] sm:$0xff] (!%p163_p2), %vm199_vm0, %v2019_v0  ;;  %207 = vst.msk [vmem:[#allocation2 + $0x30] sm:$0xff] (!%p163_p2), %vm199_vm0, %v2019_v0  ;;  %1523 = vmatprep.subr.bf16.mxu0 (!%p163_p2), %v2020_v1  ;;  %1968 = vmatprep.subr.bf16.mxu1 (!%p163_p2), %v2020_v1  ;;  %v2007_v63 = vld [vmem:[%s2829_s1 + $0x28] sm:$0xff] (!%p163_p2)   ;;  %s2024_s12 = smov (!%p163_p2), 64   ;;  %s2025_s13 = smov (!%p163_p2), 80   ;;  %vm1187_vm2 = vcmask (!%p163_p2), 261120  }
   0x9   : > { %209 = vst.msk [vmem:[#allocation2 + $0x40] sm:$0xff] (!%p163_p2), %vm199_vm0, %v2019_v0  ;;  %210 = vst.msk [vmem:[#allocation2 + $0x48] sm:$0xff] (!%p163_p2), %vm199_vm0, %v2019_v0  ;;  %s2026_s14 = smov (!%p163_p2), 96   ;;  %s2027_s17 = smov (!%p163_p2), 112   ;;  %vm1220_vm3 = vcmask (!%p163_p2), 392192   ;;  %vm1253_vm4 = vcmask (!%p163_p2), 523264  }
   0xa   : > { %211 = vst.msk [vmem:[#allocation2 + $0x50] sm:$0xff] (!%p163_p2), %vm199_vm0, %v2019_v0  ;;  %213 = vst.msk [vmem:[#allocation2 + $0x60] sm:$0xff] (!%p163_p2), %vm199_vm0, %v2019_v0  ;;  %vm1286_vm5 = vcmask (!%p163_p2), 654336   ;;  %vm1319_vm6 = vcmask (!%p163_p2), 785408   ;;  %vm1352_vm7 = vcmask (!%p163_p2), 916480   ;;  %vm1760_vm8 = vcmask (!%p163_p2), 80896  }
   0xb   : > { %214 = vst.msk [vmem:[#allocation2 + $0x68] sm:$0xff] (!%p163_p2), %vm199_vm0, %v2019_v0  ;;  %215 = vst.msk [vmem:[#allocation2 + $0x70] sm:$0xff] (!%p163_p2), %vm199_vm0, %v2019_v0  ;;  %1524 = vmatpush1.bf16.msra.mxu0 (!%p163_p2), %v2003_v3  ;;  %1977 = vmatpush1.bf16.msra.mxu1 (!%p163_p2), %v2003_v3 }
   0xc   : > { %217 = vst.msk [vmem:[#allocation2 + $0x80] sm:$0xff] (!%p163_p2), %vm199_vm0, %v2019_v0  ;;  %218 = vst.msk [vmem:[#allocation2 + $0x88] sm:$0xff] (!%p163_p2), %vm199_vm0, %v2019_v0  ;;  %1525 = vmatprep.subr.bf16.mxu0 (!%p163_p2), %v2020_v1  ;;  %1969 = vmatprep.subr.bf16.mxu1 (!%p163_p2), %v2020_v1 }
   0xd   : > { %219 = vst.msk [vmem:[#allocation2 + $0x90] sm:$0xff] %vm199_vm0, %v2019_v0  ;;  %221 = vst.msk [vmem:[#allocation2 + $0xa0] sm:$0xff] %vm199_vm0, %v2019_v0  ;;  %s2834_s16 = smov (!%p188_p3, %s1848_s16), 1  ;;  %v418_v8 = vld [vmem:[#allocation2 + $0x8] sm:$0xff]  ;;  %v419_v9 = vld [vmem:[#allocation2 + $0x10] sm:$0xff] }
   0xe   : > { %222 = vst.msk [vmem:[#allocation2 + $0xa8] sm:$0xff] %vm199_vm0, %v2019_v0  ;;  %223 = vst.msk [vmem:[#allocation2 + $0xb0] sm:$0xff] %vm199_vm0, %v2019_v0  ;;  %s1886_s21 = sshll.u32 %s2834_s16, 7  ;;  %v466_v10 = vld [vmem:[#allocation2 + $0x9] sm:$0xff]  ;;  %v450_v15 = vpack.c.bf16 %v419_v9, %v418_v8 }
   0xf   : > { %225 = vst.msk [vmem:[#allocation2 + $0xc0] sm:$0xff] %vm199_vm0, %v2019_v0  ;;  %226 = vst.msk [vmem:[#allocation2 + $0xc8] sm:$0xff] %vm199_vm0, %v2019_v0  ;;  %s2225_s24 = scalar_lea.vmem %s2828_s0, %s1886_s21  ;;  %1526 = vmatpush1.bf16.msra.mxu0 %v2004_v4  ;;  %1978 = vmatpush1.bf16.msra.mxu1 %v2004_v4  ;;  %v2008_v9 = vld [vmem:[%s2829_s1 + $0x30] sm:$0xff]  }
  0x10   : > { %227 = vst.msk [vmem:[#allocation2 + $0xd0] sm:$0xff] %vm199_vm0, %v2019_v0  ;;  %229 = vst.msk [vmem:[#allocation2 + $0xe0] sm:$0xff] %vm199_vm0, %v2019_v0  ;;  %v1958_v5 = vld [vmem:[%s2225_s24 + $0x38] sm:$0xff]   ;;  %v1959_v6 = vld [vmem:[%s2225_s24 + $0x40] sm:$0xff]   ;;  %819 = vrot.lane.b32.xlu0 %v450_v15, %s2021_s27  ;;  %1527 = vmatprep.subr.bf16.mxu0 %v2020_v1 }
  0x11   : > { %230 = vst.msk [vmem:[#allocation2 + $0xe8] sm:$0xff] %vm199_vm0, %v2019_v0  ;;  %231 = vst.msk [vmem:[#allocation2 + $0xf0] sm:$0xff] %vm199_vm0, %v2019_v0  ;;  %v1889_v7 = vld [vmem:[%s2225_s24] sm:$0xff]   ;;  %v1918_v11 = vunpack.c.l.bf16 %v1958_v5  ;;  %v1919_v12 = vunpack.c.h.bf16 %v1958_v5  ;;  %v1922_v13 = vunpack.c.l.bf16 %v1959_v6  ;;  %v1923_v14 = vunpack.c.h.bf16 %v1959_v6  ;;  %v1960_v19 = vld [vmem:[%s2225_s24 + $0x48] sm:$0xff]   ;;  %1970 = vmatprep.subr.bf16.mxu1 %v2020_v1 }
  0x12   : > { %233 = vst.msk [vmem:[#allocation2 + $0x100] sm:$0xff] %vm199_vm0, %v2019_v0  ;;  %234 = vst.msk [vmem:[#allocation2 + $0x108] sm:$0xff] %vm199_vm0, %v2019_v0  ;;  %v1890_v17 = vunpack.c.l.bf16 %v1889_v7  ;;  %v1891_v18 = vunpack.c.h.bf16 %v1889_v7  ;;  %v1952_v20 = vld [vmem:[%s2225_s24 + $0x8] sm:$0xff]   ;;  %v1926_v22 = vunpack.c.l.bf16 %v1960_v19  ;;  %v1927_v23 = vunpack.c.h.bf16 %v1960_v19  ;;  %v1961_v25 = vld [vmem:[%s2225_s24 + $0x50] sm:$0xff]  }
  0x13   : > { %235 = vst.msk [vmem:[#allocation2 + $0x110] sm:$0xff] %vm199_vm0, %v2019_v0  ;;  %237 = vst.msk [vmem:[#allocation2 + $0x120] sm:$0xff] %vm199_vm0, %v2019_v0  ;;  %v1894_v24 = vunpack.c.l.bf16 %v1952_v20  ;;  %v1953_v26 = vld [vmem:[%s2225_s24 + $0x10] sm:$0xff]   ;;  %v1962_v27 = vld [vmem:[%s2225_s24 + $0x58] sm:$0xff]   ;;  %v1895_v28 = vunpack.c.h.bf16 %v1952_v20  ;;  %v1930_v29 = vunpack.c.l.bf16 %v1961_v25  ;;  %v1931_v30 = vunpack.c.h.bf16 %v1961_v25  ;;  %1528 = vmatpush1.bf16.msra.mxu0 %v2005_v39  ;;  %1979 = vmatpush1.bf16.msra.mxu1 %v2005_v39 }
  0x14   : > { %238 = vst.msk [vmem:[#allocation2 + $0x128] sm:$0xff] %vm199_vm0, %v2019_v0  ;;  %239 = vst.msk [vmem:[#allocation2 + $0x130] sm:$0xff] %vm199_vm0, %v2019_v0  ;;  %v1898_v31 = vunpack.c.l.bf16 %v1953_v26  ;;  %v1954_v32 = vld [vmem:[%s2225_s24 + $0x18] sm:$0xff]   ;;  %v1963_v33 = vld [vmem:[%s2225_s24 + $0x60] sm:$0xff]   ;;  %v1899_v35 = vunpack.c.h.bf16 %v1953_v26  ;;  %v1934_v36 = vunpack.c.l.bf16 %v1962_v27  ;;  %v1935_v37 = vunpack.c.h.bf16 %v1962_v27  ;;  %1529 = vmatprep.subr.bf16.mxu0 %v2020_v1  ;;  %1971 = vmatprep.subr.bf16.mxu1 %v2020_v1 }
  0x15   : > { %241 = vst.msk [vmem:[#allocation2 + $0x140] sm:$0xff] %vm199_vm0, %v2019_v0  ;;  %242 = vst.msk [vmem:[#allocation2 + $0x148] sm:$0xff] %vm199_vm0, %v2019_v0  ;;  %v1955_v34 = vld [vmem:[%s2225_s24 + $0x20] sm:$0xff]   ;;  %v1902_v38 = vunpack.c.l.bf16 %v1954_v32  ;;  %v1903_v40 = vunpack.c.h.bf16 %v1954_v32  ;;  %v1938_v41 = vunpack.c.l.bf16 %v1963_v33  ;;  %v1939_v42 = vunpack.c.h.bf16 %v1963_v33  ;;  %v1964_v45 = vld [vmem:[%s2225_s24 + $0x68] sm:$0xff]  }
  0x16   : > { %243 = vst.msk [vmem:[#allocation2 + $0x150] sm:$0xff] %vm199_vm0, %v2019_v0  ;;  %245 = vst.msk [vmem:[#allocation2 + $0x160] sm:$0xff] %vm199_vm0, %v2019_v0  ;;  %v1906_v43 = vunpack.c.l.bf16 %v1955_v34  ;;  %v1907_v44 = vunpack.c.h.bf16 %v1955_v34  ;;  %v1956_v46 = vld [vmem:[%s2225_s24 + $0x28] sm:$0xff]   ;;  %v1942_v47 = vunpack.c.l.bf16 %v1964_v45  ;;  %v1943_v48 = vunpack.c.h.bf16 %v1964_v45  ;;  %v2009_v33 = vld [vmem:[%s2829_s1 + $0x38] sm:$0xff]  }
  0x17   : > { %246 = vst.msk [vmem:[#allocation2 + $0x168] sm:$0xff] %vm199_vm0, %v2019_v0  ;;  %247 = vst.msk [vmem:[#allocation2 + $0x170] sm:$0xff] %vm199_vm0, %v2019_v0  ;;  %v1910_v49 = vunpack.c.l.bf16 %v1956_v46  ;;  %v1911_v50 = vunpack.c.h.bf16 %v1956_v46  ;;  %1530 = vmatpush1.bf16.msra.mxu0 %v2006_v51  ;;  %1980 = vmatpush1.bf16.msra.mxu1 %v2006_v51  ;;  %v2010_v34 = vld [vmem:[%s2829_s1 + $0x40] sm:$0xff]   ;;  %v1966_v51 = vld [vmem:[%s2225_s24 + $0x78] sm:$0xff]  }
  0x18   : > { %249 = vst.msk [vmem:[#allocation2 + $0x180] sm:$0xff] %vm199_vm0, %v2019_v0  ;;  %250 = vst.msk [vmem:[#allocation2 + $0x188] sm:$0xff] %vm199_vm0, %v2019_v0  ;;  %1531 = vmatprep.subr.bf16.mxu0 %v2020_v1  ;;  %1972 = vmatprep.subr.bf16.mxu1 %v2020_v1 }
  0x19   : > { %251 = vst.msk [vmem:[#allocation2 + $0x190] sm:$0xff] %vm199_vm0, %v2019_v0  ;;  %253 = vst.msk [vmem:[#allocation2 + $0x1a0] sm:$0xff] %vm199_vm0, %v2019_v0 }
  0x1a   : > { %254 = vst.msk [vmem:[#allocation2 + $0x1a8] sm:$0xff] %vm199_vm0, %v2019_v0  ;;  %255 = vst.msk [vmem:[#allocation2 + $0x1b0] sm:$0xff] %vm199_vm0, %v2019_v0 }
  0x1b   : > { %257 = vst.msk [vmem:[#allocation2 + $0x1c0] sm:$0xff] %vm199_vm0, %v2019_v0  ;;  %258 = vst.msk [vmem:[#allocation2 + $0x1c8] sm:$0xff] %vm199_vm0, %v2019_v0  ;;  %1532 = vmatpush1.bf16.msra.mxu0 %v2007_v63  ;;  %1981 = vmatpush1.bf16.msra.mxu1 %v2007_v63 }
  0x1c   : > { %259 = vst.msk [vmem:[#allocation2 + $0x1d0] sm:$0xff] %vm199_vm0, %v2019_v0  ;;  %261 = vst.msk [vmem:[#allocation2 + $0x1e0] sm:$0xff] %vm199_vm0, %v2019_v0  ;;  %1533 = vmatprep.subr.bf16.mxu0 %v2020_v1  ;;  %1973 = vmatprep.subr.bf16.mxu1 %v2020_v1 }
  0x1d   : > { %262 = vst.msk [vmem:[#allocation2 + $0x1e8] sm:$0xff] %vm199_vm0, %v2019_v0  ;;  %263 = vst.msk [vmem:[#allocation2 + $0x1f0] sm:$0xff] %vm199_vm0, %v2019_v0 }
  0x1e   : > { %265 = vst.msk [vmem:[#allocation2 + $0x200] sm:$0xff] %vm199_vm0, %v2019_v0  ;;  %266 = vst.msk [vmem:[#allocation2 + $0x208] sm:$0xff] %vm199_vm0, %v2019_v0 }
  0x1f   : > { %267 = vst.msk [vmem:[#allocation2 + $0x210] sm:$0xff] %vm199_vm0, %v2019_v0  ;;  %269 = vst.msk [vmem:[#allocation2 + $0x220] sm:$0xff] %vm199_vm0, %v2019_v0  ;;  %1534 = vmatpush1.bf16.msra.mxu0 %v2008_v9  ;;  %1982 = vmatpush1.bf16.msra.mxu1 %v2008_v9 }
  0x20   : > { %270 = vst.msk [vmem:[#allocation2 + $0x228] sm:$0xff] %vm199_vm0, %v2019_v0  ;;  %271 = vst.msk [vmem:[#allocation2 + $0x230] sm:$0xff] %vm199_vm0, %v2019_v0  ;;  %1535 = vmatprep.subr.bf16.mxu0 %v2020_v1  ;;  %1974 = vmatprep.subr.bf16.mxu1 %v2020_v1 }
  0x21   : > { %204 = vst.msk [vmem:[#allocation2 + $0x18] sm:$0x1] %vm203_vm1, %v2019_v0  ;;  %208 = vst.msk [vmem:[#allocation2 + $0x38] sm:$0x1] %vm203_vm1, %v2019_v0 }
  0x22   : > { %212 = vst.msk [vmem:[#allocation2 + $0x58] sm:$0x1] %vm203_vm1, %v2019_v0  ;;  %216 = vst.msk [vmem:[#allocation2 + $0x78] sm:$0x1] %vm203_vm1, %v2019_v0 }
  0x23   : > { %220 = vst.msk [vmem:[#allocation2 + $0x98] sm:$0x1] %vm203_vm1, %v2019_v0  ;;  %224 = vst.msk [vmem:[#allocation2 + $0xb8] sm:$0x1] %vm203_vm1, %v2019_v0  ;;  %1536 = vmatpush1.bf16.msra.mxu0 %v2009_v33  ;;  %1983 = vmatpush1.bf16.msra.mxu1 %v2009_v33 }
  0x24   : > { %228 = vst.msk [vmem:[#allocation2 + $0xd8] sm:$0x1] %vm203_vm1, %v2019_v0  ;;  %232 = vst.msk [vmem:[#allocation2 + $0xf8] sm:$0x1] %vm203_vm1, %v2019_v0  ;;  %1537 = vmatprep.subr.bf16.mxu0 %v2020_v1  ;;  %1975 = vmatprep.subr.bf16.mxu1 %v2020_v1 }
  0x25   : > { %236 = vst.msk [vmem:[#allocation2 + $0x118] sm:$0x1] %vm203_vm1, %v2019_v0  ;;  %240 = vst.msk [vmem:[#allocation2 + $0x138] sm:$0x1] %vm203_vm1, %v2019_v0 }
  0x26   : > { %244 = vst.msk [vmem:[#allocation2 + $0x158] sm:$0x1] %vm203_vm1, %v2019_v0  ;;  %248 = vst.msk [vmem:[#allocation2 + $0x178] sm:$0x1] %vm203_vm1, %v2019_v0 }
  0x27   : > { %252 = vst.msk [vmem:[#allocation2 + $0x198] sm:$0x1] %vm203_vm1, %v2019_v0  ;;  %256 = vst.msk [vmem:[#allocation2 + $0x1b8] sm:$0x1] %vm203_vm1, %v2019_v0  ;;  %1538 = vmatpush1.bf16.msra.mxu0 %v2010_v34  ;;  %1984 = vmatpush1.bf16.msra.mxu1 %v2010_v34 }
  0x28   : > { %260 = vst.msk [vmem:[#allocation2 + $0x1d8] sm:$0x1] %vm203_vm1, %v2019_v0  ;;  %264 = vst.msk [vmem:[#allocation2 + $0x1f8] sm:$0x1] %vm203_vm1, %v2019_v0  ;;  %v467_v16 = vld [vmem:[#allocation2 + $0x11] sm:$0xff] }
  0x29   : > { %268 = vst.msk [vmem:[#allocation2 + $0x218] sm:$0x1] %vm203_vm1, %v2019_v0  ;;  %272 = vst.msk [vmem:[#allocation2 + $0x238] sm:$0x1] %vm203_vm1, %v2019_v0  ;;  %v498_v21 = vpack.c.bf16 %v467_v16, %v466_v10 }
  0x2a   : > { %352 = vst.msk [vmem:[#allocation2 + $0x108] sm:$0xff] %vm199_vm0, %v1918_v11  ;;  %353 = vst.msk [vmem:[#allocation2 + $0x110] sm:$0xff] %vm199_vm0, %v1919_v12 }
  0x2b   : > { %354 = vst.msk [vmem:[#allocation2 + $0x128] sm:$0xff] %vm199_vm0, %v1922_v13  ;;  %355 = vst.msk [vmem:[#allocation2 + $0x130] sm:$0xff] %vm199_vm0, %v1923_v14  ;;  %867 = vrot.lane.b32.xlu1 %v498_v21, %s2022_s28 }
  0x2c   : > { %338 = vst.msk [vmem:[#allocation2 + $0x28] sm:$0xff] %vm199_vm0, %v1890_v17  ;;  %339 = vst.msk [vmem:[#allocation2 + $0x30] sm:$0xff] %vm199_vm0, %v1891_v18 }
  0x2d   : > { %356 = vst.msk [vmem:[#allocation2 + $0x148] sm:$0xff] %vm199_vm0, %v1926_v22  ;;  %357 = vst.msk [vmem:[#allocation2 + $0x150] sm:$0xff] %vm199_vm0, %v1927_v23 }
  0x2e   : > { %340 = vst.msk [vmem:[#allocation2 + $0x48] sm:$0xff] %vm199_vm0, %v1894_v24  ;;  %341 = vst.msk [vmem:[#allocation2 + $0x50] sm:$0xff] %vm199_vm0, %v1895_v28 }
  0x2f   : > { %358 = vst.msk [vmem:[#allocation2 + $0x168] sm:$0xff] %vm199_vm0, %v1930_v29  ;;  %359 = vst.msk [vmem:[#allocation2 + $0x170] sm:$0xff] %vm199_vm0, %v1931_v30 }
  0x30   : > { %342 = vst.msk [vmem:[#allocation2 + $0x68] sm:$0xff] %vm199_vm0, %v1898_v31  ;;  %343 = vst.msk [vmem:[#allocation2 + $0x70] sm:$0xff] %vm199_vm0, %v1899_v35  ;;  %v1965_v35 = vld [vmem:[%s2225_s24 + $0x70] sm:$0xff]  }
  0x31   : > { %360 = vst.msk [vmem:[#allocation2 + $0x188] sm:$0xff] %vm199_vm0, %v1934_v36  ;;  %361 = vst.msk [vmem:[#allocation2 + $0x190] sm:$0xff] %vm199_vm0, %v1935_v37  ;;  %v482_v52 = vld [vmem:[#allocation2 + $0x109] sm:$0xff]  ;;  %v483_v53 = vld [vmem:[#allocation2 + $0x111] sm:$0xff]  ;;  %v1946_v36 = vunpack.c.l.bf16 %v1965_v35  ;;  %v1947_v37 = vunpack.c.h.bf16 %v1965_v35 }
  0x32   : > { %344 = vst.msk [vmem:[#allocation2 + $0x88] sm:$0xff] %vm199_vm0, %v1902_v38  ;;  %345 = vst.msk [vmem:[#allocation2 + $0x90] sm:$0xff] %vm199_vm0, %v1903_v40  ;;  %v434_v54 = vld [vmem:[#allocation2 + $0x108] sm:$0xff]  ;;  %v506_v55 = vpack.c.bf16 %v483_v53, %v482_v52  ;;  %v435_v56 = vld [vmem:[#allocation2 + $0x110] sm:$0xff]  ;;  %v1950_v53 = vunpack.c.l.bf16 %v1966_v51 }
  0x33   : > { %362 = vst.msk [vmem:[#allocation2 + $0x1a8] sm:$0xff] %vm199_vm0, %v1938_v41  ;;  %363 = vst.msk [vmem:[#allocation2 + $0x1b0] sm:$0xff] %vm199_vm0, %v1939_v42  ;;  %v530_v57 = vld [vmem:[#allocation2 + $0x127] sm:$0xff]  ;;  %v531_v58 = vld [vmem:[#allocation2 + $0x12f] sm:$0xff]  ;;  %v458_v59 = vpack.c.bf16 %v435_v56, %v434_v54  ;;  %v1951_v54 = vunpack.c.h.bf16 %v1966_v51 }
  0x34   : > { %346 = vst.msk [vmem:[#allocation2 + $0xa8] sm:$0xff] %vm199_vm0, %v1906_v43  ;;  %347 = vst.msk [vmem:[#allocation2 + $0xb0] sm:$0xff] %vm199_vm0, %v1907_v44  ;;  %v514_v60 = vld [vmem:[#allocation2 + $0x27] sm:$0xff]  ;;  %v515_v61 = vld [vmem:[#allocation2 + $0x2f] sm:$0xff]  ;;  %883 = vrot.lane.b32.xlu1 %v506_v55, %s2022_s28  ;;  %v2284_v62 = vpack.c.bf16 %v531_v58, %v530_v57 }
  0x35   : > { %364 = vst.msk [vmem:[#allocation2 + $0x1c8] sm:$0xff] %vm199_vm0, %v1942_v47  ;;  %365 = vst.msk [vmem:[#allocation2 + $0x1d0] sm:$0xff] %vm199_vm0, %v1943_v48  ;;  %835 = vrot.lane.b32.xlu0 %v458_v59, %s2021_s27  ;;  %v2290_v0 = vpack.c.bf16 %v515_v61, %v514_v60  ;;  %v578_v2 = vld [vmem:[#allocation2 + $0x128] sm:$0xff]  ;;  %v579_v3 = vld [vmem:[#allocation2 + $0x130] sm:$0xff] }
  0x36   : > { %348 = vst.msk [vmem:[#allocation2 + $0xc8] sm:$0xff] %vm199_vm0, %v1910_v49  ;;  %349 = vst.msk [vmem:[#allocation2 + $0xd0] sm:$0xff] %vm199_vm0, %v1911_v50  ;;  %v562_v4 = vld [vmem:[#allocation2 + $0x28] sm:$0xff]  ;;  %v563_v5 = vld [vmem:[#allocation2 + $0x30] sm:$0xff]  ;;  %v602_v6 = vpack.c.bf16 %v579_v3, %v578_v2 }
  0x37   : > { %v626_v7 = vld [vmem:[#allocation2 + $0x129] sm:$0xff]  ;;  %v627_v8 = vld [vmem:[#allocation2 + $0x131] sm:$0xff]  ;;  %v594_v10 = vpack.c.bf16 %v563_v5, %v562_v4  ;;  %366 = vst.msk [vmem:[#allocation2 + $0x1e8] sm:$0xff] %vm199_vm0, %v1946_v36  ;;  %367 = vst.msk [vmem:[#allocation2 + $0x1f0] sm:$0xff] %vm199_vm0, %v1947_v37 }
  0x38   : > { %931 = vrot.lane.b32.xlu1 %v2284_v62, %s2023_s9  ;;  %v610_v11 = vld [vmem:[#allocation2 + $0x29] sm:$0xff]  ;;  %v611_v12 = vld [vmem:[#allocation2 + $0x31] sm:$0xff]  ;;  %v650_v17 = vpack.c.bf16 %v627_v8, %v626_v7  ;;  %368 = vst.msk [vmem:[#allocation2 + $0x208] sm:$0xff] %vm199_vm0, %v1950_v53  ;;  %369 = vst.msk [vmem:[#allocation2 + $0x210] sm:$0xff] %vm199_vm0, %v1951_v54 }
  0x39   : > { %915 = vrot.lane.b32.xlu0 %v2290_v0, %s2023_s9  ;;  %v628_v13 = vld [vmem:[#allocation2 + $0x149] sm:$0xff]  ;;  %v629_v14 = vld [vmem:[#allocation2 + $0x151] sm:$0xff]  ;;  %v642_v18 = vpack.c.bf16 %v611_v12, %v610_v11 }
  0x3a   : > { %v612_v15 = vld [vmem:[#allocation2 + $0x49] sm:$0xff]  ;;  %v613_v16 = vld [vmem:[#allocation2 + $0x51] sm:$0xff]  ;;  %v2305_v21 = vpack.c.bf16 %v629_v14, %v628_v13 }
  0x3b   : > { %v675_v19 = vld [vmem:[#allocation2 + $0x147] sm:$0xff]  ;;  %v676_v20 = vld [vmem:[#allocation2 + $0x14f] sm:$0xff]  ;;  %v2307_v22 = vpack.c.bf16 %v613_v16, %v612_v15 }
  0x3c   : > { %979 = vrot.lane.b32.xlu1 %v602_v6, %s2024_s12  ;;  %v659_v23 = vld [vmem:[#allocation2 + $0x47] sm:$0xff]  ;;  %v660_v24 = vld [vmem:[#allocation2 + $0x4f] sm:$0xff]  ;;  %1874 = vmatprep.mubr.msk.bf16.mxu1 %vm199_vm0, %v2305_v21  ;;  %v699_v25 = vpack.c.bf16 %v676_v20, %v675_v19 }
  0x3d   : > { %963 = vrot.lane.b32.xlu0 %v594_v10, %s2024_s12  ;;  %1866 = vmatprep.mubr.msk.bf16.mxu0 %vm199_vm0, %v2307_v22  ;;  %v691_v26 = vpack.c.bf16 %v660_v24, %v659_v23  ;;  %v723_v27 = vld [vmem:[#allocation2 + $0x148] sm:$0xff]  ;;  %v724_v28 = vld [vmem:[#allocation2 + $0x150] sm:$0xff] }
  0x3e   : > { %v707_v29 = vld [vmem:[#allocation2 + $0x48] sm:$0xff]  ;;  %v708_v30 = vld [vmem:[#allocation2 + $0x50] sm:$0xff]  ;;  %v747_v31 = vpack.c.bf16 %v724_v28, %v723_v27 }
  0x3f   : > { %v739_v32 = vpack.c.bf16 %v708_v30, %v707_v29  ;;  %v1957_v38 = vld [vmem:[%s2225_s24 + $0x30] sm:$0xff]   ;;  %v677_v1 = vld [vmem:[#allocation2 + $0x167] sm:$0xff]  ;;  %s1887_s24 = sshll.u32 %s2834_s16, 8 }
  0x40   : > { %1027 = vrot.lane.b32.xlu1 %v650_v17, %s2025_s13  ;;  %v1914_v39 = vunpack.c.l.bf16 %v1957_v38  ;;  %v1915_v40 = vunpack.c.h.bf16 %v1957_v38  ;;  %v678_v41 = vld [vmem:[#allocation2 + $0x16f] sm:$0xff]  ;;  %v661_v42 = vld [vmem:[#allocation2 + $0x67] sm:$0xff]  ;;  %s2696_s29 = scalar_lea.vmem %s2832_s4, %s1887_s24 }
  0x41   : > { %1011 = vrot.lane.b32.xlu0 %v642_v18, %s2025_s13  ;;  %v662_v43 = vld [vmem:[#allocation2 + $0x6f] sm:$0xff]  ;;  %v700_v44 = vpack.c.bf16 %v678_v41, %v677_v1  ;;  %v679_v61 = vld [vmem:[#allocation2 + $0x187] sm:$0xff] }
  0x42   : > { %350 = vst.msk [vmem:[#allocation2 + $0xe8] sm:$0xff] %vm199_vm0, %v1914_v39  ;;  %351 = vst.msk [vmem:[#allocation2 + $0xf0] sm:$0xff] %vm199_vm0, %v1915_v40  ;;  %v692_v45 = vpack.c.bf16 %v662_v43, %v661_v42  ;;  %v725_v46 = vld [vmem:[#allocation2 + $0x168] sm:$0xff]  ;;  %v726_v47 = vld [vmem:[#allocation2 + $0x170] sm:$0xff] }
  0x43   : > { %v709_v48 = vld [vmem:[#allocation2 + $0x68] sm:$0xff]  ;;  %v710_v49 = vld [vmem:[#allocation2 + $0x70] sm:$0xff]  ;;  %v748_v50 = vpack.c.bf16 %v726_v47, %v725_v46 }
  0x44   : > { %1075 = vrot.lane.b32.xlu1 %v699_v25, %s2026_s14  ;;  %v740_v52 = vpack.c.bf16 %v710_v49, %v709_v48  ;;  %v630_v55 = vld [vmem:[#allocation2 + $0x169] sm:$0xff]  ;;  %v631_v56 = vld [vmem:[#allocation2 + $0x171] sm:$0xff] }
  0x45   : > { %1059 = vrot.lane.b32.xlu0 %v691_v26, %s2026_s14  ;;  %v614_v57 = vld [vmem:[#allocation2 + $0x69] sm:$0xff]  ;;  %v615_v58 = vld [vmem:[#allocation2 + $0x71] sm:$0xff]  ;;  %v2363_v59 = vpack.c.bf16 %v631_v56, %v630_v55 }
  0x46   : > { %v2366_v60 = vpack.c.bf16 %v615_v58, %v614_v57  ;;  %v680_v63 = vld [vmem:[#allocation2 + $0x18f] sm:$0xff]  ;;  %v663_v2 = vld [vmem:[#allocation2 + $0x87] sm:$0xff] }
  0x47   : > { %v664_v3 = vld [vmem:[#allocation2 + $0x8f] sm:$0xff]  ;;  %v701_v4 = vpack.c.bf16 %v680_v63, %v679_v61  ;;  %v665_v20 = vld [vmem:[#allocation2 + $0xa7] sm:$0xff] }
  0x48   : > { %1123 = vrot.lane.b32.xlu1 %v747_v31, %s2027_s17  ;;  %v693_v5 = vpack.c.bf16 %v664_v3, %v663_v2  ;;  %v728_v7 = vld [vmem:[#allocation2 + $0x190] sm:$0xff]  ;;  %v711_v8 = vld [vmem:[#allocation2 + $0x88] sm:$0xff] }
  0x49   : > { %1107 = vrot.lane.b32.xlu0 %v739_v32, %s2027_s17  ;;  %v712_v9 = vld [vmem:[#allocation2 + $0x90] sm:$0xff]  ;;  %v729_v24 = vld [vmem:[#allocation2 + $0x1a8] sm:$0xff] }
  0x4a   : > { %v741_v11 = vpack.c.bf16 %v712_v9, %v711_v8  ;;  %v632_v12 = vld [vmem:[#allocation2 + $0x189] sm:$0xff]  ;;  %v633_v13 = vld [vmem:[#allocation2 + $0x191] sm:$0xff] }
  0x4b   : > { %v616_v14 = vld [vmem:[#allocation2 + $0x89] sm:$0xff]  ;;  %v617_v15 = vld [vmem:[#allocation2 + $0x91] sm:$0xff]  ;;  %v2385_v16 = vpack.c.bf16 %v633_v13, %v632_v12 }
  0x4c   : > { %837 = vrot.lane.b32.xlu1 %v602_v6, %s2021_s27  ;;  %v727_v6 = vld [vmem:[#allocation2 + $0x188] sm:$0xff]  ;;  %v714_v27 = vld [vmem:[#allocation2 + $0xb0] sm:$0xff] }
  0x4d   : > { %821 = vrot.lane.b32.xlu0 %v594_v10, %s2021_s27  ;;  %v749_v10 = vpack.c.bf16 %v728_v7, %v727_v6  ;;  %v682_v19 = vld [vmem:[#allocation2 + $0x1af] sm:$0xff]  ;;  %v370_v40 = vld [vmem:[#allocation2 + $0x7] sm:$0xff] }
  0x4e   : > { %v634_v34 = vld [vmem:[#allocation2 + $0x1a9] sm:$0xff]  ;;  %v635_v35 = vld [vmem:[#allocation2 + $0x1b1] sm:$0xff] }
  0x4f   : > { %v618_v37 = vld [vmem:[#allocation2 + $0xa9] sm:$0xff]  ;;  %v619_v38 = vld [vmem:[#allocation2 + $0xb1] sm:$0xff]  ;;  %v2414_v42 = vpack.c.bf16 %v635_v35, %v634_v34 }
  0x50   : > { %885 = vrot.lane.b32.xlu1 %v650_v17, %s2022_s28  ;;  %v2388_v17 = vpack.c.bf16 %v617_v15, %v616_v14  ;;  %v386_v1 = vld [vmem:[#allocation2 + $0x107] sm:$0xff]  ;;  %v387_v41 = vld [vmem:[#allocation2 + $0x10f] sm:$0xff] }
  0x51   : > { %869 = vrot.lane.b32.xlu0 %v642_v18, %s2022_s28  ;;  %v681_v18 = vld [vmem:[#allocation2 + $0x1a7] sm:$0xff]  ;;  %v371_v43 = vld [vmem:[#allocation2 + $0xf] sm:$0xff] }
  0x52   : > { %v684_v46 = vld [vmem:[#allocation2 + $0x1cf] sm:$0xff]  ;;  %v667_v48 = vld [vmem:[#allocation2 + $0xc7] sm:$0xff] }
  0x53   : > { %v668_v49 = vld [vmem:[#allocation2 + $0xcf] sm:$0xff]  ;;  %v685_v34 = vld [vmem:[#allocation2 + $0x1e7] sm:$0xff] }
  0x54   : > { %933 = vrot.lane.b32.xlu1 %v699_v25, %s2023_s9  ;;  %v730_v25 = vld [vmem:[#allocation2 + $0x1b0] sm:$0xff]  ;;  %v2428_v54 = vpack.c.bf16 %v668_v49, %v667_v48  ;;  %v731_v55 = vld [vmem:[#allocation2 + $0x1c8] sm:$0xff] }
  0x55   : > { %917 = vrot.lane.b32.xlu0 %v691_v26, %s2023_s9  ;;  %v713_v26 = vld [vmem:[#allocation2 + $0xa8] sm:$0xff]  ;;  %v2395_v28 = vpack.c.bf16 %v730_v25, %v729_v24  ;;  %v732_v56 = vld [vmem:[#allocation2 + $0x1d0] sm:$0xff] }
  0x56   : > { %v2398_v29 = vpack.c.bf16 %v714_v27, %v713_v26  ;;  %v715_v58 = vld [vmem:[#allocation2 + $0xc8] sm:$0xff]  ;;  %v716_v61 = vld [vmem:[#allocation2 + $0xd0] sm:$0xff] }
  0x57   : > { %v686_v35 = vld [vmem:[#allocation2 + $0x1ef] sm:$0xff] }
  0x58   : > { %981 = vrot.lane.b32.xlu1 %v747_v31, %s2024_s12 }
  0x59   : > { %965 = vrot.lane.b32.xlu0 %v739_v32, %s2024_s12 }
  0x5c   : > { %1029 = vrot.lane.b32.xlu1 %v2305_v21, %s2025_s13 }
  0x5d   : > { %1013 = vrot.lane.b32.xlu0 %v2307_v22, %s2025_s13 }
  0x60   : > { %1077 = vrot.lane.b32.xlu1 %v700_v44, %s2026_s14 }
  0x61   : > { %1061 = vrot.lane.b32.xlu0 %v692_v45, %s2026_s14 }
  0x64   : > { %1125 = vrot.lane.b32.xlu1 %v748_v50, %s2027_s17 }
  0x65   : > { %1109 = vrot.lane.b32.xlu0 %v740_v52, %s2027_s17 }
  0x68   : > { %839 = vrot.lane.b32.xlu1 %v747_v31, %s2021_s27 }
  0x69   : > { %823 = vrot.lane.b32.xlu0 %v739_v32, %s2021_s27 }
  0x6c   : > { %887 = vrot.lane.b32.xlu1 %v2305_v21, %s2022_s28  ;;  %v666_v21 = vld [vmem:[#allocation2 + $0xaf] sm:$0xff] }
  0x6d   : > { %871 = vrot.lane.b32.xlu0 %v2307_v22, %s2022_s28  ;;  %v702_v22 = vpack.c.bf16 %v682_v19, %v681_v18  ;;  %v694_v23 = vpack.c.bf16 %v666_v21, %v665_v20 }
  0x70   : > { %935 = vrot.lane.b32.xlu1 %v700_v44, %s2023_s9  ;;  %v2418_v44 = vpack.c.bf16 %v619_v38, %v618_v37  ;;  %v669_v37 = vld [vmem:[#allocation2 + $0xe7] sm:$0xff]  ;;  %v670_v38 = vld [vmem:[#allocation2 + $0xef] sm:$0xff] }
  0x71   : > { %919 = vrot.lane.b32.xlu0 %v692_v45, %s2023_s9  ;;  %v683_v45 = vld [vmem:[#allocation2 + $0x1c7] sm:$0xff] }
  0x72   : > { %v2424_v53 = vpack.c.bf16 %v684_v46, %v683_v45  ;;  %v717_v46 = vld [vmem:[#allocation2 + $0xe8] sm:$0xff] }
  0x74   : > { %983 = vrot.lane.b32.xlu1 %v748_v50, %s2024_s12 }
  0x75   : > { %967 = vrot.lane.b32.xlu0 %v740_v52, %s2024_s12 }
  0x78   : > { %1031 = vrot.lane.b32.xlu1 %v2363_v59, %s2025_s13 }
  0x79   : > { %1015 = vrot.lane.b32.xlu0 %v2366_v60, %s2025_s13 }
  0x7c   : > { %1079 = vrot.lane.b32.xlu1 %v701_v4, %s2026_s14 }
  0x7d   : > { %1063 = vrot.lane.b32.xlu0 %v693_v5, %s2026_s14 }
  0x80   : > { %1127 = vrot.lane.b32.xlu1 %v749_v10, %s2027_s17 }
  0x81   : > { %1111 = vrot.lane.b32.xlu0 %v741_v11, %s2027_s17 }
  0x82   : > { %v820_v31 = vpop.permute.xlu0 %819 }
  0x84   : > { %841 = vrot.lane.b32.xlu1 %v748_v50, %s2021_s27  ;;  %v2420_v50 = vpack.c.bf16 %v387_v41, %v386_v1  ;;  %v2487_v1 = vpack.c.bf16 %v670_v38, %v669_v37  ;;  %v733_v41 = vld [vmem:[#allocation2 + $0x1e8] sm:$0xff]  ;;  %v720_v38 = vld [vmem:[#allocation2 + $0x110] sm:$0xff] }
  0x85   : > { %825 = vrot.lane.b32.xlu0 %v740_v52, %s2021_s27  ;;  %v402_v52 = vpack.c.bf16 %v371_v43, %v370_v40  ;;  %v2483_v40 = vpack.c.bf16 %v686_v35, %v685_v34  ;;  %v734_v43 = vld [vmem:[#allocation2 + $0x1f0] sm:$0xff]  ;;  %v719_v37 = vld [vmem:[#allocation2 + $0x108] sm:$0xff] }
  0x86   : > { %v2491_v49 = vpack.c.bf16 %v734_v43, %v733_v41  ;;  %v736_v34 = vld [vmem:[#allocation2 + $0x210] sm:$0xff] }
  0x87   : > { %v1141_v3 = vsel %vm199_vm0, %v402_v52, %v820_v31 }
  0x88   : > { %889 = vrot.lane.b32.xlu1 %v2363_v59, %s2022_s28 }
  0x89   : > { %873 = vrot.lane.b32.xlu0 %v2366_v60, %s2022_s28 }
  0x8c   : > { %937 = vrot.lane.b32.xlu1 %v701_v4, %s2023_s9  ;;  %v2435_v4 = vpack.c.bf16 %v732_v56, %v731_v55 }
  0x8d   : > { %921 = vrot.lane.b32.xlu0 %v693_v5, %s2023_s9  ;;  %v2439_v5 = vpack.c.bf16 %v716_v61, %v715_v58 }
  0x90   : > { %985 = vrot.lane.b32.xlu1 %v749_v10, %s2024_s12 }
  0x91   : > { %969 = vrot.lane.b32.xlu0 %v741_v11, %s2024_s12 }
  0x94   : > { %1033 = vrot.lane.b32.xlu1 %v2385_v16, %s2025_s13 }
  0x95   : > { %1017 = vrot.lane.b32.xlu0 %v2388_v17, %s2025_s13 }
  0x98   : > { %1081 = vrot.lane.b32.xlu1 %v702_v22, %s2026_s14 }
  0x99   : > { %1065 = vrot.lane.b32.xlu0 %v694_v23, %s2026_s14 }
  0x9c   : > { %1129 = vrot.lane.b32.xlu1 %v2395_v28, %s2027_s17 }
  0x9d   : > { %1113 = vrot.lane.b32.xlu0 %v2398_v29, %s2027_s17  ;;  %v868_v30 = vpop.permute.xlu1 %867 }
  0x9e   : > { %v1189_v8 = vsel %vm1187_vm2, %v1141_v3, %v868_v30  ;;  %v620_v30 = vld [vmem:[#allocation2 + $0xc9] sm:$0xff] }
  0xa0   : > { %843 = vrot.lane.b32.xlu1 %v749_v10, %s2021_s27 }
  0xa1   : > { %827 = vrot.lane.b32.xlu0 %v741_v11, %s2021_s27 }
  0xa4   : > { %891 = vrot.lane.b32.xlu1 %v2385_v16, %s2022_s28 }
  0xa5   : > { %875 = vrot.lane.b32.xlu0 %v2388_v17, %s2022_s28 }
  0xa6   : > { %v884_v32 = vpop.permute.xlu1 %883 }
  0xa7   : > { %v836_v33 = vpop.permute.xlu0 %835 }
  0xa8   : > { %939 = vrot.lane.b32.xlu1 %v702_v22, %s2023_s9  ;;  %v1165_v63 = vsel %vm199_vm0, %v2420_v50, %v836_v33 }
  0xa9   : > { %923 = vrot.lane.b32.xlu0 %v694_v23, %s2023_s9  ;;  %v1205_v6 = vsel %vm1187_vm2, %v1165_v63, %v884_v32 }
  0xaa   : > { %v932_v36 = vpop.permute.xlu1 %931 }
  0xab   : > { %v916_v39 = vpop.permute.xlu0 %915  ;;  %v1238_v9 = vsel %vm1220_vm3, %v1205_v6, %v932_v36 }
  0xac   : > { %987 = vrot.lane.b32.xlu1 %v2395_v28, %s2024_s12  ;;  %v1222_v11 = vsel %vm1220_vm3, %v1189_v8, %v916_v39 }
  0xad   : > { %971 = vrot.lane.b32.xlu0 %v2398_v29, %s2024_s12 }
  0xae   : > { %v980_v47 = vpop.permute.xlu1 %979 }
  0xaf   : > { %v964_v51 = vpop.permute.xlu0 %963  ;;  %v1271_v12 = vsel %vm1253_vm4, %v1238_v9, %v980_v47  ;;  %v718_v47 = vld [vmem:[#allocation2 + $0xf0] sm:$0xff] }
  0xb0   : > { %1035 = vrot.lane.b32.xlu1 %v2414_v42, %s2025_s13  ;;  %v1255_v13 = vsel %vm1253_vm4, %v1222_v11, %v964_v51  ;;  %v2497_v52 = vpack.c.bf16 %v718_v47, %v717_v46 }
  0xb1   : > { %1019 = vrot.lane.b32.xlu0 %v2418_v44, %s2025_s13 }
  0xb2   : > { %v1028_v57 = vpop.permute.xlu1 %1027 }
  0xb3   : > { %v1012_v2 = vpop.permute.xlu0 %1011  ;;  %v1304_v14 = vsel %vm1286_vm5, %v1271_v12, %v1028_v57 }
  0xb4   : > { %1083 = vrot.lane.b32.xlu1 %v2424_v53, %s2026_s14  ;;  %v1288_v15 = vsel %vm1286_vm5, %v1255_v13, %v1012_v2 }
  0xb5   : > { %1067 = vrot.lane.b32.xlu0 %v2428_v54, %s2026_s14 }
  0xb6   : > { %v1076_v7 = vpop.permute.xlu1 %1075 }
  0xb7   : > { %v1060_v10 = vpop.permute.xlu0 %1059  ;;  %v1337_v18 = vsel %vm1319_vm6, %v1304_v14, %v1076_v7 }
  0xb8   : > { %1131 = vrot.lane.b32.xlu1 %v2435_v4, %s2027_s17  ;;  %v1321_v20 = vsel %vm1319_vm6, %v1288_v15, %v1060_v10 }
  0xb9   : > { %1115 = vrot.lane.b32.xlu0 %v2439_v5, %s2027_s17 }
  0xba   : > { %v1124_v19 = vpop.permute.xlu1 %1123 }
  0xbb   : > { %v1108_v21 = vpop.permute.xlu0 %1107  ;;  %v1378_v22 = vsel %vm1352_vm7, %v1337_v18, %v1124_v19  ;;  %v622_v19 = vld [vmem:[#allocation2 + $0xe9] sm:$0xff] }
  0xbc   : > { %845 = vrot.lane.b32.xlu1 %v2395_v28, %s2021_s27  ;;  %v1354_v23 = vsel %vm1352_vm7, %v1321_v20, %v1108_v21  ;;  %1618 = vmatmul.mubr.bf16.vlgmr.msra.gmra.mrb[0].mxu1 %v1378_v22  ;;  %v636_v28 = vld [vmem:[#allocation2 + $0x1c9] sm:$0xff] }
  0xbd   : > { %1554 = vmatmul.mubr.bf16.vlgmr.msra.gmra.mrb[0].mxu0 %v1354_v23  ;;  %829 = vrot.lane.b32.xlu0 %v2398_v29, %s2021_s27  ;;  %v687_v23 = vld [vmem:[#allocation2 + $0x207] sm:$0xff] }
  0xbe   : > { %v838_v24 = vpop.permute.xlu1 %837  ;;  %1867 = vmatprep.mubr.msk.bf16.mxu0 %vm199_vm0, %v2366_v60  ;;  %1875 = vmatprep.mubr.msk.bf16.mxu1 %vm199_vm0, %v2363_v59  ;;  %v637_v60 = vld [vmem:[#allocation2 + $0x1d1] sm:$0xff] }
  0xbf   : > { %v822_v25 = vpop.permute.xlu0 %821  ;;  %v621_v59 = vld [vmem:[#allocation2 + $0xd1] sm:$0xff]  ;;  %v2475_v32 = vpack.c.bf16 %v637_v60, %v636_v28  ;;  %v1168_v51 = vsel %vm199_vm0, %v2284_v62, %v838_v24  ;;  %v374_v28 = vld [vmem:[#allocation2 + $0x47] sm:$0xff] }
  0xc0   : > { %893 = vrot.lane.b32.xlu1 %v2414_v42, %s2022_s28  ;;  %v2479_v33 = vpack.c.bf16 %v621_v59, %v620_v30  ;;  %v1144_v55 = vsel %vm199_vm0, %v2290_v0, %v822_v25  ;;  %v688_v24 = vld [vmem:[#allocation2 + $0x20f] sm:$0xff]  ;;  %v390_v25 = vld [vmem:[#allocation2 + $0x147] sm:$0xff] }
  0xc1   : > { %877 = vrot.lane.b32.xlu0 %v2418_v44, %s2022_s28  ;;  %v375_v60 = vld [vmem:[#allocation2 + $0x4f] sm:$0xff]  ;;  %v705_v30 = vpack.c.bf16 %v688_v24, %v687_v23  ;;  %v376_v23 = vld [vmem:[#allocation2 + $0x67] sm:$0xff] }
  0xc2   : > { %v886_v26 = vpop.permute.xlu1 %885  ;;  %v404_v35 = vpack.c.bf16 %v375_v60, %v374_v28  ;;  %v377_v24 = vld [vmem:[#allocation2 + $0x6f] sm:$0xff] }
  0xc3   : > { %v870_v27 = vpop.permute.xlu0 %869  ;;  %v1207_v56 = vsel %vm1187_vm2, %v1168_v51, %v886_v26  ;;  %v391_v26 = vld [vmem:[#allocation2 + $0x14f] sm:$0xff] }
  0xc4   : > { %941 = vrot.lane.b32.xlu1 %v2424_v53, %s2023_s9  ;;  %v1191_v58 = vsel %vm1187_vm2, %v1144_v55, %v870_v27  ;;  %v412_v59 = vpack.c.bf16 %v391_v26, %v390_v25  ;;  %v737_v60 = vld [vmem:[#allocation2 + $0x228] sm:$0xff] }
  0xc5   : > { %925 = vrot.lane.b32.xlu0 %v2428_v54, %s2023_s9 }
  0xc6   : > { %v934_v29 = vpop.permute.xlu1 %933 }
  0xc7   : > { %v918_v31 = vpop.permute.xlu0 %917  ;;  %v1240_v61 = vsel %vm1220_vm3, %v1207_v56, %v934_v29 }
  0xc8   : > { %989 = vrot.lane.b32.xlu1 %v2435_v4, %s2024_s12  ;;  %v1224_v2 = vsel %vm1220_vm3, %v1191_v58, %v918_v31  ;;  %v735_v31 = vld [vmem:[#allocation2 + $0x208] sm:$0xff] }
  0xc9   : > { %973 = vrot.lane.b32.xlu0 %v2439_v5, %s2024_s12  ;;  %v753_v41 = vpack.c.bf16 %v736_v34, %v735_v31  ;;  %v721_v31 = vld [vmem:[#allocation2 + $0x128] sm:$0xff]  ;;  %v722_v34 = vld [vmem:[#allocation2 + $0x130] sm:$0xff] }
  0xca   : > { %v982_v36 = vpop.permute.xlu1 %981 }
  0xcb   : > { %v966_v39 = vpop.permute.xlu0 %965  ;;  %v1273_v62 = vsel %vm1253_vm4, %v1240_v61, %v982_v36 }
  0xcc   : > { %1037 = vrot.lane.b32.xlu1 %v2475_v32, %s2025_s13  ;;  %v1257_v3 = vsel %vm1253_vm4, %v1224_v2, %v966_v39 }
  0xcd   : > { %1021 = vrot.lane.b32.xlu0 %v2479_v33, %s2025_s13 }
  0xce   : > { %v1030_v45 = vpop.permute.xlu1 %1029 }
  0xcf   : > { %v1014_v48 = vpop.permute.xlu0 %1013  ;;  %v1306_v6 = vsel %vm1286_vm5, %v1273_v62, %v1030_v45  ;;  %v745_v45 = vpack.c.bf16 %v720_v38, %v719_v37  ;;  %v746_v38 = vpack.c.bf16 %v722_v34, %v721_v31 }
  0xd0   : > { %1085 = vrot.lane.b32.xlu1 %v2483_v40, %s2026_s14  ;;  %v1290_v0 = vsel %vm1286_vm5, %v1257_v3, %v1014_v48 }
  0xd1   : > { %1069 = vrot.lane.b32.xlu0 %v2487_v1, %s2026_s14 }
  0xd2   : > { %v1078_v57 = vpop.permute.xlu1 %1077 }
  0xd3   : > { %v1062_v63 = vpop.permute.xlu0 %1061  ;;  %v1339_v7 = vsel %vm1319_vm6, %v1306_v6, %v1078_v57 }
  0xd4   : > { %1133 = vrot.lane.b32.xlu1 %v2491_v49, %s2027_s17  ;;  %v1323_v9 = vsel %vm1319_vm6, %v1290_v0, %v1062_v63 }
  0xd5   : > { %1117 = vrot.lane.b32.xlu0 %v2497_v52, %s2027_s17 }
  0xd6   : > { %v1126_v8 = vpop.permute.xlu1 %1125 }
  0xd7   : > { %v1110_v10 = vpop.permute.xlu0 %1109  ;;  %v1381_v11 = vsel %vm1352_vm7, %v1339_v7, %v1126_v8 }
  0xd8   : > { %847 = vrot.lane.b32.xlu1 %v2435_v4, %s2021_s27  ;;  %1626 = vmatmul.mubr.bf16.gmra.mrb[4].mxu1 %v1381_v11  ;;  %v1357_v12 = vsel %vm1352_vm7, %v1323_v9, %v1110_v10 }
  0xd9   : > { %831 = vrot.lane.b32.xlu0 %v2439_v5, %s2021_s27  ;;  %1562 = vmatmul.mubr.bf16.gmra.mrb[4].mxu0 %v1357_v12  ;;  %v638_v5 = vld [vmem:[#allocation2 + $0x1e9] sm:$0xff]  ;;  %v641_v12 = vld [vmem:[#allocation2 + $0x211] sm:$0xff] }
  0xda   : > { %v840_v13 = vpop.permute.xlu1 %839  ;;  %1868 = vmatprep.mubr.msk.bf16.mxu0 %vm199_vm0, %v2388_v17  ;;  %1876 = vmatprep.mubr.msk.bf16.mxu1 %vm199_vm0, %v2385_v16  ;;  %v639_v17 = vld [vmem:[#allocation2 + $0x1f1] sm:$0xff] }
  0xdb   : > { %v824_v14 = vpop.permute.xlu0 %823  ;;  %v623_v16 = vld [vmem:[#allocation2 + $0xf1] sm:$0xff]  ;;  %v2535_v21 = vpack.c.bf16 %v639_v17, %v638_v5  ;;  %v1171_v43 = vsel %vm199_vm0, %v412_v59, %v840_v13  ;;  %v624_v13 = vld [vmem:[#allocation2 + $0x109] sm:$0xff] }
  0xdc   : > { %895 = vrot.lane.b32.xlu1 %v2475_v32, %s2022_s28  ;;  %v2539_v22 = vpack.c.bf16 %v623_v16, %v622_v19  ;;  %v1147_v46 = vsel %vm199_vm0, %v404_v35, %v824_v14  ;;  %v625_v14 = vld [vmem:[#allocation2 + $0x111] sm:$0xff]  ;;  %v689_v17 = vld [vmem:[#allocation2 + $0x227] sm:$0xff] }
  0xdd   : > { %879 = vrot.lane.b32.xlu0 %v2479_v33, %s2022_s28  ;;  %v2583_v5 = vpack.c.bf16 %v625_v14, %v624_v13  ;;  %v393_v19 = vld [vmem:[#allocation2 + $0x16f] sm:$0xff] }
  0xde   : > { %v888_v4 = vpop.permute.xlu1 %887 }
  0xdf   : > { %v872_v15 = vpop.permute.xlu0 %871  ;;  %v1209_v47 = vsel %vm1187_vm2, %v1171_v43, %v888_v4 }
  0xe0   : > { %943 = vrot.lane.b32.xlu1 %v2483_v40, %s2023_s9  ;;  %v1193_v51 = vsel %vm1187_vm2, %v1147_v46, %v872_v15  ;;  %v392_v15 = vld [vmem:[#allocation2 + $0x167] sm:$0xff] }
  0xe1   : > { %927 = vrot.lane.b32.xlu0 %v2487_v1, %s2023_s9 }
  0xe2   : > { %v936_v18 = vpop.permute.xlu1 %935 }
  0xe3   : > { %v920_v20 = vpop.permute.xlu0 %919  ;;  %v1242_v55 = vsel %vm1220_vm3, %v1209_v47, %v936_v18  ;;  %v690_v18 = vld [vmem:[#allocation2 + $0x22f] sm:$0xff] }
  0xe4   : > { %991 = vrot.lane.b32.xlu1 %v2491_v49, %s2024_s12  ;;  %v1226_v57 = vsel %vm1220_vm3, %v1193_v51, %v920_v20  ;;  %v674_v20 = vld [vmem:[#allocation2 + $0x12f] sm:$0xff]  ;;  %v706_v26 = vpack.c.bf16 %v690_v18, %v689_v17 }
  0xe5   : > { %975 = vrot.lane.b32.xlu0 %v2497_v52, %s2024_s12 }
  0xe6   : > { %v984_v27 = vpop.permute.xlu1 %983 }
  0xe7   : > { %v968_v29 = vpop.permute.xlu0 %967  ;;  %v1275_v58 = vsel %vm1253_vm4, %v1242_v55, %v984_v27  ;;  %v413_v27 = vpack.c.bf16 %v393_v19, %v392_v15 }
  0xe8   : > { %1039 = vrot.lane.b32.xlu1 %v2535_v21, %s2025_s13  ;;  %v1259_v61 = vsel %vm1253_vm4, %v1226_v57, %v968_v29  ;;  %v738_v29 = vld [vmem:[#allocation2 + $0x230] sm:$0xff] }
  0xe9   : > { %1023 = vrot.lane.b32.xlu0 %v2539_v22, %s2025_s13 }
  0xea   : > { %v1032_v36 = vpop.permute.xlu1 %1031 }
  0xeb   : > { %v1016_v39 = vpop.permute.xlu0 %1015  ;;  %v1308_v63 = vsel %vm1286_vm5, %v1275_v58, %v1032_v36  ;;  %v754_v36 = vpack.c.bf16 %v738_v29, %v737_v60 }
  0xec   : > { %1087 = vrot.lane.b32.xlu1 %v705_v30, %s2026_s14  ;;  %v1292_v2 = vsel %vm1286_vm5, %v1259_v61, %v1016_v39 }
  0xed   : > { %1071 = vrot.lane.b32.xlu0 %v2420_v50, %s2026_s14 }
  0xee   : > { %v1080_v48 = vpop.permute.xlu1 %1079 }
  0xef   : > { %v1064_v56 = vpop.permute.xlu0 %1063  ;;  %v1341_v62 = vsel %vm1319_vm6, %v1308_v63, %v1080_v48 }
  0xf0   : > { %1135 = vrot.lane.b32.xlu1 %v753_v41, %s2027_s17  ;;  %v1325_v6 = vsel %vm1319_vm6, %v1292_v2, %v1064_v56 }
  0xf1   : > { %1119 = vrot.lane.b32.xlu0 %v745_v45, %s2027_s17 }
  0xf2   : > { %v1128_v3 = vpop.permute.xlu1 %1127 }
  0xf3   : > { %v1112_v0 = vpop.permute.xlu0 %1111  ;;  %v1384_v7 = vsel %vm1352_vm7, %v1341_v62, %v1128_v3 }
  0xf4   : > { %849 = vrot.lane.b32.xlu1 %v2491_v49, %s2021_s27  ;;  %1634 = vmatmul.mubr.bf16.gmra.mrb[8].mxu1 %v1384_v7  ;;  %v1360_v8 = vsel %vm1352_vm7, %v1325_v6, %v1112_v0 }
  0xf5   : > { %833 = vrot.lane.b32.xlu0 %v2497_v52, %s2021_s27  ;;  %1570 = vmatmul.mubr.bf16.gmra.mrb[8].mxu0 %v1360_v8  ;;  %v640_v52 = vld [vmem:[#allocation2 + $0x209] sm:$0xff] }
  0xf6   : > { %v842_v9 = vpop.permute.xlu1 %841  ;;  %1869 = vmatprep.mubr.msk.bf16.mxu0 %vm199_vm0, %v2418_v44  ;;  %1877 = vmatprep.mubr.msk.bf16.mxu1 %vm199_vm0, %v2414_v42  ;;  %v2580_v4 = vpack.c.bf16 %v641_v12, %v640_v52  ;;  %v378_v12 = vld [vmem:[#allocation2 + $0x87] sm:$0xff] }
  0xf7   : > { %v826_v10 = vpop.permute.xlu0 %825  ;;  %v1174_v37 = vsel %vm199_vm0, %v413_v27, %v842_v9 }
  0xf8   : > { %897 = vrot.lane.b32.xlu1 %v2535_v21, %s2022_s28 }
  0xf9   : > { %881 = vrot.lane.b32.xlu0 %v2539_v22, %s2022_s28 }
  0xfa   : > { %v890_v49 = vpop.permute.xlu1 %889 }
  0xfb   : > { %v874_v11 = vpop.permute.xlu0 %873 }
  0xfc   : > { %945 = vrot.lane.b32.xlu1 %v705_v30, %s2023_s9  ;;  %v405_v30 = vpack.c.bf16 %v377_v24, %v376_v23 }
  0xfd   : > { %929 = vrot.lane.b32.xlu0 %v2420_v50, %s2023_s9  ;;  %v673_v50 = vld [vmem:[#allocation2 + $0x127] sm:$0xff] }
  0xfe   : > { %v938_v44 = vpop.permute.xlu1 %937  ;;  %v698_v28 = vpack.c.bf16 %v674_v20, %v673_v50  ;;  %v1150_v39 = vsel %vm199_vm0, %v405_v30, %v826_v10 }
  0xff   : > { %v922_v42 = vpop.permute.xlu0 %921 }
 0x100   : > { %993 = vrot.lane.b32.xlu1 %v753_v41, %s2024_s12  ;;  %v1211_v41 = vsel %vm1187_vm2, %v1174_v37, %v890_v49  ;;  %v394_v49 = vld [vmem:[#allocation2 + $0x187] sm:$0xff] }
 0x101   : > { %977 = vrot.lane.b32.xlu0 %v745_v45, %s2024_s12  ;;  %v1195_v45 = vsel %vm1187_vm2, %v1150_v39, %v874_v11  ;;  %v1244_v46 = vsel %vm1220_vm3, %v1211_v41, %v938_v44  ;;  %v395_v11 = vld [vmem:[#allocation2 + $0x18f] sm:$0xff]  ;;  %v396_v41 = vld [vmem:[#allocation2 + $0x1a7] sm:$0xff] }
 0x102   : > { %v986_v16 = vpop.permute.xlu1 %985  ;;  %v1228_v48 = vsel %vm1220_vm3, %v1195_v45, %v922_v42  ;;  %v379_v44 = vld [vmem:[#allocation2 + $0x8f] sm:$0xff]  ;;  %v414_v14 = vpack.c.bf16 %v395_v11, %v394_v49 }
 0x103   : > { %v970_v25 = vpop.permute.xlu0 %969  ;;  %v1277_v51 = vsel %vm1253_vm4, %v1244_v46, %v986_v16  ;;  %v406_v42 = vpack.c.bf16 %v379_v44, %v378_v12  ;;  %v380_v46 = vld [vmem:[#allocation2 + $0xa7] sm:$0xff] }
 0x104   : > { %1041 = vrot.lane.b32.xlu1 %v2580_v4, %s2025_s13  ;;  %v1261_v55 = vsel %vm1253_vm4, %v1228_v48, %v970_v25 }
 0x105   : > { %1025 = vrot.lane.b32.xlu0 %v2583_v5, %s2025_s13 }
 0x106   : > { %v1034_v59 = vpop.permute.xlu1 %1033 }
 0x107   : > { %v1018_v35 = vpop.permute.xlu0 %1017  ;;  %v1310_v56 = vsel %vm1286_vm5, %v1277_v51, %v1034_v59 }
 0x108   : > { %1089 = vrot.lane.b32.xlu1 %v706_v26, %s2026_s14  ;;  %v1294_v57 = vsel %vm1286_vm5, %v1261_v55, %v1018_v35 }
 0x109   : > { %1073 = vrot.lane.b32.xlu0 %v698_v28, %s2026_s14 }
 0x10a   : > { %v1082_v43 = vpop.permute.xlu1 %1081 }
 0x10b   : > { %v1066_v47 = vpop.permute.xlu0 %1065  ;;  %v1343_v58 = vsel %vm1319_vm6, %v1310_v56, %v1082_v43  ;;  %v397_v43 = vld [vmem:[#allocation2 + $0x1af] sm:$0xff] }
 0x10c   : > { %1137 = vrot.lane.b32.xlu1 %v754_v36, %s2027_s17  ;;  %v1327_v63 = vsel %vm1319_vm6, %v1294_v57, %v1066_v47  ;;  %v381_v47 = vld [vmem:[#allocation2 + $0xaf] sm:$0xff]  ;;  %v415_v51 = vpack.c.bf16 %v397_v43, %v396_v41 }
 0x10d   : > { %1121 = vrot.lane.b32.xlu0 %v746_v38, %s2027_s17  ;;  %v407_v55 = vpack.c.bf16 %v381_v47, %v380_v46 }
 0x10e   : > { %v1130_v61 = vpop.permute.xlu1 %1129 }
 0x10f   : > { %v1114_v2 = vpop.permute.xlu0 %1113  ;;  %v1387_v62 = vsel %vm1352_vm7, %v1343_v58, %v1130_v61 }
 0x110   : > { %v1363_v3 = vsel %vm1352_vm7, %v1327_v63, %v1114_v2  ;;  %1642 = vmatmul.mubr.bf16.gmra.mrb[12].mxu1 %v1387_v62 }
 0x111   : > { %1578 = vmatmul.mubr.bf16.gmra.mrb[12].mxu0 %v1363_v3  ;;  %1878 = vmatprep.mubr.msk.bf16.mxu1 %vm199_vm0, %v2475_v32 }
 0x112   : > { %v844_v6 = vpop.permute.xlu1 %843  ;;  %1870 = vmatprep.mubr.msk.bf16.mxu0 %vm199_vm0, %v2479_v33 }
 0x113   : > { %v828_v0 = vpop.permute.xlu0 %827  ;;  %v1177_v32 = vsel %vm199_vm0, %v414_v14, %v844_v6 }
 0x114   : > { %v1153_v18 = vsel %vm199_vm0, %v406_v42, %v828_v0 }
 0x116   : > { %v892_v7 = vpop.permute.xlu1 %891 }
 0x117   : > { %v876_v8 = vpop.permute.xlu0 %875  ;;  %v1213_v33 = vsel %vm1187_vm2, %v1177_v32, %v892_v7 }
 0x118   : > { %v1197_v16 = vsel %vm1187_vm2, %v1153_v18, %v876_v8 }
 0x11a   : > { %v940_v9 = vpop.permute.xlu1 %939 }
 0x11b   : > { %v924_v10 = vpop.permute.xlu0 %923  ;;  %v1246_v50 = vsel %vm1220_vm3, %v1213_v33, %v940_v9 }
 0x11c   : > { %v1230_v23 = vsel %vm1220_vm3, %v1197_v16, %v924_v10 }
 0x11e   : > { %v988_v52 = vpop.permute.xlu1 %987 }
 0x11f   : > { %v972_v13 = vpop.permute.xlu0 %971  ;;  %v1279_v24 = vsel %vm1253_vm4, %v1246_v50, %v988_v52 }
 0x120   : > { %v1263_v25 = vsel %vm1253_vm4, %v1230_v23, %v972_v13  ;;  %v785_v23 = vld [vmem:[#allocation2 + $0x229] sm:$0xff] }
 0x122   : > { %v1036_v15 = vpop.permute.xlu1 %1035 }
 0x123   : > { %v1020_v17 = vpop.permute.xlu0 %1019  ;;  %v1312_v26 = vsel %vm1286_vm5, %v1279_v24, %v1036_v15 }
 0x124   : > { %v1296_v27 = vsel %vm1286_vm5, %v1263_v25, %v1020_v17 }
 0x126   : > { %v1084_v19 = vpop.permute.xlu1 %1083 }
 0x127   : > { %v1068_v20 = vpop.permute.xlu0 %1067  ;;  %v1345_v28 = vsel %vm1319_vm6, %v1312_v26, %v1084_v19 }
 0x128   : > { %v1329_v29 = vsel %vm1319_vm6, %v1296_v27, %v1068_v20  ;;  %v769_v27 = vld [vmem:[#allocation2 + $0x129] sm:$0xff] }
 0x12a   : > { %v1132_v60 = vpop.permute.xlu1 %1131 }
 0x12b   : > { %v1116_v30 = vpop.permute.xlu0 %1115  ;;  %v1390_v59 = vsel %vm1352_vm7, %v1345_v28, %v1132_v60  ;;  %v770_v28 = vld [vmem:[#allocation2 + $0x131] sm:$0xff] }
 0x12c   : > { %v1366_v31 = vsel %vm1352_vm7, %v1329_v29, %v1116_v30  ;;  %1650 = vmatmul.mubr.bf16.gmra.mrb[16].mxu1 %v1390_v59 }
 0x12d   : > { %1586 = vmatmul.mubr.bf16.gmra.mrb[16].mxu0 %v1366_v31  ;;  %1879 = vmatprep.mubr.msk.bf16.mxu1 %vm199_vm0, %v2535_v21 }
 0x12e   : > { %v846_v34 = vpop.permute.xlu1 %845  ;;  %1871 = vmatprep.mubr.msk.bf16.mxu0 %vm199_vm0, %v2539_v22 }
 0x12f   : > { %v830_v35 = vpop.permute.xlu0 %829  ;;  %v1180_v21 = vsel %vm199_vm0, %v415_v51, %v846_v34 }
 0x130   : > { %v1156_v58 = vsel %vm199_vm0, %v407_v55, %v830_v35  ;;  %v794_v35 = vpack.c.bf16 %v770_v28, %v769_v27 }
 0x132   : > { %v894_v36 = vpop.permute.xlu1 %893 }
 0x133   : > { %v878_v37 = vpop.permute.xlu0 %877  ;;  %v1215_v22 = vsel %vm1187_vm2, %v1180_v21, %v894_v36 }
 0x134   : > { %v1199_v63 = vsel %vm1187_vm2, %v1156_v58, %v878_v37 }
 0x136   : > { %v942_v38 = vpop.permute.xlu1 %941 }
 0x137   : > { %v926_v39 = vpop.permute.xlu0 %925  ;;  %v1248_v2 = vsel %vm1220_vm3, %v1215_v22, %v942_v38 }
 0x138   : > { %v1232_v3 = vsel %vm1220_vm3, %v1199_v63, %v926_v39 }
 0x13a   : > { %v990_v45 = vpop.permute.xlu1 %989 }
 0x13b   : > { %v974_v48 = vpop.permute.xlu0 %973  ;;  %v1281_v6 = vsel %vm1253_vm4, %v1248_v2, %v990_v45 }
 0x13c   : > { %v1265_v0 = vsel %vm1253_vm4, %v1232_v3, %v974_v48 }
 0x13e   : > { %v1038_v56 = vpop.permute.xlu1 %1037 }
 0x13f   : > { %v1022_v57 = vpop.permute.xlu0 %1021  ;;  %v1314_v7 = vsel %vm1286_vm5, %v1281_v6, %v1038_v56 }
 0x140   : > { %v1298_v8 = vsel %vm1286_vm5, %v1265_v0, %v1022_v57 }
 0x142   : > { %v1086_v61 = vpop.permute.xlu1 %1085 }
 0x143   : > { %v1070_v62 = vpop.permute.xlu0 %1069  ;;  %v1347_v9 = vsel %vm1319_vm6, %v1314_v7, %v1086_v61 }
 0x144   : > { %v1331_v49 = vsel %vm1319_vm6, %v1298_v8, %v1070_v62 }
 0x146   : > { %v1134_v10 = vpop.permute.xlu1 %1133 }
 0x147   : > { %v1118_v11 = vpop.permute.xlu0 %1117  ;;  %v1393_v52 = vsel %vm1352_vm7, %v1347_v9, %v1134_v10 }
 0x148   : > { %v1369_v12 = vsel %vm1352_vm7, %v1331_v49, %v1118_v11  ;;  %1658 = vmatmul.mubr.bf16.gmra.mrb[20].mxu1 %v1393_v52  ;;  %v2684_v52 = vld [vmem:[%s2830_s2] ss:$0 sm:$0xff] }
 0x149   : > { %1594 = vmatmul.mubr.bf16.gmra.mrb[20].mxu0 %v1369_v12  ;;  %1880 = vmatprep.mubr.msk.bf16.mxu1 %vm199_vm0, %v2580_v4  ;;  %v2690_v12 = vld [vmem:[%s2831_s3] ss:$0 sm:$0xff] }
 0x14a   : > { %v848_v44 = vpop.permute.xlu1 %847  ;;  %1872 = vmatprep.mubr.msk.bf16.mxu0 %vm199_vm0, %v2583_v5  ;;  %v786_v5 = vld [vmem:[#allocation2 + $0x231] sm:$0xff] }
 0x14b   : > { %v832_v13 = vpop.permute.xlu0 %831  ;;  %v1183_v16 = vsel %vm199_vm0, %v2424_v53, %v848_v44  ;;  %v802_v30 = vpack.c.bf16 %v786_v5, %v785_v23 }
 0x14c   : > { %v1159_v50 = vsel %vm199_vm0, %v2428_v54, %v832_v13 }
 0x14e   : > { %v896_v14 = vpop.permute.xlu1 %895 }
 0x14f   : > { %v880_v42 = vpop.permute.xlu0 %879  ;;  %v1217_v4 = vsel %vm1187_vm2, %v1183_v16, %v896_v14 }
 0x150   : > { %v1201_v24 = vsel %vm1187_vm2, %v1159_v50, %v880_v42 }
 0x152   : > { %v944_v15 = vpop.permute.xlu1 %943 }
 0x153   : > { %v928_v17 = vpop.permute.xlu0 %927  ;;  %v1250_v25 = vsel %vm1220_vm3, %v1217_v4, %v944_v15 }
 0x154   : > { %v1234_v60 = vsel %vm1220_vm3, %v1201_v24, %v928_v17 }
 0x156   : > { %v992_v32 = vpop.permute.xlu1 %991 }
 0x157   : > { %v976_v18 = vpop.permute.xlu0 %975  ;;  %v1283_v29 = vsel %vm1253_vm4, %v1250_v25, %v992_v32 }
 0x158   : > { %v1267_v53 = vsel %vm1253_vm4, %v1234_v60, %v976_v18 }
 0x15a   : > { %v1040_v33 = vpop.permute.xlu1 %1039 }
 0x15b   : > { %v1024_v19 = vpop.permute.xlu0 %1023  ;;  %v1316_v54 = vsel %vm1286_vm5, %v1283_v29, %v1040_v33 }
 0x15c   : > { %v1300_v59 = vsel %vm1286_vm5, %v1267_v53, %v1024_v19 }
 0x15e   : > { %v1088_v20 = vpop.permute.xlu1 %1087 }
 0x15f   : > { %v1072_v26 = vpop.permute.xlu0 %1071  ;;  %v1349_v31 = vsel %vm1319_vm6, %v1316_v54, %v1088_v20 }
 0x160   : > { %v1333_v36 = vsel %vm1319_vm6, %v1300_v59, %v1072_v26 }
 0x162   : > { %v1136_v34 = vpop.permute.xlu1 %1135 }
 0x163   : > { %v1120_v37 = vpop.permute.xlu0 %1119  ;;  %v1396_v38 = vsel %vm1352_vm7, %v1349_v31, %v1136_v34 }
 0x164   : > { %v1372_v39 = vsel %vm1352_vm7, %v1333_v36, %v1120_v37  ;;  %1666 = vmatmul.mubr.bf16.gmra.mrb[24].mxu1 %v1396_v38 }
 0x165   : > { %1602 = vmatmul.mubr.bf16.gmra.mrb[24].mxu0 %v1372_v39  ;;  %1881 = vmatprep.mubr.msk.bf16.mxu1 %vm199_vm0, %v802_v30 }
 0x166   : > { %v850_v41 = vpop.permute.xlu1 %849  ;;  %1873 = vmatprep.mubr.msk.bf16.mxu0 %vm199_vm0, %v794_v35 }
 0x167   : > { %v834_v43 = vpop.permute.xlu0 %833  ;;  %v1186_v21 = vsel %vm199_vm0, %v2483_v40, %v850_v41 }
 0x168   : > { %v1162_v58 = vsel %vm199_vm0, %v2487_v1, %v834_v43 }
 0x16a   : > { %v898_v45 = vpop.permute.xlu1 %897 }
 0x16b   : > { %v882_v46 = vpop.permute.xlu0 %881  ;;  %v1219_v22 = vsel %vm1187_vm2, %v1186_v21, %v898_v45 }
 0x16c   : > { %v1203_v63 = vsel %vm1187_vm2, %v1162_v58, %v882_v46 }
 0x16e   : > { %v946_v47 = vpop.permute.xlu1 %945 }
 0x16f   : > { %v930_v48 = vpop.permute.xlu0 %929  ;;  %v1252_v2 = vsel %vm1220_vm3, %v1219_v22, %v946_v47 }
 0x170   : > { %v1236_v3 = vsel %vm1220_vm3, %v1203_v63, %v930_v48 }
 0x172   : > { %v994_v51 = vpop.permute.xlu1 %993 }
 0x173   : > { %v978_v55 = vpop.permute.xlu0 %977  ;;  %v1285_v6 = vsel %vm1253_vm4, %v1252_v2, %v994_v51 }
 0x174   : > { %v1269_v0 = vsel %vm1253_vm4, %v1236_v3, %v978_v55 }
 0x176   : > { %v1042_v56 = vpop.permute.xlu1 %1041 }
 0x177   : > { %v1026_v57 = vpop.permute.xlu0 %1025  ;;  %v1318_v40 = vsel %vm1286_vm5, %v1285_v6, %v1042_v56 }
 0x178   : > { %v1302_v7 = vsel %vm1286_vm5, %v1269_v0, %v1026_v57 }
 0x17a   : > { %v1090_v61 = vpop.permute.xlu1 %1089 }
 0x17b   : > { %v1074_v62 = vpop.permute.xlu0 %1073  ;;  %v1351_v1 = vsel %vm1319_vm6, %v1318_v40, %v1090_v61 }
 0x17c   : > { %v1335_v9 = vsel %vm1319_vm6, %v1302_v7, %v1074_v62 }
 0x17e   : > { %v1138_v8 = vpop.permute.xlu1 %1137 }
 0x17f   : > { %v1122_v10 = vpop.permute.xlu0 %1121  ;;  %v1399_v49 = vsel %vm1352_vm7, %v1351_v1, %v1138_v8 }
 0x180   : > { %v1375_v11 = vsel %vm1352_vm7, %v1335_v9, %v1122_v10  ;;  %1674 = vmatmul.mubr.bf16.gmra.mrb[28].mxu1 %v1399_v49 }
 0x181   : > { %1610 = vmatmul.mubr.bf16.gmra.mrb[28].mxu0 %v1375_v11 }
 0x18f   : > { %v1619_v44 = vpop.f32.mrb[0].mxu1 }
 0x190   : > { %v1555_v13 = vpop.f32.mrb[0].mxu0  ;;  %v1705_v14 = vmul.f32 %v2684_v52, %v1619_v44  ;;  %v1621_v42 = vpop.f32.mrb[1].mxu1 }
 0x191   : > { %v1689_v15 = vmul.f32 %v2684_v52, %v1555_v13  ;;  %v1557_v17 = vpop.f32.mrb[1].mxu0  ;;  %v1622_v32 = vpop.f32.mrb[2].mxu1 }
 0x192   : > { %v1744_v18 = vadd.f32 %v2690_v12, %v1705_v14  ;;  %v1558_v33 = vpop.f32.mrb[2].mxu0  ;;  %v1706_v19 = vmul.f32 %v2684_v52, %v1622_v32  ;;  %v1624_v16 = vpop.f32.mrb[3].mxu1 }
 0x193   : > { %v1728_v50 = vadd.f32 %v2690_v12, %v1689_v15  ;;  %v1690_v4 = vmul.f32 %v2684_v52, %v1558_v33  ;;  %v1560_v20 = vpop.f32.mrb[3].mxu0 }
 0x194   : > { %1777 = vst.msk [vmem:[%s2696_s29 + $0x80] sm:$0xff] %vm1760_vm8, %v1744_v18  ;;  %v1745_v23 = vadd.f32 %v2690_v12, %v1706_v19 }
 0x195   : > { %1761 = vst.msk [vmem:[%s2696_s29] sm:$0xff] %vm1760_vm8, %v1728_v50  ;;  %v1729_v5 = vadd.f32 %v2690_v12, %v1690_v4 }
 0x196   : > { %1778 = vst.msk [vmem:[%s2696_s29 + $0x88] sm:$0xff] %vm1760_vm8, %v1745_v23 }
 0x197   : > { %1762 = vst.msk [vmem:[%s2696_s29 + $0x8] sm:$0xff] %vm1760_vm8, %v1729_v5 }
 0x1ab   : > { %v1627_v24 = vpop.f32.mrb[4].mxu1 }
 0x1ac   : > { %v1563_v25 = vpop.f32.mrb[4].mxu0  ;;  %v1707_v26 = vmul.f32 %v2684_v52, %v1627_v24  ;;  %v1629_v27 = vpop.f32.mrb[5].mxu1 }
 0x1ad   : > { %v1691_v28 = vmul.f32 %v2684_v52, %v1563_v25  ;;  %v1565_v60 = vpop.f32.mrb[5].mxu0  ;;  %v1630_v29 = vpop.f32.mrb[6].mxu1 }
 0x1ae   : > { %v1746_v53 = vadd.f32 %v2690_v12, %v1707_v26  ;;  %v1566_v54 = vpop.f32.mrb[6].mxu0  ;;  %v1708_v30 = vmul.f32 %v2684_v52, %v1630_v29  ;;  %v1632_v59 = vpop.f32.mrb[7].mxu1 }
 0x1af   : > { %v1730_v31 = vadd.f32 %v2690_v12, %v1691_v28  ;;  %v1692_v34 = vmul.f32 %v2684_v52, %v1566_v54  ;;  %v1568_v35 = vpop.f32.mrb[7].mxu0 }
 0x1b0   : > { %1779 = vst.msk [vmem:[%s2696_s29 + $0x90] sm:$0xff] %vm1760_vm8, %v1746_v53  ;;  %v1747_v36 = vadd.f32 %v2690_v12, %v1708_v30 }
 0x1b1   : > { %1763 = vst.msk [vmem:[%s2696_s29 + $0x10] sm:$0xff] %vm1760_vm8, %v1730_v31  ;;  %v1731_v37 = vadd.f32 %v2690_v12, %v1692_v34 }
 0x1b2   : > { %1780 = vst.msk [vmem:[%s2696_s29 + $0x98] sm:$0xff] %vm1760_vm8, %v1747_v36 }
 0x1b3   : > { %1764 = vst.msk [vmem:[%s2696_s29 + $0x18] sm:$0xff] %vm1760_vm8, %v1731_v37 }
 0x1c7   : > { %v1635_v38 = vpop.f32.mrb[8].mxu1 }
 0x1c8   : > { %v1571_v39 = vpop.f32.mrb[8].mxu0  ;;  %v1709_v41 = vmul.f32 %v2684_v52, %v1635_v38  ;;  %v1637_v43 = vpop.f32.mrb[9].mxu1 }
 0x1c9   : > { %v1693_v45 = vmul.f32 %v2684_v52, %v1571_v39  ;;  %v1573_v46 = vpop.f32.mrb[9].mxu0  ;;  %v1638_v47 = vpop.f32.mrb[10].mxu1 }
 0x1ca   : > { %v1748_v48 = vadd.f32 %v2690_v12, %v1709_v41  ;;  %v1574_v51 = vpop.f32.mrb[10].mxu0  ;;  %v1710_v55 = vmul.f32 %v2684_v52, %v1638_v47  ;;  %v1640_v56 = vpop.f32.mrb[11].mxu1 }
 0x1cb   : > { %v1732_v57 = vadd.f32 %v2690_v12, %v1693_v45  ;;  %v1694_v21 = vmul.f32 %v2684_v52, %v1574_v51  ;;  %v1576_v58 = vpop.f32.mrb[11].mxu0 }
 0x1cc   : > { %1781 = vst.msk [vmem:[%s2696_s29 + $0xa0] sm:$0xff] %vm1760_vm8, %v1748_v48  ;;  %v1749_v22 = vadd.f32 %v2690_v12, %v1710_v55 }
 0x1cd   : > { %1765 = vst.msk [vmem:[%s2696_s29 + $0x20] sm:$0xff] %vm1760_vm8, %v1732_v57  ;;  %v1733_v61 = vadd.f32 %v2690_v12, %v1694_v21 }
 0x1ce   : > { %1782 = vst.msk [vmem:[%s2696_s29 + $0xa8] sm:$0xff] %vm1760_vm8, %v1749_v22 }
 0x1cf   : > { %1766 = vst.msk [vmem:[%s2696_s29 + $0x28] sm:$0xff] %vm1760_vm8, %v1733_v61 }
 0x1e3   : > { %v1643_v63 = vpop.f32.mrb[12].mxu1 }
 0x1e4   : > { %v1579_v2 = vpop.f32.mrb[12].mxu0  ;;  %v1711_v62 = vmul.f32 %v2684_v52, %v1643_v63  ;;  %v1645_v3 = vpop.f32.mrb[13].mxu1 }
 0x1e5   : > { %v1695_v6 = vmul.f32 %v2684_v52, %v1579_v2  ;;  %v1581_v0 = vpop.f32.mrb[13].mxu0  ;;  %v1646_v40 = vpop.f32.mrb[14].mxu1 }
 0x1e6   : > { %v1750_v7 = vadd.f32 %v2690_v12, %v1711_v62  ;;  %v1582_v1 = vpop.f32.mrb[14].mxu0  ;;  %v1712_v8 = vmul.f32 %v2684_v52, %v1646_v40  ;;  %v1648_v9 = vpop.f32.mrb[15].mxu1 }
 0x1e7   : > { %v1734_v10 = vadd.f32 %v2690_v12, %v1695_v6  ;;  %v1696_v49 = vmul.f32 %v2684_v52, %v1582_v1  ;;  %v1584_v11 = vpop.f32.mrb[15].mxu0 }
 0x1e8   : > { %1783 = vst.msk [vmem:[%s2696_s29 + $0xb0] sm:$0xff] %vm1760_vm8, %v1750_v7  ;;  %v1751_v44 = vadd.f32 %v2690_v12, %v1712_v8 }
 0x1e9   : > { %1767 = vst.msk [vmem:[%s2696_s29 + $0x30] sm:$0xff] %vm1760_vm8, %v1734_v10  ;;  %v1735_v13 = vadd.f32 %v2690_v12, %v1696_v49 }
 0x1ea   : > { %1784 = vst.msk [vmem:[%s2696_s29 + $0xb8] sm:$0xff] %vm1760_vm8, %v1751_v44 }
 0x1eb   : > { %1768 = vst.msk [vmem:[%s2696_s29 + $0x38] sm:$0xff] %vm1760_vm8, %v1735_v13 }
 0x1ff   : > { %v1651_v14 = vpop.f32.mrb[16].mxu1 }
 0x200   : > { %v1587_v42 = vpop.f32.mrb[16].mxu0  ;;  %v1713_v15 = vmul.f32 %v2684_v52, %v1651_v14  ;;  %v1653_v17 = vpop.f32.mrb[17].mxu1 }
 0x201   : > { %v1697_v32 = vmul.f32 %v2684_v52, %v1587_v42  ;;  %v1589_v18 = vpop.f32.mrb[17].mxu0  ;;  %v1654_v33 = vpop.f32.mrb[18].mxu1 }
 0x202   : > { %v1752_v19 = vadd.f32 %v2690_v12, %v1713_v15  ;;  %v1590_v16 = vpop.f32.mrb[18].mxu0  ;;  %v1714_v50 = vmul.f32 %v2684_v52, %v1654_v33  ;;  %v1656_v4 = vpop.f32.mrb[19].mxu1 }
 0x203   : > { %v1736_v20 = vadd.f32 %v2690_v12, %v1697_v32  ;;  %v1698_v23 = vmul.f32 %v2684_v52, %v1590_v16  ;;  %v1592_v5 = vpop.f32.mrb[19].mxu0 }
 0x204   : > { %1785 = vst.msk [vmem:[%s2696_s29 + $0xc0] sm:$0xff] %vm1760_vm8, %v1752_v19  ;;  %v1753_v24 = vadd.f32 %v2690_v12, %v1714_v50 }
 0x205   : > { %1769 = vst.msk [vmem:[%s2696_s29 + $0x40] sm:$0xff] %vm1760_vm8, %v1736_v20  ;;  %v1737_v25 = vadd.f32 %v2690_v12, %v1698_v23 }
 0x206   : > { %1786 = vst.msk [vmem:[%s2696_s29 + $0xc8] sm:$0xff] %vm1760_vm8, %v1753_v24 }
 0x207   : > { %1770 = vst.msk [vmem:[%s2696_s29 + $0x48] sm:$0xff] %vm1760_vm8, %v1737_v25 }
 0x21b   : > { %v1659_v26 = vpop.f32.mrb[20].mxu1 }
 0x21c   : > { %v1595_v27 = vpop.f32.mrb[20].mxu0  ;;  %v1715_v28 = vmul.f32 %v2684_v52, %v1659_v26  ;;  %v1661_v60 = vpop.f32.mrb[21].mxu1 }
 0x21d   : > { %v1699_v29 = vmul.f32 %v2684_v52, %v1595_v27  ;;  %v1597_v53 = vpop.f32.mrb[21].mxu0  ;;  %v1662_v54 = vpop.f32.mrb[22].mxu1 }
 0x21e   : > { %v1754_v30 = vadd.f32 %v2690_v12, %v1715_v28  ;;  %v1598_v59 = vpop.f32.mrb[22].mxu0  ;;  %v1716_v31 = vmul.f32 %v2684_v52, %v1662_v54  ;;  %v1664_v34 = vpop.f32.mrb[23].mxu1 }
 0x21f   : > { %v1738_v35 = vadd.f32 %v2690_v12, %v1699_v29  ;;  %v1700_v36 = vmul.f32 %v2684_v52, %v1598_v59  ;;  %v1600_v37 = vpop.f32.mrb[23].mxu0 }
 0x220   : > { %1787 = vst.msk [vmem:[%s2696_s29 + $0xd0] sm:$0xff] %vm1760_vm8, %v1754_v30  ;;  %v1755_v38 = vadd.f32 %v2690_v12, %v1716_v31 }
 0x221   : > { %1771 = vst.msk [vmem:[%s2696_s29 + $0x50] sm:$0xff] %vm1760_vm8, %v1738_v35  ;;  %v1739_v39 = vadd.f32 %v2690_v12, %v1700_v36 }
 0x222   : > { %1788 = vst.msk [vmem:[%s2696_s29 + $0xd8] sm:$0xff] %vm1760_vm8, %v1755_v38 }
 0x223   : > { %1772 = vst.msk [vmem:[%s2696_s29 + $0x58] sm:$0xff] %vm1760_vm8, %v1739_v39 }
 0x237   : > { %v1667_v41 = vpop.f32.mrb[24].mxu1 }
 0x238   : > { %v1603_v43 = vpop.f32.mrb[24].mxu0  ;;  %v1717_v45 = vmul.f32 %v2684_v52, %v1667_v41  ;;  %v1669_v46 = vpop.f32.mrb[25].mxu1 }
 0x239   : > { %v1701_v47 = vmul.f32 %v2684_v52, %v1603_v43  ;;  %v1605_v48 = vpop.f32.mrb[25].mxu0  ;;  %v1670_v51 = vpop.f32.mrb[26].mxu1 }
 0x23a   : > { %v1756_v55 = vadd.f32 %v2690_v12, %v1717_v45  ;;  %v1606_v56 = vpop.f32.mrb[26].mxu0  ;;  %v1718_v57 = vmul.f32 %v2684_v52, %v1670_v51  ;;  %v1672_v21 = vpop.f32.mrb[27].mxu1 }
 0x23b   : > { %v1740_v58 = vadd.f32 %v2690_v12, %v1701_v47  ;;  %v1702_v22 = vmul.f32 %v2684_v52, %v1606_v56  ;;  %v1608_v61 = vpop.f32.mrb[27].mxu0 }
 0x23c   : > { %1789 = vst.msk [vmem:[%s2696_s29 + $0xe0] sm:$0xff] %vm1760_vm8, %v1756_v55  ;;  %v1757_v63 = vadd.f32 %v2690_v12, %v1718_v57 }
 0x23d   : > { %1773 = vst.msk [vmem:[%s2696_s29 + $0x60] sm:$0xff] %vm1760_vm8, %v1740_v58  ;;  %v1741_v2 = vadd.f32 %v2690_v12, %v1702_v22 }
 0x23e   : > { %1790 = vst.msk [vmem:[%s2696_s29 + $0xe8] sm:$0xff] %vm1760_vm8, %v1757_v63 }
 0x23f   : > { %1774 = vst.msk [vmem:[%s2696_s29 + $0x68] sm:$0xff] %vm1760_vm8, %v1741_v2 }
 0x253   : > { %v1675_v62 = vpop.f32.mrb[28].mxu1 }
 0x254   : > { %v1611_v3 = vpop.f32.mrb[28].mxu0  ;;  %v1719_v6 = vmul.f32 %v2684_v52, %v1675_v62  ;;  %v1677_v0 = vpop.f32.mrb[29].mxu1 }
 0x255   : > { %v1703_v40 = vmul.f32 %v2684_v52, %v1611_v3  ;;  %v1613_v7 = vpop.f32.mrb[29].mxu0  ;;  %v1678_v1 = vpop.f32.mrb[30].mxu1 }
 0x256   : > { %v1758_v8 = vadd.f32 %v2690_v12, %v1719_v6  ;;  %v1614_v9 = vpop.f32.mrb[30].mxu0  ;;  %v1720_v10 = vmul.f32 %v2684_v52, %v1678_v1  ;;  %v1680_v49 = vpop.f32.mrb[31].mxu1 }
 0x257   : > { %v1742_v11 = vadd.f32 %v2690_v12, %v1703_v40  ;;  %v1704_v44 = vmul.f32 %v2684_v52, %v1614_v9  ;;  %v1616_v13 = vpop.f32.mrb[31].mxu0 }
 0x258   : > { %1791 = vst.msk [vmem:[%s2696_s29 + $0xf0] sm:$0xff] %vm1760_vm8, %v1758_v8  ;;  %v1759_v14 = vadd.f32 %v2690_v12, %v1720_v10 }
 0x259   : > { %1775 = vst.msk [vmem:[%s2696_s29 + $0x70] sm:$0xff] %vm1760_vm8, %v1742_v11  ;;  %v1743_v42 = vadd.f32 %v2690_v12, %v1704_v44 }
 0x25a   : > { %1792 = vst.msk [vmem:[%s2696_s29 + $0xf8] sm:$0xff] %vm1760_vm8, %v1759_v14 }
 0x25b   : > { %1776 = vst.msk [vmem:[%s2696_s29 + $0x78] sm:$0xff] %vm1760_vm8, %v1743_v42 }
 0x25c PF: > { %s14_s15 = sadd.s32 1, %s2017_s15  }
 0x25d   : > { %p11_p4 = scmp.ge.s32.totalorder %s14_s15, 4  }
 0x25f   :  { %13 = sbr.rel (!%p11_p4) target bundleno = 1 (0x1), region = 68 }

// kernel: _lambda_.10
= control target key start
LH: loop header
LB: loop body
LE: loop exit
PB: predicated region body
PF: predicated region fallthrough
CT: control target
= control target key end

     0   :  { %s4151_s18 = smov 0   ;;  %s5659_s0 = inlined_call_operand.vmem [shape: bf16[2,16,16,32], index: 0, kind: input, shape index: {}]   ;;  %s5660_s1 = inlined_call_operand.vmem [shape: bf16[2,16,16,16], index: 1, kind: input, shape index: {}]   ;;  %s5661_s2 = inlined_call_operand.vmem [shape: bf16[432,16], index: 2, kind: input, shape index: {}]   ;;  %s5662_s3 = inlined_call_operand.vmem [shape: f32[1,16], index: 3, kind: input, shape index: {}]   ;;  %s5663_s4 = inlined_call_operand.vmem [shape: f32[1,16], index: 4, kind: input, shape index: {}]   ;;  %s5664_s5 = inlined_call_operand.vmem [shape: bf16[2,16,16,16], index: 5, kind: output, shape index: {}]  }
   0x1 LB: > { %s3663_s19 = sadd.s32 4294967295, %s4110_s18   ;;  %p3667_p0 = scmp.ge.s32.totalorder %s4110_s18, 1  ;;  %s4110_s18 = sphi %s4151_s18, %s15_s18  }
   0x2   : > { %p197_p1 = scmp.lt.s32.totalorder %s4110_s18, 3 }
   0x4   : > { %p198_p2 = pnand %p3667_p0, %p197_p1 }
   0x5   : > { %vm417_vm0 = vcmask (!%p198_p2), 130048   ;;  %p4161_p3 = scmp.lt.s32.totalorder (!%p198_p2), %s3663_s19, 1  ;;  %vm246_vm1 = vcmask (!%p198_p2), 261120   ;;  %vm421_vm2 = vcmask (!%p198_p2), 122880   ;;  %v4112_v0 = vmov (!%p198_p2), 0.0   ;;  %s4113_s28 = smov (!%p198_p2), 32  }
   0x6   : > { %201 = sbr.rel (%p198_p2) target bundleno = 905 (0x389), region = 40  ;;  %418 = vst.msk [vmem:[#allocation3] sm:$0xff] (!%p198_p2), %vm417_vm0, %v4112_v0  ;;  %419 = vst.msk [vmem:[#allocation3 + $0x8] sm:$0xff] (!%p198_p2), %vm417_vm0, %v4112_v0  ;;  %vm250_vm3 = vcmask (!%p198_p2), 253952   ;;  %s4114_s29 = smov (!%p198_p2), 48   ;;  %vm2369_vm4 = vcmask (!%p198_p2), 523264  }
   0x7   : > { %420 = vst.msk [vmem:[#allocation3 + $0x10] sm:$0xff] (!%p198_p2), %vm417_vm0, %v4112_v0  ;;  %423 = vst.msk [vmem:[#allocation3 + $0x20] sm:$0xff] (!%p198_p2), %vm417_vm0, %v4112_v0  ;;  %s4116_s30 = smov (!%p198_p2), 80   ;;  %s4117_s16 = smov (!%p198_p2), 16   ;;  %vm2174_vm5 = vcmask (!%p198_p2), 392192   ;;  %vm2240_vm6 = vcmask (!%p198_p2), 785408  }
   0x8   : > { %424 = vst.msk [vmem:[#allocation3 + $0x28] sm:$0xff] (!%p198_p2), %vm417_vm0, %v4112_v0  ;;  %425 = vst.msk [vmem:[#allocation3 + $0x30] sm:$0xff] (!%p198_p2), %vm417_vm0, %v4112_v0  ;;  %s4118_s20 = smov (!%p198_p2), 64   ;;  %s4119_s22 = smov (!%p198_p2), 96   ;;  %vm2434_vm7 = vcmask (!%p198_p2), 916480   ;;  %vm2207_vm8 = vcmask (!%p198_p2), 654336  }
   0x9   : > { %427 = vst.msk [vmem:[#allocation3 + $0x40] sm:$0xff] (!%p198_p2), %vm417_vm0, %v4112_v0  ;;  %428 = vst.msk [vmem:[#allocation3 + $0x48] sm:$0xff] (!%p198_p2), %vm417_vm0, %v4112_v0  ;;  %s4120_s26 = smov (!%p198_p2), 112   ;;  %vm3563_vm9 = vcmask (!%p198_p2), 125952  }
   0xa   : > { %429 = vst.msk [vmem:[#allocation3 + $0x50] sm:$0xff] (!%p198_p2), %vm417_vm0, %v4112_v0  ;;  %431 = vst.msk [vmem:[#allocation3 + $0x60] sm:$0xff] (!%p198_p2), %vm417_vm0, %v4112_v0 }
   0xb   : > { %432 = vst.msk [vmem:[#allocation3 + $0x68] sm:$0xff] (!%p198_p2), %vm417_vm0, %v4112_v0  ;;  %433 = vst.msk [vmem:[#allocation3 + $0x70] sm:$0xff] (!%p198_p2), %vm417_vm0, %v4112_v0 }
   0xc   : > { %435 = vst.msk [vmem:[#allocation3 + $0x80] sm:$0xff] (!%p198_p2), %vm417_vm0, %v4112_v0  ;;  %436 = vst.msk [vmem:[#allocation3 + $0x88] sm:$0xff] (!%p198_p2), %vm417_vm0, %v4112_v0 }
   0xd   : > { %437 = vst.msk [vmem:[#allocation3 + $0x90] sm:$0xff] %vm417_vm0, %v4112_v0  ;;  %439 = vst.msk [vmem:[#allocation3 + $0xa0] sm:$0xff] %vm417_vm0, %v4112_v0  ;;  %s5667_s19 = smov (!%p4161_p3, %s3663_s19), 1  ;;  %v636_v11 = vld [vmem:[#allocation3 + $0x7] sm:$0xff] }
   0xe   : > { %440 = vst.msk [vmem:[#allocation3 + $0xa8] sm:$0xff] %vm417_vm0, %v4112_v0  ;;  %441 = vst.msk [vmem:[#allocation3 + $0xb0] sm:$0xff] %vm417_vm0, %v4112_v0  ;;  %s4457_s21 = sshll.u32 %s5667_s19, 7  ;;  %v637_v12 = vld [vmem:[#allocation3 + $0xf] sm:$0xff] }
   0xf   : > { %443 = vst.msk [vmem:[#allocation3 + $0xc0] sm:$0xff] %vm417_vm0, %v4112_v0  ;;  %444 = vst.msk [vmem:[#allocation3 + $0xc8] sm:$0xff] %vm417_vm0, %v4112_v0  ;;  %s4463_s24 = scalar_lea.vmem %s5660_s1, %s4457_s21  ;;  %v668_v18 = vpack.c.bf16 %v637_v12, %v636_v11  ;;  %s4483_s27 = scalar_lea.vmem %s5659_s0, %s4457_s21 }
  0x10   : > { %445 = vst.msk [vmem:[#allocation3 + $0xd0] sm:$0xff] %vm417_vm0, %v4112_v0  ;;  %447 = vst.msk [vmem:[#allocation3 + $0xe0] sm:$0xff] %vm417_vm0, %v4112_v0  ;;  %v3931_v1 = vld [vmem:[%s4463_s24 + $0x8] sm:$0xff]   ;;  %v3853_v2 = vld [vmem:[%s4463_s24] sm:$0xff]   ;;  %s5355_s12 = scalar_lea.vmem %s5664_s5, %s4457_s21 }
  0x11   : > { %448 = vst.msk [vmem:[#allocation3 + $0xe8] sm:$0xff] %vm417_vm0, %v4112_v0  ;;  %449 = vst.msk [vmem:[#allocation3 + $0xf0] sm:$0xff] %vm417_vm0, %v4112_v0  ;;  %v3932_v3 = vld [vmem:[%s4463_s24 + $0x10] sm:$0xff]   ;;  %v3858_v4 = vunpack.c.l.bf16 %v3931_v1  ;;  %v3859_v5 = vunpack.c.h.bf16 %v3931_v1  ;;  %v3854_v6 = vunpack.c.l.bf16 %v3853_v2  ;;  %v3855_v7 = vunpack.c.h.bf16 %v3853_v2  ;;  %v3933_v8 = vld [vmem:[%s4463_s24 + $0x18] sm:$0xff]   ;;  %1470 = vrot.lane.b32.xlu0 %v668_v18, %s4113_s28 }
  0x12   : > { %451 = vst.msk [vmem:[#allocation3 + $0x100] sm:$0xff] %vm417_vm0, %v4112_v0  ;;  %452 = vst.msk [vmem:[#allocation3 + $0x108] sm:$0xff] %vm417_vm0, %v4112_v0  ;;  %v3934_v9 = vld [vmem:[%s4463_s24 + $0x20] sm:$0xff]   ;;  %v3935_v10 = vld [vmem:[%s4463_s24 + $0x28] sm:$0xff]   ;;  %v3862_v13 = vunpack.c.l.bf16 %v3932_v3  ;;  %v3863_v14 = vunpack.c.h.bf16 %v3932_v3  ;;  %v3866_v15 = vunpack.c.l.bf16 %v3933_v8  ;;  %v3867_v16 = vunpack.c.h.bf16 %v3933_v8 }
  0x13   : > { %453 = vst.msk [vmem:[#allocation3 + $0x110] sm:$0xff] %vm417_vm0, %v4112_v0  ;;  %455 = vst.msk [vmem:[#allocation3 + $0x120] sm:$0xff] %vm417_vm0, %v4112_v0  ;;  %v3936_v17 = vld [vmem:[%s4463_s24 + $0x30] sm:$0xff]   ;;  %v3870_v19 = vunpack.c.l.bf16 %v3934_v9  ;;  %v3871_v20 = vunpack.c.h.bf16 %v3934_v9  ;;  %v3874_v21 = vunpack.c.l.bf16 %v3935_v10  ;;  %v3937_v22 = vld [vmem:[%s4463_s24 + $0x38] sm:$0xff]   ;;  %v3875_v25 = vunpack.c.h.bf16 %v3935_v10 }
  0x14   : > { %456 = vst.msk [vmem:[#allocation3 + $0x128] sm:$0xff] %vm417_vm0, %v4112_v0  ;;  %457 = vst.msk [vmem:[#allocation3 + $0x130] sm:$0xff] %vm417_vm0, %v4112_v0  ;;  %v3938_v23 = vld [vmem:[%s4463_s24 + $0x40] sm:$0xff]   ;;  %v3939_v24 = vld [vmem:[%s4463_s24 + $0x48] sm:$0xff]   ;;  %v3878_v26 = vunpack.c.l.bf16 %v3936_v17  ;;  %v3879_v27 = vunpack.c.h.bf16 %v3936_v17  ;;  %v3882_v28 = vunpack.c.l.bf16 %v3937_v22  ;;  %v3883_v32 = vunpack.c.h.bf16 %v3937_v22 }
  0x15   : > { %459 = vst.msk [vmem:[#allocation3 + $0x140] sm:$0xff] %vm417_vm0, %v4112_v0  ;;  %460 = vst.msk [vmem:[#allocation3 + $0x148] sm:$0xff] %vm417_vm0, %v4112_v0  ;;  %v3940_v29 = vld [vmem:[%s4463_s24 + $0x50] sm:$0xff]   ;;  %v3941_v30 = vld [vmem:[%s4463_s24 + $0x58] sm:$0xff]   ;;  %v3886_v33 = vunpack.c.l.bf16 %v3938_v23  ;;  %v3887_v34 = vunpack.c.h.bf16 %v3938_v23  ;;  %v3890_v35 = vunpack.c.l.bf16 %v3939_v24  ;;  %v3891_v38 = vunpack.c.h.bf16 %v3939_v24 }
  0x16   : > { %461 = vst.msk [vmem:[#allocation3 + $0x150] sm:$0xff] %vm417_vm0, %v4112_v0  ;;  %463 = vst.msk [vmem:[#allocation3 + $0x160] sm:$0xff] %vm417_vm0, %v4112_v0  ;;  %v3942_v31 = vld [vmem:[%s4463_s24 + $0x60] sm:$0xff]   ;;  %v3943_v36 = vld [vmem:[%s4463_s24 + $0x68] sm:$0xff]   ;;  %v3894_v39 = vunpack.c.l.bf16 %v3940_v29  ;;  %v3895_v40 = vunpack.c.h.bf16 %v3940_v29  ;;  %v3898_v41 = vunpack.c.l.bf16 %v3941_v30  ;;  %v3899_v44 = vunpack.c.h.bf16 %v3941_v30 }
  0x17   : > { %464 = vst.msk [vmem:[#allocation3 + $0x168] sm:$0xff] %vm417_vm0, %v4112_v0  ;;  %465 = vst.msk [vmem:[#allocation3 + $0x170] sm:$0xff] %vm417_vm0, %v4112_v0  ;;  %v3944_v37 = vld [vmem:[%s4463_s24 + $0x70] sm:$0xff]   ;;  %v3916_v42 = vld [vmem:[%s4483_s27 + $0x8] sm:$0xff]   ;;  %v3902_v45 = vunpack.c.l.bf16 %v3942_v31  ;;  %v3903_v46 = vunpack.c.h.bf16 %v3942_v31  ;;  %v3906_v47 = vunpack.c.l.bf16 %v3943_v36  ;;  %v3907_v50 = vunpack.c.h.bf16 %v3943_v36 }
  0x18   : > { %467 = vst.msk [vmem:[#allocation3 + $0x180] sm:$0xff] %vm417_vm0, %v4112_v0  ;;  %468 = vst.msk [vmem:[#allocation3 + $0x188] sm:$0xff] %vm417_vm0, %v4112_v0  ;;  %v3789_v43 = vld [vmem:[%s4483_s27] sm:$0xff]   ;;  %v3918_v48 = vld [vmem:[%s4483_s27 + $0x18] sm:$0xff]   ;;  %v3910_v51 = vunpack.c.l.bf16 %v3944_v37  ;;  %v3911_v52 = vunpack.c.h.bf16 %v3944_v37  ;;  %v3794_v55 = vunpack.c.l.bf16 %v3916_v42  ;;  %v3795_v56 = vunpack.c.h.bf16 %v3916_v42 }
  0x19   : > { %469 = vst.msk [vmem:[#allocation3 + $0x190] sm:$0xff] %vm417_vm0, %v4112_v0  ;;  %471 = vst.msk [vmem:[#allocation3 + $0x1a0] sm:$0xff] %vm417_vm0, %v4112_v0  ;;  %v3917_v49 = vld [vmem:[%s4483_s27 + $0x10] sm:$0xff]   ;;  %v3920_v53 = vld [vmem:[%s4483_s27 + $0x28] sm:$0xff]   ;;  %v3790_v57 = vunpack.c.l.bf16 %v3789_v43  ;;  %v3791_v58 = vunpack.c.h.bf16 %v3789_v43  ;;  %v3802_v1 = vunpack.c.l.bf16 %v3918_v48  ;;  %v3803_v2 = vunpack.c.h.bf16 %v3918_v48 }
  0x1a   : > { %472 = vst.msk [vmem:[#allocation3 + $0x1a8] sm:$0xff] %vm417_vm0, %v4112_v0  ;;  %473 = vst.msk [vmem:[#allocation3 + $0x1b0] sm:$0xff] %vm417_vm0, %v4112_v0  ;;  %v3919_v54 = vld [vmem:[%s4483_s27 + $0x20] sm:$0xff]   ;;  %v3922_v59 = vld [vmem:[%s4483_s27 + $0x38] sm:$0xff]   ;;  %v3798_v3 = vunpack.c.l.bf16 %v3917_v49  ;;  %v3810_v10 = vunpack.c.l.bf16 %v3920_v53  ;;  %v3811_v11 = vunpack.c.h.bf16 %v3920_v53 }
  0x1b   : > { %475 = vst.msk [vmem:[#allocation3 + $0x1c0] sm:$0xff] %vm417_vm0, %v4112_v0  ;;  %476 = vst.msk [vmem:[#allocation3 + $0x1c8] sm:$0xff] %vm417_vm0, %v4112_v0  ;;  %v3921_v60 = vld [vmem:[%s4483_s27 + $0x30] sm:$0xff]   ;;  %v3924_v61 = vld [vmem:[%s4483_s27 + $0x48] sm:$0xff]   ;;  %v3806_v12 = vunpack.c.l.bf16 %v3919_v54  ;;  %v3818_v17 = vunpack.c.l.bf16 %v3922_v59 }
  0x1c   : > { %477 = vst.msk [vmem:[#allocation3 + $0x1d0] sm:$0xff] %vm417_vm0, %v4112_v0  ;;  %479 = vst.msk [vmem:[#allocation3 + $0x1e0] sm:$0xff] %vm417_vm0, %v4112_v0  ;;  %v3926_v18 = vld [vmem:[%s4483_s27 + $0x58] sm:$0xff]   ;;  %v3815_v22 = vunpack.c.h.bf16 %v3921_v60  ;;  %v3928_v53 = vld [vmem:[%s4483_s27 + $0x68] sm:$0xff]  }
  0x1d   : > { %480 = vst.msk [vmem:[#allocation3 + $0x1e8] sm:$0xff] %vm417_vm0, %v4112_v0  ;;  %481 = vst.msk [vmem:[#allocation3 + $0x1f0] sm:$0xff] %vm417_vm0, %v4112_v0 }
  0x1e   : > { %483 = vst.msk [vmem:[#allocation3 + $0x200] sm:$0xff] %vm417_vm0, %v4112_v0  ;;  %484 = vst.msk [vmem:[#allocation3 + $0x208] sm:$0xff] %vm417_vm0, %v4112_v0 }
  0x1f   : > { %485 = vst.msk [vmem:[#allocation3 + $0x210] sm:$0xff] %vm417_vm0, %v4112_v0  ;;  %487 = vst.msk [vmem:[#allocation3 + $0x220] sm:$0xff] %vm417_vm0, %v4112_v0 }
  0x20   : > { %488 = vst.msk [vmem:[#allocation3 + $0x228] sm:$0xff] %vm417_vm0, %v4112_v0  ;;  %489 = vst.msk [vmem:[#allocation3 + $0x230] sm:$0xff] %vm417_vm0, %v4112_v0 }
  0x21   : > { %248 = vst.msk [vmem:[#allocation2 + $0x8] sm:$0xff] %vm246_vm1, %v4112_v0  ;;  %249 = vst.msk [vmem:[#allocation2 + $0x10] sm:$0xff] %vm246_vm1, %v4112_v0 }
  0x22   : > { %247 = vst.msk [vmem:[#allocation2] sm:$0xff] %vm246_vm1, %v4112_v0  ;;  %252 = vst.msk [vmem:[#allocation2 + $0x20] sm:$0xff] %vm246_vm1, %v4112_v0 }
  0x23   : > { %253 = vst.msk [vmem:[#allocation2 + $0x28] sm:$0xff] %vm246_vm1, %v4112_v0  ;;  %254 = vst.msk [vmem:[#allocation2 + $0x30] sm:$0xff] %vm246_vm1, %v4112_v0 }
  0x24   : > { %256 = vst.msk [vmem:[#allocation2 + $0x40] sm:$0xff] %vm246_vm1, %v4112_v0  ;;  %257 = vst.msk [vmem:[#allocation2 + $0x48] sm:$0xff] %vm246_vm1, %v4112_v0 }
  0x25   : > { %258 = vst.msk [vmem:[#allocation2 + $0x50] sm:$0xff] %vm246_vm1, %v4112_v0  ;;  %260 = vst.msk [vmem:[#allocation2 + $0x60] sm:$0xff] %vm246_vm1, %v4112_v0 }
  0x26   : > { %261 = vst.msk [vmem:[#allocation2 + $0x68] sm:$0xff] %vm246_vm1, %v4112_v0  ;;  %262 = vst.msk [vmem:[#allocation2 + $0x70] sm:$0xff] %vm246_vm1, %v4112_v0 }
  0x27   : > { %264 = vst.msk [vmem:[#allocation2 + $0x80] sm:$0xff] %vm246_vm1, %v4112_v0  ;;  %265 = vst.msk [vmem:[#allocation2 + $0x88] sm:$0xff] %vm246_vm1, %v4112_v0 }
  0x28   : > { %266 = vst.msk [vmem:[#allocation2 + $0x90] sm:$0xff] %vm246_vm1, %v4112_v0  ;;  %268 = vst.msk [vmem:[#allocation2 + $0xa0] sm:$0xff] %vm246_vm1, %v4112_v0 }
  0x29   : > { %269 = vst.msk [vmem:[#allocation2 + $0xa8] sm:$0xff] %vm246_vm1, %v4112_v0  ;;  %270 = vst.msk [vmem:[#allocation2 + $0xb0] sm:$0xff] %vm246_vm1, %v4112_v0 }
  0x2a   : > { %272 = vst.msk [vmem:[#allocation2 + $0xc0] sm:$0xff] %vm246_vm1, %v4112_v0  ;;  %273 = vst.msk [vmem:[#allocation2 + $0xc8] sm:$0xff] %vm246_vm1, %v4112_v0 }
  0x2b   : > { %274 = vst.msk [vmem:[#allocation2 + $0xd0] sm:$0xff] %vm246_vm1, %v4112_v0  ;;  %276 = vst.msk [vmem:[#allocation2 + $0xe0] sm:$0xff] %vm246_vm1, %v4112_v0 }
  0x2c   : > { %277 = vst.msk [vmem:[#allocation2 + $0xe8] sm:$0xff] %vm246_vm1, %v4112_v0  ;;  %278 = vst.msk [vmem:[#allocation2 + $0xf0] sm:$0xff] %vm246_vm1, %v4112_v0 }
  0x2d   : > { %280 = vst.msk [vmem:[#allocation2 + $0x100] sm:$0xff] %vm246_vm1, %v4112_v0  ;;  %281 = vst.msk [vmem:[#allocation2 + $0x108] sm:$0xff] %vm246_vm1, %v4112_v0 }
  0x2e   : > { %282 = vst.msk [vmem:[#allocation2 + $0x110] sm:$0xff] %vm246_vm1, %v4112_v0  ;;  %284 = vst.msk [vmem:[#allocation2 + $0x120] sm:$0xff] %vm246_vm1, %v4112_v0 }
  0x2f   : > { %285 = vst.msk [vmem:[#allocation2 + $0x128] sm:$0xff] %vm246_vm1, %v4112_v0  ;;  %286 = vst.msk [vmem:[#allocation2 + $0x130] sm:$0xff] %vm246_vm1, %v4112_v0 }
  0x30   : > { %288 = vst.msk [vmem:[#allocation2 + $0x140] sm:$0xff] %vm246_vm1, %v4112_v0  ;;  %289 = vst.msk [vmem:[#allocation2 + $0x148] sm:$0xff] %vm246_vm1, %v4112_v0 }
  0x31   : > { %290 = vst.msk [vmem:[#allocation2 + $0x150] sm:$0xff] %vm246_vm1, %v4112_v0  ;;  %292 = vst.msk [vmem:[#allocation2 + $0x160] sm:$0xff] %vm246_vm1, %v4112_v0 }
  0x32   : > { %293 = vst.msk [vmem:[#allocation2 + $0x168] sm:$0xff] %vm246_vm1, %v4112_v0  ;;  %294 = vst.msk [vmem:[#allocation2 + $0x170] sm:$0xff] %vm246_vm1, %v4112_v0 }
  0x33   : > { %296 = vst.msk [vmem:[#allocation2 + $0x180] sm:$0xff] %vm246_vm1, %v4112_v0  ;;  %297 = vst.msk [vmem:[#allocation2 + $0x188] sm:$0xff] %vm246_vm1, %v4112_v0 }
  0x34   : > { %298 = vst.msk [vmem:[#allocation2 + $0x190] sm:$0xff] %vm246_vm1, %v4112_v0  ;;  %300 = vst.msk [vmem:[#allocation2 + $0x1a0] sm:$0xff] %vm246_vm1, %v4112_v0 }
  0x35   : > { %301 = vst.msk [vmem:[#allocation2 + $0x1a8] sm:$0xff] %vm246_vm1, %v4112_v0  ;;  %302 = vst.msk [vmem:[#allocation2 + $0x1b0] sm:$0xff] %vm246_vm1, %v4112_v0 }
  0x36   : > { %304 = vst.msk [vmem:[#allocation2 + $0x1c0] sm:$0xff] %vm246_vm1, %v4112_v0  ;;  %305 = vst.msk [vmem:[#allocation2 + $0x1c8] sm:$0xff] %vm246_vm1, %v4112_v0 }
  0x37   : > { %306 = vst.msk [vmem:[#allocation2 + $0x1d0] sm:$0xff] %vm246_vm1, %v4112_v0  ;;  %308 = vst.msk [vmem:[#allocation2 + $0x1e0] sm:$0xff] %vm246_vm1, %v4112_v0 }
  0x38   : > { %309 = vst.msk [vmem:[#allocation2 + $0x1e8] sm:$0xff] %vm246_vm1, %v4112_v0  ;;  %310 = vst.msk [vmem:[#allocation2 + $0x1f0] sm:$0xff] %vm246_vm1, %v4112_v0 }
  0x39   : > { %312 = vst.msk [vmem:[#allocation2 + $0x200] sm:$0xff] %vm246_vm1, %v4112_v0  ;;  %313 = vst.msk [vmem:[#allocation2 + $0x208] sm:$0xff] %vm246_vm1, %v4112_v0 }
  0x3a   : > { %314 = vst.msk [vmem:[#allocation2 + $0x210] sm:$0xff] %vm246_vm1, %v4112_v0  ;;  %316 = vst.msk [vmem:[#allocation2 + $0x220] sm:$0xff] %vm246_vm1, %v4112_v0 }
  0x3b   : > { %317 = vst.msk [vmem:[#allocation2 + $0x228] sm:$0xff] %vm246_vm1, %v4112_v0  ;;  %318 = vst.msk [vmem:[#allocation2 + $0x230] sm:$0xff] %vm246_vm1, %v4112_v0 }
  0x3c   : > { %426 = vst.msk [vmem:[#allocation3 + $0x38] sm:$0x1] %vm421_vm2, %v4112_v0  ;;  %422 = vst.msk [vmem:[#allocation3 + $0x18] sm:$0x1] %vm421_vm2, %v4112_v0 }
  0x3d   : > { %430 = vst.msk [vmem:[#allocation3 + $0x58] sm:$0x1] %vm421_vm2, %v4112_v0  ;;  %434 = vst.msk [vmem:[#allocation3 + $0x78] sm:$0x1] %vm421_vm2, %v4112_v0 }
  0x3e   : > { %438 = vst.msk [vmem:[#allocation3 + $0x98] sm:$0x1] %vm421_vm2, %v4112_v0  ;;  %442 = vst.msk [vmem:[#allocation3 + $0xb8] sm:$0x1] %vm421_vm2, %v4112_v0 }
  0x3f   : > { %446 = vst.msk [vmem:[#allocation3 + $0xd8] sm:$0x1] %vm421_vm2, %v4112_v0  ;;  %450 = vst.msk [vmem:[#allocation3 + $0xf8] sm:$0x1] %vm421_vm2, %v4112_v0 }
  0x40   : > { %454 = vst.msk [vmem:[#allocation3 + $0x118] sm:$0x1] %vm421_vm2, %v4112_v0  ;;  %458 = vst.msk [vmem:[#allocation3 + $0x138] sm:$0x1] %vm421_vm2, %v4112_v0 }
  0x41   : > { %462 = vst.msk [vmem:[#allocation3 + $0x158] sm:$0x1] %vm421_vm2, %v4112_v0  ;;  %466 = vst.msk [vmem:[#allocation3 + $0x178] sm:$0x1] %vm421_vm2, %v4112_v0 }
  0x42   : > { %470 = vst.msk [vmem:[#allocation3 + $0x198] sm:$0x1] %vm421_vm2, %v4112_v0  ;;  %474 = vst.msk [vmem:[#allocation3 + $0x1b8] sm:$0x1] %vm421_vm2, %v4112_v0 }
  0x43   : > { %478 = vst.msk [vmem:[#allocation3 + $0x1d8] sm:$0x1] %vm421_vm2, %v4112_v0  ;;  %482 = vst.msk [vmem:[#allocation3 + $0x1f8] sm:$0x1] %vm421_vm2, %v4112_v0 }
  0x44   : > { %486 = vst.msk [vmem:[#allocation3 + $0x218] sm:$0x1] %vm421_vm2, %v4112_v0  ;;  %490 = vst.msk [vmem:[#allocation3 + $0x238] sm:$0x1] %vm421_vm2, %v4112_v0 }
  0x45   : > { %255 = vst.msk [vmem:[#allocation2 + $0x38] sm:$0x1] %vm250_vm3, %v4112_v0  ;;  %251 = vst.msk [vmem:[#allocation2 + $0x18] sm:$0x1] %vm250_vm3, %v4112_v0 }
  0x46   : > { %259 = vst.msk [vmem:[#allocation2 + $0x58] sm:$0x1] %vm250_vm3, %v4112_v0  ;;  %263 = vst.msk [vmem:[#allocation2 + $0x78] sm:$0x1] %vm250_vm3, %v4112_v0 }
  0x47   : > { %267 = vst.msk [vmem:[#allocation2 + $0x98] sm:$0x1] %vm250_vm3, %v4112_v0  ;;  %271 = vst.msk [vmem:[#allocation2 + $0xb8] sm:$0x1] %vm250_vm3, %v4112_v0 }
  0x48   : > { %275 = vst.msk [vmem:[#allocation2 + $0xd8] sm:$0x1] %vm250_vm3, %v4112_v0  ;;  %279 = vst.msk [vmem:[#allocation2 + $0xf8] sm:$0x1] %vm250_vm3, %v4112_v0 }
  0x49   : > { %283 = vst.msk [vmem:[#allocation2 + $0x118] sm:$0x1] %vm250_vm3, %v4112_v0  ;;  %287 = vst.msk [vmem:[#allocation2 + $0x138] sm:$0x1] %vm250_vm3, %v4112_v0 }
  0x4a   : > { %291 = vst.msk [vmem:[#allocation2 + $0x158] sm:$0x1] %vm250_vm3, %v4112_v0  ;;  %295 = vst.msk [vmem:[#allocation2 + $0x178] sm:$0x1] %vm250_vm3, %v4112_v0 }
  0x4b   : > { %299 = vst.msk [vmem:[#allocation2 + $0x198] sm:$0x1] %vm250_vm3, %v4112_v0  ;;  %303 = vst.msk [vmem:[#allocation2 + $0x1b8] sm:$0x1] %vm250_vm3, %v4112_v0 }
  0x4c   : > { %307 = vst.msk [vmem:[#allocation2 + $0x1d8] sm:$0x1] %vm250_vm3, %v4112_v0  ;;  %311 = vst.msk [vmem:[#allocation2 + $0x1f8] sm:$0x1] %vm250_vm3, %v4112_v0 }
  0x4d   : > { %315 = vst.msk [vmem:[#allocation2 + $0x218] sm:$0x1] %vm250_vm3, %v4112_v0  ;;  %319 = vst.msk [vmem:[#allocation2 + $0x238] sm:$0x1] %vm250_vm3, %v4112_v0 }
  0x4e   : > { %558 = vst.msk [vmem:[#allocation3 + $0x48] sm:$0xff] %vm417_vm0, %v3858_v4  ;;  %559 = vst.msk [vmem:[#allocation3 + $0x50] sm:$0xff] %vm417_vm0, %v3859_v5  ;;  %v3799_v4 = vunpack.c.h.bf16 %v3917_v49  ;;  %v3923_v5 = vld [vmem:[%s4483_s27 + $0x40] sm:$0xff]  }
  0x4f   : > { %556 = vst.msk [vmem:[#allocation3 + $0x28] sm:$0xff] %vm417_vm0, %v3854_v6  ;;  %557 = vst.msk [vmem:[#allocation3 + $0x30] sm:$0xff] %vm417_vm0, %v3855_v7  ;;  %v3822_v30 = vunpack.c.l.bf16 %v3923_v5  ;;  %v3823_v31 = vunpack.c.h.bf16 %v3923_v5 }
  0x50   : > { %560 = vst.msk [vmem:[#allocation3 + $0x68] sm:$0xff] %vm417_vm0, %v3862_v13  ;;  %561 = vst.msk [vmem:[#allocation3 + $0x70] sm:$0xff] %vm417_vm0, %v3863_v14 }
  0x51   : > { %562 = vst.msk [vmem:[#allocation3 + $0x88] sm:$0xff] %vm417_vm0, %v3866_v15  ;;  %563 = vst.msk [vmem:[#allocation3 + $0x90] sm:$0xff] %vm417_vm0, %v3867_v16  ;;  %v3807_v16 = vunpack.c.h.bf16 %v3919_v54 }
  0x52   : > { %564 = vst.msk [vmem:[#allocation3 + $0xa8] sm:$0xff] %vm417_vm0, %v3870_v19  ;;  %565 = vst.msk [vmem:[#allocation3 + $0xb0] sm:$0xff] %vm417_vm0, %v3871_v20  ;;  %v3819_v20 = vunpack.c.h.bf16 %v3922_v59  ;;  %v3843_v59 = vunpack.c.h.bf16 %v3928_v53 }
  0x53   : > { %566 = vst.msk [vmem:[#allocation3 + $0xc8] sm:$0xff] %vm417_vm0, %v3874_v21  ;;  %567 = vst.msk [vmem:[#allocation3 + $0xd0] sm:$0xff] %vm417_vm0, %v3875_v25  ;;  %v3814_v21 = vunpack.c.l.bf16 %v3921_v60 }
  0x54   : > { %568 = vst.msk [vmem:[#allocation3 + $0xe8] sm:$0xff] %vm417_vm0, %v3878_v26  ;;  %569 = vst.msk [vmem:[#allocation3 + $0xf0] sm:$0xff] %vm417_vm0, %v3879_v27  ;;  %v3826_v26 = vunpack.c.l.bf16 %v3924_v61  ;;  %v3827_v27 = vunpack.c.h.bf16 %v3924_v61 }
  0x55   : > { %570 = vst.msk [vmem:[#allocation3 + $0x108] sm:$0xff] %vm417_vm0, %v3882_v28  ;;  %571 = vst.msk [vmem:[#allocation3 + $0x110] sm:$0xff] %vm417_vm0, %v3883_v32  ;;  %v640_v62 = vld [vmem:[#allocation3 + $0x47] sm:$0xff]  ;;  %v641_v63 = vld [vmem:[#allocation3 + $0x4f] sm:$0xff]  ;;  %v3834_v32 = vunpack.c.l.bf16 %v3926_v18 }
  0x56   : > { %572 = vst.msk [vmem:[#allocation3 + $0x128] sm:$0xff] %vm417_vm0, %v3886_v33  ;;  %573 = vst.msk [vmem:[#allocation3 + $0x130] sm:$0xff] %vm417_vm0, %v3887_v34  ;;  %v638_v0 = vld [vmem:[#allocation3 + $0x27] sm:$0xff]  ;;  %v4527_v6 = vpack.c.bf16 %v641_v63, %v640_v62  ;;  %v639_v7 = vld [vmem:[#allocation3 + $0x2f] sm:$0xff]  ;;  %v3835_v33 = vunpack.c.h.bf16 %v3926_v18 }
  0x57   : > { %574 = vst.msk [vmem:[#allocation3 + $0x148] sm:$0xff] %vm417_vm0, %v3890_v35  ;;  %575 = vst.msk [vmem:[#allocation3 + $0x150] sm:$0xff] %vm417_vm0, %v3891_v38  ;;  %v642_v8 = vld [vmem:[#allocation3 + $0x67] sm:$0xff]  ;;  %v643_v9 = vld [vmem:[#allocation3 + $0x6f] sm:$0xff]  ;;  %v4533_v13 = vpack.c.bf16 %v639_v7, %v638_v0 }
  0x58   : > { %576 = vst.msk [vmem:[#allocation3 + $0x168] sm:$0xff] %vm417_vm0, %v3894_v39  ;;  %577 = vst.msk [vmem:[#allocation3 + $0x170] sm:$0xff] %vm417_vm0, %v3895_v40  ;;  %v644_v14 = vld [vmem:[#allocation3 + $0x87] sm:$0xff]  ;;  %v645_v15 = vld [vmem:[#allocation3 + $0x8f] sm:$0xff]  ;;  %1474 = vrot.lane.b32.xlu1 %v4527_v6, %s4113_s28  ;;  %v4542_v19 = vpack.c.bf16 %v643_v9, %v642_v8 }
  0x59   : > { %578 = vst.msk [vmem:[#allocation3 + $0x188] sm:$0xff] %vm417_vm0, %v3898_v41  ;;  %579 = vst.msk [vmem:[#allocation3 + $0x190] sm:$0xff] %vm417_vm0, %v3899_v44  ;;  %1472 = vrot.lane.b32.xlu0 %v4533_v13, %s4113_s28  ;;  %v672_v23 = vpack.c.bf16 %v645_v15, %v644_v14  ;;  %v646_v24 = vld [vmem:[#allocation3 + $0xa7] sm:$0xff]  ;;  %v647_v25 = vld [vmem:[#allocation3 + $0xaf] sm:$0xff] }
  0x5a   : > { %580 = vst.msk [vmem:[#allocation3 + $0x1a8] sm:$0xff] %vm417_vm0, %v3902_v45  ;;  %581 = vst.msk [vmem:[#allocation3 + $0x1b0] sm:$0xff] %vm417_vm0, %v3903_v46  ;;  %v648_v28 = vld [vmem:[#allocation3 + $0xc7] sm:$0xff]  ;;  %v649_v29 = vld [vmem:[#allocation3 + $0xcf] sm:$0xff]  ;;  %v673_v34 = vpack.c.bf16 %v647_v25, %v646_v24 }
  0x5b   : > { %582 = vst.msk [vmem:[#allocation3 + $0x1c8] sm:$0xff] %vm417_vm0, %v3906_v47  ;;  %583 = vst.msk [vmem:[#allocation3 + $0x1d0] sm:$0xff] %vm417_vm0, %v3907_v50  ;;  %v674_v35 = vpack.c.bf16 %v649_v29, %v648_v28  ;;  %v650_v36 = vld [vmem:[#allocation3 + $0xe7] sm:$0xff]  ;;  %v651_v37 = vld [vmem:[#allocation3 + $0xef] sm:$0xff] }
  0x5c   : > { %584 = vst.msk [vmem:[#allocation3 + $0x1e8] sm:$0xff] %vm417_vm0, %v3910_v51  ;;  %585 = vst.msk [vmem:[#allocation3 + $0x1f0] sm:$0xff] %vm417_vm0, %v3911_v52  ;;  %1476 = vrot.lane.b32.xlu1 %v4542_v19, %s4113_s28  ;;  %v652_v38 = vld [vmem:[#allocation3 + $0x107] sm:$0xff]  ;;  %v653_v39 = vld [vmem:[#allocation3 + $0x10f] sm:$0xff]  ;;  %v675_v40 = vpack.c.bf16 %v651_v37, %v650_v36  ;;  %v4115_v37 = vmov 0  }
  0x5d   : > { %387 = vst.msk [vmem:[#allocation2 + $0x48] sm:$0xff] %vm246_vm1, %v3794_v55  ;;  %388 = vst.msk [vmem:[#allocation2 + $0x50] sm:$0xff] %vm246_vm1, %v3795_v56  ;;  %1478 = vrot.lane.b32.xlu0 %v672_v23, %s4113_s28  ;;  %v676_v41 = vpack.c.bf16 %v653_v39, %v652_v38  ;;  %v654_v42 = vld [vmem:[#allocation3 + $0x127] sm:$0xff]  ;;  %v655_v43 = vld [vmem:[#allocation3 + $0x12f] sm:$0xff]  ;;  %v3842_v56 = vunpack.c.l.bf16 %v3928_v53  ;;  %3164 = vmatprep.subr.bf16.mxu1 %v4115_v37 }
  0x5e   : > { %385 = vst.msk [vmem:[#allocation2 + $0x28] sm:$0xff] %vm246_vm1, %v3790_v57  ;;  %386 = vst.msk [vmem:[#allocation2 + $0x30] sm:$0xff] %vm246_vm1, %v3791_v58  ;;  %v656_v44 = vld [vmem:[#allocation3 + $0x147] sm:$0xff]  ;;  %v657_v45 = vld [vmem:[#allocation3 + $0x14f] sm:$0xff]  ;;  %v677_v46 = vpack.c.bf16 %v655_v43, %v654_v42 }
  0x5f   : > { %391 = vst.msk [vmem:[#allocation2 + $0x88] sm:$0xff] %vm246_vm1, %v3802_v1  ;;  %392 = vst.msk [vmem:[#allocation2 + $0x90] sm:$0xff] %vm246_vm1, %v3803_v2  ;;  %v678_v47 = vpack.c.bf16 %v657_v45, %v656_v44  ;;  %v658_v48 = vld [vmem:[#allocation3 + $0x167] sm:$0xff]  ;;  %v659_v49 = vld [vmem:[#allocation3 + $0x16f] sm:$0xff] }
  0x60   : > { %389 = vst.msk [vmem:[#allocation2 + $0x68] sm:$0xff] %vm246_vm1, %v3798_v3  ;;  %390 = vst.msk [vmem:[#allocation2 + $0x70] sm:$0xff] %vm246_vm1, %v3799_v4  ;;  %1480 = vrot.lane.b32.xlu1 %v673_v34, %s4113_s28  ;;  %v660_v50 = vld [vmem:[#allocation3 + $0x187] sm:$0xff]  ;;  %v661_v51 = vld [vmem:[#allocation3 + $0x18f] sm:$0xff]  ;;  %v679_v58 = vpack.c.bf16 %v659_v49, %v658_v48 }
  0x61   : > { %395 = vst.msk [vmem:[#allocation2 + $0xc8] sm:$0xff] %vm246_vm1, %v3810_v10  ;;  %396 = vst.msk [vmem:[#allocation2 + $0xd0] sm:$0xff] %vm246_vm1, %v3811_v11  ;;  %1482 = vrot.lane.b32.xlu0 %v674_v35, %s4113_s28  ;;  %v3925_v52 = vld [vmem:[%s4483_s27 + $0x50] sm:$0xff]   ;;  %v3927_v57 = vld [vmem:[%s4483_s27 + $0x60] sm:$0xff]   ;;  %v680_v63 = vpack.c.bf16 %v661_v51, %v660_v50 }
  0x62   : > { %393 = vst.msk [vmem:[#allocation2 + $0xa8] sm:$0xff] %vm246_vm1, %v3806_v12  ;;  %394 = vst.msk [vmem:[#allocation2 + $0xb0] sm:$0xff] %vm246_vm1, %v3807_v16  ;;  %v3830_v54 = vunpack.c.l.bf16 %v3925_v52  ;;  %v3831_v55 = vunpack.c.h.bf16 %v3925_v52  ;;  %v3838_v60 = vunpack.c.l.bf16 %v3927_v57  ;;  %v3839_v61 = vunpack.c.h.bf16 %v3927_v57  ;;  %v3929_v62 = vld [vmem:[%s4483_s27 + $0x70] sm:$0xff]   ;;  %v662_v0 = vld [vmem:[#allocation3 + $0x1a7] sm:$0xff] }
  0x63   : > { %399 = vst.msk [vmem:[#allocation2 + $0x108] sm:$0xff] %vm246_vm1, %v3818_v17  ;;  %400 = vst.msk [vmem:[#allocation2 + $0x110] sm:$0xff] %vm246_vm1, %v3819_v20  ;;  %v663_v1 = vld [vmem:[#allocation3 + $0x1af] sm:$0xff]  ;;  %v3846_v2 = vunpack.c.l.bf16 %v3929_v62  ;;  %v3847_v3 = vunpack.c.h.bf16 %v3929_v62  ;;  %v664_v4 = vld [vmem:[#allocation3 + $0x1c7] sm:$0xff] }
  0x64   : > { %397 = vst.msk [vmem:[#allocation2 + $0xe8] sm:$0xff] %vm246_vm1, %v3814_v21  ;;  %398 = vst.msk [vmem:[#allocation2 + $0xf0] sm:$0xff] %vm246_vm1, %v3815_v22  ;;  %1484 = vrot.lane.b32.xlu1 %v675_v40, %s4113_s28  ;;  %v665_v5 = vld [vmem:[#allocation3 + $0x1cf] sm:$0xff]  ;;  %v681_v7 = vpack.c.bf16 %v663_v1, %v662_v0  ;;  %v666_v9 = vld [vmem:[#allocation3 + $0x1e7] sm:$0xff] }
  0x65   : > { %403 = vst.msk [vmem:[#allocation2 + $0x148] sm:$0xff] %vm246_vm1, %v3826_v26  ;;  %404 = vst.msk [vmem:[#allocation2 + $0x150] sm:$0xff] %vm246_vm1, %v3827_v27  ;;  %1486 = vrot.lane.b32.xlu0 %v676_v41, %s4113_s28  ;;  %v682_v8 = vpack.c.bf16 %v665_v5, %v664_v4  ;;  %v667_v10 = vld [vmem:[#allocation3 + $0x1ef] sm:$0xff]  ;;  %v4075_v44 = vld [vmem:[%s5661_s2 + $0x40] sm:$0xff]  }
  0x66   : > { %401 = vst.msk [vmem:[#allocation2 + $0x128] sm:$0xff] %vm246_vm1, %v3822_v30  ;;  %402 = vst.msk [vmem:[#allocation2 + $0x130] sm:$0xff] %vm246_vm1, %v3823_v31  ;;  %v684_v11 = vld [vmem:[#allocation2 + $0x8] sm:$0xff]  ;;  %v685_v12 = vld [vmem:[#allocation2 + $0x10] sm:$0xff]  ;;  %v683_v14 = vpack.c.bf16 %v667_v10, %v666_v9  ;;  %3946 = vmatprep.subr.bf16.mxu0 %v4075_v44 }
  0x67   : > { %407 = vst.msk [vmem:[#allocation2 + $0x188] sm:$0xff] %vm246_vm1, %v3834_v32  ;;  %408 = vst.msk [vmem:[#allocation2 + $0x190] sm:$0xff] %vm246_vm1, %v3835_v33  ;;  %v716_v15 = vpack.c.bf16 %v685_v12, %v684_v11  ;;  %v686_v16 = vld [vmem:[#allocation2 + $0x28] sm:$0xff]  ;;  %v687_v17 = vld [vmem:[#allocation2 + $0x30] sm:$0xff] }
  0x68   : > { %1488 = vrot.lane.b32.xlu1 %v677_v46, %s4113_s28  ;;  %405 = vst.msk [vmem:[#allocation2 + $0x168] sm:$0xff] %vm246_vm1, %v3830_v54  ;;  %406 = vst.msk [vmem:[#allocation2 + $0x170] sm:$0xff] %vm246_vm1, %v3831_v55  ;;  %v688_v18 = vld [vmem:[#allocation2 + $0x48] sm:$0xff]  ;;  %v689_v20 = vld [vmem:[#allocation2 + $0x50] sm:$0xff]  ;;  %v4586_v21 = vpack.c.bf16 %v687_v17, %v686_v16 }
  0x69   : > { %1490 = vrot.lane.b32.xlu0 %v678_v47, %s4113_s28  ;;  %411 = vst.msk [vmem:[#allocation2 + $0x1c8] sm:$0xff] %vm246_vm1, %v3842_v56  ;;  %412 = vst.msk [vmem:[#allocation2 + $0x1d0] sm:$0xff] %vm246_vm1, %v3843_v59  ;;  %v4589_v22 = vpack.c.bf16 %v689_v20, %v688_v18  ;;  %v690_v23 = vld [vmem:[#allocation2 + $0x68] sm:$0xff]  ;;  %v691_v24 = vld [vmem:[#allocation2 + $0x70] sm:$0xff] }
  0x6a   : > { %409 = vst.msk [vmem:[#allocation2 + $0x1a8] sm:$0xff] %vm246_vm1, %v3838_v60  ;;  %410 = vst.msk [vmem:[#allocation2 + $0x1b0] sm:$0xff] %vm246_vm1, %v3839_v61  ;;  %v692_v25 = vld [vmem:[#allocation2 + $0x88] sm:$0xff]  ;;  %v693_v26 = vld [vmem:[#allocation2 + $0x90] sm:$0xff]  ;;  %v4593_v27 = vpack.c.bf16 %v691_v24, %v690_v23 }
  0x6b   : > { %413 = vst.msk [vmem:[#allocation2 + $0x1e8] sm:$0xff] %vm246_vm1, %v3846_v2  ;;  %414 = vst.msk [vmem:[#allocation2 + $0x1f0] sm:$0xff] %vm246_vm1, %v3847_v3  ;;  %v4597_v28 = vpack.c.bf16 %v693_v26, %v692_v25  ;;  %v694_v29 = vld [vmem:[#allocation2 + $0xa8] sm:$0xff]  ;;  %v695_v30 = vld [vmem:[#allocation2 + $0xb0] sm:$0xff] }
  0x6c   : > { %1492 = vrot.lane.b32.xlu1 %v679_v58, %s4113_s28  ;;  %v696_v31 = vld [vmem:[#allocation2 + $0xc8] sm:$0xff]  ;;  %v697_v32 = vld [vmem:[#allocation2 + $0xd0] sm:$0xff]  ;;  %v4601_v33 = vpack.c.bf16 %v695_v30, %v694_v29  ;;  %v4076_v47 = vld [vmem:[%s5661_s2] sm:$0xff]  }
  0x6d   : > { %1494 = vrot.lane.b32.xlu0 %v680_v63, %s4113_s28  ;;  %v722_v34 = vpack.c.bf16 %v697_v32, %v696_v31  ;;  %v698_v35 = vld [vmem:[#allocation2 + $0xe8] sm:$0xff]  ;;  %v699_v36 = vld [vmem:[#allocation2 + $0xf0] sm:$0xff]  ;;  %v4077_v48 = vld [vmem:[%s5661_s2 + $0x80] sm:$0xff]   ;;  %3947 = vmatpush3.bf16.msra.mxu0 %v4076_v47 }
  0x6e   : > { %v700_v38 = vld [vmem:[#allocation2 + $0x108] sm:$0xff]  ;;  %v701_v39 = vld [vmem:[#allocation2 + $0x110] sm:$0xff]  ;;  %v723_v40 = vpack.c.bf16 %v699_v36, %v698_v35  ;;  %3165 = vmatpush1.bf16.msra.mxu1 %v4077_v48  ;;  %v4084_v1 = vld [vmem:[%s5661_s2 + $0x58] sm:$0xff]  }
  0x6f   : > { %v704_v41 = vld [vmem:[#allocation2 + $0x148] sm:$0xff]  ;;  %v705_v42 = vld [vmem:[#allocation2 + $0x150] sm:$0xff]  ;;  %v724_v45 = vpack.c.bf16 %v701_v39, %v700_v38  ;;  %3166 = vmatprep.subr.bf16.mxu1 %v4115_v37  ;;  %v4085_v4 = vld [vmem:[%s5661_s2 + $0x18] sm:$0xff]  }
  0x70   : > { %1496 = vrot.lane.b32.xlu1 %v681_v7, %s4113_s28  ;;  %v702_v43 = vld [vmem:[#allocation2 + $0x128] sm:$0xff]  ;;  %v703_v46 = vld [vmem:[#allocation2 + $0x130] sm:$0xff]  ;;  %v726_v56 = vpack.c.bf16 %v705_v42, %v704_v41  ;;  %v4086_v5 = vld [vmem:[%s5661_s2 + $0x98] sm:$0xff]  }
  0x71   : > { %1498 = vrot.lane.b32.xlu0 %v682_v8, %s4113_s28  ;;  %v4078_v49 = vld [vmem:[%s5661_s2 + $0x48] sm:$0xff]   ;;  %v725_v53 = vpack.c.bf16 %v703_v46, %v702_v43  ;;  %v4081_v55 = vld [vmem:[%s5661_s2 + $0x50] sm:$0xff]   ;;  %v4087_v8 = vld [vmem:[%s5661_s2 + $0x60] sm:$0xff]  }
  0x72   : > { %v4079_v50 = vld [vmem:[%s5661_s2 + $0x8] sm:$0xff]   ;;  %3948 = vmatprep.subr.bf16.mxu0 %v4078_v49  ;;  %v707_v57 = vld [vmem:[#allocation2 + $0x170] sm:$0xff]  ;;  %v4088_v16 = vld [vmem:[%s5661_s2 + $0x20] sm:$0xff]  }
  0x73   : > { %v706_v51 = vld [vmem:[#allocation2 + $0x168] sm:$0xff]  ;;  %v709_v58 = vld [vmem:[#allocation2 + $0x190] sm:$0xff]  ;;  %3949 = vmatpush3.bf16.msra.mxu0 %v4079_v50  ;;  %v4089_v17 = vld [vmem:[%s5661_s2 + $0xa0] sm:$0xff]  }
  0x74   : > { %1500 = vrot.lane.b32.xlu1 %v683_v14, %s4113_s28  ;;  %v4080_v52 = vld [vmem:[%s5661_s2 + $0x88] sm:$0xff]   ;;  %v4082_v60 = vld [vmem:[%s5661_s2 + $0x10] sm:$0xff]   ;;  %v727_v62 = vpack.c.bf16 %v707_v57, %v706_v51  ;;  %3950 = vmatprep.subr.bf16.mxu0 %v4081_v55  ;;  %v4096_v41 = vld [vmem:[%s5661_s2 + $0x78] sm:$0xff]  }
  0x75   : > { %1518 = vrot.lane.b32.xlu0 %v716_v15, %s4114_s29  ;;  %v708_v54 = vld [vmem:[#allocation2 + $0x188] sm:$0xff]  ;;  %3167 = vmatpush1.bf16.msra.mxu1 %v4080_v52  ;;  %v4083_v61 = vld [vmem:[%s5661_s2 + $0x90] sm:$0xff]   ;;  %v4097_v42 = vld [vmem:[%s5661_s2 + $0x38] sm:$0xff]  }
  0x76   : > { %v710_v59 = vld [vmem:[#allocation2 + $0x1a8] sm:$0xff]  ;;  %v713_v0 = vld [vmem:[#allocation2 + $0x1d0] sm:$0xff]  ;;  %v728_v2 = vpack.c.bf16 %v709_v58, %v708_v54  ;;  %3168 = vmatprep.subr.bf16.mxu1 %v4115_v37  ;;  %v4098_v43 = vld [vmem:[%s5661_s2 + $0xb8] sm:$0xff]  }
  0x77   : > { %v712_v63 = vld [vmem:[#allocation2 + $0x1c8] sm:$0xff]  ;;  %v711_v3 = vld [vmem:[#allocation2 + $0x1b0] sm:$0xff]  ;;  %3951 = vmatpush3.bf16.msra.mxu0 %v4082_v60  ;;  %v4099_v48 = vld [vmem:[%s5661_s2 + $0xc0] sm:$0xff]  }
  0x78   : > { %1520 = vrot.lane.b32.xlu1 %v4586_v21, %s4114_s29  ;;  %v729_v7 = vpack.c.bf16 %v711_v3, %v710_v59  ;;  %3952 = vmatprep.subr.bf16.mxu0 %v4084_v1  ;;  %v730_v9 = vpack.c.bf16 %v713_v0, %v712_v63  ;;  %v732_v10 = vld [vmem:[#allocation3 + $0x8] sm:$0xff]  ;;  %v715_v12 = vld [vmem:[#allocation2 + $0x1f0] sm:$0xff] }
  0x79   : > { %1522 = vrot.lane.b32.xlu0 %v4589_v22, %s4114_s29  ;;  %3169 = vmatpush1.bf16.msra.mxu1 %v4083_v61  ;;  %v714_v11 = vld [vmem:[#allocation2 + $0x1e8] sm:$0xff]  ;;  %v733_v14 = vld [vmem:[#allocation3 + $0x10] sm:$0xff] }
  0x7a   : > { %3170 = vmatprep.subr.bf16.mxu1 %v4115_v37  ;;  %v734_v15 = vld [vmem:[#allocation3 + $0x28] sm:$0xff]  ;;  %v731_v18 = vpack.c.bf16 %v715_v12, %v714_v11  ;;  %v764_v24 = vpack.c.bf16 %v733_v14, %v732_v10  ;;  %v735_v25 = vld [vmem:[#allocation3 + $0x30] sm:$0xff] }
  0x7b   : > { %3953 = vmatpush3.bf16.msra.mxu0 %v4085_v4  ;;  %v736_v20 = vld [vmem:[#allocation3 + $0x48] sm:$0xff]  ;;  %v737_v26 = vld [vmem:[#allocation3 + $0x50] sm:$0xff]  ;;  %v765_v32 = vpack.c.bf16 %v735_v25, %v734_v15 }
  0x7c   : > { %1524 = vrot.lane.b32.xlu1 %v4593_v27, %s4114_s29  ;;  %3954 = vmatprep.subr.bf16.mxu0 %v4087_v8  ;;  %v4090_v23 = vld [vmem:[%s5661_s2 + $0x68] sm:$0xff]   ;;  %v4680_v35 = vpack.c.bf16 %v737_v26, %v736_v20  ;;  %v4094_v38 = vld [vmem:[%s5661_s2 + $0x30] sm:$0xff]  }
  0x7d   : > { %1526 = vrot.lane.b32.xlu0 %v4597_v28, %s4114_s29  ;;  %3171 = vmatpush1.bf16.msra.mxu1 %v4086_v5  ;;  %v876_v29 = vld [vmem:[#allocation2 + $0x27] sm:$0xff]  ;;  %v877_v36 = vld [vmem:[#allocation2 + $0x2f] sm:$0xff] }
  0x7e   : > { %3172 = vmatprep.subr.bf16.mxu1 %v4115_v37  ;;  %v4091_v30 = vld [vmem:[%s5661_s2 + $0x28] sm:$0xff]   ;;  %v4095_v39 = vld [vmem:[%s5661_s2 + $0xb0] sm:$0xff]  }
  0x7f   : > { %3955 = vmatpush3.bf16.msra.mxu0 %v4088_v16  ;;  %v4092_v31 = vld [vmem:[%s5661_s2 + $0xa8] sm:$0xff]   ;;  %v1117_v47 = vld [vmem:[#allocation3 + $0x31] sm:$0xff] }
  0x80   : > { %1528 = vrot.lane.b32.xlu1 %v4601_v33, %s4114_s29  ;;  %3956 = vmatprep.subr.bf16.mxu0 %v4090_v23  ;;  %v1068_v44 = vld [vmem:[#allocation2 + $0x29] sm:$0xff]  ;;  %v781_v51 = vld [vmem:[#allocation2 + $0x11] sm:$0xff] }
  0x81   : > { %1530 = vrot.lane.b32.xlu0 %v722_v34, %s4114_s29  ;;  %3173 = vmatpush1.bf16.msra.mxu1 %v4089_v17  ;;  %v4093_v34 = vld [vmem:[%s5661_s2 + $0x70] sm:$0xff]   ;;  %v1165_v52 = vld [vmem:[#allocation2 + $0x47] sm:$0xff] }
  0x82   : > { %3174 = vmatprep.subr.bf16.mxu1 %v4115_v37  ;;  %v1116_v46 = vld [vmem:[#allocation3 + $0x29] sm:$0xff]  ;;  %v1407_v58 = vld [vmem:[#allocation3 + $0x51] sm:$0xff] }
  0x83   : > { %3957 = vmatpush3.bf16.msra.mxu0 %v4091_v30  ;;  %v780_v50 = vld [vmem:[#allocation2 + $0x9] sm:$0xff]  ;;  %v1071_v60 = vld [vmem:[#allocation2 + $0x51] sm:$0xff] }
  0x84   : > { %1532 = vrot.lane.b32.xlu1 %v723_v40, %s4114_s29  ;;  %v4690_v40 = vpack.c.bf16 %v877_v36, %v876_v29  ;;  %3958 = vmatprep.subr.bf16.mxu0 %v4093_v34  ;;  %v4100_v54 = vld [vmem:[%s5661_s2 + $0xc8] sm:$0xff]   ;;  %v1313_v4 = vld [vmem:[#allocation3 + $0x70] sm:$0xff] }
  0x85   : > { %1534 = vrot.lane.b32.xlu0 %v724_v45, %s4114_s29  ;;  %3175 = vmatpush1.bf16.msra.mxu1 %v4092_v31  ;;  %v1069_v45 = vld [vmem:[#allocation2 + $0x31] sm:$0xff]  ;;  %v1406_v57 = vld [vmem:[#allocation3 + $0x49] sm:$0xff] }
  0x86   : > { %3176 = vmatprep.subr.bf16.mxu1 %v4115_v37  ;;  %v1100_v49 = vpack.c.bf16 %v1069_v45, %v1068_v44  ;;  %v1438_v59 = vpack.c.bf16 %v1407_v58, %v1406_v57  ;;  %v1168_v63 = vld [vmem:[#allocation2 + $0x6f] sm:$0xff]  ;;  %v596_v17 = vld [vmem:[#allocation2 + $0x87] sm:$0xff] }
  0x87   : > { %3959 = vmatpush3.bf16.msra.mxu0 %v4094_v38  ;;  %v1312_v3 = vld [vmem:[#allocation3 + $0x68] sm:$0xff]  ;;  %v1073_v10 = vld [vmem:[#allocation2 + $0x71] sm:$0xff] }
  0x88   : > { %1536 = vrot.lane.b32.xlu1 %v725_v53, %s4114_s29  ;;  %3960 = vmatprep.subr.bf16.mxu0 %v4096_v41  ;;  %v1166_v53 = vld [vmem:[#allocation2 + $0x4f] sm:$0xff]  ;;  %v1343_v5 = vpack.c.bf16 %v1313_v4, %v1312_v3 }
  0x89   : > { %1538 = vrot.lane.b32.xlu0 %v726_v56, %s4114_s29  ;;  %3177 = vmatpush1.bf16.msra.mxu1 %v4095_v39  ;;  %v4722_v55 = vpack.c.bf16 %v1166_v53, %v1165_v52  ;;  %v4101_v56 = vld [vmem:[%s5661_s2 + $0xd0] sm:$0xff]   ;;  %v1314_v34 = vld [vmem:[#allocation3 + $0x88] sm:$0xff] }
  0x8a   : > { %3178 = vmatprep.subr.bf16.mxu1 %v4115_v37  ;;  %v1219_v20 = vld [vmem:[#allocation3 + $0x8f] sm:$0xff]  ;;  %v598_v52 = vld [vmem:[#allocation2 + $0xa7] sm:$0xff] }
  0x8b   : > { %3961 = vmatpush3.bf16.msra.mxu0 %v4097_v42  ;;  %v1410_v26 = vld [vmem:[#allocation3 + $0x89] sm:$0xff]  ;;  %v1411_v29 = vld [vmem:[#allocation3 + $0x91] sm:$0xff] }
  0x8c   : > { %1540 = vrot.lane.b32.xlu1 %v727_v62, %s4114_s29  ;;  %v1167_v62 = vld [vmem:[#allocation2 + $0x67] sm:$0xff]  ;;  %v1075_v45 = vld [vmem:[#allocation2 + $0x91] sm:$0xff] }
  0x8d   : > { %1542 = vrot.lane.b32.xlu0 %v728_v2, %s4114_s29  ;;  %3179 = vmatpush1.bf16.msra.mxu1 %v4098_v43  ;;  %v4751_v0 = vpack.c.bf16 %v1168_v63, %v1167_v62  ;;  %v4760_v2 = vpop.permute.xlu0 %1470  ;;  %v1074_v44 = vld [vmem:[#allocation2 + $0x89] sm:$0xff]  ;;  %v1413_v58 = vld [vmem:[#allocation3 + $0xb1] sm:$0xff] }
  0x8e   : > { %3180 = vmatprep.subr.bf16.mxu1 %v4115_v37  ;;  %v599_v53 = vld [vmem:[#allocation2 + $0xaf] sm:$0xff] }
  0x8f   : > { %v1412_v57 = vld [vmem:[#allocation3 + $0xa9] sm:$0xff] }
  0x90   : > { %1544 = vrot.lane.b32.xlu1 %v729_v7, %s4114_s29  ;;  %v1316_v62 = vld [vmem:[#allocation3 + $0xa8] sm:$0xff]  ;;  %v1317_v63 = vld [vmem:[#allocation3 + $0xb0] sm:$0xff] }
  0x91   : > { %1546 = vrot.lane.b32.xlu0 %v730_v9, %s4114_s29  ;;  %3181 = vmatpush1.bf16.msra.mxu1 %v4099_v48  ;;  %v1072_v9 = vld [vmem:[#allocation2 + $0x69] sm:$0xff] }
  0x92   : > { %3182 = vmatprep.subr.bf16.mxu1 %v4115_v37  ;;  %v4778_v14 = vpack.c.bf16 %v1073_v10, %v1072_v9  ;;  %v1076_v9 = vld [vmem:[#allocation2 + $0xa9] sm:$0xff]  ;;  %v1077_v10 = vld [vmem:[#allocation2 + $0xb1] sm:$0xff] }
  0x94   : > { %1548 = vrot.lane.b32.xlu1 %v731_v18, %s4114_s29  ;;  %v597_v18 = vld [vmem:[#allocation2 + $0x8f] sm:$0xff] }
  0x95   : > { %1566 = vrot.lane.b32.xlu0 %v764_v24, %s4116_s30  ;;  %3183 = vmatpush1.bf16.msra.mxu1 %v4100_v54 }
  0x96   : > { %3184 = vmatprep.subr.bf16.mxu1 %v4115_v37  ;;  %v1070_v37 = vld [vmem:[#allocation2 + $0x49] sm:$0xff] }
  0x97   : > { %v4744_v61 = vpack.c.bf16 %v1071_v60, %v1070_v37  ;;  %v1441_v37 = vpack.c.bf16 %v1413_v58, %v1412_v57  ;;  %v1414_v57 = vld [vmem:[#allocation3 + $0xc9] sm:$0xff]  ;;  %v1415_v58 = vld [vmem:[#allocation3 + $0xd1] sm:$0xff] }
  0x98   : > { %1568 = vrot.lane.b32.xlu1 %v765_v32, %s4116_s30 }
  0x99   : > { %1570 = vrot.lane.b32.xlu0 %v4680_v35, %s4116_s30  ;;  %3185 = vmatpush1.bf16.msra.mxu1 %v4101_v56 }
  0x9c   : > { %1662 = vrot.lane.b32.xlu1 %v4690_v40, %s4117_s16 }
  0x9d   : > { %1710 = vrot.lane.b32.xlu0 %v4533_v13, %s4114_s29  ;;  %v1148_v13 = vpack.c.bf16 %v1117_v47, %v1116_v46  ;;  %v4825_v47 = vpack.c.bf16 %v1075_v45, %v1074_v44  ;;  %v1270_v45 = vld [vmem:[#allocation2 + $0xc8] sm:$0xff] }
  0xa0   : > { %1758 = vrot.lane.b32.xlu1 %v4586_v21, %s4118_s20  ;;  %v812_v21 = vpack.c.bf16 %v781_v51, %v780_v50  ;;  %v1220_v50 = vld [vmem:[#allocation3 + $0xa7] sm:$0xff]  ;;  %v1221_v51 = vld [vmem:[#allocation3 + $0xaf] sm:$0xff] }
  0xa1   : > { %1806 = vrot.lane.b32.xlu0 %v765_v32, %s4119_s22  ;;  %v1440_v32 = vpack.c.bf16 %v1411_v29, %v1410_v26  ;;  %v1249_v54 = vpack.c.bf16 %v1221_v51, %v1220_v50  ;;  %v601_v29 = vld [vmem:[#allocation2 + $0xcf] sm:$0xff] }
  0xa2   : > { %v1271_v50 = vld [vmem:[#allocation2 + $0xd0] sm:$0xff] }
  0xa4   : > { %1854 = vrot.lane.b32.xlu1 %v1100_v49, %s4120_s26 }
  0xa5   : > { %1902 = vrot.lane.b32.xlu0 %v1148_v13, %s4117_s16 }
  0xa8   : > { %1614 = vrot.lane.b32.xlu1 %v812_v21, %s4119_s22  ;;  %v4841_v21 = vpack.c.bf16 %v599_v53, %v598_v52 }
  0xa9   : > { %1950 = vrot.lane.b32.xlu0 %v4722_v55, %s4113_s28 }
  0xac   : > { %1998 = vrot.lane.b32.xlu1 %v4527_v6, %s4118_s20 }
  0xad   : > { %2046 = vrot.lane.b32.xlu0 %v4589_v22, %s4116_s30 }
  0xb0   : > { %2675 = vrot.lane.b32.xlu1 %v1438_v59, %s4113_s28 }
  0xb1   : > { %1664 = vrot.lane.b32.xlu0 %v4722_v55, %s4117_s16 }
  0xb4   : > { %2094 = vrot.lane.b32.xlu1 %v4680_v35, %s4120_s26 }
  0xb5   : > { %1712 = vrot.lane.b32.xlu0 %v4527_v6, %s4114_s29  ;;  %v1408_v6 = vld [vmem:[#allocation3 + $0x69] sm:$0xff] }
  0xb8   : > { %1760 = vrot.lane.b32.xlu1 %v4589_v22, %s4118_s20  ;;  %v1409_v22 = vld [vmem:[#allocation3 + $0x71] sm:$0xff] }
  0xb9   : > { %1808 = vrot.lane.b32.xlu0 %v4680_v35, %s4119_s22  ;;  %v1439_v1 = vpack.c.bf16 %v1409_v22, %v1408_v6  ;;  %v1315_v35 = vld [vmem:[#allocation3 + $0x90] sm:$0xff]  ;;  %v4857_v22 = vpack.c.bf16 %v1317_v63, %v1316_v62 }
  0xba   : > { %v1344_v39 = vpack.c.bf16 %v1315_v35, %v1314_v34  ;;  %v1222_v34 = vld [vmem:[#allocation3 + $0xc7] sm:$0xff]  ;;  %v1223_v35 = vld [vmem:[#allocation3 + $0xcf] sm:$0xff] }
  0xbb   : > { %v1250_v53 = vpack.c.bf16 %v1223_v35, %v1222_v34 }
  0xbc   : > { %1856 = vrot.lane.b32.xlu1 %v4744_v61, %s4120_s26 }
  0xbd   : > { %1904 = vrot.lane.b32.xlu0 %v1438_v59, %s4117_s16 }
  0xc0   : > { %1616 = vrot.lane.b32.xlu1 %v1100_v49, %s4119_s22 }
  0xc1   : > { %1952 = vrot.lane.b32.xlu0 %v4751_v0, %s4113_s28 }
  0xc4   : > { %2000 = vrot.lane.b32.xlu1 %v4542_v19, %s4118_s20 }
  0xc5   : > { %2048 = vrot.lane.b32.xlu0 %v4593_v27, %s4116_s30 }
  0xc8   : > { %2677 = vrot.lane.b32.xlu1 %v1439_v1, %s4113_s28 }
  0xc9   : > { %1666 = vrot.lane.b32.xlu0 %v4751_v0, %s4117_s16 }
  0xca   : > { %v4765_v7 = vpop.permute.xlu1 %1474 }
  0xcb   : > { %v4767_v8 = vpop.permute.xlu0 %1472 }
  0xcc   : > { %2096 = vrot.lane.b32.xlu1 %v1343_v5, %s4120_s26 }
  0xcd   : > { %1714 = vrot.lane.b32.xlu0 %v4542_v19, %s4114_s29  ;;  %v1218_v19 = vld [vmem:[#allocation3 + $0x87] sm:$0xff] }
  0xce   : > { %v4772_v11 = vpop.permute.xlu1 %1476  ;;  %v1248_v25 = vpack.c.bf16 %v1219_v20, %v1218_v19  ;;  %v4880_v19 = vpack.c.bf16 %v1077_v10, %v1076_v9  ;;  %v588_v9 = vld [vmem:[#allocation2 + $0x7] sm:$0xff]  ;;  %v1442_v10 = vpack.c.bf16 %v1415_v58, %v1414_v57 }
  0xcf   : > { %v4774_v12 = vpop.permute.xlu0 %1478 }
  0xd0   : > { %1762 = vrot.lane.b32.xlu1 %v4593_v27, %s4118_s20  ;;  %v4790_v27 = vpack.c.bf16 %v597_v18, %v596_v17 }
  0xd1   : > { %1810 = vrot.lane.b32.xlu0 %v1343_v5, %s4119_s22 }
  0xd2   : > { %v4781_v15 = vpop.permute.xlu1 %1480 }
  0xd3   : > { %v4783_v16 = vpop.permute.xlu0 %1482 }
  0xd4   : > { %1858 = vrot.lane.b32.xlu1 %v4778_v14, %s4120_s26 }
  0xd5   : > { %1906 = vrot.lane.b32.xlu0 %v1439_v1, %s4117_s16 }
  0xd6   : > { %v4788_v23 = vpop.permute.xlu1 %1484 }
  0xd7   : > { %v4792_v24 = vpop.permute.xlu0 %1486 }
  0xd8   : > { %1618 = vrot.lane.b32.xlu1 %v4744_v61, %s4119_s22 }
  0xd9   : > { %1954 = vrot.lane.b32.xlu0 %v4790_v27, %s4113_s28 }
  0xda   : > { %v4798_v30 = vpop.permute.xlu1 %1488 }
  0xdb   : > { %v4800_v31 = vpop.permute.xlu0 %1490 }
  0xdc   : > { %2002 = vrot.lane.b32.xlu1 %v1248_v25, %s4118_s20 }
  0xdd   : > { %2050 = vrot.lane.b32.xlu0 %v4597_v28, %s4116_s30 }
  0xde   : > { %v4805_v36 = vpop.permute.xlu1 %1492 }
  0xdf   : > { %v4807_v38 = vpop.permute.xlu0 %1494 }
  0xe0   : > { %2679 = vrot.lane.b32.xlu1 %v1440_v32, %s4113_s28 }
  0xe1   : > { %1668 = vrot.lane.b32.xlu0 %v4790_v27, %s4117_s16 }
  0xe2   : > { %v4812_v41 = vpop.permute.xlu1 %1496 }
  0xe3   : > { %v4814_v42 = vpop.permute.xlu0 %1498 }
  0xe4   : > { %2098 = vrot.lane.b32.xlu1 %v1344_v39, %s4120_s26 }
  0xe5   : > { %1716 = vrot.lane.b32.xlu0 %v1248_v25, %s4114_s29  ;;  %v600_v25 = vld [vmem:[#allocation2 + $0xc7] sm:$0xff] }
  0xe6   : > { %v4818_v43 = vpop.permute.xlu1 %1500  ;;  %v4890_v51 = vpack.c.bf16 %v601_v29, %v600_v25  ;;  %v589_v25 = vld [vmem:[#allocation2 + $0xf] sm:$0xff] }
  0xe7   : > { %v4820_v46 = vpop.permute.xlu0 %1518  ;;  %v1318_v29 = vld [vmem:[#allocation3 + $0xc8] sm:$0xff] }
  0xe8   : > { %1764 = vrot.lane.b32.xlu1 %v4597_v28, %s4118_s20 }
  0xe9   : > { %1812 = vrot.lane.b32.xlu0 %v1344_v39, %s4119_s22 }
  0xea   : > { %v4827_v48 = vpop.permute.xlu1 %1520 }
  0xeb   : > { %v4829_v49 = vpop.permute.xlu0 %1522 }
  0xec   : > { %1572 = vrot.lane.b32.xlu1 %v1343_v5, %s4116_s30 }
  0xed   : > { %1860 = vrot.lane.b32.xlu0 %v4825_v47, %s4120_s26 }
  0xee   : > { %v4834_v13 = vpop.permute.xlu1 %1524 }
  0xef   : > { %v4836_v28 = vpop.permute.xlu0 %1526 }
  0xf0   : > { %1908 = vrot.lane.b32.xlu1 %v1440_v32, %s4117_s16  ;;  %v829_v32 = vld [vmem:[#allocation3 + $0x11] sm:$0xff] }
  0xf1   : > { %1620 = vrot.lane.b32.xlu0 %v4778_v14, %s4119_s22 }
  0xf2   : > { %v4843_v56 = vpop.permute.xlu1 %1528 }
  0xf3   : > { %v4845_v59 = vpop.permute.xlu0 %1530 }
  0xf4   : > { %1956 = vrot.lane.b32.xlu1 %v4841_v21, %s4113_s28 }
  0xf5   : > { %2004 = vrot.lane.b32.xlu0 %v1249_v54, %s4118_s20 }
  0xf6   : > { %v4850_v60 = vpop.permute.xlu1 %1532 }
  0xf7   : > { %v4852_v6 = vpop.permute.xlu0 %1534 }
  0xf8   : > { %2052 = vrot.lane.b32.xlu1 %v4601_v33, %s4116_s30 }
  0xf9   : > { %2681 = vrot.lane.b32.xlu0 %v1441_v37, %s4113_s28 }
  0xfa   : > { %v4859_v1 = vpop.permute.xlu1 %1536 }
  0xfb   : > { %v4861_v3 = vpop.permute.xlu0 %1538 }
  0xfc   : > { %1670 = vrot.lane.b32.xlu1 %v4841_v21, %s4117_s16 }
  0xfd   : > { %2100 = vrot.lane.b32.xlu0 %v4857_v22, %s4120_s26 }
  0xfe   : > { %v4867_v4 = vpop.permute.xlu1 %1540 }
  0xff   : > { %v4869_v5 = vpop.permute.xlu0 %1542 }
 0x100   : > { %1718 = vrot.lane.b32.xlu1 %v1249_v54, %s4114_s29  ;;  %v1298_v54 = vpack.c.bf16 %v1271_v50, %v1270_v45  ;;  %v620_v50 = vpack.c.bf16 %v589_v25, %v588_v9 }
 0x101   : > { %1766 = vrot.lane.b32.xlu0 %v4601_v33, %s4118_s20  ;;  %v828_v33 = vld [vmem:[#allocation3 + $0x9] sm:$0xff] }
 0x102   : > { %v4874_v17 = vpop.permute.xlu1 %1544  ;;  %v860_v52 = vpack.c.bf16 %v829_v32, %v828_v33  ;;  %v1319_v33 = vld [vmem:[#allocation3 + $0xd0] sm:$0xff] }
 0x103   : > { %v4876_v18 = vpop.permute.xlu0 %1546 }
 0x104   : > { %1814 = vrot.lane.b32.xlu1 %v4857_v22, %s4119_s22 }
 0x105   : > { %1574 = vrot.lane.b32.xlu0 %v1344_v39, %s4116_s30 }
 0x106   : > { %v4883_v20 = vpop.permute.xlu1 %1548 }
 0x107   : > { %v1567_v26 = vpop.permute.xlu0 %1566 }
 0x108   : > { %1862 = vrot.lane.b32.xlu1 %v4880_v19, %s4120_s26 }
 0x109   : > { %1910 = vrot.lane.b32.xlu0 %v1441_v37, %s4117_s16 }
 0x10a   : > { %v4888_v44 = vpop.permute.xlu1 %1568 }
 0x10b   : > { %v4892_v39 = vpop.permute.xlu0 %1570 }
 0x10c   : > { %1622 = vrot.lane.b32.xlu1 %v4825_v47, %s4119_s22 }
 0x10d   : > { %1958 = vrot.lane.b32.xlu0 %v4890_v51, %s4113_s28 }
 0x10e   : > { %v1663_v37 = vpop.permute.xlu1 %1662 }
 0x10f   : > { %v1711_v62 = vpop.permute.xlu0 %1710  ;;  %v2291_v63 = vsel %vm417_vm0, %v860_v52, %v1663_v37  ;;  %v4904_v52 = vpack.c.bf16 %v1319_v33, %v1318_v29  ;;  %v1078_v33 = vld [vmem:[#allocation2 + $0xc9] sm:$0xff] }
 0x110   : > { %2006 = vrot.lane.b32.xlu1 %v1250_v53, %s4118_s20  ;;  %v2338_v32 = vsel %vm2174_vm5, %v2291_v63, %v1711_v62  ;;  %v2128_v63 = vsel %vm246_vm1, %v620_v50, %v4760_v2 }
 0x111   : > { %2054 = vrot.lane.b32.xlu0 %v1298_v54, %s4116_s30  ;;  %v2176_v9 = vsel %vm2174_vm5, %v2128_v63, %v4820_v46  ;;  %v1225_v63 = vld [vmem:[#allocation3 + $0xef] sm:$0xff] }
 0x112   : > { %v1759_v34 = vpop.permute.xlu1 %1758  ;;  %v2209_v25 = vsel %vm2207_vm8, %v2176_v9, %v1567_v26  ;;  %v830_v26 = vld [vmem:[#allocation3 + $0x29] sm:$0xff] }
 0x113   : > { %v1807_v35 = vpop.permute.xlu0 %1806  ;;  %v2371_v45 = vsel %vm2369_vm4, %v2338_v32, %v1759_v34  ;;  %v1079_v32 = vld [vmem:[#allocation2 + $0xd1] sm:$0xff]  ;;  %v602_v9 = vld [vmem:[#allocation2 + $0xe7] sm:$0xff] }
 0x114   : > { %2683 = vrot.lane.b32.xlu1 %v1442_v10, %s4113_s28  ;;  %v2403_v58 = vsel %vm2240_vm6, %v2371_v45, %v1807_v35  ;;  %v4922_v2 = vpack.c.bf16 %v1079_v32, %v1078_v33 }
 0x115   : > { %1672 = vrot.lane.b32.xlu0 %v4890_v51, %s4117_s16 }
 0x116   : > { %v1855_v57 = vpop.permute.xlu1 %1854 }
 0x117   : > { %v1903_v37 = vpop.permute.xlu0 %1902  ;;  %v2436_v62 = vsel %vm2434_vm7, %v2403_v58, %v1855_v57 }
 0x118   : > { %2102 = vrot.lane.b32.xlu1 %v4904_v52, %s4120_s26  ;;  %3035 = vmatprep.mubr.bf16.mxu0 %v2436_v62  ;;  %v2484_v50 = vsel %vm417_vm0, %v1855_v57, %v1903_v37  ;;  %v1224_v62 = vld [vmem:[#allocation3 + $0xe7] sm:$0xff] }
 0x119   : > { %1720 = vrot.lane.b32.xlu0 %v1250_v53, %s4114_s29  ;;  %v831_v53 = vld [vmem:[#allocation3 + $0x31] sm:$0xff]  ;;  %v1251_v57 = vpack.c.bf16 %v1225_v63, %v1224_v62  ;;  %v1272_v37 = vld [vmem:[#allocation2 + $0xe8] sm:$0xff] }
 0x11a   : > { %v1615_v29 = vpop.permute.xlu1 %1614  ;;  %v861_v33 = vpack.c.bf16 %v831_v53, %v830_v26  ;;  %v1416_v26 = vld [vmem:[#allocation3 + $0xe9] sm:$0xff]  ;;  %v1417_v53 = vld [vmem:[#allocation3 + $0xf1] sm:$0xff] }
 0x11b   : > { %v1951_v34 = vpop.permute.xlu0 %1950  ;;  %v2242_v35 = vsel %vm2240_vm6, %v2209_v25, %v1615_v29  ;;  %v603_v25 = vld [vmem:[#allocation2 + $0xef] sm:$0xff]  ;;  %v4945_v62 = vpack.c.bf16 %v1417_v53, %v1416_v26 }
 0x11c   : > { %1768 = vrot.lane.b32.xlu1 %v1298_v54, %s4118_s20  ;;  %3036 = vmatmul.mubr.bf16.vlgmr.msra.gmra.mrb[0].mxu0 %v2242_v35  ;;  %v2516_v54 = vsel %vm246_vm1, %v2484_v50, %v1951_v34  ;;  %v1273_v34 = vld [vmem:[#allocation2 + $0xf0] sm:$0xff]  ;;  %v4937_v35 = vpack.c.bf16 %v603_v25, %v602_v9 }
 0x11d   : > { %1816 = vrot.lane.b32.xlu0 %v4904_v52, %s4119_s22  ;;  %v1321_v25 = vld [vmem:[#allocation3 + $0xf0] sm:$0xff] }
 0x11e   : > { %v1999_v45 = vpop.permute.xlu1 %1998 }
 0x11f   : > { %v2047_v46 = vpop.permute.xlu0 %2046  ;;  %v2548_v29 = vsel %vm2369_vm4, %v2516_v54, %v1999_v45 }
 0x120   : > { %1576 = vrot.lane.b32.xlu1 %v4857_v22, %s4116_s30  ;;  %v2580_v45 = vsel %vm2207_vm8, %v2548_v29, %v2047_v46  ;;  %v1320_v46 = vld [vmem:[#allocation3 + $0xe8] sm:$0xff] }
 0x121   : > { %1864 = vrot.lane.b32.xlu0 %v4922_v2, %s4120_s26 }
 0x122   : > { %v2676_v58 = vpop.permute.xlu1 %2675 }
 0x123   : > { %v1665_v32 = vpop.permute.xlu0 %1664  ;;  %v2709_v22 = vsel %vm246_vm1, %v4744_v61, %v2676_v58  ;;  %v1299_v58 = vpack.c.bf16 %v1273_v34, %v1272_v37 }
 0x124   : > { %1912 = vrot.lane.b32.xlu1 %v1442_v10, %s4117_s16  ;;  %3701 = vmatprep.mubr.msk.bf16.mxu1 %vm2174_vm5, %v2709_v22  ;;  %v2294_v54 = vsel %vm417_vm0, %v861_v33, %v1665_v32  ;;  %v4952_v32 = vpack.c.bf16 %v1321_v25, %v1320_v46  ;;  %v833_v46 = vld [vmem:[#allocation3 + $0x51] sm:$0xff] }
 0x125   : > { %1624 = vrot.lane.b32.xlu0 %v4880_v19, %s4119_s22 }
 0x126   : > { %v2095_v50 = vpop.permute.xlu1 %2094 }
 0x127   : > { %v1713_v61 = vpop.permute.xlu0 %1712  ;;  %v2612_v10 = vsel %vm2434_vm7, %v2580_v45, %v2095_v50  ;;  %v2131_v45 = vsel %vm246_vm1, %v4690_v40, %v4767_v8  ;;  %v1080_v40 = vld [vmem:[#allocation2 + $0xe9] sm:$0xff]  ;;  %v1081_v8 = vld [vmem:[#allocation2 + $0xf1] sm:$0xff] }
 0x128   : > { %1960 = vrot.lane.b32.xlu1 %v4937_v35, %s4113_s28  ;;  %3197 = vmatmul.mubr.bf16.vlgmr.msra.gmra.mrb[0].mxu1 %v2612_v10  ;;  %v2340_v63 = vsel %vm2174_vm5, %v2294_v54, %v1713_v61  ;;  %v2178_v26 = vsel %vm2174_vm5, %v2131_v45, %v4827_v48  ;;  %v832_v48 = vld [vmem:[#allocation3 + $0x49] sm:$0xff]  ;;  %v4972_v25 = vpack.c.bf16 %v1081_v8, %v1080_v40 }
 0x129   : > { %2008 = vrot.lane.b32.xlu0 %v1251_v57, %s4118_s20  ;;  %v2211_v53 = vsel %vm2207_vm8, %v2178_v26, %v4888_v44  ;;  %v604_v45 = vld [vmem:[#allocation2 + $0x107] sm:$0xff]  ;;  %v605_v26 = vld [vmem:[#allocation2 + $0x10f] sm:$0xff] }
 0x12a   : > { %v1761_v9 = vpop.permute.xlu1 %1760 }
 0x12b   : > { %v1809_v29 = vpop.permute.xlu0 %1808  ;;  %v2373_v33 = vsel %vm2369_vm4, %v2340_v63, %v1761_v9 }
 0x12c   : > { %2056 = vrot.lane.b32.xlu1 %v1299_v58, %s4116_s30  ;;  %v2405_v37 = vsel %vm2240_vm6, %v2373_v33, %v1809_v29  ;;  %v862_v33 = vpack.c.bf16 %v833_v46, %v832_v48  ;;  %v1418_v46 = vld [vmem:[#allocation3 + $0x109] sm:$0xff] }
 0x12d   : > { %2685 = vrot.lane.b32.xlu0 %v4945_v62, %s4113_s28 }
 0x12e   : > { %v1857_v22 = vpop.permute.xlu1 %1856 }
 0x12f   : > { %v1905_v34 = vpop.permute.xlu0 %1904  ;;  %v2439_v50 = vsel %vm2434_vm7, %v2405_v37, %v1857_v22 }
 0x130   : > { %1674 = vrot.lane.b32.xlu1 %v4937_v35, %s4117_s16  ;;  %3043 = vmatprep.mubr.bf16.mxu0 %v2439_v50  ;;  %v2486_v44 = vsel %vm417_vm0, %v1857_v22, %v1905_v34  ;;  %v1227_v22 = vld [vmem:[#allocation3 + $0x10f] sm:$0xff] }
 0x131   : > { %2104 = vrot.lane.b32.xlu0 %v4952_v32, %s4120_s26 }
 0x132   : > { %v1617_v54 = vpop.permute.xlu1 %1616 }
 0x133   : > { %v1953_v61 = vpop.permute.xlu0 %1952  ;;  %v2245_v10 = vsel %vm2240_vm6, %v2211_v53, %v1617_v54  ;;  %v1274_v54 = vld [vmem:[#allocation2 + $0x108] sm:$0xff] }
 0x134   : > { %1722 = vrot.lane.b32.xlu1 %v1251_v57, %s4114_s29  ;;  %3044 = vmatmul.mubr.bf16.gmra.mrb[4].mxu0 %v2245_v10  ;;  %v2518_v57 = vsel %vm246_vm1, %v2486_v44, %v1953_v61  ;;  %v1275_v61 = vld [vmem:[#allocation2 + $0x110] sm:$0xff]  ;;  %v4987_v10 = vpack.c.bf16 %v605_v26, %v604_v45 }
 0x135   : > { %1770 = vrot.lane.b32.xlu0 %v1299_v58, %s4118_s20  ;;  %v1300_v48 = vpack.c.bf16 %v1275_v61, %v1274_v54 }
 0x136   : > { %v2001_v63 = vpop.permute.xlu1 %2000 }
 0x137   : > { %v2049_v9 = vpop.permute.xlu0 %2048  ;;  %v2550_v58 = vsel %vm2369_vm4, %v2518_v57, %v2001_v63 }
 0x138   : > { %1818 = vrot.lane.b32.xlu1 %v4952_v32, %s4119_s22  ;;  %v2582_v53 = vsel %vm2207_vm8, %v2550_v58, %v2049_v9  ;;  %v1419_v9 = vld [vmem:[#allocation3 + $0x111] sm:$0xff] }
 0x139   : > { %1578 = vrot.lane.b32.xlu0 %v4904_v52, %s4116_s30  ;;  %v1226_v52 = vld [vmem:[#allocation3 + $0x107] sm:$0xff] }
 0x13a   : > { %v2678_v29 = vpop.permute.xlu1 %2677  ;;  %v1252_v63 = vpack.c.bf16 %v1227_v22, %v1226_v52 }
 0x13b   : > { %v1667_v37 = vpop.permute.xlu0 %1666  ;;  %v2712_v50 = vsel %vm246_vm1, %v4778_v14, %v2678_v29 }
 0x13c   : > { %1866 = vrot.lane.b32.xlu1 %v4972_v25, %s4120_s26  ;;  %3702 = vmatprep.mubr.msk.bf16.mxu1 %vm2174_vm5, %v2712_v50  ;;  %v2297_v14 = vsel %vm417_vm0, %v862_v33, %v1667_v37  ;;  %v4998_v33 = vpack.c.bf16 %v1419_v9, %v1418_v46  ;;  %v1322_v37 = vld [vmem:[#allocation3 + $0x108] sm:$0xff]  ;;  %v1323_v50 = vld [vmem:[#allocation3 + $0x110] sm:$0xff] }
 0x13d   : > { %1914 = vrot.lane.b32.xlu0 %v4945_v62, %s4117_s16  ;;  %v1083_v46 = vld [vmem:[#allocation2 + $0x111] sm:$0xff] }
 0x13e   : > { %v2097_v34 = vpop.permute.xlu1 %2096 }
 0x13f   : > { %v1715_v40 = vpop.permute.xlu0 %1714  ;;  %v2615_v8 = vsel %vm2434_vm7, %v2582_v53, %v2097_v34  ;;  %v2134_v34 = vsel %vm246_vm1, %v4722_v55, %v4765_v7  ;;  %v5008_v53 = vpack.c.bf16 %v1323_v50, %v1322_v37  ;;  %v1082_v7 = vld [vmem:[#allocation2 + $0x109] sm:$0xff] }
 0x140   : > { %1626 = vrot.lane.b32.xlu1 %v4922_v2, %s4119_s22  ;;  %3205 = vmatmul.mubr.bf16.gmra.mrb[4].mxu1 %v2615_v8  ;;  %v2342_v44 = vsel %vm2174_vm5, %v2297_v14, %v1715_v40  ;;  %v2180_v54 = vsel %vm2174_vm5, %v2134_v34, %v4829_v49  ;;  %v1228_v34 = vld [vmem:[#allocation3 + $0x127] sm:$0xff] }
 0x141   : > { %1962 = vrot.lane.b32.xlu0 %v4987_v10, %s4113_s28  ;;  %v2213_v61 = vsel %vm2207_vm8, %v2180_v54, %v4892_v39  ;;  %v834_v39 = vld [vmem:[#allocation3 + $0x69] sm:$0xff] }
 0x142   : > { %v1763_v57 = vpop.permute.xlu1 %1762  ;;  %v1229_v54 = vld [vmem:[#allocation3 + $0x12f] sm:$0xff] }
 0x143   : > { %v1811_v29 = vpop.permute.xlu0 %1810  ;;  %v2375_v58 = vsel %vm2369_vm4, %v2342_v44, %v1763_v57  ;;  %v835_v44 = vld [vmem:[#allocation3 + $0x71] sm:$0xff]  ;;  %v5024_v57 = vpack.c.bf16 %v1083_v46, %v1082_v7  ;;  %v1420_v46 = vld [vmem:[#allocation3 + $0x129] sm:$0xff] }
 0x144   : > { %2010 = vrot.lane.b32.xlu1 %v1252_v63, %s4118_s20  ;;  %v2407_v26 = vsel %vm2240_vm6, %v2375_v58, %v1811_v29 }
 0x145   : > { %2058 = vrot.lane.b32.xlu0 %v1300_v48, %s4116_s30 }
 0x146   : > { %v1859_v45 = vpop.permute.xlu1 %1858 }
 0x147   : > { %v1907_v52 = vpop.permute.xlu0 %1906  ;;  %v2442_v22 = vsel %vm2434_vm7, %v2407_v26, %v1859_v45  ;;  %v863_v26 = vpack.c.bf16 %v835_v44, %v834_v39 }
 0x148   : > { %2687 = vrot.lane.b32.xlu1 %v4998_v33, %s4113_s28  ;;  %3051 = vmatprep.mubr.bf16.mxu0 %v2442_v22  ;;  %v2488_v9 = vsel %vm417_vm0, %v1859_v45, %v1907_v52  ;;  %v1180_v45 = vld [vmem:[#allocation2 + $0x12f] sm:$0xff] }
 0x149   : > { %1676 = vrot.lane.b32.xlu0 %v4987_v10, %s4117_s16 }
 0x14a   : > { %v1619_v14 = vpop.permute.xlu1 %1618 }
 0x14b   : > { %v1955_v40 = vpop.permute.xlu0 %1954  ;;  %v2248_v8 = vsel %vm2240_vm6, %v2213_v61, %v1619_v14 }
 0x14c   : > { %2106 = vrot.lane.b32.xlu1 %v5008_v53, %s4120_s26  ;;  %3052 = vmatmul.mubr.bf16.gmra.mrb[8].mxu0 %v2248_v8  ;;  %v2520_v29 = vsel %vm246_vm1, %v2488_v9, %v1955_v40  ;;  %v1253_v40 = vpack.c.bf16 %v1229_v54, %v1228_v34  ;;  %v1276_v8 = vld [vmem:[#allocation2 + $0x128] sm:$0xff] }
 0x14d   : > { %1724 = vrot.lane.b32.xlu0 %v1252_v63, %s4114_s29 }
 0x14e   : > { %v2003_v55 = vpop.permute.xlu1 %2002 }
 0x14f   : > { %v2051_v49 = vpop.permute.xlu0 %2050  ;;  %v2552_v63 = vsel %vm2369_vm4, %v2520_v29, %v2003_v55  ;;  %v1277_v55 = vld [vmem:[#allocation2 + $0x130] sm:$0xff] }
 0x150   : > { %1772 = vrot.lane.b32.xlu1 %v1300_v48, %s4118_s20  ;;  %v1179_v48 = vld [vmem:[#allocation2 + $0x127] sm:$0xff]  ;;  %v2584_v22 = vsel %vm2207_vm8, %v2552_v63, %v2051_v49  ;;  %v1421_v49 = vld [vmem:[#allocation3 + $0x131] sm:$0xff]  ;;  %v1301_v29 = vpack.c.bf16 %v1277_v55, %v1276_v8 }
 0x151   : > { %1820 = vrot.lane.b32.xlu0 %v5008_v53, %s4119_s22  ;;  %v1084_v8 = vld [vmem:[#allocation2 + $0x129] sm:$0xff] }
 0x152   : > { %v2680_v58 = vpop.permute.xlu1 %2679 }
 0x153   : > { %v1669_v37 = vpop.permute.xlu0 %1668  ;;  %v2715_v50 = vsel %vm246_vm1, %v4825_v47, %v2680_v58  ;;  %v5046_v58 = vpack.c.bf16 %v1421_v49, %v1420_v46 }
 0x154   : > { %1580 = vrot.lane.b32.xlu1 %v4952_v32, %s4116_s30  ;;  %3703 = vmatprep.mubr.msk.bf16.mxu1 %vm2174_vm5, %v2715_v50  ;;  %v2300_v47 = vsel %vm417_vm0, %v863_v26, %v1669_v37  ;;  %v1204_v32 = vpack.c.bf16 %v1180_v45, %v1179_v48  ;;  %v1324_v37 = vld [vmem:[#allocation3 + $0x128] sm:$0xff]  ;;  %v1325_v50 = vld [vmem:[#allocation3 + $0x130] sm:$0xff] }
 0x155   : > { %1868 = vrot.lane.b32.xlu0 %v5024_v57, %s4120_s26 }
 0x156   : > { %v2099_v52 = vpop.permute.xlu1 %2098 }
 0x157   : > { %v1717_v61 = vpop.permute.xlu0 %1716  ;;  %v2618_v14 = vsel %vm2434_vm7, %v2584_v22, %v2099_v52  ;;  %v2137_v52 = vsel %vm246_vm1, %v4751_v0, %v4772_v11  ;;  %v5056_v22 = vpack.c.bf16 %v1325_v50, %v1324_v37  ;;  %v1182_v37 = vld [vmem:[#allocation2 + $0x14f] sm:$0xff] }
 0x158   : > { %1916 = vrot.lane.b32.xlu1 %v4998_v33, %s4117_s16  ;;  %3213 = vmatmul.mubr.bf16.gmra.mrb[8].mxu1 %v2618_v14  ;;  %v2344_v9 = vsel %vm2174_vm5, %v2300_v47, %v1717_v61  ;;  %v2182_v34 = vsel %vm2174_vm5, %v2137_v52, %v4834_v13  ;;  %v1085_v13 = vld [vmem:[#allocation2 + $0x131] sm:$0xff] }
 0x159   : > { %1628 = vrot.lane.b32.xlu0 %v4972_v25, %s4119_s22  ;;  %v1231_v52 = vld [vmem:[#allocation3 + $0x14f] sm:$0xff] }
 0x15a   : > { %v1765_v7 = vpop.permute.xlu1 %1764 }
 0x15b   : > { %v1813_v39 = vpop.permute.xlu0 %1812  ;;  %v2377_v44 = vsel %vm2369_vm4, %v2344_v9, %v1765_v7  ;;  %v5073_v9 = vpack.c.bf16 %v1085_v13, %v1084_v8  ;;  %v1422_v8 = vld [vmem:[#allocation3 + $0x149] sm:$0xff]  ;;  %v1423_v13 = vld [vmem:[#allocation3 + $0x151] sm:$0xff] }
 0x15c   : > { %1964 = vrot.lane.b32.xlu1 %v1204_v32, %s4113_s28  ;;  %v2409_v48 = vsel %vm2240_vm6, %v2377_v44, %v1813_v39  ;;  %v837_v44 = vld [vmem:[#allocation3 + $0x91] sm:$0xff] }
 0x15d   : > { %2012 = vrot.lane.b32.xlu0 %v1253_v40, %s4118_s20 }
 0x15e   : > { %v1573_v63 = vpop.permute.xlu1 %1572 }
 0x15f   : > { %v1861_v26 = vpop.permute.xlu0 %1860  ;;  %v2215_v61 = vsel %vm2207_vm8, %v2182_v34, %v1573_v63  ;;  %v1181_v63 = vld [vmem:[#allocation2 + $0x147] sm:$0xff] }
 0x160   : > { %2060 = vrot.lane.b32.xlu1 %v1301_v29, %s4116_s30  ;;  %v2445_v45 = vsel %vm2434_vm7, %v2409_v48, %v1861_v26 }
 0x161   : > { %2689 = vrot.lane.b32.xlu0 %v5046_v58, %s4113_s28  ;;  %3059 = vmatprep.mubr.bf16.mxu0 %v2445_v45  ;;  %v1230_v45 = vld [vmem:[#allocation3 + $0x147] sm:$0xff] }
 0x162   : > { %v1909_v54 = vpop.permute.xlu1 %1908 }
 0x163   : > { %v1621_v14 = vpop.permute.xlu0 %1620  ;;  %v2490_v55 = vsel %vm417_vm0, %v1861_v26, %v1909_v54  ;;  %v1278_v54 = vld [vmem:[#allocation2 + $0x148] sm:$0xff] }
 0x164   : > { %1678 = vrot.lane.b32.xlu1 %v1204_v32, %s4117_s16  ;;  %v2251_v47 = vsel %vm2240_vm6, %v2215_v61, %v1621_v14  ;;  %v1279_v61 = vld [vmem:[#allocation2 + $0x150] sm:$0xff] }
 0x165   : > { %2108 = vrot.lane.b32.xlu0 %v5056_v22, %s4120_s26  ;;  %3060 = vmatmul.mubr.bf16.gmra.mrb[12].mxu0 %v2251_v47  ;;  %v1254_v47 = vpack.c.bf16 %v1231_v52, %v1230_v45 }
 0x166   : > { %v1957_v0 = vpop.permute.xlu1 %1956 }
 0x167   : > { %v2005_v11 = vpop.permute.xlu0 %2004  ;;  %v2522_v46 = vsel %vm246_vm1, %v2490_v55, %v1957_v0 }
 0x168   : > { %1726 = vrot.lane.b32.xlu1 %v1253_v40, %s4114_s29  ;;  %v836_v40 = vld [vmem:[#allocation3 + $0x89] sm:$0xff]  ;;  %v2554_v39 = vsel %vm2369_vm4, %v2522_v46, %v2005_v11  ;;  %v1302_v11 = vpack.c.bf16 %v1279_v61, %v1278_v54  ;;  %v1087_v54 = vld [vmem:[#allocation2 + $0x151] sm:$0xff] }
 0x169   : > { %1774 = vrot.lane.b32.xlu0 %v1301_v29, %s4118_s20  ;;  %v864_v48 = vpack.c.bf16 %v837_v44, %v836_v40  ;;  %v1326_v40 = vld [vmem:[#allocation3 + $0x148] sm:$0xff] }
 0x16a   : > { %v2053_v7 = vpop.permute.xlu1 %2052 }
 0x16b   : > { %v2682_v32 = vpop.permute.xlu0 %2681  ;;  %v2586_v50 = vsel %vm2207_vm8, %v2554_v39, %v2053_v7  ;;  %v1327_v39 = vld [vmem:[#allocation3 + $0x150] sm:$0xff] }
 0x16c   : > { %v2718_v49 = vsel %vm246_vm1, %v4880_v19, %v2682_v32  ;;  %1822 = vrot.lane.b32.xlu1 %v5056_v22, %s4119_s22  ;;  %v5091_v32 = vpack.c.bf16 %v1423_v13, %v1422_v8 }
 0x16d   : > { %1582 = vrot.lane.b32.xlu0 %v5008_v53, %s4116_s30  ;;  %3704 = vmatprep.mubr.msk.bf16.mxu1 %vm2174_vm5, %v2718_v49  ;;  %v1205_v53 = vpack.c.bf16 %v1182_v37, %v1181_v63 }
 0x16e   : > { %v1671_v29 = vpop.permute.xlu1 %1670 }
 0x16f   : > { %v2101_v19 = vpop.permute.xlu0 %2100  ;;  %v2303_v0 = vsel %vm417_vm0, %v864_v48, %v1671_v29 }
 0x170   : > { %1870 = vrot.lane.b32.xlu1 %v5073_v9, %s4120_s26  ;;  %v2621_v26 = vsel %vm2434_vm7, %v2586_v50, %v2101_v19  ;;  %v2140_v50 = vsel %vm246_vm1, %v4790_v27, %v4774_v12  ;;  %v5102_v19 = vpack.c.bf16 %v1327_v39, %v1326_v40  ;;  %v1086_v27 = vld [vmem:[#allocation2 + $0x149] sm:$0xff]  ;;  %v3945_v39 = vld [vmem:[%s4463_s24 + $0x78] sm:$0xff]  }
 0x171   : > { %1918 = vrot.lane.b32.xlu0 %v5046_v58, %s4117_s16  ;;  %3221 = vmatmul.mubr.bf16.gmra.mrb[12].mxu1 %v2621_v26  ;;  %v2184_v26 = vsel %vm2174_vm5, %v2140_v50, %v4836_v28  ;;  %v3930_v28 = vld [vmem:[%s4483_s27 + $0x78] sm:$0xff]   ;;  %v5117_v8 = vpack.c.bf16 %v1087_v54, %v1086_v27  ;;  %v1280_v27 = vld [vmem:[#allocation2 + $0x168] sm:$0xff]  ;;  %v1281_v54 = vld [vmem:[#allocation2 + $0x170] sm:$0xff] }
 0x172   : > { %v1719_v34 = vpop.permute.xlu1 %1718  ;;  %v3850_v13 = vunpack.c.l.bf16 %v3930_v28 }
 0x173   : > { %v1767_v14 = vpop.permute.xlu0 %1766  ;;  %v2346_v55 = vsel %vm2174_vm5, %v2303_v0, %v1719_v34  ;;  %v839_v0 = vld [vmem:[#allocation3 + $0xb1] sm:$0xff] }
 0x174   : > { %1630 = vrot.lane.b32.xlu1 %v5024_v57, %s4119_s22  ;;  %v2379_v49 = vsel %vm2369_vm4, %v2346_v55, %v1767_v14  ;;  %v838_v14 = vld [vmem:[#allocation3 + $0xa9] sm:$0xff]  ;;  %v3851_v55 = vunpack.c.h.bf16 %v3930_v28  ;;  %415 = vst.msk [vmem:[#allocation2 + $0x208] sm:$0xff] %vm246_vm1, %v3850_v13 }
 0x175   : > { %1966 = vrot.lane.b32.xlu0 %v1205_v53, %s4113_s28  ;;  %v865_v40 = vpack.c.bf16 %v839_v0, %v838_v14  ;;  %v1424_v28 = vld [vmem:[#allocation3 + $0x169] sm:$0xff] }
 0x176   : > { %v1815_v7 = vpop.permute.xlu1 %1814  ;;  %416 = vst.msk [vmem:[#allocation2 + $0x210] sm:$0xff] %vm246_vm1, %v3851_v55  ;;  %v1303_v55 = vpack.c.bf16 %v1281_v54, %v1280_v27 }
 0x177   : > { %v1575_v46 = vpop.permute.xlu0 %1574  ;;  %v2411_v44 = vsel %vm2240_vm6, %v2379_v49, %v1815_v7 }
 0x178   : > { %2014 = vrot.lane.b32.xlu1 %v1254_v47, %s4118_s20  ;;  %v2217_v48 = vsel %vm2207_vm8, %v2184_v26, %v1575_v46  ;;  %v1232_v26 = vld [vmem:[#allocation3 + $0x167] sm:$0xff] }
 0x179   : > { %2062 = vrot.lane.b32.xlu0 %v1302_v11, %s4116_s30 }
 0x17a   : > { %v1863_v29 = vpop.permute.xlu1 %1862 }
 0x17b   : > { %v1911_v63 = vpop.permute.xlu0 %1910  ;;  %v2448_v37 = vsel %vm2434_vm7, %v2411_v44, %v1863_v29  ;;  %v1183_v44 = vld [vmem:[#allocation2 + $0x167] sm:$0xff] }
 0x17c   : > { %2691 = vrot.lane.b32.xlu1 %v5091_v32, %s4113_s28  ;;  %3067 = vmatprep.mubr.bf16.mxu0 %v2448_v37  ;;  %v3915_v37 = vunpack.c.h.bf16 %v3945_v39 }
 0x17d   : > { %1680 = vrot.lane.b32.xlu0 %v1205_v53, %s4117_s16  ;;  %v2492_v53 = vsel %vm417_vm0, %v1863_v29, %v1911_v63  ;;  %v1184_v29 = vld [vmem:[#allocation2 + $0x16f] sm:$0xff]  ;;  %v3914_v63 = vunpack.c.l.bf16 %v3945_v39 }
 0x17e   : > { %v1623_v45 = vpop.permute.xlu1 %1622  ;;  %587 = vst.msk [vmem:[#allocation3 + $0x210] sm:$0xff] %vm417_vm0, %v3915_v37 }
 0x17f   : > { %v1959_v52 = vpop.permute.xlu0 %1958  ;;  %v2254_v34 = vsel %vm2240_vm6, %v2217_v48, %v1623_v45  ;;  %v1233_v48 = vld [vmem:[#allocation3 + $0x16f] sm:$0xff]  ;;  %586 = vst.msk [vmem:[#allocation3 + $0x208] sm:$0xff] %vm417_vm0, %v3914_v63 }
 0x180   : > { %2110 = vrot.lane.b32.xlu1 %v5102_v19, %s4120_s26  ;;  %3068 = vmatmul.mubr.bf16.gmra.mrb[16].mxu0 %v2254_v34  ;;  %v1206_v34 = vpack.c.bf16 %v1184_v29, %v1183_v44  ;;  %v2143_v44 = vsel %vm246_vm1, %v4841_v21, %v4781_v15 }
 0x181   : > { %1728 = vrot.lane.b32.xlu0 %v1254_v47, %s4114_s29  ;;  %v2524_v47 = vsel %vm246_vm1, %v2492_v53, %v1959_v52  ;;  %v1425_v53 = vld [vmem:[#allocation3 + $0x171] sm:$0xff]  ;;  %v2186_v63 = vsel %vm2174_vm5, %v2143_v44, %v4843_v56 }
 0x182   : > { %v2007_v12 = vpop.permute.xlu1 %2006  ;;  %v1089_v56 = vld [vmem:[#allocation2 + $0x171] sm:$0xff] }
 0x183   : > { %v2055_v61 = vpop.permute.xlu0 %2054  ;;  %v2556_v46 = vsel %vm2369_vm4, %v2524_v47, %v2007_v12  ;;  %v1255_v12 = vpack.c.bf16 %v1233_v48, %v1232_v26  ;;  %v1447_v47 = vpack.c.bf16 %v1425_v53, %v1424_v28  ;;  %v1088_v48 = vld [vmem:[#allocation2 + $0x169] sm:$0xff]  ;;  %v841_v28 = vld [vmem:[#allocation3 + $0xd1] sm:$0xff] }
 0x184   : > { %1776 = vrot.lane.b32.xlu1 %v1302_v11, %s4118_s20  ;;  %v5168_v54 = vpack.c.bf16 %v1089_v56, %v1088_v48 }
 0x185   : > { %1824 = vrot.lane.b32.xlu0 %v5102_v19, %s4119_s22 }
 0x186   : > { %v2684_v7 = vpop.permute.xlu1 %2683 }
 0x187   : > { %v1673_v49 = vpop.permute.xlu0 %1672  ;;  %v2721_v11 = vsel %vm246_vm1, %v4922_v2, %v2684_v7  ;;  %v2588_v2 = vsel %vm2207_vm8, %v2556_v46, %v2055_v61  ;;  %v1328_v46 = vld [vmem:[#allocation3 + $0x168] sm:$0xff] }
 0x188   : > { %1584 = vrot.lane.b32.xlu1 %v5056_v22, %s4116_s30  ;;  %3705 = vmatprep.mubr.msk.bf16.mxu1 %vm2174_vm5, %v2721_v11  ;;  %v2306_v22 = vsel %vm417_vm0, %v865_v40, %v1673_v49  ;;  %v1329_v49 = vld [vmem:[#allocation3 + $0x170] sm:$0xff] }
 0x189   : > { %1872 = vrot.lane.b32.xlu0 %v5117_v8, %s4120_s26  ;;  %v5151_v29 = vpack.c.bf16 %v1329_v49, %v1328_v46  ;;  %v1234_v46 = vld [vmem:[#allocation3 + $0x187] sm:$0xff]  ;;  %v1235_v49 = vld [vmem:[#allocation3 + $0x18f] sm:$0xff] }
 0x18a   : > { %v2103_v50 = vpop.permute.xlu1 %2102 }
 0x18b   : > { %v1721_v45 = vpop.permute.xlu0 %1720  ;;  %v2624_v52 = vsel %vm2434_vm7, %v2588_v2, %v2103_v50 }
 0x18c   : > { %1920 = vrot.lane.b32.xlu1 %v5091_v32, %s4117_s16  ;;  %3229 = vmatmul.mubr.bf16.gmra.mrb[16].mxu1 %v2624_v52  ;;  %v2348_v14 = vsel %vm2174_vm5, %v2306_v22, %v1721_v45 }
 0x18d   : > { %1632 = vrot.lane.b32.xlu0 %v5073_v9, %s4119_s22 }
 0x18e   : > { %v1769_v61 = vpop.permute.xlu1 %1768 }
 0x18f   : > { %v1817_v0 = vpop.permute.xlu0 %1816  ;;  %v2381_v13 = vsel %vm2369_vm4, %v2348_v14, %v1769_v61  ;;  %v1185_v14 = vld [vmem:[#allocation2 + $0x187] sm:$0xff] }
 0x190   : > { %1968 = vrot.lane.b32.xlu1 %v1206_v34, %s4113_s28  ;;  %v2413_v40 = vsel %vm2240_vm6, %v2381_v13, %v1817_v0  ;;  %v1186_v0 = vld [vmem:[#allocation2 + $0x18f] sm:$0xff] }
 0x191   : > { %2016 = vrot.lane.b32.xlu0 %v1255_v12, %s4118_s20 }
 0x192   : > { %v1577_v7 = vpop.permute.xlu1 %1576 }
 0x193   : > { %v1865_v11 = vpop.permute.xlu0 %1864  ;;  %v2219_v50 = vsel %vm2207_vm8, %v2186_v63, %v1577_v7  ;;  %v1256_v63 = vpack.c.bf16 %v1235_v49, %v1234_v46 }
 0x194   : > { %2064 = vrot.lane.b32.xlu1 %v1303_v55, %s4116_s30  ;;  %v2451_v39 = vsel %vm2434_vm7, %v2413_v40, %v1865_v11  ;;  %v1282_v40 = vld [vmem:[#allocation2 + $0x188] sm:$0xff] }
 0x195   : > { %2693 = vrot.lane.b32.xlu0 %v1447_v47, %s4113_s28  ;;  %3075 = vmatprep.mubr.bf16.mxu0 %v2451_v39  ;;  %v1283_v39 = vld [vmem:[#allocation2 + $0x190] sm:$0xff] }
 0x196   : > { %v1913_v37 = vpop.permute.xlu1 %1912 }
 0x197   : > { %v1625_v2 = vpop.permute.xlu0 %1624  ;;  %v2494_v45 = vsel %vm417_vm0, %v1865_v11, %v1913_v37 }
 0x198   : > { %1682 = vrot.lane.b32.xlu1 %v1206_v34, %s4117_s16  ;;  %v2257_v26 = vsel %vm2240_vm6, %v2219_v50, %v1625_v2  ;;  %v1304_v50 = vpack.c.bf16 %v1283_v39, %v1282_v40  ;;  %v1426_v2 = vld [vmem:[#allocation3 + $0x189] sm:$0xff] }
 0x199   : > { %2112 = vrot.lane.b32.xlu0 %v5151_v29, %s4120_s26  ;;  %3076 = vmatmul.mubr.bf16.gmra.mrb[20].mxu0 %v2257_v26  ;;  %v1427_v26 = vld [vmem:[#allocation3 + $0x191] sm:$0xff] }
 0x19a   : > { %v1961_v15 = vpop.permute.xlu1 %1960  ;;  %v1448_v48 = vpack.c.bf16 %v1427_v26, %v1426_v2  ;;  %v1236_v2 = vld [vmem:[#allocation3 + $0x1a7] sm:$0xff]  ;;  %v1237_v26 = vld [vmem:[#allocation3 + $0x1af] sm:$0xff] }
 0x19b   : > { %v2009_v21 = vpop.permute.xlu0 %2008  ;;  %v2526_v22 = vsel %vm246_vm1, %v2494_v45, %v1961_v15  ;;  %v1330_v45 = vld [vmem:[#allocation3 + $0x188] sm:$0xff] }
 0x19c   : > { %1730 = vrot.lane.b32.xlu1 %v1255_v12, %s4114_s29  ;;  %v840_v12 = vld [vmem:[#allocation3 + $0xc9] sm:$0xff]  ;;  %v2558_v61 = vsel %vm2369_vm4, %v2526_v22, %v2009_v21 }
 0x19d   : > { %1778 = vrot.lane.b32.xlu0 %v1303_v55, %s4118_s20  ;;  %v866_v7 = vpack.c.bf16 %v841_v28, %v840_v12 }
 0x19e   : > { %v2057_v52 = vpop.permute.xlu1 %2056 }
 0x19f   : > { %v2686_v34 = vpop.permute.xlu0 %2685  ;;  %v2590_v13 = vsel %vm2207_vm8, %v2558_v61, %v2057_v52  ;;  %v1331_v52 = vld [vmem:[#allocation3 + $0x190] sm:$0xff]  ;;  %v2146_v61 = vsel %vm246_vm1, %v4890_v51, %v4783_v16 }
 0x1a0   : > { %v2724_v27 = vsel %vm246_vm1, %v4972_v25, %v2686_v34  ;;  %1826 = vrot.lane.b32.xlu1 %v5151_v29, %s4119_s22  ;;  %v5193_v28 = vpack.c.bf16 %v1331_v52, %v1330_v45  ;;  %v1090_v51 = vld [vmem:[#allocation2 + $0x189] sm:$0xff] }
 0x1a1   : > { %1586 = vrot.lane.b32.xlu0 %v5102_v19, %s4116_s30  ;;  %3706 = vmatprep.mubr.msk.bf16.mxu1 %vm2174_vm5, %v2724_v27  ;;  %v1207_v19 = vpack.c.bf16 %v1186_v0, %v1185_v14  ;;  %v1285_v45 = vld [vmem:[#allocation2 + $0x1b0] sm:$0xff] }
 0x1a2   : > { %v1675_v53 = vpop.permute.xlu1 %1674 }
 0x1a3   : > { %v2105_v25 = vpop.permute.xlu0 %2104  ;;  %v2309_v37 = vsel %vm417_vm0, %v866_v7, %v1675_v53  ;;  %v2188_v53 = vsel %vm2174_vm5, %v2146_v61, %v4845_v59 }
 0x1a4   : > { %1874 = vrot.lane.b32.xlu1 %v5168_v54, %s4120_s26  ;;  %v2627_v55 = vsel %vm2434_vm7, %v2590_v13, %v2105_v25 }
 0x1a5   : > { %1922 = vrot.lane.b32.xlu0 %v1447_v47, %s4117_s16  ;;  %3237 = vmatmul.mubr.bf16.gmra.mrb[20].mxu1 %v2627_v55  ;;  %v1091_v55 = vld [vmem:[#allocation2 + $0x191] sm:$0xff] }
 0x1a6   : > { %v1723_v11 = vpop.permute.xlu1 %1722 }
 0x1a7   : > { %v1771_v44 = vpop.permute.xlu0 %1770  ;;  %v2350_v47 = vsel %vm2174_vm5, %v2309_v37, %v1723_v11 }
 0x1a8   : > { %1634 = vrot.lane.b32.xlu1 %v5117_v8, %s4119_s22  ;;  %v2383_v56 = vsel %vm2369_vm4, %v2350_v47, %v1771_v44  ;;  %v1187_v44 = vld [vmem:[#allocation2 + $0x1a7] sm:$0xff] }
 0x1a9   : > { %1970 = vrot.lane.b32.xlu0 %v1207_v19, %s4113_s28 }
 0x1aa   : > { %v1819_v15 = vpop.permute.xlu1 %1818 }
 0x1ab   : > { %v1579_v21 = vpop.permute.xlu0 %1578  ;;  %v2415_v22 = vsel %vm2240_vm6, %v2383_v56, %v1819_v15  ;;  %v1284_v56 = vld [vmem:[#allocation2 + $0x1a8] sm:$0xff] }
 0x1ac   : > { %2018 = vrot.lane.b32.xlu1 %v1256_v63, %s4118_s20  ;;  %v2221_v14 = vsel %vm2207_vm8, %v2188_v53, %v1579_v21  ;;  %v1257_v21 = vpack.c.bf16 %v1237_v26, %v1236_v2 }
 0x1ad   : > { %2066 = vrot.lane.b32.xlu0 %v1304_v50, %s4116_s30 }
 0x1ae   : > { %v1867_v34 = vpop.permute.xlu1 %1866 }
 0x1af   : > { %v1915_v27 = vpop.permute.xlu0 %1914  ;;  %v2454_v12 = vsel %vm2434_vm7, %v2415_v22, %v1867_v34  ;;  %v1428_v22 = vld [vmem:[#allocation3 + $0x1a9] sm:$0xff] }
 0x1b0   : > { %2695 = vrot.lane.b32.xlu1 %v1448_v48, %s4113_s28  ;;  %3083 = vmatprep.mubr.bf16.mxu0 %v2454_v12  ;;  %v2496_v59 = vsel %vm417_vm0, %v1867_v34, %v1915_v27  ;;  %v1429_v34 = vld [vmem:[#allocation3 + $0x1b1] sm:$0xff] }
 0x1b1   : > { %1684 = vrot.lane.b32.xlu0 %v1207_v19, %s4117_s16  ;;  %v5207_v19 = vpack.c.bf16 %v1091_v55, %v1090_v51  ;;  %v2149_v51 = vsel %vm246_vm1, %v4937_v35, %v4788_v23 }
 0x1b2   : > { %v1627_v0 = vpop.permute.xlu1 %1626 }
 0x1b3   : > { %v1963_v13 = vpop.permute.xlu0 %1962  ;;  %v2260_v25 = vsel %vm2240_vm6, %v2221_v14, %v1627_v0  ;;  %v1332_v14 = vld [vmem:[#allocation3 + $0x1a8] sm:$0xff]  ;;  %v1333_v0 = vld [vmem:[#allocation3 + $0x1b0] sm:$0xff] }
 0x1b4   : > { %2114 = vrot.lane.b32.xlu1 %v5193_v28, %s4120_s26  ;;  %3084 = vmatmul.mubr.bf16.gmra.mrb[24].mxu0 %v2260_v25  ;;  %v2528_v46 = vsel %vm246_vm1, %v2496_v59, %v1963_v13  ;;  %v5236_v55 = vpack.c.bf16 %v1333_v0, %v1332_v14 }
 0x1b5   : > { %1732 = vrot.lane.b32.xlu0 %v1256_v63, %s4114_s29  ;;  %v1188_v63 = vld [vmem:[#allocation2 + $0x1af] sm:$0xff] }
 0x1b6   : > { %v2011_v16 = vpop.permute.xlu1 %2010 }
 0x1b7   : > { %v2059_v7 = vpop.permute.xlu0 %2058  ;;  %v2560_v11 = vsel %vm2369_vm4, %v2528_v46, %v2011_v16 }
 0x1b8   : > { %1780 = vrot.lane.b32.xlu1 %v1304_v50, %s4118_s20  ;;  %v2592_v50 = vsel %vm2207_vm8, %v2560_v11, %v2059_v7  ;;  %v2190_v7 = vsel %vm2174_vm5, %v2149_v51, %v4850_v60  ;;  %v1093_v60 = vld [vmem:[#allocation2 + $0x1b1] sm:$0xff]  ;;  %v1334_v51 = vld [vmem:[#allocation3 + $0x1c8] sm:$0xff] }
 0x1b9   : > { %1828 = vrot.lane.b32.xlu0 %v5193_v28, %s4119_s22 }
 0x1ba   : > { %v2688_v49 = vpop.permute.xlu1 %2687 }
 0x1bb   : > { %v1677_v40 = vpop.permute.xlu0 %1676  ;;  %v2727_v39 = vsel %vm246_vm1, %v5024_v57, %v2688_v49 }
 0x1bc   : > { %1588 = vrot.lane.b32.xlu1 %v5151_v29, %s4116_s30  ;;  %3707 = vmatprep.mubr.msk.bf16.mxu1 %vm2174_vm5, %v2727_v39  ;;  %v2312_v57 = vsel %vm417_vm0, %v4945_v62, %v1677_v40  ;;  %v1208_v29 = vpack.c.bf16 %v1188_v63, %v1187_v44  ;;  %v1305_v62 = vpack.c.bf16 %v1285_v45, %v1284_v56  ;;  %v1092_v40 = vld [vmem:[#allocation2 + $0x1a9] sm:$0xff] }
 0x1bd   : > { %1876 = vrot.lane.b32.xlu0 %v5207_v19, %s4120_s26  ;;  %v5253_v2 = vpack.c.bf16 %v1093_v60, %v1092_v40  ;;  %v1239_v45 = vld [vmem:[#allocation3 + $0x1cf] sm:$0xff] }
 0x1be   : > { %v2107_v37 = vpop.permute.xlu1 %2106 }
 0x1bf   : > { %v1725_v47 = vpop.permute.xlu0 %1724  ;;  %v2630_v15 = vsel %vm2434_vm7, %v2592_v50, %v2107_v37 }
 0x1c0   : > { %1924 = vrot.lane.b32.xlu1 %v1448_v48, %s4117_s16  ;;  %3245 = vmatmul.mubr.bf16.gmra.mrb[24].mxu1 %v2630_v15  ;;  %v2352_v27 = vsel %vm2174_vm5, %v2312_v57, %v1725_v47  ;;  %v1449_v48 = vpack.c.bf16 %v1429_v34, %v1428_v22  ;;  %v1189_v15 = vld [vmem:[#allocation2 + $0x1c7] sm:$0xff]  ;;  %v1190_v57 = vld [vmem:[#allocation2 + $0x1cf] sm:$0xff] }
 0x1c1   : > { %1636 = vrot.lane.b32.xlu0 %v5168_v54, %s4119_s22  ;;  %v1209_v56 = vpack.c.bf16 %v1190_v57, %v1189_v15  ;;  %v1286_v22 = vld [vmem:[#allocation2 + $0x1c8] sm:$0xff]  ;;  %v1287_v34 = vld [vmem:[#allocation2 + $0x1d0] sm:$0xff] }
 0x1c2   : > { %v1773_v52 = vpop.permute.xlu1 %1772 }
 0x1c3   : > { %v1821_v12 = vpop.permute.xlu0 %1820  ;;  %v2385_v61 = vsel %vm2369_vm4, %v2352_v27, %v1773_v52 }
 0x1c4   : > { %1972 = vrot.lane.b32.xlu1 %v1208_v29, %s4113_s28  ;;  %v2417_v25 = vsel %vm2240_vm6, %v2385_v61, %v1821_v12 }
 0x1c5   : > { %2020 = vrot.lane.b32.xlu0 %v1257_v21, %s4118_s20 }
 0x1c6   : > { %v1581_v53 = vpop.permute.xlu1 %1580 }
 0x1c7   : > { %v1869_v13 = vpop.permute.xlu0 %1868  ;;  %v2223_v46 = vsel %vm2207_vm8, %v2190_v7, %v1581_v53  ;;  %v1430_v53 = vld [vmem:[#allocation3 + $0x1c9] sm:$0xff] }
 0x1c8   : > { %2068 = vrot.lane.b32.xlu1 %v1305_v62, %s4116_s30  ;;  %v2457_v16 = vsel %vm2434_vm7, %v2417_v25, %v1869_v13  ;;  %v1335_v7 = vld [vmem:[#allocation3 + $0x1d0] sm:$0xff] }
 0x1c9   : > { %2697 = vrot.lane.b32.xlu0 %v1449_v48, %s4113_s28  ;;  %3091 = vmatprep.mubr.bf16.mxu0 %v2457_v16 }
 0x1ca   : > { %v1917_v59 = vpop.permute.xlu1 %1916 }
 0x1cb   : > { %v1629_v49 = vpop.permute.xlu0 %1628  ;;  %v2498_v39 = vsel %vm417_vm0, %v1869_v13, %v1917_v59 }
 0x1cc   : > { %1686 = vrot.lane.b32.xlu1 %v1208_v29, %s4117_s16  ;;  %v2263_v11 = vsel %vm2240_vm6, %v2223_v46, %v1629_v49 }
 0x1cd   : > { %2116 = vrot.lane.b32.xlu0 %v5236_v55, %s4120_s26  ;;  %3092 = vmatmul.mubr.bf16.gmra.mrb[28].mxu0 %v2263_v11  ;;  %v2152_v11 = vsel %vm246_vm1, %v4987_v10, %v4792_v24  ;;  %v1094_v10 = vld [vmem:[#allocation2 + $0x1c9] sm:$0xff] }
 0x1ce   : > { %v1965_v23 = vpop.permute.xlu1 %1964 }
 0x1cf   : > { %v2013_v35 = vpop.permute.xlu0 %2012  ;;  %v2530_v63 = vsel %vm246_vm1, %v2498_v39, %v1965_v23  ;;  %v5282_v23 = vpack.c.bf16 %v1335_v7, %v1334_v51  ;;  %v607_v51 = vld [vmem:[#allocation2 + $0x12f] sm:$0xff] }
 0x1d0   : > { %1734 = vrot.lane.b32.xlu1 %v1257_v21, %s4114_s29  ;;  %v2562_v26 = vsel %vm2369_vm4, %v2530_v63, %v2013_v35  ;;  %v2192_v35 = vsel %vm2174_vm5, %v2152_v11, %v4852_v6  ;;  %v1095_v63 = vld [vmem:[#allocation2 + $0x1d1] sm:$0xff] }
 0x1d1   : > { %1782 = vrot.lane.b32.xlu0 %v1305_v62, %s4118_s20  ;;  %v1306_v62 = vpack.c.bf16 %v1287_v34, %v1286_v22 }
 0x1d2   : > { %v2061_v44 = vpop.permute.xlu1 %2060 }
 0x1d3   : > { %v2690_v37 = vpop.permute.xlu0 %2689  ;;  %v2594_v29 = vsel %vm2207_vm8, %v2562_v26, %v2061_v44 }
 0x1d4   : > { %v2730_v50 = vsel %vm246_vm1, %v5073_v9, %v2690_v37  ;;  %1830 = vrot.lane.b32.xlu1 %v5236_v55, %s4119_s22 }
 0x1d5   : > { %1590 = vrot.lane.b32.xlu0 %v5193_v28, %s4116_s30  ;;  %3708 = vmatprep.mubr.msk.bf16.mxu1 %vm2174_vm5, %v2730_v50  ;;  %v1238_v28 = vld [vmem:[#allocation3 + $0x1c7] sm:$0xff]  ;;  %v5296_v50 = vpack.c.bf16 %v1095_v63, %v1094_v10  ;;  %v5324_v63 = vld [vmem:[%s5662_s3] ss:$0 sm:$0xff] }
 0x1d6   : > { %v1679_v47 = vpop.permute.xlu1 %1678  ;;  %v1258_v12 = vpack.c.bf16 %v1239_v45, %v1238_v28  ;;  %v1191_v45 = vld [vmem:[#allocation2 + $0x1e7] sm:$0xff] }
 0x1d7   : > { %v2109_v21 = vpop.permute.xlu0 %2108  ;;  %v2315_v61 = vsel %vm417_vm0, %v4998_v33, %v1679_v47 }
 0x1d8   : > { %1878 = vrot.lane.b32.xlu1 %v5253_v2, %s4120_s26  ;;  %v2633_v9 = vsel %vm2434_vm7, %v2594_v29, %v2109_v21 }
 0x1d9   : > { %1926 = vrot.lane.b32.xlu0 %v1449_v48, %s4117_s16  ;;  %3253 = vmatmul.mubr.bf16.gmra.mrb[28].mxu1 %v2633_v9  ;;  %v1431_v48 = vld [vmem:[#allocation3 + $0x1d1] sm:$0xff] }
 0x1da   : > { %v1727_v52 = vpop.permute.xlu1 %1726  ;;  %v5271_v25 = vpack.c.bf16 %v1431_v48, %v1430_v53 }
 0x1db   : > { %v1775_v27 = vpop.permute.xlu0 %1774  ;;  %v2354_v14 = vsel %vm2174_vm5, %v2315_v61, %v1727_v52  ;;  %v1192_v52 = vld [vmem:[#allocation2 + $0x1ef] sm:$0xff] }
 0x1dc   : > { %1638 = vrot.lane.b32.xlu1 %v5207_v19, %s4119_s22  ;;  %v2387_v16 = vsel %vm2369_vm4, %v2354_v14, %v1775_v27  ;;  %v1210_v48 = vpack.c.bf16 %v1192_v52, %v1191_v45  ;;  %v606_v14 = vld [vmem:[#allocation2 + $0x127] sm:$0xff] }
 0x1dd   : > { %1974 = vrot.lane.b32.xlu0 %v1209_v56, %s4113_s28 }
 0x1de   : > { %v1823_v0 = vpop.permute.xlu1 %1822 }
 0x1df   : > { %v1583_v13 = vpop.permute.xlu0 %1582  ;;  %v2419_v33 = vsel %vm2240_vm6, %v2387_v16, %v1823_v0  ;;  %v1289_v16 = vld [vmem:[#allocation2 + $0x1f0] sm:$0xff] }
 0x1e0   : > { %2022 = vrot.lane.b32.xlu1 %v1258_v12, %s4118_s20  ;;  %v2225_v40 = vsel %vm2207_vm8, %v2192_v35, %v1583_v13  ;;  %v1288_v13 = vld [vmem:[#allocation2 + $0x1e8] sm:$0xff]  ;;  %v629_v35 = vpack.c.bf16 %v607_v51, %v606_v14  ;;  %v1097_v14 = vld [vmem:[#allocation2 + $0x1f1] sm:$0xff] }
 0x1e1   : > { %2070 = vrot.lane.b32.xlu0 %v1306_v62, %s4116_s30  ;;  %v1307_v11 = vpack.c.bf16 %v1289_v16, %v1288_v13 }
 0x1e2   : > { %v1871_v59 = vpop.permute.xlu1 %1870 }
 0x1e3   : > { %v1919_v46 = vpop.permute.xlu0 %1918  ;;  %v2460_v49 = vsel %vm2434_vm7, %v2419_v33, %v1871_v59  ;;  %v1432_v33 = vld [vmem:[#allocation3 + $0x1e9] sm:$0xff] }
 0x1e4   : > { %2699 = vrot.lane.b32.xlu1 %v5271_v25, %s4113_s28  ;;  %3099 = vmatprep.mubr.bf16.mxu0 %v2460_v49  ;;  %v2500_v6 = vsel %vm417_vm0, %v1871_v59, %v1919_v46  ;;  %v1433_v59 = vld [vmem:[#allocation3 + $0x1f1] sm:$0xff] }
 0x1e5   : > { %1688 = vrot.lane.b32.xlu0 %v1209_v56, %s4117_s16 }
 0x1e6   : > { %v1631_v60 = vpop.permute.xlu1 %1630 }
 0x1e7   : > { %v1967_v39 = vpop.permute.xlu0 %1966  ;;  %v2266_v44 = vsel %vm2240_vm6, %v2225_v40, %v1631_v60  ;;  %v5319_v40 = vpack.c.bf16 %v1433_v59, %v1432_v33 }
 0x1e8   : > { %2118 = vrot.lane.b32.xlu1 %v5282_v23, %s4120_s26  ;;  %3100 = vmatmul.mubr.bf16.gmra.mrb[32].mxu0 %v2266_v44  ;;  %v2532_v26 = vsel %vm246_vm1, %v2500_v6, %v1967_v39  ;;  %v1336_v39 = vld [vmem:[#allocation3 + $0x1e8] sm:$0xff]  ;;  %v1337_v44 = vld [vmem:[#allocation3 + $0x1f0] sm:$0xff] }
 0x1e9   : > { %1736 = vrot.lane.b32.xlu0 %v1258_v12, %s4114_s29  ;;  %v1240_v12 = vld [vmem:[#allocation3 + $0x1e7] sm:$0xff] }
 0x1ea   : > { %v2015_v24 = vpop.permute.xlu1 %2014 }
 0x1eb   : > { %v2063_v37 = vpop.permute.xlu0 %2062  ;;  %v2564_v15 = vsel %vm2369_vm4, %v2532_v26, %v2015_v24 }
 0x1ec   : > { %1784 = vrot.lane.b32.xlu1 %v1306_v62, %s4118_s20  ;;  %v2596_v27 = vsel %vm2207_vm8, %v2564_v15, %v2063_v37  ;;  %v2155_v15 = vsel %vm246_vm1, %v629_v35, %v4798_v30 }
 0x1ed   : > { %1832 = vrot.lane.b32.xlu0 %v5282_v23, %s4119_s22 }
 0x1ee   : > { %v2692_v47 = vpop.permute.xlu1 %2691 }
 0x1ef   : > { %v1681_v57 = vpop.permute.xlu0 %1680  ;;  %v2733_v29 = vsel %vm246_vm1, %v5117_v8, %v2692_v47  ;;  %v3962_v21 = vpop.f32.mrb[0].mxu0  ;;  %v1241_v8 = vld [vmem:[#allocation3 + $0x1ef] sm:$0xff] }
 0x1f0   : > { %v3963_v9 = vpop.f32.mrb[1].mxu0  ;;  %1592 = vrot.lane.b32.xlu1 %v5236_v55, %s4116_s30  ;;  %3709 = vmatprep.mubr.msk.bf16.mxu1 %vm2174_vm5, %v2733_v29  ;;  %v2318_v55 = vsel %vm417_vm0, %v5046_v58, %v1681_v57  ;;  %v1259_v0 = vpack.c.bf16 %v1241_v8, %v1240_v12  ;;  %v5334_v57 = vld [vmem:[%s5663_s4] ss:$0 sm:$0xff] }
 0x1f1   : > { %1880 = vrot.lane.b32.xlu0 %v5296_v50, %s4120_s26  ;;  %v3964_v56 = vadd.f32 %v3963_v9, %v3962_v21  ;;  %v3965_v28 = vpop.f32.mrb[2].mxu0  ;;  %v5338_v21 = vpack.c.bf16 %v1337_v44, %v1336_v39  ;;  %v2194_v9 = vsel %vm2174_vm5, %v2155_v15, %v4859_v1  ;;  %v1193_v44 = vld [vmem:[#allocation2 + $0x207] sm:$0xff] }
 0x1f2   : > { %v3966_v22 = vpop.f32.mrb[3].mxu0  ;;  %v2111_v34 = vpop.permute.xlu1 %2110 }
 0x1f3   : > { %v1729_v61 = vpop.permute.xlu0 %1728  ;;  %v3967_v62 = vadd.f32 %v3966_v22, %v3965_v28  ;;  %v2636_v53 = vsel %vm2434_vm7, %v2596_v27, %v2111_v34 }
 0x1f4   : > { %1928 = vrot.lane.b32.xlu1 %v5271_v25, %s4117_s16  ;;  %3261 = vmatmul.mubr.bf16.gmra.mrb[32].mxu1 %v2636_v53  ;;  %v2356_v46 = vsel %vm2174_vm5, %v2318_v55, %v1729_v61 }
 0x1f5   : > { %1640 = vrot.lane.b32.xlu0 %v5253_v2, %s4119_s22 }
 0x1f6   : > { %v1777_v7 = vpop.permute.xlu1 %1776 }
 0x1f7   : > { %v1825_v49 = vpop.permute.xlu0 %1824  ;;  %v2389_v58 = vsel %vm2369_vm4, %v2356_v46, %v1777_v7 }
 0x1f8   : > { %1976 = vrot.lane.b32.xlu1 %v1210_v48, %s4113_s28  ;;  %v2421_v37 = vsel %vm2240_vm6, %v2389_v58, %v1825_v49 }
 0x1f9   : > { %2024 = vrot.lane.b32.xlu0 %v1259_v0, %s4118_s20 }
 0x1fa   : > { %v1585_v60 = vpop.permute.xlu1 %1584 }
 0x1fb   : > { %v1873_v24 = vpop.permute.xlu0 %1872  ;;  %v3198_v10 = vpop.f32.mrb[0].mxu1  ;;  %v2227_v52 = vsel %vm2207_vm8, %v2194_v9, %v1585_v60  ;;  %v1291_v9 = vld [vmem:[#allocation2 + $0x210] sm:$0xff] }
 0x1fc   : > { %v3199_v6 = vadd.f32 %v3964_v56, %v3198_v10  ;;  %v3200_v26 = vpop.f32.mrb[1].mxu1  ;;  %2072 = vrot.lane.b32.xlu1 %v1307_v11, %s4116_s30  ;;  %v2463_v47 = vsel %vm2434_vm7, %v2421_v37, %v1873_v24 }
 0x1fd   : > { %2701 = vrot.lane.b32.xlu0 %v5319_v40, %s4113_s28  ;;  %3107 = vmatprep.mubr.bf16.mxu0 %v2463_v47  ;;  %v3201_v29 = vpop.f32.mrb[2].mxu1  ;;  %v1242_v26 = vld [vmem:[#allocation3 + $0x207] sm:$0xff]  ;;  %v1243_v47 = vld [vmem:[#allocation3 + $0x20f] sm:$0xff] }
 0x1fe   : > { %v3332_v56 = vmul.f32 %v5324_v63, %v3199_v6  ;;  %v3202_v28 = vadd.f32 %v3967_v62, %v3201_v29  ;;  %v3203_v30 = vpop.f32.mrb[3].mxu1  ;;  %v1921_v45 = vpop.permute.xlu1 %1920  ;;  %v1290_v29 = vld [vmem:[#allocation2 + $0x208] sm:$0xff] }
 0x1ff   : > { %v1633_v22 = vpop.permute.xlu0 %1632  ;;  %v2502_v16 = vsel %vm417_vm0, %v1873_v24, %v1921_v45  ;;  %v1194_v24 = vld [vmem:[#allocation2 + $0x20f] sm:$0xff]  ;;  %v1260_v45 = vpack.c.bf16 %v1243_v47, %v1242_v26 }
 0x200   : > { %v3371_v34 = vadd.f32 %v5334_v57, %v3332_v56  ;;  %v3333_v27 = vmul.f32 %v5324_v63, %v3202_v28  ;;  %1690 = vrot.lane.b32.xlu1 %v1210_v48, %s4117_s16  ;;  %v2269_v12 = vsel %vm2240_vm6, %v2227_v52, %v1633_v22  ;;  %v1096_v48 = vld [vmem:[#allocation2 + $0x1e9] sm:$0xff]  ;;  %v1308_v22 = vpack.c.bf16 %v1291_v9, %v1290_v29  ;;  %v1099_v29 = vld [vmem:[#allocation2 + $0x211] sm:$0xff] }
 0x201   : > { %2120 = vrot.lane.b32.xlu0 %v5338_v21, %s4120_s26  ;;  %3108 = vmatmul.mubr.bf16.gmra.mrb[36].mxu0 %v2269_v12  ;;  %v5369_v49 = vpack.c.bf16 %v1097_v14, %v1096_v48  ;;  %v608_v28 = vld [vmem:[#allocation2 + $0x147] sm:$0xff]  ;;  %v609_v30 = vld [vmem:[#allocation2 + $0x14f] sm:$0xff] }
 0x202   : > { %v3403_v1 = vmax.f32 %v3371_v34, 0.0  ;;  %v3372_v8 = vadd.f32 %v5334_v57, %v3333_v27  ;;  %v1969_v61 = vpop.permute.xlu1 %1968  ;;  %v1434_v34 = vld [vmem:[#allocation3 + $0x209] sm:$0xff]  ;;  %v1435_v27 = vld [vmem:[#allocation3 + $0x211] sm:$0xff] }
 0x203   : > { %v2017_v62 = vpop.permute.xlu0 %2016  ;;  %v2534_v7 = vsel %vm246_vm1, %v2502_v16, %v1969_v61  ;;  %v5388_v48 = vpack.c.bf16 %v1435_v27, %v1434_v34  ;;  %v1339_v16 = vld [vmem:[#allocation3 + $0x210] sm:$0xff] }
 0x204   : > { %v3756_v53 = vpack.c.bf16 %v3403_v1, %v3403_v1  ;;  %v3404_v55 = vmax.f32 %v3372_v8, 0.0  ;;  %1738 = vrot.lane.b32.xlu1 %v1259_v0, %s4114_s29  ;;  %v2566_v35 = vsel %vm2369_vm4, %v2534_v7, %v2017_v62  ;;  %v630_v8 = vpack.c.bf16 %v609_v30, %v608_v28  ;;  %v851_v27 = vld [vmem:[#allocation3 + $0x171] sm:$0xff] }
 0x205   : > { %1786 = vrot.lane.b32.xlu0 %v1307_v11, %s4118_s20 }
 0x206   : > { %3564 = vst.msk [vmem:[%s5355_s12] sm:$0xf] %vm3563_vm9, %v3756_v53  ;;  %v3757_v13 = vpack.c.bf16 %v3404_v55, %v3404_v55  ;;  %v2065_v51 = vpop.permute.xlu1 %2064 }
 0x207   : > { %v2694_v33 = vpop.permute.xlu0 %2693  ;;  %v3968_v59 = vpop.f32.mrb[4].mxu0 }
 0x208   : > { %3565 = vst.msk [vmem:[%s5355_s12 + $0x4] sm:$0xf] %vm3563_vm9, %v3757_v13  ;;  %v2736_v46 = vsel %vm246_vm1, %v5168_v54, %v2694_v33  ;;  %1834 = vrot.lane.b32.xlu1 %v5338_v21, %s4119_s22  ;;  %v3969_v0 = vpop.f32.mrb[5].mxu0  ;;  %v2598_v54 = vsel %vm2207_vm8, %v2566_v35, %v2065_v51  ;;  %v1338_v13 = vld [vmem:[#allocation3 + $0x208] sm:$0xff] }
 0x209   : > { %1594 = vrot.lane.b32.xlu0 %v5282_v23, %s4116_s30  ;;  %v3970_v58 = vadd.f32 %v3969_v0, %v3968_v59  ;;  %v3971_v11 = vpop.f32.mrb[6].mxu0  ;;  %3710 = vmatprep.mubr.msk.bf16.mxu1 %vm2174_vm5, %v2736_v46  ;;  %v1211_v23 = vpack.c.bf16 %v1194_v24, %v1193_v44  ;;  %v2158_v0 = vsel %vm246_vm1, %v630_v8, %v4800_v31 }
 0x20a   : > { %v1683_v60 = vpop.permute.xlu1 %1682  ;;  %v3972_v39 = vpop.f32.mrb[7].mxu0  ;;  %v2196_v44 = vsel %vm2174_vm5, %v2158_v0, %v4861_v3  ;;  %v610_v0 = vld [vmem:[#allocation2 + $0x167] sm:$0xff] }
 0x20b   : > { %v2113_v10 = vpop.permute.xlu0 %2112  ;;  %v3973_v37 = vadd.f32 %v3972_v39, %v3971_v11  ;;  %v2321_v52 = vsel %vm417_vm0, %v5091_v32, %v1683_v60  ;;  %v1356_v39 = vpack.c.bf16 %v1339_v16, %v1338_v13  ;;  %v1196_v13 = vld [vmem:[#allocation2 + $0x22f] sm:$0xff] }
 0x20c   : > { %1882 = vrot.lane.b32.xlu1 %v5369_v49, %s4120_s26  ;;  %v2639_v6 = vsel %vm2434_vm7, %v2598_v54, %v2113_v10 }
 0x20d   : > { %1930 = vrot.lane.b32.xlu0 %v5319_v40, %s4117_s16  ;;  %3269 = vmatmul.mubr.bf16.gmra.mrb[36].mxu1 %v2639_v6 }
 0x20e   : > { %v1731_v15 = vpop.permute.xlu1 %1730 }
 0x20f   : > { %v1779_v56 = vpop.permute.xlu0 %1778  ;;  %v2358_v12 = vsel %vm2174_vm5, %v2321_v52, %v1731_v15  ;;  %v1098_v15 = vld [vmem:[#allocation2 + $0x209] sm:$0xff] }
 0x210   : > { %1642 = vrot.lane.b32.xlu1 %v5296_v50, %s4119_s22  ;;  %v2391_v14 = vsel %vm2369_vm4, %v2358_v12, %v1779_v56  ;;  %v5416_v12 = vpack.c.bf16 %v1099_v29, %v1098_v15  ;;  %v1340_v15 = vld [vmem:[#allocation3 + $0x228] sm:$0xff]  ;;  %v1341_v29 = vld [vmem:[#allocation3 + $0x230] sm:$0xff] }
 0x211   : > { %1978 = vrot.lane.b32.xlu0 %v1211_v23, %s4113_s28 }
 0x212   : > { %v1827_v1 = vpop.permute.xlu1 %1826 }
 0x213   : > { %v1587_v61 = vpop.permute.xlu0 %1586  ;;  %v3206_v62 = vpop.f32.mrb[4].mxu1  ;;  %v2423_v51 = vsel %vm2240_vm6, %v2391_v14, %v1827_v1 }
 0x214   : > { %v3207_v53 = vadd.f32 %v3970_v58, %v3206_v62  ;;  %v3208_v55 = vpop.f32.mrb[5].mxu1  ;;  %2026 = vrot.lane.b32.xlu1 %v1260_v45, %s4118_s20  ;;  %v2229_v31 = vsel %vm2207_vm8, %v2196_v44, %v1587_v61  ;;  %v1436_v44 = vld [vmem:[#allocation3 + $0x229] sm:$0xff] }
 0x215   : > { %2074 = vrot.lane.b32.xlu0 %v1308_v22, %s4116_s30  ;;  %v3209_v32 = vpop.f32.mrb[6].mxu1 }
 0x216   : > { %v3334_v7 = vmul.f32 %v5324_v63, %v3207_v53  ;;  %v3210_v33 = vadd.f32 %v3973_v37, %v3209_v32  ;;  %v3211_v59 = vpop.f32.mrb[7].mxu1  ;;  %v1875_v46 = vpop.permute.xlu1 %1874  ;;  %v1195_v32 = vld [vmem:[#allocation2 + $0x227] sm:$0xff] }
 0x217   : > { %v1923_v58 = vpop.permute.xlu0 %1922  ;;  %v2466_v11 = vsel %vm2434_vm7, %v2423_v51, %v1875_v46 }
 0x218   : > { %v3373_v35 = vadd.f32 %v5334_v57, %v3334_v7  ;;  %v3335_v60 = vmul.f32 %v5324_v63, %v3210_v33  ;;  %2703 = vrot.lane.b32.xlu1 %v5388_v48, %s4113_s28  ;;  %3115 = vmatprep.mubr.bf16.mxu0 %v2466_v11  ;;  %v2504_v30 = vsel %vm417_vm0, %v1875_v46, %v1923_v58  ;;  %v1244_v7 = vld [vmem:[#allocation3 + $0x227] sm:$0xff]  ;;  %v1245_v33 = vld [vmem:[#allocation3 + $0x22f] sm:$0xff] }
 0x219   : > { %1692 = vrot.lane.b32.xlu0 %v1211_v23, %s4117_s16  ;;  %v1261_v58 = vpack.c.bf16 %v1245_v33, %v1244_v7  ;;  %v1292_v11 = vld [vmem:[#allocation2 + $0x228] sm:$0xff] }
 0x21a   : > { %v3405_v24 = vmax.f32 %v3373_v35, 0.0  ;;  %v3374_v54 = vadd.f32 %v5334_v57, %v3335_v60  ;;  %v1635_v10 = vpop.permute.xlu1 %1634  ;;  %v1293_v35 = vld [vmem:[#allocation2 + $0x230] sm:$0xff] }
 0x21b   : > { %v1971_v37 = vpop.permute.xlu0 %1970  ;;  %v2272_v6 = vsel %vm2240_vm6, %v2229_v31, %v1635_v10  ;;  %v611_v60 = vld [vmem:[#allocation2 + $0x16f] sm:$0xff] }
 0x21c   : > { %v3758_v26 = vpack.c.bf16 %v3405_v24, %v3405_v24  ;;  %v3406_v47 = vmax.f32 %v3374_v54, 0.0  ;;  %2122 = vrot.lane.b32.xlu1 %v1356_v39, %s4120_s26  ;;  %3116 = vmatmul.mubr.bf16.gmra.mrb[40].mxu0 %v2272_v6  ;;  %v2536_v1 = vsel %vm246_vm1, %v2504_v30, %v1971_v37  ;;  %v1437_v31 = vld [vmem:[#allocation3 + $0x231] sm:$0xff] }
 0x21d   : > { %1740 = vrot.lane.b32.xlu0 %v1260_v45, %s4114_s29  ;;  %v850_v45 = vld [vmem:[#allocation3 + $0x169] sm:$0xff] }
 0x21e   : > { %3566 = vst.msk [vmem:[%s5355_s12 + $0x8] sm:$0xf] %vm3563_vm9, %v3758_v26  ;;  %v3759_v3 = vpack.c.bf16 %v3406_v47, %v3406_v47  ;;  %v2019_v23 = vpop.permute.xlu1 %2018  ;;  %v871_v14 = vpack.c.bf16 %v851_v27, %v850_v45  ;;  %v1309_v26 = vpack.c.bf16 %v1293_v35, %v1292_v11  ;;  %v631_v47 = vpack.c.bf16 %v611_v60, %v610_v0 }
 0x21f   : > { %v2067_v9 = vpop.permute.xlu0 %2066  ;;  %v3974_v56 = vpop.f32.mrb[8].mxu0  ;;  %v2568_v62 = vsel %vm2369_vm4, %v2536_v1, %v2019_v23  ;;  %v1453_v23 = vpack.c.bf16 %v1437_v31, %v1436_v44  ;;  %v852_v31 = vld [vmem:[#allocation3 + $0x189] sm:$0xff] }
 0x220   : > { %3567 = vst.msk [vmem:[%s5355_s12 + $0xc] sm:$0xf] %vm3563_vm9, %v3759_v3  ;;  %1788 = vrot.lane.b32.xlu1 %v1308_v22, %s4118_s20  ;;  %v3975_v28 = vpop.f32.mrb[9].mxu0  ;;  %v2600_v51 = vsel %vm2207_vm8, %v2568_v62, %v2067_v9 }
 0x221   : > { %1836 = vrot.lane.b32.xlu0 %v1356_v39, %s4119_s22  ;;  %v3976_v52 = vadd.f32 %v3975_v28, %v3974_v56  ;;  %v3977_v34 = vpop.f32.mrb[10].mxu0 }
 0x222   : > { %v2696_v8 = vpop.permute.xlu1 %2695  ;;  %v3978_v61 = vpop.f32.mrb[11].mxu0 }
 0x223   : > { %v1685_v53 = vpop.permute.xlu0 %1684  ;;  %v2739_v22 = vsel %vm246_vm1, %v5207_v19, %v2696_v8  ;;  %v3979_v55 = vadd.f32 %v3978_v61, %v3977_v34  ;;  %v1357_v8 = vpack.c.bf16 %v1341_v29, %v1340_v15  ;;  %v2161_v61 = vsel %vm246_vm1, %v631_v47, %v4805_v36 }
 0x224   : > { %1596 = vrot.lane.b32.xlu1 %v5338_v21, %s4116_s30  ;;  %3711 = vmatprep.mubr.msk.bf16.mxu1 %vm2174_vm5, %v2739_v22  ;;  %v2324_v46 = vsel %vm417_vm0, %v871_v14, %v1685_v53  ;;  %v1212_v21 = vpack.c.bf16 %v1196_v13, %v1195_v32  ;;  %v2198_v62 = vsel %vm2174_vm5, %v2161_v61, %v4867_v4 }
 0x225   : > { %1884 = vrot.lane.b32.xlu0 %v5416_v12, %s4120_s26 }
 0x226   : > { %v2115_v16 = vpop.permute.xlu1 %2114 }
 0x227   : > { %v1733_v59 = vpop.permute.xlu0 %1732  ;;  %v2642_v19 = vsel %vm2434_vm7, %v2600_v51, %v2115_v16 }
 0x228   : > { %1932 = vrot.lane.b32.xlu1 %v5388_v48, %s4117_s16  ;;  %3277 = vmatmul.mubr.bf16.gmra.mrb[40].mxu1 %v2642_v19  ;;  %v2360_v24 = vsel %vm2174_vm5, %v2324_v46, %v1733_v59 }
 0x229   : > { %1644 = vrot.lane.b32.xlu0 %v5369_v49, %s4119_s22 }
 0x22a   : > { %v1781_v39 = vpop.permute.xlu1 %1780 }
 0x22b   : > { %v1829_v54 = vpop.permute.xlu0 %1828  ;;  %v3214_v10 = vpop.f32.mrb[8].mxu1  ;;  %v2393_v37 = vsel %vm2369_vm4, %v2360_v24, %v1781_v39  ;;  %v853_v24 = vld [vmem:[#allocation3 + $0x191] sm:$0xff] }
 0x22c   : > { %v3215_v48 = vadd.f32 %v3976_v52, %v3214_v10  ;;  %v3216_v6 = vpop.f32.mrb[9].mxu1  ;;  %1980 = vrot.lane.b32.xlu1 %v1212_v21, %s4113_s28  ;;  %v2425_v45 = vsel %vm2240_vm6, %v2393_v37, %v1829_v54 }
 0x22d   : > { %2028 = vrot.lane.b32.xlu0 %v1261_v58, %s4118_s20  ;;  %v3217_v3 = vpop.f32.mrb[10].mxu1  ;;  %v872_v6 = vpack.c.bf16 %v853_v24, %v852_v31 }
 0x22e   : > { %v3336_v9 = vmul.f32 %v5324_v63, %v3215_v48  ;;  %v3218_v56 = vadd.f32 %v3979_v55, %v3217_v3  ;;  %v3219_v28 = vpop.f32.mrb[11].mxu1  ;;  %v1589_v30 = vpop.permute.xlu1 %1588 }
 0x22f   : > { %v1877_v34 = vpop.permute.xlu0 %1876  ;;  %v2231_v14 = vsel %vm2207_vm8, %v2198_v62, %v1589_v30 }
 0x230   : > { %v3375_v52 = vadd.f32 %v5334_v57, %v3336_v9  ;;  %v3337_v27 = vmul.f32 %v5324_v63, %v3218_v56  ;;  %2076 = vrot.lane.b32.xlu1 %v1309_v26, %s4116_s30  ;;  %v2469_v1 = vsel %vm2434_vm7, %v2425_v45, %v1877_v34 }
 0x231   : > { %3123 = vmatprep.mubr.bf16.mxu0 %v2469_v1  ;;  %2705 = vrot.lane.b32.xlu0 %v1453_v23, %s4113_s28  ;;  %v612_v23 = vld [vmem:[#allocation2 + $0x187] sm:$0xff] }
 0x232   : > { %v3407_v53 = vmax.f32 %v3375_v52, 0.0  ;;  %v3376_v22 = vadd.f32 %v5334_v57, %v3337_v27  ;;  %v1925_v55 = vpop.permute.xlu1 %1924 }
 0x233   : > { %v1637_v32 = vpop.permute.xlu0 %1636  ;;  %v2506_v19 = vsel %vm417_vm0, %v1877_v34, %v1925_v55 }
 0x234   : > { %v3760_v13 = vpack.c.bf16 %v3407_v53, %v3407_v53  ;;  %v3408_v16 = vmax.f32 %v3376_v22, 0.0  ;;  %2124 = vrot.lane.b32.xlu1 %v1357_v8, %s4120_s26  ;;  %v2275_v36 = vsel %vm2240_vm6, %v2231_v14, %v1637_v32 }
 0x235   : > { %3124 = vmatmul.mubr.bf16.gmra.mrb[44].mxu0 %v2275_v36 }
 0x236   : > { %3568 = vst.msk [vmem:[%s5355_s12 + $0x10] sm:$0xf] %vm3563_vm9, %v3760_v13  ;;  %v3761_v51 = vpack.c.bf16 %v3408_v16, %v3408_v16  ;;  %v1973_v7 = vpop.permute.xlu1 %1972 }
 0x237   : > { %v2021_v33 = vpop.permute.xlu0 %2020  ;;  %v2538_v58 = vsel %vm246_vm1, %v2506_v19, %v1973_v7 }
 0x238   : > { %3569 = vst.msk [vmem:[%s5355_s12 + $0x14] sm:$0xf] %vm3563_vm9, %v3761_v51  ;;  %v3980_v4 = vpop.f32.mrb[12].mxu0  ;;  %v2570_v44 = vsel %vm2369_vm4, %v2538_v58, %v2021_v33 }
 0x239   : > { %v3981_v59 = vpop.f32.mrb[13].mxu0 }
 0x23a   : > { %v3982_v46 = vadd.f32 %v3981_v59, %v3980_v4  ;;  %v3983_v21 = vpop.f32.mrb[14].mxu0  ;;  %v2069_v0 = vpop.permute.xlu1 %2068 }
 0x23b   : > { %v2698_v11 = vpop.permute.xlu0 %2697  ;;  %v3984_v35 = vpop.f32.mrb[15].mxu0  ;;  %v2602_v10 = vsel %vm2207_vm8, %v2570_v44, %v2069_v0 }
 0x23c   : > { %v2742_v60 = vsel %vm246_vm1, %v5253_v2, %v2698_v11  ;;  %v3985_v39 = vadd.f32 %v3984_v35, %v3983_v21  ;;  %v613_v2 = vld [vmem:[#allocation2 + $0x18f] sm:$0xff] }
 0x23d   : > { %3712 = vmatprep.mubr.msk.bf16.mxu1 %vm2174_vm5, %v2742_v60  ;;  %v632_v1 = vpack.c.bf16 %v613_v2, %v612_v23  ;;  %v854_v60 = vld [vmem:[#allocation3 + $0x1a9] sm:$0xff] }
 0x23e   : > { %v1687_v54 = vpop.permute.xlu1 %1686 }
 0x23f   : > { %v2117_v37 = vpop.permute.xlu0 %2116  ;;  %v2327_v15 = vsel %vm417_vm0, %v872_v6, %v1687_v54  ;;  %v2164_v16 = vsel %vm246_vm1, %v632_v1, %v4807_v38 }
 0x240   : > { %v2645_v48 = vsel %vm2434_vm7, %v2602_v10, %v2117_v37  ;;  %v2200_v36 = vsel %vm2174_vm5, %v2164_v16, %v4869_v5 }
 0x241   : > { %3285 = vmatmul.mubr.bf16.gmra.mrb[44].mxu1 %v2645_v48 }
 0x242   : > { %v1735_v26 = vpop.permute.xlu1 %1734 }
 0x243   : > { %v1783_v47 = vpop.permute.xlu0 %1782  ;;  %v2362_v56 = vsel %vm2174_vm5, %v2327_v15, %v1735_v26  ;;  %v614_v15 = vld [vmem:[#allocation2 + $0x1a7] sm:$0xff] }
 0x244   : > { %v3222_v3 = vpop.f32.mrb[12].mxu1  ;;  %v2395_v62 = vsel %vm2369_vm4, %v2362_v56, %v1783_v47 }
 0x245   : > { %v3223_v29 = vadd.f32 %v3982_v46, %v3222_v3  ;;  %v3224_v9 = vpop.f32.mrb[13].mxu1 }
 0x246   : > { %v3225_v28 = vpop.f32.mrb[14].mxu1  ;;  %v1831_v30 = vpop.permute.xlu1 %1830 }
 0x247   : > { %v3338_v34 = vmul.f32 %v5324_v63, %v3223_v29  ;;  %v3226_v45 = vadd.f32 %v3985_v39, %v3225_v28  ;;  %v1591_v52 = vpop.permute.xlu0 %1590  ;;  %v3227_v27 = vpop.f32.mrb[15].mxu1  ;;  %v2427_v53 = vsel %vm2240_vm6, %v2395_v62, %v1831_v30  ;;  %v855_v39 = vld [vmem:[#allocation3 + $0x1b1] sm:$0xff] }
 0x248   : > { %v2233_v33 = vsel %vm2207_vm8, %v2200_v36, %v1591_v52  ;;  %v873_v6 = vpack.c.bf16 %v855_v39, %v854_v60  ;;  %v615_v29 = vld [vmem:[#allocation2 + $0x1af] sm:$0xff] }
 0x249   : > { %v3377_v8 = vadd.f32 %v5334_v57, %v3338_v34  ;;  %v3339_v61 = vmul.f32 %v5324_v63, %v3226_v45  ;;  %v633_v52 = vpack.c.bf16 %v615_v29, %v614_v15 }
 0x24a   : > { %v1879_v22 = vpop.permute.xlu1 %1878 }
 0x24b   : > { %v3409_v55 = vmax.f32 %v3377_v8, 0.0  ;;  %v3378_v14 = vadd.f32 %v5334_v57, %v3339_v61  ;;  %v1927_v32 = vpop.permute.xlu0 %1926  ;;  %v2472_v13 = vsel %vm2434_vm7, %v2427_v53, %v1879_v22 }
 0x24c   : > { %3131 = vmatprep.mubr.bf16.mxu0 %v2472_v13  ;;  %v2508_v5 = vsel %vm417_vm0, %v1879_v22, %v1927_v32  ;;  %v2167_v13 = vsel %vm246_vm1, %v633_v52, %v4812_v41 }
 0x24d   : > { %v3762_v51 = vpack.c.bf16 %v3409_v55, %v3409_v55  ;;  %v3410_v7 = vmax.f32 %v3378_v14, 0.0  ;;  %v2202_v16 = vsel %vm2174_vm5, %v2167_v13, %v4874_v17 }
 0x24e   : > { %v1639_v4 = vpop.permute.xlu1 %1638 }
 0x24f   : > { %3570 = vst.msk [vmem:[%s5355_s12 + $0x18] sm:$0xf] %vm3563_vm9, %v3762_v51  ;;  %v3763_v59 = vpack.c.bf16 %v3410_v7, %v3410_v7  ;;  %v1975_v19 = vpop.permute.xlu0 %1974  ;;  %v2278_v46 = vsel %vm2240_vm6, %v2233_v33, %v1639_v4 }
 0x250   : > { %3132 = vmatmul.mubr.bf16.gmra.mrb[48].mxu0 %v2278_v46  ;;  %v2540_v44 = vsel %vm246_vm1, %v2508_v5, %v1975_v19 }
 0x251   : > { %3571 = vst.msk [vmem:[%s5355_s12 + $0x1c] sm:$0xf] %vm3563_vm9, %v3763_v59 }
 0x252   : > { %v2023_v21 = vpop.permute.xlu1 %2022 }
 0x253   : > { %v2071_v38 = vpop.permute.xlu0 %2070  ;;  %v3986_v0 = vpop.f32.mrb[16].mxu0  ;;  %v2572_v54 = vsel %vm2369_vm4, %v2540_v44, %v2023_v21 }
 0x254   : > { %v3987_v58 = vpop.f32.mrb[17].mxu0  ;;  %v2604_v47 = vsel %vm2207_vm8, %v2572_v54, %v2071_v38 }
 0x255   : > { %v3988_v11 = vadd.f32 %v3987_v58, %v3986_v0  ;;  %v3989_v35 = vpop.f32.mrb[18].mxu0 }
 0x256   : > { %v2700_v31 = vpop.permute.xlu1 %2699  ;;  %v3990_v24 = vpop.f32.mrb[19].mxu0 }
 0x257   : > { %v1689_v10 = vpop.permute.xlu0 %1688  ;;  %v2745_v37 = vsel %vm246_vm1, %v5296_v50, %v2700_v31  ;;  %v3991_v48 = vadd.f32 %v3990_v24, %v3989_v35 }
 0x258   : > { %3713 = vmatprep.mubr.msk.bf16.mxu1 %vm2174_vm5, %v2745_v37  ;;  %v2330_v2 = vsel %vm417_vm0, %v873_v6, %v1689_v10 }
 0x25a   : > { %v2119_v26 = vpop.permute.xlu1 %2118 }
 0x25b   : > { %v1737_v3 = vpop.permute.xlu0 %1736  ;;  %v2648_v23 = vsel %vm2434_vm7, %v2604_v47, %v2119_v26 }
 0x25c   : > { %3293 = vmatmul.mubr.bf16.gmra.mrb[48].mxu1 %v2648_v23  ;;  %v2364_v56 = vsel %vm2174_vm5, %v2330_v2, %v1737_v3  ;;  %v616_v23 = vld [vmem:[#allocation2 + $0x1c7] sm:$0xff]  ;;  %v617_v2 = vld [vmem:[#allocation2 + $0x1cf] sm:$0xff] }
 0x25d   : > { %v634_v52 = vpack.c.bf16 %v617_v2, %v616_v23 }
 0x25e   : > { %v1785_v9 = vpop.permute.xlu1 %1784 }
 0x25f   : > { %v1833_v28 = vpop.permute.xlu0 %1832  ;;  %v3230_v50 = vpop.f32.mrb[16].mxu1  ;;  %v2397_v30 = vsel %vm2369_vm4, %v2364_v56, %v1785_v9 }
 0x260   : > { %v3231_v34 = vadd.f32 %v3988_v11, %v3230_v50  ;;  %v3232_v45 = vpop.f32.mrb[17].mxu1  ;;  %v2429_v22 = vsel %vm2240_vm6, %v2397_v30, %v1833_v28 }
 0x261   : > { %v3233_v27 = vpop.f32.mrb[18].mxu1 }
 0x262   : > { %v3340_v1 = vmul.f32 %v5324_v63, %v3231_v34  ;;  %v3234_v8 = vadd.f32 %v3991_v48, %v3233_v27  ;;  %v3235_v61 = vpop.f32.mrb[19].mxu1  ;;  %v1593_v62 = vpop.permute.xlu1 %1592 }
 0x263   : > { %v1881_v53 = vpop.permute.xlu0 %1880  ;;  %v2235_v33 = vsel %vm2207_vm8, %v2202_v16, %v1593_v62 }
 0x264   : > { %v3379_v55 = vadd.f32 %v5334_v57, %v3340_v1  ;;  %v3341_v14 = vmul.f32 %v5324_v63, %v3234_v8  ;;  %v2475_v32 = vsel %vm2434_vm7, %v2429_v22, %v1881_v53 }
 0x265   : > { %3139 = vmatprep.mubr.bf16.mxu0 %v2475_v32 }
 0x266   : > { %v3411_v36 = vmax.f32 %v3379_v55, 0.0  ;;  %v3380_v51 = vadd.f32 %v5334_v57, %v3341_v14  ;;  %v1929_v7 = vpop.permute.xlu1 %1928  ;;  %v2170_v14 = vsel %vm246_vm1, %v634_v52, %v4814_v42 }
 0x267   : > { %v1641_v4 = vpop.permute.xlu0 %1640  ;;  %v2510_v58 = vsel %vm417_vm0, %v1881_v53, %v1929_v7  ;;  %v2204_v32 = vsel %vm2174_vm5, %v2170_v14, %v4876_v18 }
 0x268   : > { %v3764_v59 = vpack.c.bf16 %v3411_v36, %v3411_v36  ;;  %v3412_v19 = vmax.f32 %v3380_v51, 0.0  ;;  %v2281_v46 = vsel %vm2240_vm6, %v2235_v33, %v1641_v4 }
 0x269   : > { %3140 = vmatmul.mubr.bf16.gmra.mrb[52].mxu0 %v2281_v46 }
 0x26a   : > { %3572 = vst.msk [vmem:[%s5355_s12 + $0x20] sm:$0xf] %vm3563_vm9, %v3764_v59  ;;  %v3765_v41 = vpack.c.bf16 %v3412_v19, %v3412_v19  ;;  %v1977_v21 = vpop.permute.xlu1 %1976 }
 0x26b   : > { %v2025_v38 = vpop.permute.xlu0 %2024  ;;  %v2542_v60 = vsel %vm246_vm1, %v2510_v58, %v1977_v21 }
 0x26c   : > { %3573 = vst.msk [vmem:[%s5355_s12 + $0x24] sm:$0xf] %vm3563_vm9, %v3765_v41  ;;  %v3992_v17 = vpop.f32.mrb[20].mxu0  ;;  %v2574_v54 = vsel %vm2369_vm4, %v2542_v60, %v2025_v38 }
 0x26d   : > { %v3993_v0 = vpop.f32.mrb[21].mxu0 }
 0x26e   : > { %v3994_v5 = vadd.f32 %v3993_v0, %v3992_v17  ;;  %v3995_v11 = vpop.f32.mrb[22].mxu0  ;;  %v2073_v35 = vpop.permute.xlu1 %2072 }
 0x26f   : > { %v2702_v39 = vpop.permute.xlu0 %2701  ;;  %v3996_v44 = vpop.f32.mrb[23].mxu0  ;;  %v2606_v37 = vsel %vm2207_vm8, %v2574_v54, %v2073_v35  ;;  %v618_v54 = vld [vmem:[#allocation2 + $0x1e7] sm:$0xff] }
 0x270   : > { %v2748_v31 = vsel %vm246_vm1, %v5369_v49, %v2702_v39  ;;  %v3997_v24 = vadd.f32 %v3996_v44, %v3995_v11 }
 0x271   : > { %3714 = vmatprep.mubr.msk.bf16.mxu1 %vm2174_vm5, %v2748_v31 }
 0x272   : > { %v1691_v10 = vpop.permute.xlu1 %1690 }
 0x273   : > { %v2121_v48 = vpop.permute.xlu0 %2120  ;;  %v2333_v49 = vsel %vm417_vm0, %v5271_v25, %v1691_v10  ;;  %v619_v10 = vld [vmem:[#allocation2 + $0x1ef] sm:$0xff] }
 0x274   : > { %v2651_v6 = vsel %vm2434_vm7, %v2606_v37, %v2121_v48  ;;  %v635_v23 = vpack.c.bf16 %v619_v10, %v618_v54 }
 0x275   : > { %3301 = vmatmul.mubr.bf16.gmra.mrb[52].mxu1 %v2651_v6 }
 0x276   : > { %v1739_v26 = vpop.permute.xlu1 %1738 }
 0x277   : > { %v1787_v47 = vpop.permute.xlu0 %1786  ;;  %v2366_v9 = vsel %vm2174_vm5, %v2333_v49, %v1739_v26 }
 0x278   : > { %v3238_v3 = vpop.f32.mrb[20].mxu1  ;;  %v2399_v8 = vsel %vm2369_vm4, %v2366_v9, %v1787_v47 }
 0x279   : > { %v3239_v15 = vadd.f32 %v3994_v5, %v3238_v3  ;;  %v3240_v29 = vpop.f32.mrb[21].mxu1 }
 0x27a   : > { %v3241_v56 = vpop.f32.mrb[22].mxu1  ;;  %v1835_v28 = vpop.permute.xlu1 %1834 }
 0x27b   : > { %v3342_v50 = vmul.f32 %v5324_v63, %v3239_v15  ;;  %v3242_v30 = vadd.f32 %v3997_v24, %v3241_v56  ;;  %v1595_v34 = vpop.permute.xlu0 %1594  ;;  %v3243_v45 = vpop.f32.mrb[23].mxu1  ;;  %v2431_v25 = vsel %vm2240_vm6, %v2399_v8, %v1835_v28 }
 0x27c   : > { %v2237_v36 = vsel %vm2207_vm8, %v2204_v32, %v1595_v34  ;;  %v2173_v34 = vsel %vm246_vm1, %v635_v23, %v4818_v43 }
 0x27d   : > { %v3381_v27 = vadd.f32 %v5334_v57, %v3342_v50  ;;  %v3343_v1 = vmul.f32 %v5324_v63, %v3242_v30  ;;  %v2206_v45 = vsel %vm2174_vm5, %v2173_v34, %v4883_v20 }
 0x27e   : > { %v1883_v61 = vpop.permute.xlu1 %1882 }
 0x27f   : > { %v3413_v62 = vmax.f32 %v3381_v27, 0.0  ;;  %v3382_v53 = vadd.f32 %v5334_v57, %v3343_v1  ;;  %v1931_v22 = vpop.permute.xlu0 %1930  ;;  %v2478_v55 = vsel %vm2434_vm7, %v2431_v25, %v1883_v61 }
 0x280   : > { %3147 = vmatprep.mubr.bf16.mxu0 %v2478_v55  ;;  %v2512_v18 = vsel %vm417_vm0, %v1883_v61, %v1931_v22  ;;  %v1388_v22 = vld [vmem:[#allocation2 + $0x229] sm:$0xff]  ;;  %v1389_v55 = vld [vmem:[#allocation2 + $0x231] sm:$0xff] }
 0x281   : > { %v3766_v13 = vpack.c.bf16 %v3413_v62, %v3413_v62  ;;  %v3414_v16 = vmax.f32 %v3382_v53, 0.0 }
 0x282   : > { %v1643_v51 = vpop.permute.xlu1 %1642 }
 0x283   : > { %3574 = vst.msk [vmem:[%s5355_s12 + $0x28] sm:$0xf] %vm3563_vm9, %v3766_v13  ;;  %v3767_v7 = vpack.c.bf16 %v3414_v16, %v3414_v16  ;;  %v1979_v33 = vpop.permute.xlu0 %1978  ;;  %v2284_v4 = vsel %vm2240_vm6, %v2237_v36, %v1643_v51  ;;  %v1405_v13 = vpack.c.bf16 %v1389_v55, %v1388_v22 }
 0x284   : > { %3148 = vmatmul.mubr.bf16.gmra.mrb[56].mxu0 %v2284_v4  ;;  %v2544_v38 = vsel %vm246_vm1, %v2512_v18, %v1979_v33 }
 0x285   : > { %3575 = vst.msk [vmem:[%s5355_s12 + $0x2c] sm:$0xf] %vm3563_vm9, %v3767_v7 }
 0x286   : > { %v2027_v59 = vpop.permute.xlu1 %2026 }
 0x287   : > { %v2075_v42 = vpop.permute.xlu0 %2074  ;;  %v3998_v19 = vpop.f32.mrb[24].mxu0  ;;  %v2576_v58 = vsel %vm2369_vm4, %v2544_v38, %v2027_v59 }
 0x288   : > { %v3999_v46 = vpop.f32.mrb[25].mxu0  ;;  %v2608_v39 = vsel %vm2207_vm8, %v2576_v58, %v2075_v42 }
 0x289   : > { %v4000_v41 = vadd.f32 %v3999_v46, %v3998_v19  ;;  %v4001_v21 = vpop.f32.mrb[26].mxu0 }
 0x28a   : > { %v2704_v17 = vpop.permute.xlu1 %2703  ;;  %v4002_v0 = vpop.f32.mrb[27].mxu0 }
 0x28b   : > { %v1693_v5 = vpop.permute.xlu0 %1692  ;;  %v2751_v11 = vsel %vm246_vm1, %v5416_v12, %v2704_v17  ;;  %v4003_v35 = vadd.f32 %v4002_v0, %v4001_v21 }
 0x28c   : > { %3715 = vmatprep.mubr.msk.bf16.mxu1 %vm2174_vm5, %v2751_v11  ;;  %v2336_v24 = vsel %vm417_vm0, %v5319_v40, %v1693_v5 }
 0x28e   : > { %v2123_v60 = vpop.permute.xlu1 %2122 }
 0x28f   : > { %v1741_v44 = vpop.permute.xlu0 %1740  ;;  %v2654_v31 = vsel %vm2434_vm7, %v2608_v39, %v2123_v60 }
 0x290   : > { %3309 = vmatmul.mubr.bf16.gmra.mrb[56].mxu1 %v2654_v31  ;;  %v2368_v48 = vsel %vm2174_vm5, %v2336_v24, %v1741_v44 }
 0x292   : > { %v1789_v37 = vpop.permute.xlu1 %1788 }
 0x293   : > { %v1837_v6 = vpop.permute.xlu0 %1836  ;;  %v3246_v12 = vpop.f32.mrb[24].mxu1  ;;  %v2401_v26 = vsel %vm2369_vm4, %v2368_v48, %v1789_v37 }
 0x294   : > { %v3247_v47 = vadd.f32 %v4000_v41, %v3246_v12  ;;  %v3248_v3 = vpop.f32.mrb[25].mxu1  ;;  %v2433_v56 = vsel %vm2240_vm6, %v2401_v26, %v1837_v6 }
 0x295   : > { %v3249_v2 = vpop.f32.mrb[26].mxu1 }
 0x296   : > { %v3344_v49 = vmul.f32 %v5324_v63, %v3247_v47  ;;  %v3250_v15 = vadd.f32 %v4003_v35, %v3249_v2  ;;  %v3251_v29 = vpop.f32.mrb[27].mxu1  ;;  %v1597_v9 = vpop.permute.xlu1 %1596 }
 0x297   : > { %v1885_v40 = vpop.permute.xlu0 %1884  ;;  %v2239_v8 = vsel %vm2207_vm8, %v2206_v45, %v1597_v9 }
 0x298   : > { %v3383_v28 = vadd.f32 %v5334_v57, %v3344_v49  ;;  %v3345_v50 = vmul.f32 %v5324_v63, %v3250_v15  ;;  %v2481_v30 = vsel %vm2434_vm7, %v2433_v56, %v1885_v40 }
 0x299   : > { %3155 = vmatprep.mubr.bf16.mxu0 %v2481_v30 }
 0x29a   : > { %v3415_v52 = vmax.f32 %v3383_v28, 0.0  ;;  %v3384_v27 = vadd.f32 %v5334_v57, %v3345_v50  ;;  %v1933_v1 = vpop.permute.xlu1 %1932 }
 0x29b   : > { %v1645_v25 = vpop.permute.xlu0 %1644  ;;  %v2514_v16 = vsel %vm417_vm0, %v1885_v40, %v1933_v1 }
 0x29c   : > { %v3768_v61 = vpack.c.bf16 %v3415_v52, %v3415_v52  ;;  %v3416_v62 = vmax.f32 %v3384_v27, 0.0  ;;  %v2287_v53 = vsel %vm2240_vm6, %v2239_v8, %v1645_v25 }
 0x29d   : > { %3156 = vmatmul.mubr.bf16.gmra.mrb[60].mxu0 %v2287_v53 }
 0x29e   : > { %3576 = vst.msk [vmem:[%s5355_s12 + $0x30] sm:$0xf] %vm3563_vm9, %v3768_v61  ;;  %v3769_v43 = vpack.c.bf16 %v3416_v62, %v3416_v62  ;;  %v1981_v14 = vpop.permute.xlu1 %1980 }
 0x29f   : > { %v2029_v20 = vpop.permute.xlu0 %2028  ;;  %v2546_v51 = vsel %vm246_vm1, %v2514_v16, %v1981_v14 }
 0x2a0   : > { %3577 = vst.msk [vmem:[%s5355_s12 + $0x34] sm:$0xf] %vm3563_vm9, %v3769_v43  ;;  %v4004_v32 = vpop.f32.mrb[28].mxu0  ;;  %v2578_v18 = vsel %vm2369_vm4, %v2546_v51, %v2029_v20 }
 0x2a1   : > { %v4005_v36 = vpop.f32.mrb[29].mxu0 }
 0x2a2   : > { %v4006_v7 = vadd.f32 %v4005_v36, %v4004_v32  ;;  %v4007_v33 = vpop.f32.mrb[30].mxu0  ;;  %v2077_v4 = vpop.permute.xlu1 %2076  ;;  %v5599_v32 = vld [vmem:[%s5663_s4] ss:$0 sm:$0xff] }
 0x2a3   : > { %v4008_v59 = vpop.f32.mrb[31].mxu0  ;;  %v2706_v42 = vpop.permute.xlu0 %2705  ;;  %v2610_v41 = vsel %vm2207_vm8, %v2578_v18, %v2077_v4 }
 0x2a4   : > { %v4009_v19 = vadd.f32 %v4008_v59, %v4007_v33  ;;  %v2754_v46 = vsel %vm246_vm1, %v1405_v13, %v2706_v42 }
 0x2a5   : > { %3716 = vmatprep.mubr.msk.bf16.mxu1 %vm2174_vm5, %v2754_v46 }
 0x2a6   : > { %v2125_v21 = vpop.permute.xlu1 %2124 }
 0x2a7   : > { %v2657_v38 = vsel %vm2434_vm7, %v2610_v41, %v2125_v21 }
 0x2a8   : > { %3317 = vmatmul.mubr.bf16.gmra.mrb[60].mxu1 %v2657_v38 }
 0x2ac   : > { %v3254_v17 = vpop.f32.mrb[28].mxu1 }
 0x2ad   : > { %v3255_v0 = vadd.f32 %v4006_v7, %v3254_v17  ;;  %v3256_v58 = vpop.f32.mrb[29].mxu1 }
 0x2ae   : > { %v3257_v5 = vpop.f32.mrb[30].mxu1 }
 0x2af   : > { %v3346_v11 = vmul.f32 %v5324_v63, %v3255_v0  ;;  %v3258_v35 = vadd.f32 %v4009_v19, %v3257_v5  ;;  %v3259_v60 = vpop.f32.mrb[31].mxu1 }
 0x2b1   : > { %v3385_v39 = vadd.f32 %v5334_v57, %v3346_v11  ;;  %v3347_v44 = vmul.f32 %v5324_v63, %v3258_v35 }
 0x2b3   : > { %v3417_v31 = vmax.f32 %v3385_v39, 0.0  ;;  %v3386_v24 = vadd.f32 %v5334_v57, %v3347_v44 }
 0x2b5   : > { %v3770_v54 = vpack.c.bf16 %v3417_v31, %v3417_v31  ;;  %v3418_v10 = vmax.f32 %v3386_v24, 0.0 }
 0x2b7   : > { %3578 = vst.msk [vmem:[%s5355_s12 + $0x38] sm:$0xf] %vm3563_vm9, %v3770_v54  ;;  %v3771_v37 = vpack.c.bf16 %v3418_v10, %v3418_v10 }
 0x2b9   : > { %3579 = vst.msk [vmem:[%s5355_s12 + $0x3c] sm:$0xf] %vm3563_vm9, %v3771_v37 }
 0x2bb   : > { %v4010_v48 = vpop.f32.mrb[32].mxu0 }
 0x2bc   : > { %v4011_v6 = vpop.f32.mrb[33].mxu0 }
 0x2bd   : > { %v4012_v12 = vadd.f32 %v4011_v6, %v4010_v48  ;;  %v4013_v26 = vpop.f32.mrb[34].mxu0 }
 0x2be   : > { %v4014_v47 = vpop.f32.mrb[35].mxu0 }
 0x2bf   : > { %v4015_v3 = vadd.f32 %v4014_v47, %v4013_v26 }
 0x2c7   : > { %v3262_v23 = vpop.f32.mrb[32].mxu1 }
 0x2c8   : > { %v3263_v2 = vadd.f32 %v4012_v12, %v3262_v23  ;;  %v3264_v49 = vpop.f32.mrb[33].mxu1 }
 0x2c9   : > { %v3265_v15 = vpop.f32.mrb[34].mxu1 }
 0x2ca   : > { %v3348_v29 = vmul.f32 %v5324_v63, %v3263_v2  ;;  %v3266_v9 = vadd.f32 %v4015_v3, %v3265_v15  ;;  %v3267_v40 = vpop.f32.mrb[35].mxu1 }
 0x2cc   : > { %v3387_v56 = vadd.f32 %v5334_v57, %v3348_v29  ;;  %v3349_v28 = vmul.f32 %v5324_v63, %v3266_v9 }
 0x2ce   : > { %v3419_v50 = vmax.f32 %v3387_v56, 0.0  ;;  %v3388_v30 = vadd.f32 %v5334_v57, %v3349_v28  ;;  %v5593_v57 = vld [vmem:[%s5662_s3] ss:$0 sm:$0xff] }
 0x2d0   : > { %v3772_v34 = vpack.c.bf16 %v3419_v50, %v3419_v50  ;;  %v3420_v45 = vmax.f32 %v3388_v30, 0.0 }
 0x2d2   : > { %3580 = vst.msk [vmem:[%s5355_s12 + $0x40] sm:$0xf] %vm3563_vm9, %v3772_v34  ;;  %v3773_v52 = vpack.c.bf16 %v3420_v45, %v3420_v45 }
 0x2d4   : > { %3581 = vst.msk [vmem:[%s5355_s12 + $0x44] sm:$0xf] %vm3563_vm9, %v3773_v52  ;;  %v4016_v27 = vpop.f32.mrb[36].mxu0 }
 0x2d5   : > { %v4017_v1 = vpop.f32.mrb[37].mxu0 }
 0x2d6   : > { %v4018_v8 = vadd.f32 %v4017_v1, %v4016_v27  ;;  %v4019_v25 = vpop.f32.mrb[38].mxu0 }
 0x2d7   : > { %v4020_v61 = vpop.f32.mrb[39].mxu0 }
 0x2d8   : > { %v4021_v62 = vadd.f32 %v4020_v61, %v4019_v25 }
 0x2e0   : > { %v3270_v53 = vpop.f32.mrb[36].mxu1 }
 0x2e1   : > { %v3271_v22 = vadd.f32 %v4018_v8, %v3270_v53  ;;  %v3272_v63 = vpop.f32.mrb[37].mxu1 }
 0x2e2   : > { %v3273_v55 = vpop.f32.mrb[38].mxu1 }
 0x2e3   : > { %v3350_v43 = vmul.f32 %v5593_v57, %v3271_v22  ;;  %v3274_v14 = vadd.f32 %v4021_v62, %v3273_v55  ;;  %v3275_v20 = vpop.f32.mrb[39].mxu1 }
 0x2e5   : > { %v3389_v13 = vadd.f32 %v5599_v32, %v3350_v43  ;;  %v3351_v16 = vmul.f32 %v5593_v57, %v3274_v14 }
 0x2e7   : > { %v3421_v36 = vmax.f32 %v3389_v13, 0.0  ;;  %v3390_v51 = vadd.f32 %v5599_v32, %v3351_v16 }
 0x2e9   : > { %v3774_v7 = vpack.c.bf16 %v3421_v36, %v3421_v36  ;;  %v3422_v33 = vmax.f32 %v3390_v51, 0.0 }
 0x2eb   : > { %3582 = vst.msk [vmem:[%s5355_s12 + $0x48] sm:$0xf] %vm3563_vm9, %v3774_v7  ;;  %v3775_v4 = vpack.c.bf16 %v3422_v33, %v3422_v33 }
 0x2ed   : > { %3583 = vst.msk [vmem:[%s5355_s12 + $0x4c] sm:$0xf] %vm3563_vm9, %v3775_v4 }
 0x2ef   : > { %v4022_v59 = vpop.f32.mrb[40].mxu0 }
 0x2f0   : > { %v4023_v42 = vpop.f32.mrb[41].mxu0 }
 0x2f1   : > { %v4024_v19 = vadd.f32 %v4023_v42, %v4022_v59  ;;  %v4025_v46 = vpop.f32.mrb[42].mxu0 }
 0x2f2   : > { %v4026_v18 = vpop.f32.mrb[43].mxu0 }
 0x2f3   : > { %v4027_v41 = vadd.f32 %v4026_v18, %v4025_v46 }
 0x2fb   : > { %v3278_v21 = vpop.f32.mrb[40].mxu1 }
 0x2fc   : > { %v3279_v38 = vadd.f32 %v4024_v19, %v3278_v21  ;;  %v3280_v17 = vpop.f32.mrb[41].mxu1 }
 0x2fd   : > { %v3281_v0 = vpop.f32.mrb[42].mxu1 }
 0x2fe   : > { %v3352_v58 = vmul.f32 %v5593_v57, %v3279_v38  ;;  %v3282_v5 = vadd.f32 %v4027_v41, %v3281_v0  ;;  %v3283_v11 = vpop.f32.mrb[43].mxu1 }
 0x300   : > { %v3391_v35 = vadd.f32 %v5599_v32, %v3352_v58  ;;  %v3353_v60 = vmul.f32 %v5593_v57, %v3282_v5 }
 0x302   : > { %v3423_v39 = vmax.f32 %v3391_v35, 0.0  ;;  %v3392_v44 = vadd.f32 %v5599_v32, %v3353_v60 }
 0x304   : > { %v3776_v31 = vpack.c.bf16 %v3423_v39, %v3423_v39  ;;  %v3424_v24 = vmax.f32 %v3392_v44, 0.0 }
 0x306   : > { %3584 = vst.msk [vmem:[%s5355_s12 + $0x50] sm:$0xf] %vm3563_vm9, %v3776_v31  ;;  %v3777_v54 = vpack.c.bf16 %v3424_v24, %v3424_v24 }
 0x308   : > { %3585 = vst.msk [vmem:[%s5355_s12 + $0x54] sm:$0xf] %vm3563_vm9, %v3777_v54  ;;  %v4028_v10 = vpop.f32.mrb[44].mxu0 }
 0x309   : > { %v4029_v37 = vpop.f32.mrb[45].mxu0 }
 0x30a   : > { %v4030_v48 = vadd.f32 %v4029_v37, %v4028_v10  ;;  %v4031_v6 = vpop.f32.mrb[46].mxu0 }
 0x30b   : > { %v4032_v12 = vpop.f32.mrb[47].mxu0 }
 0x30c   : > { %v4033_v26 = vadd.f32 %v4032_v12, %v4031_v6 }
 0x314   : > { %v3286_v47 = vpop.f32.mrb[44].mxu1 }
 0x315   : > { %v3287_v3 = vadd.f32 %v4030_v48, %v3286_v47  ;;  %v3288_v23 = vpop.f32.mrb[45].mxu1 }
 0x316   : > { %v3289_v2 = vpop.f32.mrb[46].mxu1 }
 0x317   : > { %v3354_v49 = vmul.f32 %v5593_v57, %v3287_v3  ;;  %v3290_v15 = vadd.f32 %v4033_v26, %v3289_v2  ;;  %v3291_v29 = vpop.f32.mrb[47].mxu1 }
 0x319   : > { %v3393_v9 = vadd.f32 %v5599_v32, %v3354_v49  ;;  %v3355_v40 = vmul.f32 %v5593_v57, %v3290_v15 }
 0x31b   : > { %v3425_v56 = vmax.f32 %v3393_v9, 0.0  ;;  %v3394_v28 = vadd.f32 %v5599_v32, %v3355_v40 }
 0x31d   : > { %v3778_v50 = vpack.c.bf16 %v3425_v56, %v3425_v56  ;;  %v3426_v30 = vmax.f32 %v3394_v28, 0.0 }
 0x31f   : > { %3586 = vst.msk [vmem:[%s5355_s12 + $0x58] sm:$0xf] %vm3563_vm9, %v3778_v50  ;;  %v3779_v34 = vpack.c.bf16 %v3426_v30, %v3426_v30 }
 0x321   : > { %3587 = vst.msk [vmem:[%s5355_s12 + $0x5c] sm:$0xf] %vm3563_vm9, %v3779_v34 }
 0x323   : > { %v4034_v45 = vpop.f32.mrb[48].mxu0 }
 0x324   : > { %v4035_v52 = vpop.f32.mrb[49].mxu0 }
 0x325   : > { %v4036_v27 = vadd.f32 %v4035_v52, %v4034_v45  ;;  %v4037_v1 = vpop.f32.mrb[50].mxu0 }
 0x326   : > { %v4038_v8 = vpop.f32.mrb[51].mxu0 }
 0x327   : > { %v4039_v25 = vadd.f32 %v4038_v8, %v4037_v1 }
 0x32f   : > { %v3294_v61 = vpop.f32.mrb[48].mxu1 }
 0x330   : > { %v3295_v62 = vadd.f32 %v4036_v27, %v3294_v61  ;;  %v3296_v53 = vpop.f32.mrb[49].mxu1 }
 0x331   : > { %v3297_v22 = vpop.f32.mrb[50].mxu1 }
 0x332   : > { %v3356_v63 = vmul.f32 %v5593_v57, %v3295_v62  ;;  %v3298_v55 = vadd.f32 %v4039_v25, %v3297_v22  ;;  %v3299_v43 = vpop.f32.mrb[51].mxu1 }
 0x334   : > { %v3395_v14 = vadd.f32 %v5599_v32, %v3356_v63  ;;  %v3357_v20 = vmul.f32 %v5593_v57, %v3298_v55 }
 0x336   : > { %v3427_v13 = vmax.f32 %v3395_v14, 0.0  ;;  %v3396_v16 = vadd.f32 %v5599_v32, %v3357_v20 }
 0x338   : > { %v3780_v36 = vpack.c.bf16 %v3427_v13, %v3427_v13  ;;  %v3428_v51 = vmax.f32 %v3396_v16, 0.0 }
 0x33a   : > { %3588 = vst.msk [vmem:[%s5355_s12 + $0x60] sm:$0xf] %vm3563_vm9, %v3780_v36  ;;  %v3781_v7 = vpack.c.bf16 %v3428_v51, %v3428_v51 }
 0x33c   : > { %3589 = vst.msk [vmem:[%s5355_s12 + $0x64] sm:$0xf] %vm3563_vm9, %v3781_v7  ;;  %v4040_v33 = vpop.f32.mrb[52].mxu0 }
 0x33d   : > { %v4041_v4 = vpop.f32.mrb[53].mxu0 }
 0x33e   : > { %v4042_v59 = vadd.f32 %v4041_v4, %v4040_v33  ;;  %v4043_v42 = vpop.f32.mrb[54].mxu0 }
 0x33f   : > { %v4044_v19 = vpop.f32.mrb[55].mxu0 }
 0x340   : > { %v4045_v46 = vadd.f32 %v4044_v19, %v4043_v42 }
 0x348   : > { %v3302_v18 = vpop.f32.mrb[52].mxu1 }
 0x349   : > { %v3303_v41 = vadd.f32 %v4042_v59, %v3302_v18  ;;  %v3304_v21 = vpop.f32.mrb[53].mxu1 }
 0x34a   : > { %v3305_v38 = vpop.f32.mrb[54].mxu1 }
 0x34b   : > { %v3358_v17 = vmul.f32 %v5593_v57, %v3303_v41  ;;  %v3306_v0 = vadd.f32 %v4045_v46, %v3305_v38  ;;  %v3307_v58 = vpop.f32.mrb[55].mxu1 }
 0x34d   : > { %v3397_v5 = vadd.f32 %v5599_v32, %v3358_v17  ;;  %v3359_v11 = vmul.f32 %v5593_v57, %v3306_v0 }
 0x34f   : > { %v3429_v35 = vmax.f32 %v3397_v5, 0.0  ;;  %v3398_v60 = vadd.f32 %v5599_v32, %v3359_v11 }
 0x351   : > { %v3782_v39 = vpack.c.bf16 %v3429_v35, %v3429_v35  ;;  %v3430_v44 = vmax.f32 %v3398_v60, 0.0 }
 0x353   : > { %3590 = vst.msk [vmem:[%s5355_s12 + $0x68] sm:$0xf] %vm3563_vm9, %v3782_v39  ;;  %v3783_v31 = vpack.c.bf16 %v3430_v44, %v3430_v44 }
 0x355   : > { %3591 = vst.msk [vmem:[%s5355_s12 + $0x6c] sm:$0xf] %vm3563_vm9, %v3783_v31 }
 0x357   : > { %v4046_v24 = vpop.f32.mrb[56].mxu0 }
 0x358   : > { %v4047_v54 = vpop.f32.mrb[57].mxu0 }
 0x359   : > { %v4048_v10 = vadd.f32 %v4047_v54, %v4046_v24  ;;  %v4049_v37 = vpop.f32.mrb[58].mxu0 }
 0x35a   : > { %v4050_v48 = vpop.f32.mrb[59].mxu0 }
 0x35b   : > { %v4051_v6 = vadd.f32 %v4050_v48, %v4049_v37 }
 0x363   : > { %v3310_v12 = vpop.f32.mrb[56].mxu1 }
 0x364   : > { %v3311_v26 = vadd.f32 %v4048_v10, %v3310_v12  ;;  %v3312_v47 = vpop.f32.mrb[57].mxu1 }
 0x365   : > { %v3313_v3 = vpop.f32.mrb[58].mxu1 }
 0x366   : > { %v3360_v23 = vmul.f32 %v5593_v57, %v3311_v26  ;;  %v3314_v2 = vadd.f32 %v4051_v6, %v3313_v3  ;;  %v3315_v49 = vpop.f32.mrb[59].mxu1 }
 0x368   : > { %v3399_v15 = vadd.f32 %v5599_v32, %v3360_v23  ;;  %v3361_v29 = vmul.f32 %v5593_v57, %v3314_v2 }
 0x36a   : > { %v3431_v9 = vmax.f32 %v3399_v15, 0.0  ;;  %v3400_v40 = vadd.f32 %v5599_v32, %v3361_v29 }
 0x36c   : > { %v3784_v56 = vpack.c.bf16 %v3431_v9, %v3431_v9  ;;  %v3432_v28 = vmax.f32 %v3400_v40, 0.0 }
 0x36e   : > { %3592 = vst.msk [vmem:[%s5355_s12 + $0x70] sm:$0xf] %vm3563_vm9, %v3784_v56  ;;  %v3785_v50 = vpack.c.bf16 %v3432_v28, %v3432_v28 }
 0x370   : > { %3593 = vst.msk [vmem:[%s5355_s12 + $0x74] sm:$0xf] %vm3563_vm9, %v3785_v50  ;;  %v4052_v30 = vpop.f32.mrb[60].mxu0 }
 0x371   : > { %v4053_v34 = vpop.f32.mrb[61].mxu0 }
 0x372   : > { %v4054_v45 = vadd.f32 %v4053_v34, %v4052_v30  ;;  %v4055_v52 = vpop.f32.mrb[62].mxu0 }
 0x373   : > { %v4056_v27 = vpop.f32.mrb[63].mxu0 }
 0x374   : > { %v4057_v1 = vadd.f32 %v4056_v27, %v4055_v52 }
 0x37b   : > { %v3318_v8 = vpop.f32.mrb[60].mxu1 }
 0x37c   : > { %v3319_v25 = vadd.f32 %v4054_v45, %v3318_v8  ;;  %v3320_v61 = vpop.f32.mrb[61].mxu1 }
 0x37d   : > { %v3321_v62 = vpop.f32.mrb[62].mxu1 }
 0x37e   : > { %v3362_v53 = vmul.f32 %v5593_v57, %v3319_v25  ;;  %v3322_v22 = vadd.f32 %v4057_v1, %v3321_v62  ;;  %v3323_v63 = vpop.f32.mrb[63].mxu1 }
 0x380   : > { %v3401_v55 = vadd.f32 %v5599_v32, %v3362_v53  ;;  %v3363_v43 = vmul.f32 %v5593_v57, %v3322_v22 }
 0x382   : > { %v3433_v14 = vmax.f32 %v3401_v55, 0.0  ;;  %v3402_v20 = vadd.f32 %v5599_v32, %v3363_v43 }
 0x384   : > { %v3786_v13 = vpack.c.bf16 %v3433_v14, %v3433_v14  ;;  %v3434_v16 = vmax.f32 %v3402_v20, 0.0 }
 0x386   : > { %3594 = vst.msk [vmem:[%s5355_s12 + $0x78] sm:$0xf] %vm3563_vm9, %v3786_v13  ;;  %v3787_v36 = vpack.c.bf16 %v3434_v16, %v3434_v16 }
 0x388   : > { %3595 = vst.msk [vmem:[%s5355_s12 + $0x7c] sm:$0xf] %vm3563_vm9, %v3787_v36 }
 0x389 PF: > { %s15_s18 = sadd.s32 1, %s4110_s18  }
 0x38a   : > { %p12_p4 = scmp.ge.s32.totalorder %s15_s18, 4  }
 0x38c   :  { %14 = sbr.rel (!%p12_p4) target bundleno = 1 (0x1), region = 77 }

</bundles_post_ra>
